<compile_context>
chip_gen: v7x
topology: tpu7x:2x2x1
jax: 0.10.0
libtpu: 0.0.40
codegen_flags: <defaults>
</compile_context>

<pallas_src>
import functools

import jax
import jax.numpy as jnp
from jax.experimental import pallas as pl
from jax.experimental.pallas import tpu as pltpu


def _round_up(v, m):
    return -(-v // m) * m


# ---------------------------------------------------------------------------
# Conv kernel: per-sample tap accumulation on the MXU.
# ---------------------------------------------------------------------------
def _make_conv_kernel(taps, Wp, L, out_flat, activation):
    """taps: list of (ky, kx);  Wp: padded row width;  L = (OH-1)*Wp + OW."""

    def kernel(x_ref, w_ref, o_ref):
        cout = o_ref.shape[1]
        acc = None
        for t, (ky, kx) in enumerate(taps):
            off = ky * Wp + kx
            x_t = x_ref[0, :, off:off + L]            # (Cin_p, L)
            w_t = w_ref[t]                            # (Cout_p, Cin_p)
            part = jnp.dot(w_t, x_t, preferred_element_type=jnp.float32)
            acc = part if acc is None else acc + part
        if activation == "tanh":
            acc = jnp.tanh(acc)
        o_ref[0, :, :L] = acc.astype(o_ref.dtype)
        # Define the (KW-1) trailing wrap columns so the output is fully written.
        o_ref[0, :, L:] = jnp.zeros((cout, out_flat - L), o_ref.dtype)

    return kernel


def conv2d_pallas(x_padded, w, *, activation="none",
                  compute_dtype=jnp.bfloat16, out_dtype=jnp.float32):
    """VALID 2-D conv (NCHW activations, OIHW weights, no bias).

    `x_padded` already carries the reflection padding.  Returns the output in
    a channel-major, row-wrapped flat layout:
        out[n, co, y*Wp + x] == conv(x_padded, w)[n, co, y, x]   for x < OW
    (columns x >= OW of each row are wrap junk), plus the decode geometry.
    Output channels are zero-padded up to a multiple of 8.
    """
    N, Cin, Hp, Wp = x_padded.shape
    Cout, _, KH, KW = w.shape
    OH, OW = Hp - KH + 1, Wp - KW + 1
    L = (OH - 1) * Wp + OW            # max tap offset + L == Hp*Wp exactly
    out_flat = OH * Wp
    F = Hp * Wp

    # Pad channel dims to sublane multiples (padded weights are zero -> exact).
    Cin_p, Cout_p = _round_up(Cin, 8), _round_up(Cout, 8)

    x_flat = x_padded.reshape(N, Cin, F).astype(compute_dtype)
    if Cin_p != Cin:
        x_flat = jnp.pad(x_flat, ((0, 0), (0, Cin_p - Cin), (0, 0)))

    w_taps = jnp.transpose(w, (2, 3, 0, 1)).reshape(KH * KW, Cout, Cin)
    w_taps = jnp.pad(
        w_taps, ((0, 0), (0, Cout_p - Cout), (0, Cin_p - Cin))
    ).astype(compute_dtype)

    taps = [(ky, kx) for ky in range(KH) for kx in range(KW)]
    kernel = _make_conv_kernel(taps, Wp, L, out_flat, activation)

    cost = pl.CostEstimate(
        flops=2 * N * Cout_p * Cin_p * KH * KW * L,
        transcendentals=(N * Cout_p * L) if activation == "tanh" else 0,
        bytes_accessed=int(x_flat.size * x_flat.dtype.itemsize
                           + w_taps.size * w_taps.dtype.itemsize
                           + N * Cout_p * out_flat * jnp.dtype(out_dtype).itemsize),
    )

    out = pl.pallas_call(
        kernel,
        out_shape=jax.ShapeDtypeStruct((N, Cout_p, out_flat), out_dtype),
        grid_spec=pltpu.PrefetchScalarGridSpec(
            num_scalar_prefetch=0,
            grid=(N,),
            in_specs=[
                pl.BlockSpec((1, Cin_p, F), lambda n: (n, 0, 0)),
                pl.BlockSpec((KH * KW, Cout_p, Cin_p), lambda n: (0, 0, 0)),
            ],
            out_specs=pl.BlockSpec((1, Cout_p, out_flat), lambda n: (n, 0, 0)),
        ),
        compiler_params=pltpu.CompilerParams(
            dimension_semantics=("parallel",),
            vmem_limit_bytes=32 * 1024 * 1024,
        ),
        cost_estimate=cost,
    )(x_flat, w_taps)

    geom = dict(Cout=Cout, OH=OH, OW=OW, Wp=Wp)
    return out, geom


# ---------------------------------------------------------------------------
# ILN (+ fused ReLU) kernel on the conv's channel-major flat output.
# ---------------------------------------------------------------------------
def _make_iln_kernel(C, OW, eps, apply_relu):
    def kernel(x_ref, rho_ref, gamma_ref, beta_ref, o_ref):
        # valid region only: drop padded channels and wrap columns
        x = x_ref[0, :C, :, :OW].astype(jnp.float32)        # (C, OH, OW)

        # Instance-norm stats: per-channel mean / biased variance.
        mu_c = jnp.mean(jnp.mean(x, axis=2, keepdims=True), axis=1, keepdims=True)
        xc = x - mu_c                                        # centered once, reused
        var_c = jnp.mean(jnp.mean(xc * xc, axis=2, keepdims=True),
                         axis=1, keepdims=True)
        inv_c = jax.lax.rsqrt(var_c + eps)

        # Layer-norm stats derived from the per-channel stats (equal counts).
        mu_l = jnp.mean(mu_c, axis=0, keepdims=True)         # (1,1,1)
        d = mu_c - mu_l
        var_l = jnp.mean(var_c + d * d, axis=0, keepdims=True)
        inv_l = jax.lax.rsqrt(var_l + eps)

        rho = rho_ref[...]                                   # (C,1,1)
        gamma = gamma_ref[...]
        beta = beta_ref[...]
        # rho*i_norm + (1-rho)*l_norm, then *gamma + beta, folded into one
        # per-channel scale/shift applied to the centered activation.
        scale = gamma * (rho * inv_c + (1.0 - rho) * inv_l)
        shift = gamma * ((1.0 - rho) * d * inv_l) + beta
        out = xc * scale + shift
        if apply_relu:
            out = jnp.maximum(out, 0.0)
        o_ref[0] = out.astype(o_ref.dtype)

    return kernel


def iln_pallas(conv_out, geom, rho, gamma, beta, *, eps=1e-8,
               apply_relu=False, out_dtype=jnp.bfloat16):
    """ILN (+ optional fused ReLU) reading the conv kernel's flat output.

    Returns the valid (N, C, OH, OW) activation; wrap columns / padded output
    channels are dropped here so no extra HBM compaction pass is needed.
    NOTE: input/output shapes differ, so input_output_aliases is not applicable.
    """
    C, OH, OW, Wp = geom["Cout"], geom["OH"], geom["OW"], geom["Wp"]
    N, Cp, _ = conv_out.shape
    x4 = conv_out.reshape(N, Cp, OH, Wp)       # free reshape (splits last dim)
    rho3 = rho.reshape(C, 1, 1).astype(jnp.float32)
    gamma3 = gamma.reshape(C, 1, 1).astype(jnp.float32)
    beta3 = beta.reshape(C, 1, 1).astype(jnp.float32)

    kernel = _make_iln_kernel(C, OW, eps, apply_relu)
    cost = pl.CostEstimate(
        flops=10 * N * C * OH * OW,
        transcendentals=2 * N * C,
        bytes_accessed=int(x4.size * x4.dtype.itemsize
                           + N * C * OH * OW * jnp.dtype(out_dtype).itemsize
                           + 3 * C * 4),
    )
    return pl.pallas_call(
        kernel,
        out_shape=jax.ShapeDtypeStruct((N, C, OH, OW), out_dtype),
        grid_spec=pltpu.PrefetchScalarGridSpec(
            num_scalar_prefetch=0,
            grid=(N,),
            in_specs=[
                pl.BlockSpec((1, Cp, OH, Wp), lambda n: (n, 0, 0, 0)),
                pl.BlockSpec((C, 1, 1), lambda n: (0, 0, 0)),
                pl.BlockSpec((C, 1, 1), lambda n: (0, 0, 0)),
                pl.BlockSpec((C, 1, 1), lambda n: (0, 0, 0)),
            ],
            out_specs=pl.BlockSpec((1, C, OH, OW), lambda n: (n, 0, 0, 0)),
        ),
        compiler_params=pltpu.CompilerParams(
            dimension_semantics=("parallel",),
            vmem_limit_bytes=32 * 1024 * 1024,
        ),
        cost_estimate=cost,
    )(x4, rho3, gamma3, beta3)


# ---------------------------------------------------------------------------
# Plain-JAX glue (data movement only)
# ---------------------------------------------------------------------------
def upsample_nearest_2x(x):
    # nn.Upsample(scale_factor=2, mode='nearest'): out[i] = in[i // 2]
    return jnp.repeat(jnp.repeat(x, 2, axis=2), 2, axis=3)


def reflect_pad(x, p):
    return jnp.pad(x, ((0, 0), (0, 0), (p, p), (p, p)), mode="reflect")


# ---------------------------------------------------------------------------
# UpsampleBlock forward
# ---------------------------------------------------------------------------
def upsample_block(x, params, *, compute_dtype=jnp.bfloat16):
    """UGATIT UpsampleBlock forward (NCHW in, NCHW out)."""
    x = x.astype(compute_dtype)

    # Stage 1: Upsample x2 -> ReflectionPad(1) -> Conv3x3 (C -> C/2) -> ILN -> ReLU
    # TODO(synk): fuse upsample + reflection pad into the conv tap indexing to
    # avoid materializing the 4x-larger activation in HBM.
    h = reflect_pad(upsample_nearest_2x(x), 1)
    cf, geom = conv2d_pallas(h, params["w1"], compute_dtype=compute_dtype)
    h = iln_pallas(cf, geom, params["rho1"], params["gamma1"], params["beta1"],
                   apply_relu=True, out_dtype=compute_dtype)

    # Stage 2: Upsample x2 -> ReflectionPad(1) -> Conv3x3 (C/2 -> C/4) -> ILN -> ReLU
    h = reflect_pad(upsample_nearest_2x(h), 1)
    cf, geom = conv2d_pallas(h, params["w2"], compute_dtype=compute_dtype)
    h = iln_pallas(cf, geom, params["rho2"], params["gamma2"], params["beta2"],
                   apply_relu=True, out_dtype=compute_dtype)

    # Stage 3: ReflectionPad(3) -> Conv7x7 (C/4 -> 3) -> Tanh (fused in the kernel)
    h = reflect_pad(h, 3)
    cf, geom = conv2d_pallas(h, params["w3"], activation="tanh",
                             compute_dtype=compute_dtype)
    N, Cp = cf.shape[0], cf.shape[1]
    out = cf.reshape(N, Cp, geom["OH"], geom["Wp"])
    return out[:, :geom["Cout"], :, :geom["OW"]]


# ---------------------------------------------------------------------------
# Pure-XLA reference (for correctness checks)
# ---------------------------------------------------------------------------
def _conv_ref(x, w):
    return jax.lax.conv_general_dilated(
        x, w, (1, 1), "VALID", dimension_numbers=("NCHW", "OIHW", "NCHW"))


def _iln_ref(x, rho, gamma, beta, eps=1e-8):
    in_mean = jnp.mean(x, axis=(2, 3), keepdims=True)
    in_var = jnp.mean((x - in_mean) ** 2, axis=(2, 3), keepdims=True)
    i_norm = (x - in_mean) / jnp.sqrt(in_var + eps)
    ln_mean = jnp.mean(x, axis=(1, 2, 3), keepdims=True)
    ln_var = jnp.mean((x - ln_mean) ** 2, axis=(1, 2, 3), keepdims=True)
    l_norm = (x - ln_mean) / jnp.sqrt(ln_var + eps)
    out = i_norm * rho + l_norm * (1.0 - rho)
    return out * gamma + beta


def upsample_block_ref(x, params, *, compute_dtype=jnp.float32):
    """Reference.  With compute_dtype=bfloat16 it rounds operands at the same
    points as the Pallas pipeline (f32 accumulation everywhere)."""
    def rnd(a):
        return a.astype(compute_dtype).astype(jnp.float32)

    h = rnd(x)
    h = reflect_pad(upsample_nearest_2x(h), 1)
    h = _conv_ref(h, rnd(params["w1"]))
    h = jax.nn.relu(_iln_ref(h, params["rho1"], params["gamma1"], params["beta1"]))
    h = rnd(h)
    h = reflect_pad(upsample_nearest_2x(h), 1)
    h = _conv_ref(h, rnd(params["w2"]))
    h = jax.nn.relu(_iln_ref(h, params["rho2"], params["gamma2"], params["beta2"]))
    h = rnd(h)
    h = reflect_pad(h, 3)
    h = _conv_ref(h, rnd(params["w3"]))
    return jnp.tanh(h)


# ---------------------------------------------------------------------------
# Deterministic parameter init (matches the module __init__)
# ---------------------------------------------------------------------------
def init_params(key, channels):
    c2, c4 = channels // 2, channels // 4
    k1, k2, k3 = jax.random.split(key, 3)
    return {
        # Conv2d wrapper: weight ~ N(0, 1); bias=False throughout.
        "w1": jax.random.normal(k1, (c2, channels, 3, 3), jnp.float32),
        "w2": jax.random.normal(k2, (c4, c2, 3, 3), jnp.float32),
        "w3": jax.random.normal(k3, (3, c4, 7, 7), jnp.float32),
        # ILN: rho = 0, gamma = 1, beta = 0.
        "rho1": jnp.zeros((1, c2, 1, 1), jnp.float32),
        "gamma1": jnp.ones((1, c2, 1, 1), jnp.float32),
        "beta1": jnp.zeros((1, c2, 1, 1), jnp.float32),
        "rho2": jnp.zeros((1, c4, 1, 1), jnp.float32),
        "gamma2": jnp.ones((1, c4, 1, 1), jnp.float32),
        "beta2": jnp.zeros((1, c4, 1, 1), jnp.float32),
    }


if __name__ == "__main__":
    key = jax.random.PRNGKey(0)
    kx, kp = jax.random.split(key)

    N, C, RESL = 2, 8, 8  # batch, channels, input resolution
    x = jax.random.normal(kx, (N, C, RESL, RESL), jnp.float32)
    params = init_params(kp, C)

    fwd_bf16 = jax.jit(upsample_block)  # bf16 MXU operands (default fast path)
    fwd_f32 = jax.jit(functools.partial(upsample_block, compute_dtype=jnp.float32))

    out = jax.block_until_ready(fwd_bf16(x, params))
    out_f32 = jax.block_until_ready(fwd_f32(x, params))
    assert out.shape == (N, 3, RESL * 4, RESL * 4), out.shape

    # 1) f32 pipeline vs f32 reference: tight check of kernel semantics.
    ref_f32 = jax.block_until_ready(jax.jit(upsample_block_ref)(x, params))
    err_f32 = float(jnp.max(jnp.abs(out_f32 - ref_f32)))
    assert jnp.allclose(out_f32, ref_f32, atol=1e-3, rtol=1e-3), err_f32

    # 2) bf16-MXU pipeline vs a reference with matching rounding points: loose
    #    bound covering accumulation-order / re-rounding differences only.
    ref_bf16 = jax.block_until_ready(
        jax.jit(functools.partial(upsample_block_ref,
                                  compute_dtype=jnp.bfloat16))(x, params))
    err_bf16 = float(jnp.max(jnp.abs(out - ref_bf16)))
    assert jnp.allclose(out, ref_bf16, atol=5e-2, rtol=5e-2), err_bf16

    print("KERNEL_OK")
</pallas_src>

<mosaic_0001>
module attributes {stable_mosaic.version = 11 : i64} {
  func.func @kernel(%arg0: i32, %arg1: memref<1x8x324xbf16, #tpu.memory_space<vmem>>, %arg2: memref<9x8x8xbf16, #tpu.memory_space<vmem>>, %arg3: memref<1x8x288xf32, #tpu.memory_space<vmem>>) attributes {dimension_semantics = [#tpu.dimension_semantics<parallel>], iteration_bounds = array<i64: 2>, scalar_prefetch = 0 : i64, scratch_operands = 0 : i64, tpu.core_type = #tpu.core_type<tc>, window_params = [{transform_indices = @transform_0, window_bounds = array<i64: 1, 8, 324>}, {pipeline_mode = #tpu.pipeline_mode<synchronous>, transform_indices = @transform_1, window_bounds = array<i64: 9, 8, 8>}, {transform_indices = @transform_2, window_bounds = array<i64: 1, 8, 288>}]} {
    %c0 = arith.constant 0 : index
    %c0_0 = arith.constant 0 : index
    %c0_1 = arith.constant 0 : index
    %0 = vector.load %arg1[%c0, %c0_0, %c0_1] : memref<1x8x324xbf16, #tpu.memory_space<vmem>>, vector<1x8x286xbf16>
    %1 = vector.shape_cast %0 : vector<1x8x286xbf16> to vector<8x286xbf16>
    %c0_2 = arith.constant 0 : index
    %c0_3 = arith.constant 0 : index
    %c0_4 = arith.constant 0 : index
    %2 = vector.load %arg2[%c0_2, %c0_3, %c0_4] : memref<9x8x8xbf16, #tpu.memory_space<vmem>>, vector<1x8x8xbf16>
    %3 = vector.shape_cast %2 : vector<1x8x8xbf16> to vector<8x8xbf16>
    %cst = arith.constant dense<0.000000e+00> : vector<8x286xf32>
    %4 = tpu.matmul %3, %1, %cst {dimension_numbers = #tpu.dot_dimension_numbers<[1], [0], [0], [1], [0, 0, 1, 1], [], []>} : vector<8x8xbf16>, vector<8x286xbf16>, vector<8x286xf32> -> vector<8x286xf32>
    %c0_5 = arith.constant 0 : index
    %c0_6 = arith.constant 0 : index
    %c1 = arith.constant 1 : index
    %5 = vector.load %arg1[%c0_5, %c0_6, %c1] : memref<1x8x324xbf16, #tpu.memory_space<vmem>>, vector<1x8x286xbf16>
    %6 = vector.shape_cast %5 : vector<1x8x286xbf16> to vector<8x286xbf16>
    %c1_7 = arith.constant 1 : index
    %c0_8 = arith.constant 0 : index
    %c0_9 = arith.constant 0 : index
    %7 = vector.load %arg2[%c1_7, %c0_8, %c0_9] : memref<9x8x8xbf16, #tpu.memory_space<vmem>>, vector<1x8x8xbf16>
    %8 = vector.shape_cast %7 : vector<1x8x8xbf16> to vector<8x8xbf16>
    %cst_10 = arith.constant dense<0.000000e+00> : vector<8x286xf32>
    %9 = tpu.matmul %8, %6, %cst_10 {dimension_numbers = #tpu.dot_dimension_numbers<[1], [0], [0], [1], [0, 0, 1, 1], [], []>} : vector<8x8xbf16>, vector<8x286xbf16>, vector<8x286xf32> -> vector<8x286xf32>
    %10 = arith.addf %4, %9 : vector<8x286xf32>
    %c0_11 = arith.constant 0 : index
    %c0_12 = arith.constant 0 : index
    %c2 = arith.constant 2 : index
    %11 = vector.load %arg1[%c0_11, %c0_12, %c2] : memref<1x8x324xbf16, #tpu.memory_space<vmem>>, vector<1x8x286xbf16>
    %12 = vector.shape_cast %11 : vector<1x8x286xbf16> to vector<8x286xbf16>
    %c2_13 = arith.constant 2 : index
    %c0_14 = arith.constant 0 : index
    %c0_15 = arith.constant 0 : index
    %13 = vector.load %arg2[%c2_13, %c0_14, %c0_15] : memref<9x8x8xbf16, #tpu.memory_space<vmem>>, vector<1x8x8xbf16>
    %14 = vector.shape_cast %13 : vector<1x8x8xbf16> to vector<8x8xbf16>
    %cst_16 = arith.constant dense<0.000000e+00> : vector<8x286xf32>
    %15 = tpu.matmul %14, %12, %cst_16 {dimension_numbers = #tpu.dot_dimension_numbers<[1], [0], [0], [1], [0, 0, 1, 1], [], []>} : vector<8x8xbf16>, vector<8x286xbf16>, vector<8x286xf32> -> vector<8x286xf32>
    %16 = arith.addf %10, %15 : vector<8x286xf32>
    %c0_17 = arith.constant 0 : index
    %c0_18 = arith.constant 0 : index
    %c18 = arith.constant 18 : index
    %17 = vector.load %arg1[%c0_17, %c0_18, %c18] : memref<1x8x324xbf16, #tpu.memory_space<vmem>>, vector<1x8x286xbf16>
    %18 = vector.shape_cast %17 : vector<1x8x286xbf16> to vector<8x286xbf16>
    %c3 = arith.constant 3 : index
    %c0_19 = arith.constant 0 : index
    %c0_20 = arith.constant 0 : index
    %19 = vector.load %arg2[%c3, %c0_19, %c0_20] : memref<9x8x8xbf16, #tpu.memory_space<vmem>>, vector<1x8x8xbf16>
    %20 = vector.shape_cast %19 : vector<1x8x8xbf16> to vector<8x8xbf16>
    %cst_21 = arith.constant dense<0.000000e+00> : vector<8x286xf32>
    %21 = tpu.matmul %20, %18, %cst_21 {dimension_numbers = #tpu.dot_dimension_numbers<[1], [0], [0], [1], [0, 0, 1, 1], [], []>} : vector<8x8xbf16>, vector<8x286xbf16>, vector<8x286xf32> -> vector<8x286xf32>
    %22 = arith.addf %16, %21 : vector<8x286xf32>
    %c0_22 = arith.constant 0 : index
    %c0_23 = arith.constant 0 : index
    %c19 = arith.constant 19 : index
    %23 = vector.load %arg1[%c0_22, %c0_23, %c19] : memref<1x8x324xbf16, #tpu.memory_space<vmem>>, vector<1x8x286xbf16>
    %24 = vector.shape_cast %23 : vector<1x8x286xbf16> to vector<8x286xbf16>
    %c4 = arith.constant 4 : index
    %c0_24 = arith.constant 0 : index
    %c0_25 = arith.constant 0 : index
    %25 = vector.load %arg2[%c4, %c0_24, %c0_25] : memref<9x8x8xbf16, #tpu.memory_space<vmem>>, vector<1x8x8xbf16>
    %26 = vector.shape_cast %25 : vector<1x8x8xbf16> to vector<8x8xbf16>
    %cst_26 = arith.constant dense<0.000000e+00> : vector<8x286xf32>
    %27 = tpu.matmul %26, %24, %cst_26 {dimension_numbers = #tpu.dot_dimension_numbers<[1], [0], [0], [1], [0, 0, 1, 1], [], []>} : vector<8x8xbf16>, vector<8x286xbf16>, vector<8x286xf32> -> vector<8x286xf32>
    %28 = arith.addf %22, %27 : vector<8x286xf32>
    %c0_27 = arith.constant 0 : index
    %c0_28 = arith.constant 0 : index
    %c20 = arith.constant 20 : index
    %29 = vector.load %arg1[%c0_27, %c0_28, %c20] : memref<1x8x324xbf16, #tpu.memory_space<vmem>>, vector<1x8x286xbf16>
    %30 = vector.shape_cast %29 : vector<1x8x286xbf16> to vector<8x286xbf16>
    %c5 = arith.constant 5 : index
    %c0_29 = arith.constant 0 : index
    %c0_30 = arith.constant 0 : index
    %31 = vector.load %arg2[%c5, %c0_29, %c0_30] : memref<9x8x8xbf16, #tpu.memory_space<vmem>>, vector<1x8x8xbf16>
    %32 = vector.shape_cast %31 : vector<1x8x8xbf16> to vector<8x8xbf16>
    %cst_31 = arith.constant dense<0.000000e+00> : vector<8x286xf32>
    %33 = tpu.matmul %32, %30, %cst_31 {dimension_numbers = #tpu.dot_dimension_numbers<[1], [0], [0], [1], [0, 0, 1, 1], [], []>} : vector<8x8xbf16>, vector<8x286xbf16>, vector<8x286xf32> -> vector<8x286xf32>
    %34 = arith.addf %28, %33 : vector<8x286xf32>
    %c0_32 = arith.constant 0 : index
    %c0_33 = arith.constant 0 : index
    %c36 = arith.constant 36 : index
    %35 = vector.load %arg1[%c0_32, %c0_33, %c36] : memref<1x8x324xbf16, #tpu.memory_space<vmem>>, vector<1x8x286xbf16>
    %36 = vector.shape_cast %35 : vector<1x8x286xbf16> to vector<8x286xbf16>
    %c6 = arith.constant 6 : index
    %c0_34 = arith.constant 0 : index
    %c0_35 = arith.constant 0 : index
    %37 = vector.load %arg2[%c6, %c0_34, %c0_35] : memref<9x8x8xbf16, #tpu.memory_space<vmem>>, vector<1x8x8xbf16>
    %38 = vector.shape_cast %37 : vector<1x8x8xbf16> to vector<8x8xbf16>
    %cst_36 = arith.constant dense<0.000000e+00> : vector<8x286xf32>
    %39 = tpu.matmul %38, %36, %cst_36 {dimension_numbers = #tpu.dot_dimension_numbers<[1], [0], [0], [1], [0, 0, 1, 1], [], []>} : vector<8x8xbf16>, vector<8x286xbf16>, vector<8x286xf32> -> vector<8x286xf32>
    %40 = arith.addf %34, %39 : vector<8x286xf32>
    %c0_37 = arith.constant 0 : index
    %c0_38 = arith.constant 0 : index
    %c37 = arith.constant 37 : index
    %41 = vector.load %arg1[%c0_37, %c0_38, %c37] : memref<1x8x324xbf16, #tpu.memory_space<vmem>>, vector<1x8x286xbf16>
    %42 = vector.shape_cast %41 : vector<1x8x286xbf16> to vector<8x286xbf16>
    %c7 = arith.constant 7 : index
    %c0_39 = arith.constant 0 : index
    %c0_40 = arith.constant 0 : index
    %43 = vector.load %arg2[%c7, %c0_39, %c0_40] : memref<9x8x8xbf16, #tpu.memory_space<vmem>>, vector<1x8x8xbf16>
    %44 = vector.shape_cast %43 : vector<1x8x8xbf16> to vector<8x8xbf16>
    %cst_41 = arith.constant dense<0.000000e+00> : vector<8x286xf32>
    %45 = tpu.matmul %44, %42, %cst_41 {dimension_numbers = #tpu.dot_dimension_numbers<[1], [0], [0], [1], [0, 0, 1, 1], [], []>} : vector<8x8xbf16>, vector<8x286xbf16>, vector<8x286xf32> -> vector<8x286xf32>
    %46 = arith.addf %40, %45 : vector<8x286xf32>
    %c0_42 = arith.constant 0 : index
    %c0_43 = arith.constant 0 : index
    %c38 = arith.constant 38 : index
    %47 = vector.load %arg1[%c0_42, %c0_43, %c38] : memref<1x8x324xbf16, #tpu.memory_space<vmem>>, vector<1x8x286xbf16>
    %48 = vector.shape_cast %47 : vector<1x8x286xbf16> to vector<8x286xbf16>
    %c8 = arith.constant 8 : index
    %c0_44 = arith.constant 0 : index
    %c0_45 = arith.constant 0 : index
    %49 = vector.load %arg2[%c8, %c0_44, %c0_45] : memref<9x8x8xbf16, #tpu.memory_space<vmem>>, vector<1x8x8xbf16>
    %50 = vector.shape_cast %49 : vector<1x8x8xbf16> to vector<8x8xbf16>
    %cst_46 = arith.constant dense<0.000000e+00> : vector<8x286xf32>
    %51 = tpu.matmul %50, %48, %cst_46 {dimension_numbers = #tpu.dot_dimension_numbers<[1], [0], [0], [1], [0, 0, 1, 1], [], []>} : vector<8x8xbf16>, vector<8x286xbf16>, vector<8x286xf32> -> vector<8x286xf32>
    %52 = arith.addf %46, %51 : vector<8x286xf32>
    %c0_47 = arith.constant 0 : index
    %c0_48 = arith.constant 0 : index
    %c0_49 = arith.constant 0 : index
    %53 = vector.load %arg3[%c0_47, %c0_48, %c0_49] : memref<1x8x288xf32, #tpu.memory_space<vmem>>, vector<1x8x286xf32>
    %54 = vector.shape_cast %53 : vector<1x8x286xf32> to vector<8x286xf32>
    %55 = vector.shape_cast %52 : vector<8x286xf32> to vector<1x8x286xf32>
    tpu.vector_store %arg3[%c0_47, %c0_48, %c0_49], %55 {strides = array<i32>} : memref<1x8x288xf32, #tpu.memory_space<vmem>>, vector<1x8x286xf32>,
    %cst_50 = arith.constant 0.000000e+00 : f32
    %56 = vector.broadcast %cst_50 : f32 to vector<8x2xf32>
    %c0_51 = arith.constant 0 : index
    %c0_52 = arith.constant 0 : index
    %c286 = arith.constant 286 : index
    %57 = vector.load %arg3[%c0_51, %c0_52, %c286] : memref<1x8x288xf32, #tpu.memory_space<vmem>>, vector<1x8x2xf32>
    %58 = vector.shape_cast %57 : vector<1x8x2xf32> to vector<8x2xf32>
    %59 = vector.shape_cast %56 : vector<8x2xf32> to vector<1x8x2xf32>
    tpu.vector_store %arg3[%c0_51, %c0_52, %c286], %59 {strides = array<i32>} : memref<1x8x288xf32, #tpu.memory_space<vmem>>, vector<1x8x2xf32>,
    return
  }
  func.func @transform_0(%arg0: i32) -> (i32, i32, i32) {
    %c0_i32 = arith.constant 0 : i32
    %c0_i32_0 = arith.constant 0 : i32
    %c0_i32_1 = arith.constant 0 : i32
    return %arg0, %c0_i32, %c0_i32_0 : i32, i32, i32
  }
  func.func @transform_1(%arg0: i32) -> (i32, i32, i32) {
    %c0_i32 = arith.constant 0 : i32
    %c0_i32_0 = arith.constant 0 : i32
    %c0_i32_1 = arith.constant 0 : i32
    %c0_i32_2 = arith.constant 0 : i32
    return %c0_i32, %c0_i32_0, %c0_i32_1 : i32, i32, i32
  }
  func.func @transform_2(%arg0: i32) -> (i32, i32, i32) {
    %c0_i32 = arith.constant 0 : i32
    %c0_i32_0 = arith.constant 0 : i32
    %c0_i32_1 = arith.constant 0 : i32
    return %arg0, %c0_i32, %c0_i32_0 : i32, i32, i32
  }
}

module attributes {stable_mosaic.version = 11 : i64} {
  func.func @kernel(%arg0: i32, %arg1: memref<1x8x16x18xf32, #tpu.memory_space<vmem>>, %arg2: memref<4x1x1xf32, #tpu.memory_space<vmem>>, %arg3: memref<4x1x1xf32, #tpu.memory_space<vmem>>, %arg4: memref<4x1x1xf32, #tpu.memory_space<vmem>>, %arg5: memref<1x4x16x16xbf16, #tpu.memory_space<vmem>>) attributes {dimension_semantics = [#tpu.dimension_semantics<parallel>], iteration_bounds = array<i64: 2>, scalar_prefetch = 0 : i64, scratch_operands = 0 : i64, tpu.core_type = #tpu.core_type<tc>, window_params = [{transform_indices = @transform_0, window_bounds = array<i64: 1, 8, 16, 18>}, {pipeline_mode = #tpu.pipeline_mode<synchronous>, transform_indices = @transform_1, window_bounds = array<i64: 4, 1, 1>}, {pipeline_mode = #tpu.pipeline_mode<synchronous>, transform_indices = @transform_2, window_bounds = array<i64: 4, 1, 1>}, {pipeline_mode = #tpu.pipeline_mode<synchronous>, transform_indices = @transform_3, window_bounds = array<i64: 4, 1, 1>}, {transform_indices = @transform_4, window_bounds = array<i64: 1, 4, 16, 16>}]} {
    %c0 = arith.constant 0 : index
    %c0_0 = arith.constant 0 : index
    %c0_1 = arith.constant 0 : index
    %c0_2 = arith.constant 0 : index
    %0 = vector.load %arg1[%c0, %c0_0, %c0_1, %c0_2] : memref<1x8x16x18xf32, #tpu.memory_space<vmem>>, vector<1x4x16x16xf32>
    %1 = vector.shape_cast %0 : vector<1x4x16x16xf32> to vector<4x16x16xf32>
    %cst = arith.constant dense<0.000000e+00> : vector<4x16xf32>
    %2 = vector.multi_reduction <add>, %1, %cst [2] : vector<4x16x16xf32> to vector<4x16xf32>
    %3 = vector.shape_cast %2 : vector<4x16xf32> to vector<4x16x1xf32>
    %cst_3 = arith.constant 1.600000e+01 : f32
    %4 = vector.broadcast %cst_3 : f32 to vector<4x16x1xf32>
    %5 = arith.divf %3, %4 : vector<4x16x1xf32>
    %cst_4 = arith.constant dense<0.000000e+00> : vector<4x1xf32>
    %6 = vector.multi_reduction <add>, %5, %cst_4 [1] : vector<4x16x1xf32> to vector<4x1xf32>
    %7 = vector.shape_cast %6 : vector<4x1xf32> to vector<4x1x1xf32>
    %cst_5 = arith.constant 1.600000e+01 : f32
    %8 = vector.broadcast %cst_5 : f32 to vector<4x1x1xf32>
    %9 = arith.divf %7, %8 : vector<4x1x1xf32>
    %10 = vector.broadcast %9 : vector<4x1x1xf32> to vector<4x16x16xf32>
    %11 = arith.subf %1, %10 : vector<4x16x16xf32>
    %12 = arith.mulf %11, %11 : vector<4x16x16xf32>
    %cst_6 = arith.constant dense<0.000000e+00> : vector<4x16xf32>
    %13 = vector.multi_reduction <add>, %12, %cst_6 [2] : vector<4x16x16xf32> to vector<4x16xf32>
    %14 = vector.shape_cast %13 : vector<4x16xf32> to vector<4x16x1xf32>
    %cst_7 = arith.constant 1.600000e+01 : f32
    %15 = vector.broadcast %cst_7 : f32 to vector<4x16x1xf32>
    %16 = arith.divf %14, %15 : vector<4x16x1xf32>
    %cst_8 = arith.constant dense<0.000000e+00> : vector<4x1xf32>
    %17 = vector.multi_reduction <add>, %16, %cst_8 [1] : vector<4x16x1xf32> to vector<4x1xf32>
    %18 = vector.shape_cast %17 : vector<4x1xf32> to vector<4x1x1xf32>
    %cst_9 = arith.constant 1.600000e+01 : f32
    %19 = vector.broadcast %cst_9 : f32 to vector<4x1x1xf32>
    %20 = arith.divf %18, %19 : vector<4x1x1xf32>
    %cst_10 = arith.constant 9.99999993E-9 : f32
    %21 = vector.broadcast %cst_10 : f32 to vector<4x1x1xf32>
    %22 = arith.addf %20, %21 : vector<4x1x1xf32>
    %23 = math.rsqrt %22 : vector<4x1x1xf32>
    %cst_11 = arith.constant dense<0.000000e+00> : vector<1x1xf32>
    %24 = vector.multi_reduction <add>, %9, %cst_11 [0] : vector<4x1x1xf32> to vector<1x1xf32>
    %25 = vector.shape_cast %24 : vector<1x1xf32> to vector<1x1x1xf32>
    %cst_12 = arith.constant 4.000000e+00 : f32
    %26 = vector.broadcast %cst_12 : f32 to vector<1x1x1xf32>
    %27 = arith.divf %25, %26 : vector<1x1x1xf32>
    %28 = vector.broadcast %27 : vector<1x1x1xf32> to vector<4x1x1xf32>
    %29 = arith.subf %9, %28 : vector<4x1x1xf32>
    %30 = arith.mulf %29, %29 : vector<4x1x1xf32>
    %31 = arith.addf %20, %30 : vector<4x1x1xf32>
    %cst_13 = arith.constant dense<0.000000e+00> : vector<1x1xf32>
    %32 = vector.multi_reduction <add>, %31, %cst_13 [0] : vector<4x1x1xf32> to vector<1x1xf32>
    %33 = vector.shape_cast %32 : vector<1x1xf32> to vector<1x1x1xf32>
    %cst_14 = arith.constant 4.000000e+00 : f32
    %34 = vector.broadcast %cst_14 : f32 to vector<1x1x1xf32>
    %35 = arith.divf %33, %34 : vector<1x1x1xf32>
    %cst_15 = arith.constant 9.99999993E-9 : f32
    %36 = vector.broadcast %cst_15 : f32 to vector<1x1x1xf32>
    %37 = arith.addf %35, %36 : vector<1x1x1xf32>
    %38 = math.rsqrt %37 : vector<1x1x1xf32>
    %c0_16 = arith.constant 0 : index
    %c0_17 = arith.constant 0 : index
    %c0_18 = arith.constant 0 : index
    %39 = vector.load %arg2[%c0_16, %c0_17, %c0_18] : memref<4x1x1xf32, #tpu.memory_space<vmem>>, vector<4x1x1xf32>
    %c0_19 = arith.constant 0 : index
    %c0_20 = arith.constant 0 : index
    %c0_21 = arith.constant 0 : index
    %40 = vector.load %arg3[%c0_19, %c0_20, %c0_21] : memref<4x1x1xf32, #tpu.memory_space<vmem>>, vector<4x1x1xf32>
    %c0_22 = arith.constant 0 : index
    %c0_23 = arith.constant 0 : index
    %c0_24 = arith.constant 0 : index
    %41 = vector.load %arg4[%c0_22, %c0_23, %c0_24] : memref<4x1x1xf32, #tpu.memory_space<vmem>>, vector<4x1x1xf32>
    %42 = arith.mulf %39, %23 : vector<4x1x1xf32>
    %cst_25 = arith.constant 1.000000e+00 : f32
    %43 = vector.broadcast %cst_25 : f32 to vector<4x1x1xf32>
    %44 = arith.subf %43, %39 : vector<4x1x1xf32>
    %45 = vector.broadcast %38 : vector<1x1x1xf32> to vector<4x1x1xf32>
    %46 = arith.mulf %44, %45 : vector<4x1x1xf32>
    %47 = arith.addf %42, %46 : vector<4x1x1xf32>
    %48 = arith.mulf %40, %47 : vector<4x1x1xf32>
    %cst_26 = arith.constant 1.000000e+00 : f32
    %49 = vector.broadcast %cst_26 : f32 to vector<4x1x1xf32>
    %50 = arith.subf %49, %39 : vector<4x1x1xf32>
    %51 = arith.mulf %50, %29 : vector<4x1x1xf32>
    %52 = vector.broadcast %38 : vector<1x1x1xf32> to vector<4x1x1xf32>
    %53 = arith.mulf %51, %52 : vector<4x1x1xf32>
    %54 = arith.mulf %40, %53 : vector<4x1x1xf32>
    %55 = arith.addf %54, %41 : vector<4x1x1xf32>
    %56 = vector.broadcast %48 : vector<4x1x1xf32> to vector<4x16x16xf32>
    %57 = arith.mulf %11, %56 : vector<4x16x16xf32>
    %58 = vector.broadcast %55 : vector<4x1x1xf32> to vector<4x16x16xf32>
    %59 = arith.addf %57, %58 : vector<4x16x16xf32>
    %cst_27 = arith.constant 0.000000e+00 : f32
    %60 = vector.broadcast %cst_27 : f32 to vector<4x16x16xf32>
    %61 = arith.maximumf %59, %60 : vector<4x16x16xf32>
    %62 = arith.truncf %61 : vector<4x16x16xf32> to vector<4x16x16xbf16>
    %c0_28 = arith.constant 0 : index
    %c0_29 = arith.constant 0 : index
    %c0_30 = arith.constant 0 : index
    %c0_31 = arith.constant 0 : index
    %63 = vector.load %arg5[%c0_28, %c0_29, %c0_30, %c0_31] : memref<1x4x16x16xbf16, #tpu.memory_space<vmem>>, vector<1x4x16x16xbf16>
    %64 = vector.shape_cast %63 : vector<1x4x16x16xbf16> to vector<4x16x16xbf16>
    %65 = vector.shape_cast %62 : vector<4x16x16xbf16> to vector<1x4x16x16xbf16>
    tpu.vector_store %arg5[%c0_28, %c0_29, %c0_30, %c0_31], %65 {strides = array<i32>} : memref<1x4x16x16xbf16, #tpu.memory_space<vmem>>, vector<1x4x16x16xbf16>,
    return
  }
  func.func @transform_0(%arg0: i32) -> (i32, i32, i32, i32) {
    %c0_i32 = arith.constant 0 : i32
    %c0_i32_0 = arith.constant 0 : i32
    %c0_i32_1 = arith.constant 0 : i32
    %c0_i32_2 = arith.constant 0 : i32
    return %arg0, %c0_i32, %c0_i32_0, %c0_i32_1 : i32, i32, i32, i32
  }
  func.func @transform_1(%arg0: i32) -> (i32, i32, i32) {
    %c0_i32 = arith.constant 0 : i32
    %c0_i32_0 = arith.constant 0 : i32
    %c0_i32_1 = arith.constant 0 : i32
    %c0_i32_2 = arith.constant 0 : i32
    return %c0_i32, %c0_i32_0, %c0_i32_1 : i32, i32, i32
  }
  func.func @transform_2(%arg0: i32) -> (i32, i32, i32) {
    %c0_i32 = arith.constant 0 : i32
    %c0_i32_0 = arith.constant 0 : i32
    %c0_i32_1 = arith.constant 0 : i32
    %c0_i32_2 = arith.constant 0 : i32
    return %c0_i32, %c0_i32_0, %c0_i32_1 : i32, i32, i32
  }
  func.func @transform_3(%arg0: i32) -> (i32, i32, i32) {
    %c0_i32 = arith.constant 0 : i32
    %c0_i32_0 = arith.constant 0 : i32
    %c0_i32_1 = arith.constant 0 : i32
    %c0_i32_2 = arith.constant 0 : i32
    return %c0_i32, %c0_i32_0, %c0_i32_1 : i32, i32, i32
  }
  func.func @transform_4(%arg0: i32) -> (i32, i32, i32, i32) {
    %c0_i32 = arith.constant 0 : i32
    %c0_i32_0 = arith.constant 0 : i32
    %c0_i32_1 = arith.constant 0 : i32
    %c0_i32_2 = arith.constant 0 : i32
    return %arg0, %c0_i32, %c0_i32_0, %c0_i32_1 : i32, i32, i32, i32
  }
}

module attributes {stable_mosaic.version = 11 : i64} {
  func.func @kernel(%arg0: i32, %arg1: memref<1x8x1156xbf16, #tpu.memory_space<vmem>>, %arg2: memref<9x8x8xbf16, #tpu.memory_space<vmem>>, %arg3: memref<1x8x1088xf32, #tpu.memory_space<vmem>>) attributes {dimension_semantics = [#tpu.dimension_semantics<parallel>], iteration_bounds = array<i64: 2>, scalar_prefetch = 0 : i64, scratch_operands = 0 : i64, tpu.core_type = #tpu.core_type<tc>, window_params = [{transform_indices = @transform_0, window_bounds = array<i64: 1, 8, 1156>}, {pipeline_mode = #tpu.pipeline_mode<synchronous>, transform_indices = @transform_1, window_bounds = array<i64: 9, 8, 8>}, {transform_indices = @transform_2, window_bounds = array<i64: 1, 8, 1088>}]} {
    %c0 = arith.constant 0 : index
    %c0_0 = arith.constant 0 : index
    %c0_1 = arith.constant 0 : index
    %0 = vector.load %arg1[%c0, %c0_0, %c0_1] : memref<1x8x1156xbf16, #tpu.memory_space<vmem>>, vector<1x8x1086xbf16>
    %1 = vector.shape_cast %0 : vector<1x8x1086xbf16> to vector<8x1086xbf16>
    %c0_2 = arith.constant 0 : index
    %c0_3 = arith.constant 0 : index
    %c0_4 = arith.constant 0 : index
    %2 = vector.load %arg2[%c0_2, %c0_3, %c0_4] : memref<9x8x8xbf16, #tpu.memory_space<vmem>>, vector<1x8x8xbf16>
    %3 = vector.shape_cast %2 : vector<1x8x8xbf16> to vector<8x8xbf16>
    %cst = arith.constant dense<0.000000e+00> : vector<8x1086xf32>
    %4 = tpu.matmul %3, %1, %cst {dimension_numbers = #tpu.dot_dimension_numbers<[1], [0], [0], [1], [0, 0, 1, 1], [], []>} : vector<8x8xbf16>, vector<8x1086xbf16>, vector<8x1086xf32> -> vector<8x1086xf32>
    %c0_5 = arith.constant 0 : index
    %c0_6 = arith.constant 0 : index
    %c1 = arith.constant 1 : index
    %5 = vector.load %arg1[%c0_5, %c0_6, %c1] : memref<1x8x1156xbf16, #tpu.memory_space<vmem>>, vector<1x8x1086xbf16>
    %6 = vector.shape_cast %5 : vector<1x8x1086xbf16> to vector<8x1086xbf16>
    %c1_7 = arith.constant 1 : index
    %c0_8 = arith.constant 0 : index
    %c0_9 = arith.constant 0 : index
    %7 = vector.load %arg2[%c1_7, %c0_8, %c0_9] : memref<9x8x8xbf16, #tpu.memory_space<vmem>>, vector<1x8x8xbf16>
    %8 = vector.shape_cast %7 : vector<1x8x8xbf16> to vector<8x8xbf16>
    %cst_10 = arith.constant dense<0.000000e+00> : vector<8x1086xf32>
    %9 = tpu.matmul %8, %6, %cst_10 {dimension_numbers = #tpu.dot_dimension_numbers<[1], [0], [0], [1], [0, 0, 1, 1], [], []>} : vector<8x8xbf16>, vector<8x1086xbf16>, vector<8x1086xf32> -> vector<8x1086xf32>
    %10 = arith.addf %4, %9 : vector<8x1086xf32>
    %c0_11 = arith.constant 0 : index
    %c0_12 = arith.constant 0 : index
    %c2 = arith.constant 2 : index
    %11 = vector.load %arg1[%c0_11, %c0_12, %c2] : memref<1x8x1156xbf16, #tpu.memory_space<vmem>>, vector<1x8x1086xbf16>
    %12 = vector.shape_cast %11 : vector<1x8x1086xbf16> to vector<8x1086xbf16>
    %c2_13 = arith.constant 2 : index
    %c0_14 = arith.constant 0 : index
    %c0_15 = arith.constant 0 : index
    %13 = vector.load %arg2[%c2_13, %c0_14, %c0_15] : memref<9x8x8xbf16, #tpu.memory_space<vmem>>, vector<1x8x8xbf16>
    %14 = vector.shape_cast %13 : vector<1x8x8xbf16> to vector<8x8xbf16>
    %cst_16 = arith.constant dense<0.000000e+00> : vector<8x1086xf32>
    %15 = tpu.matmul %14, %12, %cst_16 {dimension_numbers = #tpu.dot_dimension_numbers<[1], [0], [0], [1], [0, 0, 1, 1], [], []>} : vector<8x8xbf16>, vector<8x1086xbf16>, vector<8x1086xf32> -> vector<8x1086xf32>
    %16 = arith.addf %10, %15 : vector<8x1086xf32>
    %c0_17 = arith.constant 0 : index
    %c0_18 = arith.constant 0 : index
    %c34 = arith.constant 34 : index
    %17 = vector.load %arg1[%c0_17, %c0_18, %c34] : memref<1x8x1156xbf16, #tpu.memory_space<vmem>>, vector<1x8x1086xbf16>
    %18 = vector.shape_cast %17 : vector<1x8x1086xbf16> to vector<8x1086xbf16>
    %c3 = arith.constant 3 : index
    %c0_19 = arith.constant 0 : index
    %c0_20 = arith.constant 0 : index
    %19 = vector.load %arg2[%c3, %c0_19, %c0_20] : memref<9x8x8xbf16, #tpu.memory_space<vmem>>, vector<1x8x8xbf16>
    %20 = vector.shape_cast %19 : vector<1x8x8xbf16> to vector<8x8xbf16>
    %cst_21 = arith.constant dense<0.000000e+00> : vector<8x1086xf32>
    %21 = tpu.matmul %20, %18, %cst_21 {dimension_numbers = #tpu.dot_dimension_numbers<[1], [0], [0], [1], [0, 0, 1, 1], [], []>} : vector<8x8xbf16>, vector<8x1086xbf16>, vector<8x1086xf32> -> vector<8x1086xf32>
    %22 = arith.addf %16, %21 : vector<8x1086xf32>
    %c0_22 = arith.constant 0 : index
    %c0_23 = arith.constant 0 : index
    %c35 = arith.constant 35 : index
    %23 = vector.load %arg1[%c0_22, %c0_23, %c35] : memref<1x8x1156xbf16, #tpu.memory_space<vmem>>, vector<1x8x1086xbf16>
    %24 = vector.shape_cast %23 : vector<1x8x1086xbf16> to vector<8x1086xbf16>
    %c4 = arith.constant 4 : index
    %c0_24 = arith.constant 0 : index
    %c0_25 = arith.constant 0 : index
    %25 = vector.load %arg2[%c4, %c0_24, %c0_25] : memref<9x8x8xbf16, #tpu.memory_space<vmem>>, vector<1x8x8xbf16>
    %26 = vector.shape_cast %25 : vector<1x8x8xbf16> to vector<8x8xbf16>
    %cst_26 = arith.constant dense<0.000000e+00> : vector<8x1086xf32>
    %27 = tpu.matmul %26, %24, %cst_26 {dimension_numbers = #tpu.dot_dimension_numbers<[1], [0], [0], [1], [0, 0, 1, 1], [], []>} : vector<8x8xbf16>, vector<8x1086xbf16>, vector<8x1086xf32> -> vector<8x1086xf32>
    %28 = arith.addf %22, %27 : vector<8x1086xf32>
    %c0_27 = arith.constant 0 : index
    %c0_28 = arith.constant 0 : index
    %c36 = arith.constant 36 : index
    %29 = vector.load %arg1[%c0_27, %c0_28, %c36] : memref<1x8x1156xbf16, #tpu.memory_space<vmem>>, vector<1x8x1086xbf16>
    %30 = vector.shape_cast %29 : vector<1x8x1086xbf16> to vector<8x1086xbf16>
    %c5 = arith.constant 5 : index
    %c0_29 = arith.constant 0 : index
    %c0_30 = arith.constant 0 : index
    %31 = vector.load %arg2[%c5, %c0_29, %c0_30] : memref<9x8x8xbf16, #tpu.memory_space<vmem>>, vector<1x8x8xbf16>
    %32 = vector.shape_cast %31 : vector<1x8x8xbf16> to vector<8x8xbf16>
    %cst_31 = arith.constant dense<0.000000e+00> : vector<8x1086xf32>
    %33 = tpu.matmul %32, %30, %cst_31 {dimension_numbers = #tpu.dot_dimension_numbers<[1], [0], [0], [1], [0, 0, 1, 1], [], []>} : vector<8x8xbf16>, vector<8x1086xbf16>, vector<8x1086xf32> -> vector<8x1086xf32>
    %34 = arith.addf %28, %33 : vector<8x1086xf32>
    %c0_32 = arith.constant 0 : index
    %c0_33 = arith.constant 0 : index
    %c68 = arith.constant 68 : index
    %35 = vector.load %arg1[%c0_32, %c0_33, %c68] : memref<1x8x1156xbf16, #tpu.memory_space<vmem>>, vector<1x8x1086xbf16>
    %36 = vector.shape_cast %35 : vector<1x8x1086xbf16> to vector<8x1086xbf16>
    %c6 = arith.constant 6 : index
    %c0_34 = arith.constant 0 : index
    %c0_35 = arith.constant 0 : index
    %37 = vector.load %arg2[%c6, %c0_34, %c0_35] : memref<9x8x8xbf16, #tpu.memory_space<vmem>>, vector<1x8x8xbf16>
    %38 = vector.shape_cast %37 : vector<1x8x8xbf16> to vector<8x8xbf16>
    %cst_36 = arith.constant dense<0.000000e+00> : vector<8x1086xf32>
    %39 = tpu.matmul %38, %36, %cst_36 {dimension_numbers = #tpu.dot_dimension_numbers<[1], [0], [0], [1], [0, 0, 1, 1], [], []>} : vector<8x8xbf16>, vector<8x1086xbf16>, vector<8x1086xf32> -> vector<8x1086xf32>
    %40 = arith.addf %34, %39 : vector<8x1086xf32>
    %c0_37 = arith.constant 0 : index
    %c0_38 = arith.constant 0 : index
    %c69 = arith.constant 69 : index
    %41 = vector.load %arg1[%c0_37, %c0_38, %c69] : memref<1x8x1156xbf16, #tpu.memory_space<vmem>>, vector<1x8x1086xbf16>
    %42 = vector.shape_cast %41 : vector<1x8x1086xbf16> to vector<8x1086xbf16>
    %c7 = arith.constant 7 : index
    %c0_39 = arith.constant 0 : index
    %c0_40 = arith.constant 0 : index
    %43 = vector.load %arg2[%c7, %c0_39, %c0_40] : memref<9x8x8xbf16, #tpu.memory_space<vmem>>, vector<1x8x8xbf16>
    %44 = vector.shape_cast %43 : vector<1x8x8xbf16> to vector<8x8xbf16>
    %cst_41 = arith.constant dense<0.000000e+00> : vector<8x1086xf32>
    %45 = tpu.matmul %44, %42, %cst_41 {dimension_numbers = #tpu.dot_dimension_numbers<[1], [0], [0], [1], [0, 0, 1, 1], [], []>} : vector<8x8xbf16>, vector<8x1086xbf16>, vector<8x1086xf32> -> vector<8x1086xf32>
    %46 = arith.addf %40, %45 : vector<8x1086xf32>
    %c0_42 = arith.constant 0 : index
    %c0_43 = arith.constant 0 : index
    %c70 = arith.constant 70 : index
    %47 = vector.load %arg1[%c0_42, %c0_43, %c70] : memref<1x8x1156xbf16, #tpu.memory_space<vmem>>, vector<1x8x1086xbf16>
    %48 = vector.shape_cast %47 : vector<1x8x1086xbf16> to vector<8x1086xbf16>
    %c8 = arith.constant 8 : index
    %c0_44 = arith.constant 0 : index
    %c0_45 = arith.constant 0 : index
    %49 = vector.load %arg2[%c8, %c0_44, %c0_45] : memref<9x8x8xbf16, #tpu.memory_space<vmem>>, vector<1x8x8xbf16>
    %50 = vector.shape_cast %49 : vector<1x8x8xbf16> to vector<8x8xbf16>
    %cst_46 = arith.constant dense<0.000000e+00> : vector<8x1086xf32>
    %51 = tpu.matmul %50, %48, %cst_46 {dimension_numbers = #tpu.dot_dimension_numbers<[1], [0], [0], [1], [0, 0, 1, 1], [], []>} : vector<8x8xbf16>, vector<8x1086xbf16>, vector<8x1086xf32> -> vector<8x1086xf32>
    %52 = arith.addf %46, %51 : vector<8x1086xf32>
    %c0_47 = arith.constant 0 : index
    %c0_48 = arith.constant 0 : index
    %c0_49 = arith.constant 0 : index
    %53 = vector.load %arg3[%c0_47, %c0_48, %c0_49] : memref<1x8x1088xf32, #tpu.memory_space<vmem>>, vector<1x8x1086xf32>
    %54 = vector.shape_cast %53 : vector<1x8x1086xf32> to vector<8x1086xf32>
    %55 = vector.shape_cast %52 : vector<8x1086xf32> to vector<1x8x1086xf32>
    tpu.vector_store %arg3[%c0_47, %c0_48, %c0_49], %55 {strides = array<i32>} : memref<1x8x1088xf32, #tpu.memory_space<vmem>>, vector<1x8x1086xf32>,
    %cst_50 = arith.constant 0.000000e+00 : f32
    %56 = vector.broadcast %cst_50 : f32 to vector<8x2xf32>
    %c0_51 = arith.constant 0 : index
    %c0_52 = arith.constant 0 : index
    %c1086 = arith.constant 1086 : index
    %57 = vector.load %arg3[%c0_51, %c0_52, %c1086] : memref<1x8x1088xf32, #tpu.memory_space<vmem>>, vector<1x8x2xf32>
    %58 = vector.shape_cast %57 : vector<1x8x2xf32> to vector<8x2xf32>
    %59 = vector.shape_cast %56 : vector<8x2xf32> to vector<1x8x2xf32>
    tpu.vector_store %arg3[%c0_51, %c0_52, %c1086], %59 {strides = array<i32>} : memref<1x8x1088xf32, #tpu.memory_space<vmem>>, vector<1x8x2xf32>,
    return
  }
  func.func @transform_0(%arg0: i32) -> (i32, i32, i32) {
    %c0_i32 = arith.constant 0 : i32
    %c0_i32_0 = arith.constant 0 : i32
    %c0_i32_1 = arith.constant 0 : i32
    return %arg0, %c0_i32, %c0_i32_0 : i32, i32, i32
  }
  func.func @transform_1(%arg0: i32) -> (i32, i32, i32) {
    %c0_i32 = arith.constant 0 : i32
    %c0_i32_0 = arith.constant 0 : i32
    %c0_i32_1 = arith.constant 0 : i32
    %c0_i32_2 = arith.constant 0 : i32
    return %c0_i32, %c0_i32_0, %c0_i32_1 : i32, i32, i32
  }
  func.func @transform_2(%arg0: i32) -> (i32, i32, i32) {
    %c0_i32 = arith.constant 0 : i32
    %c0_i32_0 = arith.constant 0 : i32
    %c0_i32_1 = arith.constant 0 : i32
    return %arg0, %c0_i32, %c0_i32_0 : i32, i32, i32
  }
}

module attributes {stable_mosaic.version = 11 : i64} {
  func.func @kernel(%arg0: i32, %arg1: memref<1x8x32x34xf32, #tpu.memory_space<vmem>>, %arg2: memref<2x1x1xf32, #tpu.memory_space<vmem>>, %arg3: memref<2x1x1xf32, #tpu.memory_space<vmem>>, %arg4: memref<2x1x1xf32, #tpu.memory_space<vmem>>, %arg5: memref<1x2x32x32xbf16, #tpu.memory_space<vmem>>) attributes {dimension_semantics = [#tpu.dimension_semantics<parallel>], iteration_bounds = array<i64: 2>, scalar_prefetch = 0 : i64, scratch_operands = 0 : i64, tpu.core_type = #tpu.core_type<tc>, window_params = [{transform_indices = @transform_0, window_bounds = array<i64: 1, 8, 32, 34>}, {pipeline_mode = #tpu.pipeline_mode<synchronous>, transform_indices = @transform_1, window_bounds = array<i64: 2, 1, 1>}, {pipeline_mode = #tpu.pipeline_mode<synchronous>, transform_indices = @transform_2, window_bounds = array<i64: 2, 1, 1>}, {pipeline_mode = #tpu.pipeline_mode<synchronous>, transform_indices = @transform_3, window_bounds = array<i64: 2, 1, 1>}, {transform_indices = @transform_4, window_bounds = array<i64: 1, 2, 32, 32>}]} {
    %c0 = arith.constant 0 : index
    %c0_0 = arith.constant 0 : index
    %c0_1 = arith.constant 0 : index
    %c0_2 = arith.constant 0 : index
    %0 = vector.load %arg1[%c0, %c0_0, %c0_1, %c0_2] : memref<1x8x32x34xf32, #tpu.memory_space<vmem>>, vector<1x2x32x32xf32>
    %1 = vector.shape_cast %0 : vector<1x2x32x32xf32> to vector<2x32x32xf32>
    %cst = arith.constant dense<0.000000e+00> : vector<2x32xf32>
    %2 = vector.multi_reduction <add>, %1, %cst [2] : vector<2x32x32xf32> to vector<2x32xf32>
    %3 = vector.shape_cast %2 : vector<2x32xf32> to vector<2x32x1xf32>
    %cst_3 = arith.constant 3.200000e+01 : f32
    %4 = vector.broadcast %cst_3 : f32 to vector<2x32x1xf32>
    %5 = arith.divf %3, %4 : vector<2x32x1xf32>
    %cst_4 = arith.constant dense<0.000000e+00> : vector<2x1xf32>
    %6 = vector.multi_reduction <add>, %5, %cst_4 [1] : vector<2x32x1xf32> to vector<2x1xf32>
    %7 = vector.shape_cast %6 : vector<2x1xf32> to vector<2x1x1xf32>
    %cst_5 = arith.constant 3.200000e+01 : f32
    %8 = vector.broadcast %cst_5 : f32 to vector<2x1x1xf32>
    %9 = arith.divf %7, %8 : vector<2x1x1xf32>
    %10 = vector.broadcast %9 : vector<2x1x1xf32> to vector<2x32x32xf32>
    %11 = arith.subf %1, %10 : vector<2x32x32xf32>
    %12 = arith.mulf %11, %11 : vector<2x32x32xf32>
    %cst_6 = arith.constant dense<0.000000e+00> : vector<2x32xf32>
    %13 = vector.multi_reduction <add>, %12, %cst_6 [2] : vector<2x32x32xf32> to vector<2x32xf32>
    %14 = vector.shape_cast %13 : vector<2x32xf32> to vector<2x32x1xf32>
    %cst_7 = arith.constant 3.200000e+01 : f32
    %15 = vector.broadcast %cst_7 : f32 to vector<2x32x1xf32>
    %16 = arith.divf %14, %15 : vector<2x32x1xf32>
    %cst_8 = arith.constant dense<0.000000e+00> : vector<2x1xf32>
    %17 = vector.multi_reduction <add>, %16, %cst_8 [1] : vector<2x32x1xf32> to vector<2x1xf32>
    %18 = vector.shape_cast %17 : vector<2x1xf32> to vector<2x1x1xf32>
    %cst_9 = arith.constant 3.200000e+01 : f32
    %19 = vector.broadcast %cst_9 : f32 to vector<2x1x1xf32>
    %20 = arith.divf %18, %19 : vector<2x1x1xf32>
    %cst_10 = arith.constant 9.99999993E-9 : f32
    %21 = vector.broadcast %cst_10 : f32 to vector<2x1x1xf32>
    %22 = arith.addf %20, %21 : vector<2x1x1xf32>
    %23 = math.rsqrt %22 : vector<2x1x1xf32>
    %cst_11 = arith.constant dense<0.000000e+00> : vector<1x1xf32>
    %24 = vector.multi_reduction <add>, %9, %cst_11 [0] : vector<2x1x1xf32> to vector<1x1xf32>
    %25 = vector.shape_cast %24 : vector<1x1xf32> to vector<1x1x1xf32>
    %cst_12 = arith.constant 2.000000e+00 : f32
    %26 = vector.broadcast %cst_12 : f32 to vector<1x1x1xf32>
    %27 = arith.divf %25, %26 : vector<1x1x1xf32>
    %28 = vector.broadcast %27 : vector<1x1x1xf32> to vector<2x1x1xf32>
    %29 = arith.subf %9, %28 : vector<2x1x1xf32>
    %30 = arith.mulf %29, %29 : vector<2x1x1xf32>
    %31 = arith.addf %20, %30 : vector<2x1x1xf32>
    %cst_13 = arith.constant dense<0.000000e+00> : vector<1x1xf32>
    %32 = vector.multi_reduction <add>, %31, %cst_13 [0] : vector<2x1x1xf32> to vector<1x1xf32>
    %33 = vector.shape_cast %32 : vector<1x1xf32> to vector<1x1x1xf32>
    %cst_14 = arith.constant 2.000000e+00 : f32
    %34 = vector.broadcast %cst_14 : f32 to vector<1x1x1xf32>
    %35 = arith.divf %33, %34 : vector<1x1x1xf32>
    %cst_15 = arith.constant 9.99999993E-9 : f32
    %36 = vector.broadcast %cst_15 : f32 to vector<1x1x1xf32>
    %37 = arith.addf %35, %36 : vector<1x1x1xf32>
    %38 = math.rsqrt %37 : vector<1x1x1xf32>
    %c0_16 = arith.constant 0 : index
    %c0_17 = arith.constant 0 : index
    %c0_18 = arith.constant 0 : index
    %39 = vector.load %arg2[%c0_16, %c0_17, %c0_18] : memref<2x1x1xf32, #tpu.memory_space<vmem>>, vector<2x1x1xf32>
    %c0_19 = arith.constant 0 : index
    %c0_20 = arith.constant 0 : index
    %c0_21 = arith.constant 0 : index
    %40 = vector.load %arg3[%c0_19, %c0_20, %c0_21] : memref<2x1x1xf32, #tpu.memory_space<vmem>>, vector<2x1x1xf32>
    %c0_22 = arith.constant 0 : index
    %c0_23 = arith.constant 0 : index
    %c0_24 = arith.constant 0 : index
    %41 = vector.load %arg4[%c0_22, %c0_23, %c0_24] : memref<2x1x1xf32, #tpu.memory_space<vmem>>, vector<2x1x1xf32>
    %42 = arith.mulf %39, %23 : vector<2x1x1xf32>
    %cst_25 = arith.constant 1.000000e+00 : f32
    %43 = vector.broadcast %cst_25 : f32 to vector<2x1x1xf32>
    %44 = arith.subf %43, %39 : vector<2x1x1xf32>
    %45 = vector.broadcast %38 : vector<1x1x1xf32> to vector<2x1x1xf32>
    %46 = arith.mulf %44, %45 : vector<2x1x1xf32>
    %47 = arith.addf %42, %46 : vector<2x1x1xf32>
    %48 = arith.mulf %40, %47 : vector<2x1x1xf32>
    %cst_26 = arith.constant 1.000000e+00 : f32
    %49 = vector.broadcast %cst_26 : f32 to vector<2x1x1xf32>
    %50 = arith.subf %49, %39 : vector<2x1x1xf32>
    %51 = arith.mulf %50, %29 : vector<2x1x1xf32>
    %52 = vector.broadcast %38 : vector<1x1x1xf32> to vector<2x1x1xf32>
    %53 = arith.mulf %51, %52 : vector<2x1x1xf32>
    %54 = arith.mulf %40, %53 : vector<2x1x1xf32>
    %55 = arith.addf %54, %41 : vector<2x1x1xf32>
    %56 = vector.broadcast %48 : vector<2x1x1xf32> to vector<2x32x32xf32>
    %57 = arith.mulf %11, %56 : vector<2x32x32xf32>
    %58 = vector.broadcast %55 : vector<2x1x1xf32> to vector<2x32x32xf32>
    %59 = arith.addf %57, %58 : vector<2x32x32xf32>
    %cst_27 = arith.constant 0.000000e+00 : f32
    %60 = vector.broadcast %cst_27 : f32 to vector<2x32x32xf32>
    %61 = arith.maximumf %59, %60 : vector<2x32x32xf32>
    %62 = arith.truncf %61 : vector<2x32x32xf32> to vector<2x32x32xbf16>
    %c0_28 = arith.constant 0 : index
    %c0_29 = arith.constant 0 : index
    %c0_30 = arith.constant 0 : index
    %c0_31 = arith.constant 0 : index
    %63 = vector.load %arg5[%c0_28, %c0_29, %c0_30, %c0_31] : memref<1x2x32x32xbf16, #tpu.memory_space<vmem>>, vector<1x2x32x32xbf16>
    %64 = vector.shape_cast %63 : vector<1x2x32x32xbf16> to vector<2x32x32xbf16>
    %65 = vector.shape_cast %62 : vector<2x32x32xbf16> to vector<1x2x32x32xbf16>
    tpu.vector_store %arg5[%c0_28, %c0_29, %c0_30, %c0_31], %65 {strides = array<i32>} : memref<1x2x32x32xbf16, #tpu.memory_space<vmem>>, vector<1x2x32x32xbf16>,
    return
  }
  func.func @transform_0(%arg0: i32) -> (i32, i32, i32, i32) {
    %c0_i32 = arith.constant 0 : i32
    %c0_i32_0 = arith.constant 0 : i32
    %c0_i32_1 = arith.constant 0 : i32
    %c0_i32_2 = arith.constant 0 : i32
    return %arg0, %c0_i32, %c0_i32_0, %c0_i32_1 : i32, i32, i32, i32
  }
  func.func @transform_1(%arg0: i32) -> (i32, i32, i32) {
    %c0_i32 = arith.constant 0 : i32
    %c0_i32_0 = arith.constant 0 : i32
    %c0_i32_1 = arith.constant 0 : i32
    %c0_i32_2 = arith.constant 0 : i32
    return %c0_i32, %c0_i32_0, %c0_i32_1 : i32, i32, i32
  }
  func.func @transform_2(%arg0: i32) -> (i32, i32, i32) {
    %c0_i32 = arith.constant 0 : i32
    %c0_i32_0 = arith.constant 0 : i32
    %c0_i32_1 = arith.constant 0 : i32
    %c0_i32_2 = arith.constant 0 : i32
    return %c0_i32, %c0_i32_0, %c0_i32_1 : i32, i32, i32
  }
  func.func @transform_3(%arg0: i32) -> (i32, i32, i32) {
    %c0_i32 = arith.constant 0 : i32
    %c0_i32_0 = arith.constant 0 : i32
    %c0_i32_1 = arith.constant 0 : i32
    %c0_i32_2 = arith.constant 0 : i32
    return %c0_i32, %c0_i32_0, %c0_i32_1 : i32, i32, i32
  }
  func.func @transform_4(%arg0: i32) -> (i32, i32, i32, i32) {
    %c0_i32 = arith.constant 0 : i32
    %c0_i32_0 = arith.constant 0 : i32
    %c0_i32_1 = arith.constant 0 : i32
    %c0_i32_2 = arith.constant 0 : i32
    return %arg0, %c0_i32, %c0_i32_0, %c0_i32_1 : i32, i32, i32, i32
  }
}

module attributes {stable_mosaic.version = 11 : i64} {
  func.func @kernel(%arg0: i32, %arg1: memref<1x8x1444xbf16, #tpu.memory_space<vmem>>, %arg2: memref<49x8x8xbf16, #tpu.memory_space<vmem>>, %arg3: memref<1x8x1216xf32, #tpu.memory_space<vmem>>) attributes {dimension_semantics = [#tpu.dimension_semantics<parallel>], iteration_bounds = array<i64: 2>, scalar_prefetch = 0 : i64, scratch_operands = 0 : i64, tpu.core_type = #tpu.core_type<tc>, window_params = [{transform_indices = @transform_0, window_bounds = array<i64: 1, 8, 1444>}, {pipeline_mode = #tpu.pipeline_mode<synchronous>, transform_indices = @transform_1, window_bounds = array<i64: 49, 8, 8>}, {transform_indices = @transform_2, window_bounds = array<i64: 1, 8, 1216>}]} {
    %c0 = arith.constant 0 : index
    %c0_0 = arith.constant 0 : index
    %c0_1 = arith.constant 0 : index
    %0 = vector.load %arg1[%c0, %c0_0, %c0_1] : memref<1x8x1444xbf16, #tpu.memory_space<vmem>>, vector<1x8x1210xbf16>
    %1 = vector.shape_cast %0 : vector<1x8x1210xbf16> to vector<8x1210xbf16>
    %c0_2 = arith.constant 0 : index
    %c0_3 = arith.constant 0 : index
    %c0_4 = arith.constant 0 : index
    %2 = vector.load %arg2[%c0_2, %c0_3, %c0_4] : memref<49x8x8xbf16, #tpu.memory_space<vmem>>, vector<1x8x8xbf16>
    %3 = vector.shape_cast %2 : vector<1x8x8xbf16> to vector<8x8xbf16>
    %cst = arith.constant dense<0.000000e+00> : vector<8x1210xf32>
    %4 = tpu.matmul %3, %1, %cst {dimension_numbers = #tpu.dot_dimension_numbers<[1], [0], [0], [1], [0, 0, 1, 1], [], []>} : vector<8x8xbf16>, vector<8x1210xbf16>, vector<8x1210xf32> -> vector<8x1210xf32>
    %c0_5 = arith.constant 0 : index
    %c0_6 = arith.constant 0 : index
    %c1 = arith.constant 1 : index
    %5 = vector.load %arg1[%c0_5, %c0_6, %c1] : memref<1x8x1444xbf16, #tpu.memory_space<vmem>>, vector<1x8x1210xbf16>
    %6 = vector.shape_cast %5 : vector<1x8x1210xbf16> to vector<8x1210xbf16>
    %c1_7 = arith.constant 1 : index
    %c0_8 = arith.constant 0 : index
    %c0_9 = arith.constant 0 : index
    %7 = vector.load %arg2[%c1_7, %c0_8, %c0_9] : memref<49x8x8xbf16, #tpu.memory_space<vmem>>, vector<1x8x8xbf16>
    %8 = vector.shape_cast %7 : vector<1x8x8xbf16> to vector<8x8xbf16>
    %cst_10 = arith.constant dense<0.000000e+00> : vector<8x1210xf32>
    %9 = tpu.matmul %8, %6, %cst_10 {dimension_numbers = #tpu.dot_dimension_numbers<[1], [0], [0], [1], [0, 0, 1, 1], [], []>} : vector<8x8xbf16>, vector<8x1210xbf16>, vector<8x1210xf32> -> vector<8x1210xf32>
    %10 = arith.addf %4, %9 : vector<8x1210xf32>
    %c0_11 = arith.constant 0 : index
    %c0_12 = arith.constant 0 : index
    %c2 = arith.constant 2 : index
    %11 = vector.load %arg1[%c0_11, %c0_12, %c2] : memref<1x8x1444xbf16, #tpu.memory_space<vmem>>, vector<1x8x1210xbf16>
    %12 = vector.shape_cast %11 : vector<1x8x1210xbf16> to vector<8x1210xbf16>
    %c2_13 = arith.constant 2 : index
    %c0_14 = arith.constant 0 : index
    %c0_15 = arith.constant 0 : index
    %13 = vector.load %arg2[%c2_13, %c0_14, %c0_15] : memref<49x8x8xbf16, #tpu.memory_space<vmem>>, vector<1x8x8xbf16>
    %14 = vector.shape_cast %13 : vector<1x8x8xbf16> to vector<8x8xbf16>
    %cst_16 = arith.constant dense<0.000000e+00> : vector<8x1210xf32>
    %15 = tpu.matmul %14, %12, %cst_16 {dimension_numbers = #tpu.dot_dimension_numbers<[1], [0], [0], [1], [0, 0, 1, 1], [], []>} : vector<8x8xbf16>, vector<8x1210xbf16>, vector<8x1210xf32> -> vector<8x1210xf32>
    %16 = arith.addf %10, %15 : vector<8x1210xf32>
    %c0_17 = arith.constant 0 : index
    %c0_18 = arith.constant 0 : index
    %c3 = arith.constant 3 : index
    %17 = vector.load %arg1[%c0_17, %c0_18, %c3] : memref<1x8x1444xbf16, #tpu.memory_space<vmem>>, vector<1x8x1210xbf16>
    %18 = vector.shape_cast %17 : vector<1x8x1210xbf16> to vector<8x1210xbf16>
    %c3_19 = arith.constant 3 : index
    %c0_20 = arith.constant 0 : index
    %c0_21 = arith.constant 0 : index
    %19 = vector.load %arg2[%c3_19, %c0_20, %c0_21] : memref<49x8x8xbf16, #tpu.memory_space<vmem>>, vector<1x8x8xbf16>
    %20 = vector.shape_cast %19 : vector<1x8x8xbf16> to vector<8x8xbf16>
    %cst_22 = arith.constant dense<0.000000e+00> : vector<8x1210xf32>
    %21 = tpu.matmul %20, %18, %cst_22 {dimension_numbers = #tpu.dot_dimension_numbers<[1], [0], [0], [1], [0, 0, 1, 1], [], []>} : vector<8x8xbf16>, vector<8x1210xbf16>, vector<8x1210xf32> -> vector<8x1210xf32>
    %22 = arith.addf %16, %21 : vector<8x1210xf32>
    %c0_23 = arith.constant 0 : index
    %c0_24 = arith.constant 0 : index
    %c4 = arith.constant 4 : index
    %23 = vector.load %arg1[%c0_23, %c0_24, %c4] : memref<1x8x1444xbf16, #tpu.memory_space<vmem>>, vector<1x8x1210xbf16>
    %24 = vector.shape_cast %23 : vector<1x8x1210xbf16> to vector<8x1210xbf16>
    %c4_25 = arith.constant 4 : index
    %c0_26 = arith.constant 0 : index
    %c0_27 = arith.constant 0 : index
    %25 = vector.load %arg2[%c4_25, %c0_26, %c0_27] : memref<49x8x8xbf16, #tpu.memory_space<vmem>>, vector<1x8x8xbf16>
    %26 = vector.shape_cast %25 : vector<1x8x8xbf16> to vector<8x8xbf16>
    %cst_28 = arith.constant dense<0.000000e+00> : vector<8x1210xf32>
    %27 = tpu.matmul %26, %24, %cst_28 {dimension_numbers = #tpu.dot_dimension_numbers<[1], [0], [0], [1], [0, 0, 1, 1], [], []>} : vector<8x8xbf16>, vector<8x1210xbf16>, vector<8x1210xf32> -> vector<8x1210xf32>
    %28 = arith.addf %22, %27 : vector<8x1210xf32>
    %c0_29 = arith.constant 0 : index
    %c0_30 = arith.constant 0 : index
    %c5 = arith.constant 5 : index
    %29 = vector.load %arg1[%c0_29, %c0_30, %c5] : memref<1x8x1444xbf16, #tpu.memory_space<vmem>>, vector<1x8x1210xbf16>
    %30 = vector.shape_cast %29 : vector<1x8x1210xbf16> to vector<8x1210xbf16>
    %c5_31 = arith.constant 5 : index
    %c0_32 = arith.constant 0 : index
    %c0_33 = arith.constant 0 : index
    %31 = vector.load %arg2[%c5_31, %c0_32, %c0_33] : memref<49x8x8xbf16, #tpu.memory_space<vmem>>, vector<1x8x8xbf16>
    %32 = vector.shape_cast %31 : vector<1x8x8xbf16> to vector<8x8xbf16>
    %cst_34 = arith.constant dense<0.000000e+00> : vector<8x1210xf32>
    %33 = tpu.matmul %32, %30, %cst_34 {dimension_numbers = #tpu.dot_dimension_numbers<[1], [0], [0], [1], [0, 0, 1, 1], [], []>} : vector<8x8xbf16>, vector<8x1210xbf16>, vector<8x1210xf32> -> vector<8x1210xf32>
    %34 = arith.addf %28, %33 : vector<8x1210xf32>
    %c0_35 = arith.constant 0 : index
    %c0_36 = arith.constant 0 : index
    %c6 = arith.constant 6 : index
    %35 = vector.load %arg1[%c0_35, %c0_36, %c6] : memref<1x8x1444xbf16, #tpu.memory_space<vmem>>, vector<1x8x1210xbf16>
    %36 = vector.shape_cast %35 : vector<1x8x1210xbf16> to vector<8x1210xbf16>
    %c6_37 = arith.constant 6 : index
    %c0_38 = arith.constant 0 : index
    %c0_39 = arith.constant 0 : index
    %37 = vector.load %arg2[%c6_37, %c0_38, %c0_39] : memref<49x8x8xbf16, #tpu.memory_space<vmem>>, vector<1x8x8xbf16>
    %38 = vector.shape_cast %37 : vector<1x8x8xbf16> to vector<8x8xbf16>
    %cst_40 = arith.constant dense<0.000000e+00> : vector<8x1210xf32>
    %39 = tpu.matmul %38, %36, %cst_40 {dimension_numbers = #tpu.dot_dimension_numbers<[1], [0], [0], [1], [0, 0, 1, 1], [], []>} : vector<8x8xbf16>, vector<8x1210xbf16>, vector<8x1210xf32> -> vector<8x1210xf32>
    %40 = arith.addf %34, %39 : vector<8x1210xf32>
    %c0_41 = arith.constant 0 : index
    %c0_42 = arith.constant 0 : index
    %c38 = arith.constant 38 : index
    %41 = vector.load %arg1[%c0_41, %c0_42, %c38] : memref<1x8x1444xbf16, #tpu.memory_space<vmem>>, vector<1x8x1210xbf16>
    %42 = vector.shape_cast %41 : vector<1x8x1210xbf16> to vector<8x1210xbf16>
    %c7 = arith.constant 7 : index
    %c0_43 = arith.constant 0 : index
    %c0_44 = arith.constant 0 : index
    %43 = vector.load %arg2[%c7, %c0_43, %c0_44] : memref<49x8x8xbf16, #tpu.memory_space<vmem>>, vector<1x8x8xbf16>
    %44 = vector.shape_cast %43 : vector<1x8x8xbf16> to vector<8x8xbf16>
    %cst_45 = arith.constant dense<0.000000e+00> : vector<8x1210xf32>
    %45 = tpu.matmul %44, %42, %cst_45 {dimension_numbers = #tpu.dot_dimension_numbers<[1], [0], [0], [1], [0, 0, 1, 1], [], []>} : vector<8x8xbf16>, vector<8x1210xbf16>, vector<8x1210xf32> -> vector<8x1210xf32>
    %46 = arith.addf %40, %45 : vector<8x1210xf32>
    %c0_46 = arith.constant 0 : index
    %c0_47 = arith.constant 0 : index
    %c39 = arith.constant 39 : index
    %47 = vector.load %arg1[%c0_46, %c0_47, %c39] : memref<1x8x1444xbf16, #tpu.memory_space<vmem>>, vector<1x8x1210xbf16>
    %48 = vector.shape_cast %47 : vector<1x8x1210xbf16> to vector<8x1210xbf16>
    %c8 = arith.constant 8 : index
    %c0_48 = arith.constant 0 : index
    %c0_49 = arith.constant 0 : index
    %49 = vector.load %arg2[%c8, %c0_48, %c0_49] : memref<49x8x8xbf16, #tpu.memory_space<vmem>>, vector<1x8x8xbf16>
    %50 = vector.shape_cast %49 : vector<1x8x8xbf16> to vector<8x8xbf16>
    %cst_50 = arith.constant dense<0.000000e+00> : vector<8x1210xf32>
    %51 = tpu.matmul %50, %48, %cst_50 {dimension_numbers = #tpu.dot_dimension_numbers<[1], [0], [0], [1], [0, 0, 1, 1], [], []>} : vector<8x8xbf16>, vector<8x1210xbf16>, vector<8x1210xf32> -> vector<8x1210xf32>
    %52 = arith.addf %46, %51 : vector<8x1210xf32>
    %c0_51 = arith.constant 0 : index
    %c0_52 = arith.constant 0 : index
    %c40 = arith.constant 40 : index
    %53 = vector.load %arg1[%c0_51, %c0_52, %c40] : memref<1x8x1444xbf16, #tpu.memory_space<vmem>>, vector<1x8x1210xbf16>
    %54 = vector.shape_cast %53 : vector<1x8x1210xbf16> to vector<8x1210xbf16>
    %c9 = arith.constant 9 : index
    %c0_53 = arith.constant 0 : index
    %c0_54 = arith.constant 0 : index
    %55 = vector.load %arg2[%c9, %c0_53, %c0_54] : memref<49x8x8xbf16, #tpu.memory_space<vmem>>, vector<1x8x8xbf16>
    %56 = vector.shape_cast %55 : vector<1x8x8xbf16> to vector<8x8xbf16>
    %cst_55 = arith.constant dense<0.000000e+00> : vector<8x1210xf32>
    %57 = tpu.matmul %56, %54, %cst_55 {dimension_numbers = #tpu.dot_dimension_numbers<[1], [0], [0], [1], [0, 0, 1, 1], [], []>} : vector<8x8xbf16>, vector<8x1210xbf16>, vector<8x1210xf32> -> vector<8x1210xf32>
    %58 = arith.addf %52, %57 : vector<8x1210xf32>
    %c0_56 = arith.constant 0 : index
    %c0_57 = arith.constant 0 : index
    %c41 = arith.constant 41 : index
    %59 = vector.load %arg1[%c0_56, %c0_57, %c41] : memref<1x8x1444xbf16, #tpu.memory_space<vmem>>, vector<1x8x1210xbf16>
    %60 = vector.shape_cast %59 : vector<1x8x1210xbf16> to vector<8x1210xbf16>
    %c10 = arith.constant 10 : index
    %c0_58 = arith.constant 0 : index
    %c0_59 = arith.constant 0 : index
    %61 = vector.load %arg2[%c10, %c0_58, %c0_59] : memref<49x8x8xbf16, #tpu.memory_space<vmem>>, vector<1x8x8xbf16>
    %62 = vector.shape_cast %61 : vector<1x8x8xbf16> to vector<8x8xbf16>
    %cst_60 = arith.constant dense<0.000000e+00> : vector<8x1210xf32>
    %63 = tpu.matmul %62, %60, %cst_60 {dimension_numbers = #tpu.dot_dimension_numbers<[1], [0], [0], [1], [0, 0, 1, 1], [], []>} : vector<8x8xbf16>, vector<8x1210xbf16>, vector<8x1210xf32> -> vector<8x1210xf32>
    %64 = arith.addf %58, %63 : vector<8x1210xf32>
    %c0_61 = arith.constant 0 : index
    %c0_62 = arith.constant 0 : index
    %c42 = arith.constant 42 : index
    %65 = vector.load %arg1[%c0_61, %c0_62, %c42] : memref<1x8x1444xbf16, #tpu.memory_space<vmem>>, vector<1x8x1210xbf16>
    %66 = vector.shape_cast %65 : vector<1x8x1210xbf16> to vector<8x1210xbf16>
    %c11 = arith.constant 11 : index
    %c0_63 = arith.constant 0 : index
    %c0_64 = arith.constant 0 : index
    %67 = vector.load %arg2[%c11, %c0_63, %c0_64] : memref<49x8x8xbf16, #tpu.memory_space<vmem>>, vector<1x8x8xbf16>
    %68 = vector.shape_cast %67 : vector<1x8x8xbf16> to vector<8x8xbf16>
    %cst_65 = arith.constant dense<0.000000e+00> : vector<8x1210xf32>
    %69 = tpu.matmul %68, %66, %cst_65 {dimension_numbers = #tpu.dot_dimension_numbers<[1], [0], [0], [1], [0, 0, 1, 1], [], []>} : vector<8x8xbf16>, vector<8x1210xbf16>, vector<8x1210xf32> -> vector<8x1210xf32>
    %70 = arith.addf %64, %69 : vector<8x1210xf32>
    %c0_66 = arith.constant 0 : index
    %c0_67 = arith.constant 0 : index
    %c43 = arith.constant 43 : index
    %71 = vector.load %arg1[%c0_66, %c0_67, %c43] : memref<1x8x1444xbf16, #tpu.memory_space<vmem>>, vector<1x8x1210xbf16>
    %72 = vector.shape_cast %71 : vector<1x8x1210xbf16> to vector<8x1210xbf16>
    %c12 = arith.constant 12 : index
    %c0_68 = arith.constant 0 : index
    %c0_69 = arith.constant 0 : index
    %73 = vector.load %arg2[%c12, %c0_68, %c0_69] : memref<49x8x8xbf16, #tpu.memory_space<vmem>>, vector<1x8x8xbf16>
    %74 = vector.shape_cast %73 : vector<1x8x8xbf16> to vector<8x8xbf16>
    %cst_70 = arith.constant dense<0.000000e+00> : vector<8x1210xf32>
    %75 = tpu.matmul %74, %72, %cst_70 {dimension_numbers = #tpu.dot_dimension_numbers<[1], [0], [0], [1], [0, 0, 1, 1], [], []>} : vector<8x8xbf16>, vector<8x1210xbf16>, vector<8x1210xf32> -> vector<8x1210xf32>
    %76 = arith.addf %70, %75 : vector<8x1210xf32>
    %c0_71 = arith.constant 0 : index
    %c0_72 = arith.constant 0 : index
    %c44 = arith.constant 44 : index
    %77 = vector.load %arg1[%c0_71, %c0_72, %c44] : memref<1x8x1444xbf16, #tpu.memory_space<vmem>>, vector<1x8x1210xbf16>
    %78 = vector.shape_cast %77 : vector<1x8x1210xbf16> to vector<8x1210xbf16>
    %c13 = arith.constant 13 : index
    %c0_73 = arith.constant 0 : index
    %c0_74 = arith.constant 0 : index
    %79 = vector.load %arg2[%c13, %c0_73, %c0_74] : memref<49x8x8xbf16, #tpu.memory_space<vmem>>, vector<1x8x8xbf16>
    %80 = vector.shape_cast %79 : vector<1x8x8xbf16> to vector<8x8xbf16>
    %cst_75 = arith.constant dense<0.000000e+00> : vector<8x1210xf32>
    %81 = tpu.matmul %80, %78, %cst_75 {dimension_numbers = #tpu.dot_dimension_numbers<[1], [0], [0], [1], [0, 0, 1, 1], [], []>} : vector<8x8xbf16>, vector<8x1210xbf16>, vector<8x1210xf32> -> vector<8x1210xf32>
    %82 = arith.addf %76, %81 : vector<8x1210xf32>
    %c0_76 = arith.constant 0 : index
    %c0_77 = arith.constant 0 : index
    %c76 = arith.constant 76 : index
    %83 = vector.load %arg1[%c0_76, %c0_77, %c76] : memref<1x8x1444xbf16, #tpu.memory_space<vmem>>, vector<1x8x1210xbf16>
    %84 = vector.shape_cast %83 : vector<1x8x1210xbf16> to vector<8x1210xbf16>
    %c14 = arith.constant 14 : index
    %c0_78 = arith.constant 0 : index
    %c0_79 = arith.constant 0 : index
    %85 = vector.load %arg2[%c14, %c0_78, %c0_79] : memref<49x8x8xbf16, #tpu.memory_space<vmem>>, vector<1x8x8xbf16>
    %86 = vector.shape_cast %85 : vector<1x8x8xbf16> to vector<8x8xbf16>
    %cst_80 = arith.constant dense<0.000000e+00> : vector<8x1210xf32>
    %87 = tpu.matmul %86, %84, %cst_80 {dimension_numbers = #tpu.dot_dimension_numbers<[1], [0], [0], [1], [0, 0, 1, 1], [], []>} : vector<8x8xbf16>, vector<8x1210xbf16>, vector<8x1210xf32> -> vector<8x1210xf32>
    %88 = arith.addf %82, %87 : vector<8x1210xf32>
    %c0_81 = arith.constant 0 : index
    %c0_82 = arith.constant 0 : index
    %c77 = arith.constant 77 : index
    %89 = vector.load %arg1[%c0_81, %c0_82, %c77] : memref<1x8x1444xbf16, #tpu.memory_space<vmem>>, vector<1x8x1210xbf16>
    %90 = vector.shape_cast %89 : vector<1x8x1210xbf16> to vector<8x1210xbf16>
    %c15 = arith.constant 15 : index
    %c0_83 = arith.constant 0 : index
    %c0_84 = arith.constant 0 : index
    %91 = vector.load %arg2[%c15, %c0_83, %c0_84] : memref<49x8x8xbf16, #tpu.memory_space<vmem>>, vector<1x8x8xbf16>
    %92 = vector.shape_cast %91 : vector<1x8x8xbf16> to vector<8x8xbf16>
    %cst_85 = arith.constant dense<0.000000e+00> : vector<8x1210xf32>
    %93 = tpu.matmul %92, %90, %cst_85 {dimension_numbers = #tpu.dot_dimension_numbers<[1], [0], [0], [1], [0, 0, 1, 1], [], []>} : vector<8x8xbf16>, vector<8x1210xbf16>, vector<8x1210xf32> -> vector<8x1210xf32>
    %94 = arith.addf %88, %93 : vector<8x1210xf32>
    %c0_86 = arith.constant 0 : index
    %c0_87 = arith.constant 0 : index
    %c78 = arith.constant 78 : index
    %95 = vector.load %arg1[%c0_86, %c0_87, %c78] : memref<1x8x1444xbf16, #tpu.memory_space<vmem>>, vector<1x8x1210xbf16>
    %96 = vector.shape_cast %95 : vector<1x8x1210xbf16> to vector<8x1210xbf16>
    %c16 = arith.constant 16 : index
    %c0_88 = arith.constant 0 : index
    %c0_89 = arith.constant 0 : index
    %97 = vector.load %arg2[%c16, %c0_88, %c0_89] : memref<49x8x8xbf16, #tpu.memory_space<vmem>>, vector<1x8x8xbf16>
    %98 = vector.shape_cast %97 : vector<1x8x8xbf16> to vector<8x8xbf16>
    %cst_90 = arith.constant dense<0.000000e+00> : vector<8x1210xf32>
    %99 = tpu.matmul %98, %96, %cst_90 {dimension_numbers = #tpu.dot_dimension_numbers<[1], [0], [0], [1], [0, 0, 1, 1], [], []>} : vector<8x8xbf16>, vector<8x1210xbf16>, vector<8x1210xf32> -> vector<8x1210xf32>
    %100 = arith.addf %94, %99 : vector<8x1210xf32>
    %c0_91 = arith.constant 0 : index
    %c0_92 = arith.constant 0 : index
    %c79 = arith.constant 79 : index
    %101 = vector.load %arg1[%c0_91, %c0_92, %c79] : memref<1x8x1444xbf16, #tpu.memory_space<vmem>>, vector<1x8x1210xbf16>
    %102 = vector.shape_cast %101 : vector<1x8x1210xbf16> to vector<8x1210xbf16>
    %c17 = arith.constant 17 : index
    %c0_93 = arith.constant 0 : index
    %c0_94 = arith.constant 0 : index
    %103 = vector.load %arg2[%c17, %c0_93, %c0_94] : memref<49x8x8xbf16, #tpu.memory_space<vmem>>, vector<1x8x8xbf16>
    %104 = vector.shape_cast %103 : vector<1x8x8xbf16> to vector<8x8xbf16>
    %cst_95 = arith.constant dense<0.000000e+00> : vector<8x1210xf32>
    %105 = tpu.matmul %104, %102, %cst_95 {dimension_numbers = #tpu.dot_dimension_numbers<[1], [0], [0], [1], [0, 0, 1, 1], [], []>} : vector<8x8xbf16>, vector<8x1210xbf16>, vector<8x1210xf32> -> vector<8x1210xf32>
    %106 = arith.addf %100, %105 : vector<8x1210xf32>
    %c0_96 = arith.constant 0 : index
    %c0_97 = arith.constant 0 : index
    %c80 = arith.constant 80 : index
    %107 = vector.load %arg1[%c0_96, %c0_97, %c80] : memref<1x8x1444xbf16, #tpu.memory_space<vmem>>, vector<1x8x1210xbf16>
    %108 = vector.shape_cast %107 : vector<1x8x1210xbf16> to vector<8x1210xbf16>
    %c18 = arith.constant 18 : index
    %c0_98 = arith.constant 0 : index
    %c0_99 = arith.constant 0 : index
    %109 = vector.load %arg2[%c18, %c0_98, %c0_99] : memref<49x8x8xbf16, #tpu.memory_space<vmem>>, vector<1x8x8xbf16>
    %110 = vector.shape_cast %109 : vector<1x8x8xbf16> to vector<8x8xbf16>
    %cst_100 = arith.constant dense<0.000000e+00> : vector<8x1210xf32>
    %111 = tpu.matmul %110, %108, %cst_100 {dimension_numbers = #tpu.dot_dimension_numbers<[1], [0], [0], [1], [0, 0, 1, 1], [], []>} : vector<8x8xbf16>, vector<8x1210xbf16>, vector<8x1210xf32> -> vector<8x1210xf32>
    %112 = arith.addf %106, %111 : vector<8x1210xf32>
    %c0_101 = arith.constant 0 : index
    %c0_102 = arith.constant 0 : index
    %c81 = arith.constant 81 : index
    %113 = vector.load %arg1[%c0_101, %c0_102, %c81] : memref<1x8x1444xbf16, #tpu.memory_space<vmem>>, vector<1x8x1210xbf16>
    %114 = vector.shape_cast %113 : vector<1x8x1210xbf16> to vector<8x1210xbf16>
    %c19 = arith.constant 19 : index
    %c0_103 = arith.constant 0 : index
    %c0_104 = arith.constant 0 : index
    %115 = vector.load %arg2[%c19, %c0_103, %c0_104] : memref<49x8x8xbf16, #tpu.memory_space<vmem>>, vector<1x8x8xbf16>
    %116 = vector.shape_cast %115 : vector<1x8x8xbf16> to vector<8x8xbf16>
    %cst_105 = arith.constant dense<0.000000e+00> : vector<8x1210xf32>
    %117 = tpu.matmul %116, %114, %cst_105 {dimension_numbers = #tpu.dot_dimension_numbers<[1], [0], [0], [1], [0, 0, 1, 1], [], []>} : vector<8x8xbf16>, vector<8x1210xbf16>, vector<8x1210xf32> -> vector<8x1210xf32>
    %118 = arith.addf %112, %117 : vector<8x1210xf32>
    %c0_106 = arith.constant 0 : index
    %c0_107 = arith.constant 0 : index
    %c82 = arith.constant 82 : index
    %119 = vector.load %arg1[%c0_106, %c0_107, %c82] : memref<1x8x1444xbf16, #tpu.memory_space<vmem>>, vector<1x8x1210xbf16>
    %120 = vector.shape_cast %119 : vector<1x8x1210xbf16> to vector<8x1210xbf16>
    %c20 = arith.constant 20 : index
    %c0_108 = arith.constant 0 : index
    %c0_109 = arith.constant 0 : index
    %121 = vector.load %arg2[%c20, %c0_108, %c0_109] : memref<49x8x8xbf16, #tpu.memory_space<vmem>>, vector<1x8x8xbf16>
    %122 = vector.shape_cast %121 : vector<1x8x8xbf16> to vector<8x8xbf16>
    %cst_110 = arith.constant dense<0.000000e+00> : vector<8x1210xf32>
    %123 = tpu.matmul %122, %120, %cst_110 {dimension_numbers = #tpu.dot_dimension_numbers<[1], [0], [0], [1], [0, 0, 1, 1], [], []>} : vector<8x8xbf16>, vector<8x1210xbf16>, vector<8x1210xf32> -> vector<8x1210xf32>
    %124 = arith.addf %118, %123 : vector<8x1210xf32>
    %c0_111 = arith.constant 0 : index
    %c0_112 = arith.constant 0 : index
    %c114 = arith.constant 114 : index
    %125 = vector.load %arg1[%c0_111, %c0_112, %c114] : memref<1x8x1444xbf16, #tpu.memory_space<vmem>>, vector<1x8x1210xbf16>
    %126 = vector.shape_cast %125 : vector<1x8x1210xbf16> to vector<8x1210xbf16>
    %c21 = arith.constant 21 : index
    %c0_113 = arith.constant 0 : index
    %c0_114 = arith.constant 0 : index
    %127 = vector.load %arg2[%c21, %c0_113, %c0_114] : memref<49x8x8xbf16, #tpu.memory_space<vmem>>, vector<1x8x8xbf16>
    %128 = vector.shape_cast %127 : vector<1x8x8xbf16> to vector<8x8xbf16>
    %cst_115 = arith.constant dense<0.000000e+00> : vector<8x1210xf32>
    %129 = tpu.matmul %128, %126, %cst_115 {dimension_numbers = #tpu.dot_dimension_numbers<[1], [0], [0], [1], [0, 0, 1, 1], [], []>} : vector<8x8xbf16>, vector<8x1210xbf16>, vector<8x1210xf32> -> vector<8x1210xf32>
    %130 = arith.addf %124, %129 : vector<8x1210xf32>
    %c0_116 = arith.constant 0 : index
    %c0_117 = arith.constant 0 : index
    %c115 = arith.constant 115 : index
    %131 = vector.load %arg1[%c0_116, %c0_117, %c115] : memref<1x8x1444xbf16, #tpu.memory_space<vmem>>, vector<1x8x1210xbf16>
    %132 = vector.shape_cast %131 : vector<1x8x1210xbf16> to vector<8x1210xbf16>
    %c22 = arith.constant 22 : index
    %c0_118 = arith.constant 0 : index
    %c0_119 = arith.constant 0 : index
    %133 = vector.load %arg2[%c22, %c0_118, %c0_119] : memref<49x8x8xbf16, #tpu.memory_space<vmem>>, vector<1x8x8xbf16>
    %134 = vector.shape_cast %133 : vector<1x8x8xbf16> to vector<8x8xbf16>
    %cst_120 = arith.constant dense<0.000000e+00> : vector<8x1210xf32>
    %135 = tpu.matmul %134, %132, %cst_120 {dimension_numbers = #tpu.dot_dimension_numbers<[1], [0], [0], [1], [0, 0, 1, 1], [], []>} : vector<8x8xbf16>, vector<8x1210xbf16>, vector<8x1210xf32> -> vector<8x1210xf32>
    %136 = arith.addf %130, %135 : vector<8x1210xf32>
    %c0_121 = arith.constant 0 : index
    %c0_122 = arith.constant 0 : index
    %c116 = arith.constant 116 : index
    %137 = vector.load %arg1[%c0_121, %c0_122, %c116] : memref<1x8x1444xbf16, #tpu.memory_space<vmem>>, vector<1x8x1210xbf16>
    %138 = vector.shape_cast %137 : vector<1x8x1210xbf16> to vector<8x1210xbf16>
    %c23 = arith.constant 23 : index
    %c0_123 = arith.constant 0 : index
    %c0_124 = arith.constant 0 : index
    %139 = vector.load %arg2[%c23, %c0_123, %c0_124] : memref<49x8x8xbf16, #tpu.memory_space<vmem>>, vector<1x8x8xbf16>
    %140 = vector.shape_cast %139 : vector<1x8x8xbf16> to vector<8x8xbf16>
    %cst_125 = arith.constant dense<0.000000e+00> : vector<8x1210xf32>
    %141 = tpu.matmul %140, %138, %cst_125 {dimension_numbers = #tpu.dot_dimension_numbers<[1], [0], [0], [1], [0, 0, 1, 1], [], []>} : vector<8x8xbf16>, vector<8x1210xbf16>, vector<8x1210xf32> -> vector<8x1210xf32>
    %142 = arith.addf %136, %141 : vector<8x1210xf32>
    %c0_126 = arith.constant 0 : index
    %c0_127 = arith.constant 0 : index
    %c117 = arith.constant 117 : index
    %143 = vector.load %arg1[%c0_126, %c0_127, %c117] : memref<1x8x1444xbf16, #tpu.memory_space<vmem>>, vector<1x8x1210xbf16>
    %144 = vector.shape_cast %143 : vector<1x8x1210xbf16> to vector<8x1210xbf16>
    %c24 = arith.constant 24 : index
    %c0_128 = arith.constant 0 : index
    %c0_129 = arith.constant 0 : index
    %145 = vector.load %arg2[%c24, %c0_128, %c0_129] : memref<49x8x8xbf16, #tpu.memory_space<vmem>>, vector<1x8x8xbf16>
    %146 = vector.shape_cast %145 : vector<1x8x8xbf16> to vector<8x8xbf16>
    %cst_130 = arith.constant dense<0.000000e+00> : vector<8x1210xf32>
    %147 = tpu.matmul %146, %144, %cst_130 {dimension_numbers = #tpu.dot_dimension_numbers<[1], [0], [0], [1], [0, 0, 1, 1], [], []>} : vector<8x8xbf16>, vector<8x1210xbf16>, vector<8x1210xf32> -> vector<8x1210xf32>
    %148 = arith.addf %142, %147 : vector<8x1210xf32>
    %c0_131 = arith.constant 0 : index
    %c0_132 = arith.constant 0 : index
    %c118 = arith.constant 118 : index
    %149 = vector.load %arg1[%c0_131, %c0_132, %c118] : memref<1x8x1444xbf16, #tpu.memory_space<vmem>>, vector<1x8x1210xbf16>
    %150 = vector.shape_cast %149 : vector<1x8x1210xbf16> to vector<8x1210xbf16>
    %c25 = arith.constant 25 : index
    %c0_133 = arith.constant 0 : index
    %c0_134 = arith.constant 0 : index
    %151 = vector.load %arg2[%c25, %c0_133, %c0_134] : memref<49x8x8xbf16, #tpu.memory_space<vmem>>, vector<1x8x8xbf16>
    %152 = vector.shape_cast %151 : vector<1x8x8xbf16> to vector<8x8xbf16>
    %cst_135 = arith.constant dense<0.000000e+00> : vector<8x1210xf32>
    %153 = tpu.matmul %152, %150, %cst_135 {dimension_numbers = #tpu.dot_dimension_numbers<[1], [0], [0], [1], [0, 0, 1, 1], [], []>} : vector<8x8xbf16>, vector<8x1210xbf16>, vector<8x1210xf32> -> vector<8x1210xf32>
    %154 = arith.addf %148, %153 : vector<8x1210xf32>
    %c0_136 = arith.constant 0 : index
    %c0_137 = arith.constant 0 : index
    %c119 = arith.constant 119 : index
    %155 = vector.load %arg1[%c0_136, %c0_137, %c119] : memref<1x8x1444xbf16, #tpu.memory_space<vmem>>, vector<1x8x1210xbf16>
    %156 = vector.shape_cast %155 : vector<1x8x1210xbf16> to vector<8x1210xbf16>
    %c26 = arith.constant 26 : index
    %c0_138 = arith.constant 0 : index
    %c0_139 = arith.constant 0 : index
    %157 = vector.load %arg2[%c26, %c0_138, %c0_139] : memref<49x8x8xbf16, #tpu.memory_space<vmem>>, vector<1x8x8xbf16>
    %158 = vector.shape_cast %157 : vector<1x8x8xbf16> to vector<8x8xbf16>
    %cst_140 = arith.constant dense<0.000000e+00> : vector<8x1210xf32>
    %159 = tpu.matmul %158, %156, %cst_140 {dimension_numbers = #tpu.dot_dimension_numbers<[1], [0], [0], [1], [0, 0, 1, 1], [], []>} : vector<8x8xbf16>, vector<8x1210xbf16>, vector<8x1210xf32> -> vector<8x1210xf32>
    %160 = arith.addf %154, %159 : vector<8x1210xf32>
    %c0_141 = arith.constant 0 : index
    %c0_142 = arith.constant 0 : index
    %c120 = arith.constant 120 : index
    %161 = vector.load %arg1[%c0_141, %c0_142, %c120] : memref<1x8x1444xbf16, #tpu.memory_space<vmem>>, vector<1x8x1210xbf16>
    %162 = vector.shape_cast %161 : vector<1x8x1210xbf16> to vector<8x1210xbf16>
    %c27 = arith.constant 27 : index
    %c0_143 = arith.constant 0 : index
    %c0_144 = arith.constant 0 : index
    %163 = vector.load %arg2[%c27, %c0_143, %c0_144] : memref<49x8x8xbf16, #tpu.memory_space<vmem>>, vector<1x8x8xbf16>
    %164 = vector.shape_cast %163 : vector<1x8x8xbf16> to vector<8x8xbf16>
    %cst_145 = arith.constant dense<0.000000e+00> : vector<8x1210xf32>
    %165 = tpu.matmul %164, %162, %cst_145 {dimension_numbers = #tpu.dot_dimension_numbers<[1], [0], [0], [1], [0, 0, 1, 1], [], []>} : vector<8x8xbf16>, vector<8x1210xbf16>, vector<8x1210xf32> -> vector<8x1210xf32>
    %166 = arith.addf %160, %165 : vector<8x1210xf32>
    %c0_146 = arith.constant 0 : index
    %c0_147 = arith.constant 0 : index
    %c152 = arith.constant 152 : index
    %167 = vector.load %arg1[%c0_146, %c0_147, %c152] : memref<1x8x1444xbf16, #tpu.memory_space<vmem>>, vector<1x8x1210xbf16>
    %168 = vector.shape_cast %167 : vector<1x8x1210xbf16> to vector<8x1210xbf16>
    %c28 = arith.constant 28 : index
    %c0_148 = arith.constant 0 : index
    %c0_149 = arith.constant 0 : index
    %169 = vector.load %arg2[%c28, %c0_148, %c0_149] : memref<49x8x8xbf16, #tpu.memory_space<vmem>>, vector<1x8x8xbf16>
    %170 = vector.shape_cast %169 : vector<1x8x8xbf16> to vector<8x8xbf16>
    %cst_150 = arith.constant dense<0.000000e+00> : vector<8x1210xf32>
    %171 = tpu.matmul %170, %168, %cst_150 {dimension_numbers = #tpu.dot_dimension_numbers<[1], [0], [0], [1], [0, 0, 1, 1], [], []>} : vector<8x8xbf16>, vector<8x1210xbf16>, vector<8x1210xf32> -> vector<8x1210xf32>
    %172 = arith.addf %166, %171 : vector<8x1210xf32>
    %c0_151 = arith.constant 0 : index
    %c0_152 = arith.constant 0 : index
    %c153 = arith.constant 153 : index
    %173 = vector.load %arg1[%c0_151, %c0_152, %c153] : memref<1x8x1444xbf16, #tpu.memory_space<vmem>>, vector<1x8x1210xbf16>
    %174 = vector.shape_cast %173 : vector<1x8x1210xbf16> to vector<8x1210xbf16>
    %c29 = arith.constant 29 : index
    %c0_153 = arith.constant 0 : index
    %c0_154 = arith.constant 0 : index
    %175 = vector.load %arg2[%c29, %c0_153, %c0_154] : memref<49x8x8xbf16, #tpu.memory_space<vmem>>, vector<1x8x8xbf16>
    %176 = vector.shape_cast %175 : vector<1x8x8xbf16> to vector<8x8xbf16>
    %cst_155 = arith.constant dense<0.000000e+00> : vector<8x1210xf32>
    %177 = tpu.matmul %176, %174, %cst_155 {dimension_numbers = #tpu.dot_dimension_numbers<[1], [0], [0], [1], [0, 0, 1, 1], [], []>} : vector<8x8xbf16>, vector<8x1210xbf16>, vector<8x1210xf32> -> vector<8x1210xf32>
    %178 = arith.addf %172, %177 : vector<8x1210xf32>
    %c0_156 = arith.constant 0 : index
    %c0_157 = arith.constant 0 : index
    %c154 = arith.constant 154 : index
    %179 = vector.load %arg1[%c0_156, %c0_157, %c154] : memref<1x8x1444xbf16, #tpu.memory_space<vmem>>, vector<1x8x1210xbf16>
    %180 = vector.shape_cast %179 : vector<1x8x1210xbf16> to vector<8x1210xbf16>
    %c30 = arith.constant 30 : index
    %c0_158 = arith.constant 0 : index
    %c0_159 = arith.constant 0 : index
    %181 = vector.load %arg2[%c30, %c0_158, %c0_159] : memref<49x8x8xbf16, #tpu.memory_space<vmem>>, vector<1x8x8xbf16>
    %182 = vector.shape_cast %181 : vector<1x8x8xbf16> to vector<8x8xbf16>
    %cst_160 = arith.constant dense<0.000000e+00> : vector<8x1210xf32>
    %183 = tpu.matmul %182, %180, %cst_160 {dimension_numbers = #tpu.dot_dimension_numbers<[1], [0], [0], [1], [0, 0, 1, 1], [], []>} : vector<8x8xbf16>, vector<8x1210xbf16>, vector<8x1210xf32> -> vector<8x1210xf32>
    %184 = arith.addf %178, %183 : vector<8x1210xf32>
    %c0_161 = arith.constant 0 : index
    %c0_162 = arith.constant 0 : index
    %c155 = arith.constant 155 : index
    %185 = vector.load %arg1[%c0_161, %c0_162, %c155] : memref<1x8x1444xbf16, #tpu.memory_space<vmem>>, vector<1x8x1210xbf16>
    %186 = vector.shape_cast %185 : vector<1x8x1210xbf16> to vector<8x1210xbf16>
    %c31 = arith.constant 31 : index
    %c0_163 = arith.constant 0 : index
    %c0_164 = arith.constant 0 : index
    %187 = vector.load %arg2[%c31, %c0_163, %c0_164] : memref<49x8x8xbf16, #tpu.memory_space<vmem>>, vector<1x8x8xbf16>
    %188 = vector.shape_cast %187 : vector<1x8x8xbf16> to vector<8x8xbf16>
    %cst_165 = arith.constant dense<0.000000e+00> : vector<8x1210xf32>
    %189 = tpu.matmul %188, %186, %cst_165 {dimension_numbers = #tpu.dot_dimension_numbers<[1], [0], [0], [1], [0, 0, 1, 1], [], []>} : vector<8x8xbf16>, vector<8x1210xbf16>, vector<8x1210xf32> -> vector<8x1210xf32>
    %190 = arith.addf %184, %189 : vector<8x1210xf32>
    %c0_166 = arith.constant 0 : index
    %c0_167 = arith.constant 0 : index
    %c156 = arith.constant 156 : index
    %191 = vector.load %arg1[%c0_166, %c0_167, %c156] : memref<1x8x1444xbf16, #tpu.memory_space<vmem>>, vector<1x8x1210xbf16>
    %192 = vector.shape_cast %191 : vector<1x8x1210xbf16> to vector<8x1210xbf16>
    %c32 = arith.constant 32 : index
    %c0_168 = arith.constant 0 : index
    %c0_169 = arith.constant 0 : index
    %193 = vector.load %arg2[%c32, %c0_168, %c0_169] : memref<49x8x8xbf16, #tpu.memory_space<vmem>>, vector<1x8x8xbf16>
    %194 = vector.shape_cast %193 : vector<1x8x8xbf16> to vector<8x8xbf16>
    %cst_170 = arith.constant dense<0.000000e+00> : vector<8x1210xf32>
    %195 = tpu.matmul %194, %192, %cst_170 {dimension_numbers = #tpu.dot_dimension_numbers<[1], [0], [0], [1], [0, 0, 1, 1], [], []>} : vector<8x8xbf16>, vector<8x1210xbf16>, vector<8x1210xf32> -> vector<8x1210xf32>
    %196 = arith.addf %190, %195 : vector<8x1210xf32>
    %c0_171 = arith.constant 0 : index
    %c0_172 = arith.constant 0 : index
    %c157 = arith.constant 157 : index
    %197 = vector.load %arg1[%c0_171, %c0_172, %c157] : memref<1x8x1444xbf16, #tpu.memory_space<vmem>>, vector<1x8x1210xbf16>
    %198 = vector.shape_cast %197 : vector<1x8x1210xbf16> to vector<8x1210xbf16>
    %c33 = arith.constant 33 : index
    %c0_173 = arith.constant 0 : index
    %c0_174 = arith.constant 0 : index
    %199 = vector.load %arg2[%c33, %c0_173, %c0_174] : memref<49x8x8xbf16, #tpu.memory_space<vmem>>, vector<1x8x8xbf16>
    %200 = vector.shape_cast %199 : vector<1x8x8xbf16> to vector<8x8xbf16>
    %cst_175 = arith.constant dense<0.000000e+00> : vector<8x1210xf32>
    %201 = tpu.matmul %200, %198, %cst_175 {dimension_numbers = #tpu.dot_dimension_numbers<[1], [0], [0], [1], [0, 0, 1, 1], [], []>} : vector<8x8xbf16>, vector<8x1210xbf16>, vector<8x1210xf32> -> vector<8x1210xf32>
    %202 = arith.addf %196, %201 : vector<8x1210xf32>
    %c0_176 = arith.constant 0 : index
    %c0_177 = arith.constant 0 : index
    %c158 = arith.constant 158 : index
    %203 = vector.load %arg1[%c0_176, %c0_177, %c158] : memref<1x8x1444xbf16, #tpu.memory_space<vmem>>, vector<1x8x1210xbf16>
    %204 = vector.shape_cast %203 : vector<1x8x1210xbf16> to vector<8x1210xbf16>
    %c34 = arith.constant 34 : index
    %c0_178 = arith.constant 0 : index
    %c0_179 = arith.constant 0 : index
    %205 = vector.load %arg2[%c34, %c0_178, %c0_179] : memref<49x8x8xbf16, #tpu.memory_space<vmem>>, vector<1x8x8xbf16>
    %206 = vector.shape_cast %205 : vector<1x8x8xbf16> to vector<8x8xbf16>
    %cst_180 = arith.constant dense<0.000000e+00> : vector<8x1210xf32>
    %207 = tpu.matmul %206, %204, %cst_180 {dimension_numbers = #tpu.dot_dimension_numbers<[1], [0], [0], [1], [0, 0, 1, 1], [], []>} : vector<8x8xbf16>, vector<8x1210xbf16>, vector<8x1210xf32> -> vector<8x1210xf32>
    %208 = arith.addf %202, %207 : vector<8x1210xf32>
    %c0_181 = arith.constant 0 : index
    %c0_182 = arith.constant 0 : index
    %c190 = arith.constant 190 : index
    %209 = vector.load %arg1[%c0_181, %c0_182, %c190] : memref<1x8x1444xbf16, #tpu.memory_space<vmem>>, vector<1x8x1210xbf16>
    %210 = vector.shape_cast %209 : vector<1x8x1210xbf16> to vector<8x1210xbf16>
    %c35 = arith.constant 35 : index
    %c0_183 = arith.constant 0 : index
    %c0_184 = arith.constant 0 : index
    %211 = vector.load %arg2[%c35, %c0_183, %c0_184] : memref<49x8x8xbf16, #tpu.memory_space<vmem>>, vector<1x8x8xbf16>
    %212 = vector.shape_cast %211 : vector<1x8x8xbf16> to vector<8x8xbf16>
    %cst_185 = arith.constant dense<0.000000e+00> : vector<8x1210xf32>
    %213 = tpu.matmul %212, %210, %cst_185 {dimension_numbers = #tpu.dot_dimension_numbers<[1], [0], [0], [1], [0, 0, 1, 1], [], []>} : vector<8x8xbf16>, vector<8x1210xbf16>, vector<8x1210xf32> -> vector<8x1210xf32>
    %214 = arith.addf %208, %213 : vector<8x1210xf32>
    %c0_186 = arith.constant 0 : index
    %c0_187 = arith.constant 0 : index
    %c191 = arith.constant 191 : index
    %215 = vector.load %arg1[%c0_186, %c0_187, %c191] : memref<1x8x1444xbf16, #tpu.memory_space<vmem>>, vector<1x8x1210xbf16>
    %216 = vector.shape_cast %215 : vector<1x8x1210xbf16> to vector<8x1210xbf16>
    %c36 = arith.constant 36 : index
    %c0_188 = arith.constant 0 : index
    %c0_189 = arith.constant 0 : index
    %217 = vector.load %arg2[%c36, %c0_188, %c0_189] : memref<49x8x8xbf16, #tpu.memory_space<vmem>>, vector<1x8x8xbf16>
    %218 = vector.shape_cast %217 : vector<1x8x8xbf16> to vector<8x8xbf16>
    %cst_190 = arith.constant dense<0.000000e+00> : vector<8x1210xf32>
    %219 = tpu.matmul %218, %216, %cst_190 {dimension_numbers = #tpu.dot_dimension_numbers<[1], [0], [0], [1], [0, 0, 1, 1], [], []>} : vector<8x8xbf16>, vector<8x1210xbf16>, vector<8x1210xf32> -> vector<8x1210xf32>
    %220 = arith.addf %214, %219 : vector<8x1210xf32>
    %c0_191 = arith.constant 0 : index
    %c0_192 = arith.constant 0 : index
    %c192 = arith.constant 192 : index
    %221 = vector.load %arg1[%c0_191, %c0_192, %c192] : memref<1x8x1444xbf16, #tpu.memory_space<vmem>>, vector<1x8x1210xbf16>
    %222 = vector.shape_cast %221 : vector<1x8x1210xbf16> to vector<8x1210xbf16>
    %c37 = arith.constant 37 : index
    %c0_193 = arith.constant 0 : index
    %c0_194 = arith.constant 0 : index
    %223 = vector.load %arg2[%c37, %c0_193, %c0_194] : memref<49x8x8xbf16, #tpu.memory_space<vmem>>, vector<1x8x8xbf16>
    %224 = vector.shape_cast %223 : vector<1x8x8xbf16> to vector<8x8xbf16>
    %cst_195 = arith.constant dense<0.000000e+00> : vector<8x1210xf32>
    %225 = tpu.matmul %224, %222, %cst_195 {dimension_numbers = #tpu.dot_dimension_numbers<[1], [0], [0], [1], [0, 0, 1, 1], [], []>} : vector<8x8xbf16>, vector<8x1210xbf16>, vector<8x1210xf32> -> vector<8x1210xf32>
    %226 = arith.addf %220, %225 : vector<8x1210xf32>
    %c0_196 = arith.constant 0 : index
    %c0_197 = arith.constant 0 : index
    %c193 = arith.constant 193 : index
    %227 = vector.load %arg1[%c0_196, %c0_197, %c193] : memref<1x8x1444xbf16, #tpu.memory_space<vmem>>, vector<1x8x1210xbf16>
    %228 = vector.shape_cast %227 : vector<1x8x1210xbf16> to vector<8x1210xbf16>
    %c38_198 = arith.constant 38 : index
    %c0_199 = arith.constant 0 : index
    %c0_200 = arith.constant 0 : index
    %229 = vector.load %arg2[%c38_198, %c0_199, %c0_200] : memref<49x8x8xbf16, #tpu.memory_space<vmem>>, vector<1x8x8xbf16>
    %230 = vector.shape_cast %229 : vector<1x8x8xbf16> to vector<8x8xbf16>
    %cst_201 = arith.constant dense<0.000000e+00> : vector<8x1210xf32>
    %231 = tpu.matmul %230, %228, %cst_201 {dimension_numbers = #tpu.dot_dimension_numbers<[1], [0], [0], [1], [0, 0, 1, 1], [], []>} : vector<8x8xbf16>, vector<8x1210xbf16>, vector<8x1210xf32> -> vector<8x1210xf32>
    %232 = arith.addf %226, %231 : vector<8x1210xf32>
    %c0_202 = arith.constant 0 : index
    %c0_203 = arith.constant 0 : index
    %c194 = arith.constant 194 : index
    %233 = vector.load %arg1[%c0_202, %c0_203, %c194] : memref<1x8x1444xbf16, #tpu.memory_space<vmem>>, vector<1x8x1210xbf16>
    %234 = vector.shape_cast %233 : vector<1x8x1210xbf16> to vector<8x1210xbf16>
    %c39_204 = arith.constant 39 : index
    %c0_205 = arith.constant 0 : index
    %c0_206 = arith.constant 0 : index
    %235 = vector.load %arg2[%c39_204, %c0_205, %c0_206] : memref<49x8x8xbf16, #tpu.memory_space<vmem>>, vector<1x8x8xbf16>
    %236 = vector.shape_cast %235 : vector<1x8x8xbf16> to vector<8x8xbf16>
    %cst_207 = arith.constant dense<0.000000e+00> : vector<8x1210xf32>
    %237 = tpu.matmul %236, %234, %cst_207 {dimension_numbers = #tpu.dot_dimension_numbers<[1], [0], [0], [1], [0, 0, 1, 1], [], []>} : vector<8x8xbf16>, vector<8x1210xbf16>, vector<8x1210xf32> -> vector<8x1210xf32>
    %238 = arith.addf %232, %237 : vector<8x1210xf32>
    %c0_208 = arith.constant 0 : index
    %c0_209 = arith.constant 0 : index
    %c195 = arith.constant 195 : index
    %239 = vector.load %arg1[%c0_208, %c0_209, %c195] : memref<1x8x1444xbf16, #tpu.memory_space<vmem>>, vector<1x8x1210xbf16>
    %240 = vector.shape_cast %239 : vector<1x8x1210xbf16> to vector<8x1210xbf16>
    %c40_210 = arith.constant 40 : index
    %c0_211 = arith.constant 0 : index
    %c0_212 = arith.constant 0 : index
    %241 = vector.load %arg2[%c40_210, %c0_211, %c0_212] : memref<49x8x8xbf16, #tpu.memory_space<vmem>>, vector<1x8x8xbf16>
    %242 = vector.shape_cast %241 : vector<1x8x8xbf16> to vector<8x8xbf16>
    %cst_213 = arith.constant dense<0.000000e+00> : vector<8x1210xf32>
    %243 = tpu.matmul %242, %240, %cst_213 {dimension_numbers = #tpu.dot_dimension_numbers<[1], [0], [0], [1], [0, 0, 1, 1], [], []>} : vector<8x8xbf16>, vector<8x1210xbf16>, vector<8x1210xf32> -> vector<8x1210xf32>
    %244 = arith.addf %238, %243 : vector<8x1210xf32>
    %c0_214 = arith.constant 0 : index
    %c0_215 = arith.constant 0 : index
    %c196 = arith.constant 196 : index
    %245 = vector.load %arg1[%c0_214, %c0_215, %c196] : memref<1x8x1444xbf16, #tpu.memory_space<vmem>>, vector<1x8x1210xbf16>
    %246 = vector.shape_cast %245 : vector<1x8x1210xbf16> to vector<8x1210xbf16>
    %c41_216 = arith.constant 41 : index
    %c0_217 = arith.constant 0 : index
    %c0_218 = arith.constant 0 : index
    %247 = vector.load %arg2[%c41_216, %c0_217, %c0_218] : memref<49x8x8xbf16, #tpu.memory_space<vmem>>, vector<1x8x8xbf16>
    %248 = vector.shape_cast %247 : vector<1x8x8xbf16> to vector<8x8xbf16>
    %cst_219 = arith.constant dense<0.000000e+00> : vector<8x1210xf32>
    %249 = tpu.matmul %248, %246, %cst_219 {dimension_numbers = #tpu.dot_dimension_numbers<[1], [0], [0], [1], [0, 0, 1, 1], [], []>} : vector<8x8xbf16>, vector<8x1210xbf16>, vector<8x1210xf32> -> vector<8x1210xf32>
    %250 = arith.addf %244, %249 : vector<8x1210xf32>
    %c0_220 = arith.constant 0 : index
    %c0_221 = arith.constant 0 : index
    %c228 = arith.constant 228 : index
    %251 = vector.load %arg1[%c0_220, %c0_221, %c228] : memref<1x8x1444xbf16, #tpu.memory_space<vmem>>, vector<1x8x1210xbf16>
    %252 = vector.shape_cast %251 : vector<1x8x1210xbf16> to vector<8x1210xbf16>
    %c42_222 = arith.constant 42 : index
    %c0_223 = arith.constant 0 : index
    %c0_224 = arith.constant 0 : index
    %253 = vector.load %arg2[%c42_222, %c0_223, %c0_224] : memref<49x8x8xbf16, #tpu.memory_space<vmem>>, vector<1x8x8xbf16>
    %254 = vector.shape_cast %253 : vector<1x8x8xbf16> to vector<8x8xbf16>
    %cst_225 = arith.constant dense<0.000000e+00> : vector<8x1210xf32>
    %255 = tpu.matmul %254, %252, %cst_225 {dimension_numbers = #tpu.dot_dimension_numbers<[1], [0], [0], [1], [0, 0, 1, 1], [], []>} : vector<8x8xbf16>, vector<8x1210xbf16>, vector<8x1210xf32> -> vector<8x1210xf32>
    %256 = arith.addf %250, %255 : vector<8x1210xf32>
    %c0_226 = arith.constant 0 : index
    %c0_227 = arith.constant 0 : index
    %c229 = arith.constant 229 : index
    %257 = vector.load %arg1[%c0_226, %c0_227, %c229] : memref<1x8x1444xbf16, #tpu.memory_space<vmem>>, vector<1x8x1210xbf16>
    %258 = vector.shape_cast %257 : vector<1x8x1210xbf16> to vector<8x1210xbf16>
    %c43_228 = arith.constant 43 : index
    %c0_229 = arith.constant 0 : index
    %c0_230 = arith.constant 0 : index
    %259 = vector.load %arg2[%c43_228, %c0_229, %c0_230] : memref<49x8x8xbf16, #tpu.memory_space<vmem>>, vector<1x8x8xbf16>
    %260 = vector.shape_cast %259 : vector<1x8x8xbf16> to vector<8x8xbf16>
    %cst_231 = arith.constant dense<0.000000e+00> : vector<8x1210xf32>
    %261 = tpu.matmul %260, %258, %cst_231 {dimension_numbers = #tpu.dot_dimension_numbers<[1], [0], [0], [1], [0, 0, 1, 1], [], []>} : vector<8x8xbf16>, vector<8x1210xbf16>, vector<8x1210xf32> -> vector<8x1210xf32>
    %262 = arith.addf %256, %261 : vector<8x1210xf32>
    %c0_232 = arith.constant 0 : index
    %c0_233 = arith.constant 0 : index
    %c230 = arith.constant 230 : index
    %263 = vector.load %arg1[%c0_232, %c0_233, %c230] : memref<1x8x1444xbf16, #tpu.memory_space<vmem>>, vector<1x8x1210xbf16>
    %264 = vector.shape_cast %263 : vector<1x8x1210xbf16> to vector<8x1210xbf16>
    %c44_234 = arith.constant 44 : index
    %c0_235 = arith.constant 0 : index
    %c0_236 = arith.constant 0 : index
    %265 = vector.load %arg2[%c44_234, %c0_235, %c0_236] : memref<49x8x8xbf16, #tpu.memory_space<vmem>>, vector<1x8x8xbf16>
    %266 = vector.shape_cast %265 : vector<1x8x8xbf16> to vector<8x8xbf16>
    %cst_237 = arith.constant dense<0.000000e+00> : vector<8x1210xf32>
    %267 = tpu.matmul %266, %264, %cst_237 {dimension_numbers = #tpu.dot_dimension_numbers<[1], [0], [0], [1], [0, 0, 1, 1], [], []>} : vector<8x8xbf16>, vector<8x1210xbf16>, vector<8x1210xf32> -> vector<8x1210xf32>
    %268 = arith.addf %262, %267 : vector<8x1210xf32>
    %c0_238 = arith.constant 0 : index
    %c0_239 = arith.constant 0 : index
    %c231 = arith.constant 231 : index
    %269 = vector.load %arg1[%c0_238, %c0_239, %c231] : memref<1x8x1444xbf16, #tpu.memory_space<vmem>>, vector<1x8x1210xbf16>
    %270 = vector.shape_cast %269 : vector<1x8x1210xbf16> to vector<8x1210xbf16>
    %c45 = arith.constant 45 : index
    %c0_240 = arith.constant 0 : index
    %c0_241 = arith.constant 0 : index
    %271 = vector.load %arg2[%c45, %c0_240, %c0_241] : memref<49x8x8xbf16, #tpu.memory_space<vmem>>, vector<1x8x8xbf16>
    %272 = vector.shape_cast %271 : vector<1x8x8xbf16> to vector<8x8xbf16>
    %cst_242 = arith.constant dense<0.000000e+00> : vector<8x1210xf32>
    %273 = tpu.matmul %272, %270, %cst_242 {dimension_numbers = #tpu.dot_dimension_numbers<[1], [0], [0], [1], [0, 0, 1, 1], [], []>} : vector<8x8xbf16>, vector<8x1210xbf16>, vector<8x1210xf32> -> vector<8x1210xf32>
    %274 = arith.addf %268, %273 : vector<8x1210xf32>
    %c0_243 = arith.constant 0 : index
    %c0_244 = arith.constant 0 : index
    %c232 = arith.constant 232 : index
    %275 = vector.load %arg1[%c0_243, %c0_244, %c232] : memref<1x8x1444xbf16, #tpu.memory_space<vmem>>, vector<1x8x1210xbf16>
    %276 = vector.shape_cast %275 : vector<1x8x1210xbf16> to vector<8x1210xbf16>
    %c46 = arith.constant 46 : index
    %c0_245 = arith.constant 0 : index
    %c0_246 = arith.constant 0 : index
    %277 = vector.load %arg2[%c46, %c0_245, %c0_246] : memref<49x8x8xbf16, #tpu.memory_space<vmem>>, vector<1x8x8xbf16>
    %278 = vector.shape_cast %277 : vector<1x8x8xbf16> to vector<8x8xbf16>
    %cst_247 = arith.constant dense<0.000000e+00> : vector<8x1210xf32>
    %279 = tpu.matmul %278, %276, %cst_247 {dimension_numbers = #tpu.dot_dimension_numbers<[1], [0], [0], [1], [0, 0, 1, 1], [], []>} : vector<8x8xbf16>, vector<8x1210xbf16>, vector<8x1210xf32> -> vector<8x1210xf32>
    %280 = arith.addf %274, %279 : vector<8x1210xf32>
    %c0_248 = arith.constant 0 : index
    %c0_249 = arith.constant 0 : index
    %c233 = arith.constant 233 : index
    %281 = vector.load %arg1[%c0_248, %c0_249, %c233] : memref<1x8x1444xbf16, #tpu.memory_space<vmem>>, vector<1x8x1210xbf16>
    %282 = vector.shape_cast %281 : vector<1x8x1210xbf16> to vector<8x1210xbf16>
    %c47 = arith.constant 47 : index
    %c0_250 = arith.constant 0 : index
    %c0_251 = arith.constant 0 : index
    %283 = vector.load %arg2[%c47, %c0_250, %c0_251] : memref<49x8x8xbf16, #tpu.memory_space<vmem>>, vector<1x8x8xbf16>
    %284 = vector.shape_cast %283 : vector<1x8x8xbf16> to vector<8x8xbf16>
    %cst_252 = arith.constant dense<0.000000e+00> : vector<8x1210xf32>
    %285 = tpu.matmul %284, %282, %cst_252 {dimension_numbers = #tpu.dot_dimension_numbers<[1], [0], [0], [1], [0, 0, 1, 1], [], []>} : vector<8x8xbf16>, vector<8x1210xbf16>, vector<8x1210xf32> -> vector<8x1210xf32>
    %286 = arith.addf %280, %285 : vector<8x1210xf32>
    %c0_253 = arith.constant 0 : index
    %c0_254 = arith.constant 0 : index
    %c234 = arith.constant 234 : index
    %287 = vector.load %arg1[%c0_253, %c0_254, %c234] : memref<1x8x1444xbf16, #tpu.memory_space<vmem>>, vector<1x8x1210xbf16>
    %288 = vector.shape_cast %287 : vector<1x8x1210xbf16> to vector<8x1210xbf16>
    %c48 = arith.constant 48 : index
    %c0_255 = arith.constant 0 : index
    %c0_256 = arith.constant 0 : index
    %289 = vector.load %arg2[%c48, %c0_255, %c0_256] : memref<49x8x8xbf16, #tpu.memory_space<vmem>>, vector<1x8x8xbf16>
    %290 = vector.shape_cast %289 : vector<1x8x8xbf16> to vector<8x8xbf16>
    %cst_257 = arith.constant dense<0.000000e+00> : vector<8x1210xf32>
    %291 = tpu.matmul %290, %288, %cst_257 {dimension_numbers = #tpu.dot_dimension_numbers<[1], [0], [0], [1], [0, 0, 1, 1], [], []>} : vector<8x8xbf16>, vector<8x1210xbf16>, vector<8x1210xf32> -> vector<8x1210xf32>
    %292 = arith.addf %286, %291 : vector<8x1210xf32>
    %293 = math.tanh %292 : vector<8x1210xf32>
    %c0_258 = arith.constant 0 : index
    %c0_259 = arith.constant 0 : index
    %c0_260 = arith.constant 0 : index
    %294 = vector.load %arg3[%c0_258, %c0_259, %c0_260] : memref<1x8x1216xf32, #tpu.memory_space<vmem>>, vector<1x8x1210xf32>
    %295 = vector.shape_cast %294 : vector<1x8x1210xf32> to vector<8x1210xf32>
    %296 = vector.shape_cast %293 : vector<8x1210xf32> to vector<1x8x1210xf32>
    tpu.vector_store %arg3[%c0_258, %c0_259, %c0_260], %296 {strides = array<i32>} : memref<1x8x1216xf32, #tpu.memory_space<vmem>>, vector<1x8x1210xf32>,
    %cst_261 = arith.constant 0.000000e+00 : f32
    %297 = vector.broadcast %cst_261 : f32 to vector<8x6xf32>
    %c0_262 = arith.constant 0 : index
    %c0_263 = arith.constant 0 : index
    %c1210 = arith.constant 1210 : index
    %298 = vector.load %arg3[%c0_262, %c0_263, %c1210] : memref<1x8x1216xf32, #tpu.memory_space<vmem>>, vector<1x8x6xf32>
    %299 = vector.shape_cast %298 : vector<1x8x6xf32> to vector<8x6xf32>
    %300 = vector.shape_cast %297 : vector<8x6xf32> to vector<1x8x6xf32>
    tpu.vector_store %arg3[%c0_262, %c0_263, %c1210], %300 {strides = array<i32>} : memref<1x8x1216xf32, #tpu.memory_space<vmem>>, vector<1x8x6xf32>,
    return
  }
  func.func @transform_0(%arg0: i32) -> (i32, i32, i32) {
    %c0_i32 = arith.constant 0 : i32
    %c0_i32_0 = arith.constant 0 : i32
    %c0_i32_1 = arith.constant 0 : i32
    return %arg0, %c0_i32, %c0_i32_0 : i32, i32, i32
  }
  func.func @transform_1(%arg0: i32) -> (i32, i32, i32) {
    %c0_i32 = arith.constant 0 : i32
    %c0_i32_0 = arith.constant 0 : i32
    %c0_i32_1 = arith.constant 0 : i32
    %c0_i32_2 = arith.constant 0 : i32
    return %c0_i32, %c0_i32_0, %c0_i32_1 : i32, i32, i32
  }
  func.func @transform_2(%arg0: i32) -> (i32, i32, i32) {
    %c0_i32 = arith.constant 0 : i32
    %c0_i32_0 = arith.constant 0 : i32
    %c0_i32_1 = arith.constant 0 : i32
    return %arg0, %c0_i32, %c0_i32_0 : i32, i32, i32
  }
}

</mosaic_0001>

<bundles_post_ra>
// kernel: upsample_block.6
= control target key start
LH: loop header
LB: loop body
LE: loop exit
PB: predicated region body
PF: predicated region fallthrough
CT: control target
= control target key end

     0   :  { %s707_s15 = smov 0   ;;  %s890_s0 = inlined_call_operand.vmem [shape: f32[2,8,16,18], index: 0, kind: input, shape index: {}]   ;;  %s891_s1 = inlined_call_operand.vmem [shape: f32[4,1,1], index: 1, kind: input, shape index: {}]   ;;  %s892_s2 = inlined_call_operand.vmem [shape: f32[4,1,1], index: 2, kind: input, shape index: {}]   ;;  %s893_s3 = inlined_call_operand.vmem [shape: f32[4,1,1], index: 3, kind: input, shape index: {}]   ;;  %s894_s4 = inlined_call_operand.vmem [shape: bf16[2,4,16,16], index: 4, kind: output, shape index: {}]  }
   0x1 LB: > { %s623_s16 = sadd.s32 4294967295, %s679_s15   ;;  %p627_p0 = scmp.ge.s32.totalorder %s679_s15, 1  ;;  %s679_s15 = sphi %s707_s15, %s14_s15  }
   0x2   : > { %p162_p1 = scmp.lt.s32.totalorder %s679_s15, 3 }
   0x4   : > { %p163_p2 = pnand %p627_p0, %p162_p1 }
   0x5   : > { %p188_p3 = scmp.lt.s32.totalorder (!%p163_p2), %s623_s16, 1  ;;  %vm206_vm0 = vcmask (!%p163_p2), 130048   ;;  %vm559_vm1 = vcmask (!%p163_p2), 125952  }
   0x6   : > { %166 = sbr.rel (%p163_p2) target bundleno = 546 (0x222), region = 36 }
   0xd   : > { %s896_s16 = smov (!%p188_p3, %s623_s16), 1 }
   0xe   : > { %s642_s17 = sshll.u32 %s896_s16, 7  ;;  %s643_s21 = sshll.u32 %s896_s16, 5 }
   0xf   : > { %s192_s20 = scalar_lea.vmem %s890_s0, %s642_s17  ;;  %s865_s24 = scalar_lea.vmem %s894_s4, %s643_s21 }
  0x10   : > { %v721_v0 = vld [vmem:[%s192_s20 + $0x10] sm:$0xff]  ;;  %v723_v1 = vld [vmem:[%s192_s20] sm:$0xff]  ;;  %v725_v2 = vld [vmem:[%s192_s20 + $0x18] sm:$0xff] }
  0x11   : > { %v213_v3 = vsel %vm206_vm0, %v721_v0, 0.0  ;;  %v207_v4 = vsel %vm206_vm0, %v723_v1, 0.0  ;;  %v731_v5 = vld [vmem:[%s192_s20 + $0x8] sm:$0xff]  ;;  %v216_v6 = vsel %vm206_vm0, %v725_v2, 0.0  ;;  %v739_v9 = vld [vmem:[%s192_s20 + $0x20] sm:$0xff]  ;;  %v745_v12 = vld [vmem:[%s192_s20 + $0x38] sm:$0xff] }
  0x12   : > { %214 = vadd.xlane.f32.xlu1 %v213_v3  ;;  %208 = vadd.xlane.f32.xlu0 %v207_v4  ;;  %v210_v7 = vsel %vm206_vm0, %v731_v5, 0.0  ;;  %v737_v8 = vld [vmem:[%s192_s20 + $0x28] sm:$0xff]  ;;  %v219_v11 = vsel %vm206_vm0, %v739_v9, 0.0  ;;  %v747_v13 = vld [vmem:[%s192_s20 + $0x30] sm:$0xff]  ;;  %v228_v14 = vsel %vm206_vm0, %v745_v12, 0.0 }
  0x13   : > { %v222_v10 = vsel %vm206_vm0, %v737_v8, 0.0  ;;  %v225_v15 = vsel %vm206_vm0, %v747_v13, 0.0 }
  0x16   : > { %217 = vadd.xlane.f32.xlu1 %v216_v6  ;;  %211 = vadd.xlane.f32.xlu0 %v210_v7 }
  0x1a   : > { %223 = vadd.xlane.f32.xlu1 %v222_v10  ;;  %220 = vadd.xlane.f32.xlu0 %v219_v11 }
  0x1e   : > { %229 = vadd.xlane.f32.xlu1 %v228_v14  ;;  %226 = vadd.xlane.f32.xlu0 %v225_v15 }
  0x9f   : > { %v215_v16 = vpop.xlane.xlu1 %214  ;;  %v209_v17 = vpop.xlane.xlu0 %208 }
  0xa0   : > { %v234_v18 = vmul.f32 0.0625, %v215_v16  ;;  %v232_v21 = vmul.f32 0.0625, %v209_v17 }
  0xa3   : > { %v218_v19 = vpop.xlane.xlu1 %217  ;;  %v212_v20 = vpop.xlane.xlu0 %211 }
  0xa4   : > { %v235_v22 = vmul.f32 0.0625, %v218_v19  ;;  %v233_v23 = vmul.f32 0.0625, %v212_v20 }
  0xa6   : > { %v247_v24 = vadd.f32 %v235_v22, %v234_v18  ;;  %v240_v25 = vadd.f32 %v233_v23, %v232_v21 }
  0xa7   : > { %v224_v26 = vpop.xlane.xlu1 %223  ;;  %v221_v27 = vpop.xlane.xlu0 %220 }
  0xa8   : > { %v248_v28 = vrot.slane %v247_v24, 4  ;;  %v241_v29 = vrot.slane %v240_v25, 4  ;;  %v237_v30 = vmul.f32 0.0625, %v224_v26  ;;  %v236_v31 = vmul.f32 0.0625, %v221_v27 }
  0xaa   : > { %v249_v32 = vadd.f32 %v248_v28, %v247_v24  ;;  %v242_v33 = vadd.f32 %v241_v29, %v240_v25  ;;  %v254_v34 = vadd.f32 %v237_v30, %v236_v31 }
  0xab   : > { %v230_v35 = vpop.xlane.xlu1 %229  ;;  %v227_v36 = vpop.xlane.xlu0 %226 }
  0xac   : > { %v250_v37 = vrot.slane %v249_v32, 2  ;;  %v243_v38 = vrot.slane %v242_v33, 2  ;;  %v255_v39 = vrot.slane %v254_v34, 4  ;;  %v239_v40 = vmul.f32 0.0625, %v230_v35 }
  0xad   : > { %v238_v41 = vmul.f32 0.0625, %v227_v36 }
  0xae   : > { %v251_v42 = vadd.f32 %v250_v37, %v249_v32  ;;  %v244_v43 = vadd.f32 %v243_v38, %v242_v33  ;;  %v256_v44 = vadd.f32 %v255_v39, %v254_v34  ;;  %v681_v32 = vmov 0  }
  0xaf   : > { %v261_v45 = vadd.f32 %v239_v40, %v238_v41  ;;  %662 = vset.pattern.permute.xlu1 %v681_v32  ;;  %661 = vset.pattern.permute.xlu0 %v681_v32 }
  0xb0   : > { %v252_v46 = vrot.slane %v251_v42, 1  ;;  %v245_v47 = vrot.slane %v244_v43, 1  ;;  %v257_v48 = vrot.slane %v256_v44, 2 }
  0xb1   : > { %v262_v49 = vrot.slane %v261_v45, 4 }
  0xb2   : > { %v253_v50 = vadd.f32 %v252_v46, %v251_v42  ;;  %v246_v51 = vadd.f32 %v245_v47, %v244_v43  ;;  %v258_v52 = vadd.f32 %v257_v48, %v256_v44 }
  0xb3   : > { %v263_v53 = vadd.f32 %v262_v49, %v261_v45 }
  0xb4   : > { %v269_v54 = vmul.f32 0.0625, %v253_v50  ;;  %v268_v55 = vmul.f32 0.0625, %v246_v51  ;;  %v259_v56 = vrot.slane %v258_v52, 1 }
  0xb5   : > { %v264_v57 = vrot.slane %v263_v53, 2 }
  0xb6   : > { %v360_v58 = vadd.f32 %v269_v54, %v268_v55  ;;  %v260_v59 = vadd.f32 %v259_v56, %v258_v52  ;;  %v754_v60 = vsub.f32 %v731_v5, %v268_v55  ;;  %v757_v61 = vsub.f32 %v723_v1, %v268_v55 }
  0xb7   : > { %v265_v62 = vadd.f32 %v264_v57, %v263_v53  ;;  %v760_v63 = vsub.f32 %v725_v2, %v269_v54  ;;  %v763_v3 = vsub.f32 %v721_v0, %v269_v54 }
  0xb8   : > { %v270_v4 = vmul.f32 0.0625, %v260_v59  ;;  %v281_v6 = vmul.f32 %v754_v60, %v754_v60  ;;  %v280_v7 = vmul.f32 %v757_v61, %v757_v61 }
  0xb9   : > { %v266_v10 = vrot.slane %v265_v62, 1  ;;  %v283_v5 = vmul.f32 %v760_v63, %v760_v63  ;;  %v282_v1 = vmul.f32 %v763_v3, %v763_v3 }
  0xba   : > { %v361_v11 = vadd.f32 %v360_v58, %v270_v4  ;;  %v291_v2 = vsel %vm206_vm0, %v281_v6, 0.0  ;;  %v288_v0 = vsel %vm206_vm0, %v280_v7, 0.0  ;;  %v776_v14 = vsub.f32 %v737_v8, %v270_v4 }
  0xbb   : > { %v267_v15 = vadd.f32 %v266_v10, %v265_v62  ;;  %292 = vadd.xlane.f32.xlu1 %v291_v2  ;;  %289 = vadd.xlane.f32.xlu0 %v288_v0  ;;  %v779_v16 = vsub.f32 %v739_v9, %v270_v4  ;;  %v297_v18 = vsel %vm206_vm0, %v283_v5, 0.0  ;;  %v294_v19 = vsel %vm206_vm0, %v282_v1, 0.0 }
  0xbc   : > { %v285_v20 = vmul.f32 %v776_v14, %v776_v14 }
  0xbd   : > { %v271_v17 = vmul.f32 0.0625, %v267_v15  ;;  %v284_v21 = vmul.f32 %v779_v16, %v779_v16 }
  0xbe   : > { %v303_v24 = vsel %vm206_vm0, %v285_v20, 0.0 }
  0xbf   : > { %v362_v22 = vadd.f32 %v361_v11, %v271_v17  ;;  %298 = vadd.xlane.f32.xlu1 %v297_v18  ;;  %295 = vadd.xlane.f32.xlu0 %v294_v19  ;;  %v788_v8 = vsub.f32 %v745_v12, %v271_v17  ;;  %v791_v9 = vsub.f32 %v747_v13, %v271_v17  ;;  %v300_v25 = vsel %vm206_vm0, %v284_v21, 0.0 }
  0xc1   : > { %v364_v23 = vmul.f32 0.25, %v362_v22  ;;  %v287_v26 = vmul.f32 %v788_v8, %v788_v8  ;;  %v286_v27 = vmul.f32 %v791_v9, %v791_v9 }
  0xc3   : > { %304 = vadd.xlane.f32.xlu1 %v303_v24  ;;  %301 = vadd.xlane.f32.xlu0 %v300_v25  ;;  %v799_v28 = vsub.f32 %v268_v55, %v364_v23  ;;  %v801_v12 = vsub.f32 %v269_v54, %v364_v23  ;;  %v803_v29 = vsub.f32 %v270_v4, %v364_v23  ;;  %v309_v30 = vsel %vm206_vm0, %v287_v26, 0.0 }
  0xc4   : > { %v805_v13 = vsub.f32 %v271_v17, %v364_v23  ;;  %v306_v31 = vsel %vm206_vm0, %v286_v27, 0.0 }
  0xc5   : > { %v369_v18 = vmul.f32 %v799_v28, %v799_v28  ;;  %v370_v19 = vmul.f32 %v801_v12, %v801_v12 }
  0xc7   : > { %310 = vadd.xlane.f32.xlu1 %v309_v30  ;;  %307 = vadd.xlane.f32.xlu0 %v306_v31  ;;  %v371_v30 = vmul.f32 %v803_v29, %v803_v29 }
 0x148   : > { %v293_v33 = vpop.xlane.xlu1 %292  ;;  %v290_v34 = vpop.xlane.xlu0 %289 }
 0x149   : > { %v313_v35 = vmul.f32 0.0625, %v293_v33  ;;  %v312_v36 = vmul.f32 0.0625, %v290_v34 }
 0x14b   : > { %v320_v37 = vadd.f32 %v313_v35, %v312_v36  ;;  %v372_v36 = vmul.f32 %v805_v13, %v805_v13 }
 0x14c   : > { %v299_v38 = vpop.xlane.xlu1 %298  ;;  %v296_v39 = vpop.xlane.xlu0 %295 }
 0x14d   : > { %v321_v40 = vrot.slane %v320_v37, 4  ;;  %v315_v41 = vmul.f32 0.0625, %v299_v38  ;;  %v314_v42 = vmul.f32 0.0625, %v296_v39 }
 0x14f   : > { %v322_v43 = vadd.f32 %v321_v40, %v320_v37  ;;  %v327_v44 = vadd.f32 %v315_v41, %v314_v42 }
 0x150   : > { %v305_v45 = vpop.xlane.xlu1 %304  ;;  %v302_v46 = vpop.xlane.xlu0 %301 }
 0x151   : > { %v323_v47 = vrot.slane %v322_v43, 2  ;;  %v328_v48 = vrot.slane %v327_v44, 4  ;;  %v317_v49 = vmul.f32 0.0625, %v305_v45  ;;  %v316_v50 = vmul.f32 0.0625, %v302_v46  ;;  %v384_v46 = vld [vmem:[%s891_s1 + $0x1] sm:$0x1] }
 0x153   : > { %v324_v51 = vadd.f32 %v323_v47, %v322_v43  ;;  %v329_v52 = vadd.f32 %v328_v48, %v327_v44  ;;  %v334_v53 = vadd.f32 %v317_v49, %v316_v50  ;;  %v435_v47 = vlaneseq  ;;  %v383_v48 = vld [vmem:[%s891_s1] sm:$0x1]  ;;  %v385_v49 = vld [vmem:[%s891_s1 + $0x2] sm:$0x1]  ;;  %v386_v50 = vld [vmem:[%s891_s1 + $0x3] sm:$0x1] }
 0x154   : > { %v311_v54 = vpop.xlane.xlu1 %310  ;;  %v308_v55 = vpop.xlane.xlu0 %307 }
 0x155   : > { %v325_v56 = vrot.slane %v324_v51, 1  ;;  %v330_v57 = vrot.slane %v329_v52, 2  ;;  %v335_v58 = vrot.slane %v334_v53, 4  ;;  %v319_v59 = vmul.f32 0.0625, %v311_v54 }
 0x156   : > { %v318_v62 = vmul.f32 0.0625, %v308_v55  ;;  %v436_v55 = vshrl.u32 %v435_v47, 7 }
 0x157   : > { %v326_v4 = vadd.f32 %v325_v56, %v324_v51  ;;  %v331_v6 = vadd.f32 %v330_v57, %v329_v52  ;;  %v336_v7 = vadd.f32 %v335_v58, %v334_v53  ;;  %v400_v51 = vsub.f32 1.0, %v384_v46 }
 0x158   : > { %v341_v10 = vadd.f32 %v319_v59, %v318_v62  ;;  %v399_v52 = vsub.f32 1.0, %v383_v48  ;;  %v401_v53 = vsub.f32 1.0, %v385_v49  ;;  %v402_v56 = vsub.f32 1.0, %v386_v50 }
 0x159   : > { %v332_v5 = vrot.slane %v331_v6, 1  ;;  %v337_v1 = vrot.slane %v336_v7, 2  ;;  %v348_v2 = vmul.f32 0.0625, %v326_v4  ;;  %v416_v62 = vmul.f32 %v400_v51, %v801_v12 }
 0x15a   : > { %v342_v11 = vrot.slane %v341_v10, 4  ;;  %v415_v59 = vmul.f32 %v399_v52, %v799_v28  ;;  %v417_v4 = vmul.f32 %v401_v53, %v803_v29  ;;  %v388_v29 = vld [vmem:[%s892_s2 + $0x1] sm:$0x1] }
 0x15b   : > { %v333_v0 = vadd.f32 %v332_v5, %v331_v6  ;;  %v338_v15 = vadd.f32 %v337_v1, %v336_v7  ;;  %v373_v23 = vadd.f32 %v369_v18, %v348_v2  ;;  %v352_v38 = vadd.f32 1e-08, %v348_v2 }
 0x15c   : > { %v343_v17 = vadd.f32 %v342_v11, %v341_v10  ;;  %v437_v10 = vsub.s32 0, %v436_v55  ;;  %v418_v1 = vmul.f32 %v402_v56, %v805_v13  ;;  %v387_v13 = vld [vmem:[%s892_s2] sm:$0x1] }
 0x15d   : > { %v349_v20 = vmul.f32 0.0625, %v333_v0  ;;  %v339_v21 = vrot.slane %v338_v15, 1  ;;  %663 = vrsqrt.f32 %v352_v38  ;;  %v391_v38 = vld [vmem:[%s893_s3] sm:$0x1] }
 0x15e   : > { %v344_v22 = vrot.slane %v343_v17, 2 }
 0x15f   : > { %v374_v24 = vadd.f32 %v370_v19, %v349_v20  ;;  %v340_v25 = vadd.f32 %v339_v21, %v338_v15  ;;  %v353_v40 = vadd.f32 1e-08, %v349_v20 }
 0x160   : > { %v345_v26 = vadd.f32 %v344_v22, %v343_v17 }
 0x161   : > { %v377_v27 = vadd.f32 %v374_v24, %v373_v23  ;;  %v350_v31 = vmul.f32 0.0625, %v340_v25  ;;  %665 = vrsqrt.f32 %v353_v40 }
 0x162   : > { %v346_v32 = vrot.slane %v345_v26, 1 }
 0x163   : > { %v375_v33 = vadd.f32 %v371_v30, %v350_v31  ;;  %v354_v41 = vadd.f32 1e-08, %v350_v31 }
 0x164   : > { %v347_v34 = vadd.f32 %v346_v32, %v345_v26 }
 0x165   : > { %v378_v35 = vadd.f32 %v377_v27, %v375_v33  ;;  %667 = vrsqrt.f32 %v354_v41  ;;  %v389_v27 = vld [vmem:[%s892_s2 + $0x2] sm:$0x1] }
 0x166   : > { %v351_v37 = vmul.f32 0.0625, %v347_v34  ;;  %v390_v34 = vld [vmem:[%s892_s2 + $0x3] sm:$0x1] }
 0x167   : > { %v664_v54 = vpop.eup %663 }
 0x168   : > { %v376_v39 = vadd.f32 %v372_v36, %v351_v37  ;;  %v355_v44 = vadd.f32 1e-08, %v351_v37  ;;  %v395_v5 = vmul.f32 %v664_v54, %v383_v48 }
 0x16a   : > { %v379_v42 = vadd.f32 %v378_v35, %v376_v39 }
 0x16b   : > { %v666_v57 = vpop.eup %665 }
 0x16c   : > { %v380_v43 = vmul.f32 0.25, %v379_v42  ;;  %v396_v7 = vmul.f32 %v666_v57, %v384_v46  ;;  %v392_v42 = vld [vmem:[%s893_s3 + $0x1] sm:$0x1]  ;;  %v393_v46 = vld [vmem:[%s893_s3 + $0x2] sm:$0x1] }
 0x16e   : > { %v381_v45 = vadd.f32 1e-08, %v380_v43 }
 0x16f   : > { %v668_v58 = vpop.eup %667 }
 0x170   : > { %669 = vrsqrt.f32 %v381_v45  ;;  %v397_v0 = vmul.f32 %v668_v58, %v385_v49 }
 0x171   : > { %671 = vrsqrt.f32 %v355_v44 }
 0x17a   : > { %v670_v6 = vpop.eup %669 }
 0x17b   : > { %v404_v11 = vmul.f32 %v670_v6, %v400_v51  ;;  %v403_v2 = vmul.f32 %v670_v6, %v399_v52  ;;  %v405_v15 = vmul.f32 %v670_v6, %v401_v53  ;;  %v672_v17 = vpop.eup %671  ;;  %v419_v18 = vmul.f32 %v670_v6, %v415_v59 }
 0x17c   : > { %v420_v19 = vmul.f32 %v670_v6, %v416_v62  ;;  %v421_v20 = vmul.f32 %v670_v6, %v417_v4  ;;  %v422_v21 = vmul.f32 %v670_v6, %v418_v1  ;;  %v406_v23 = vmul.f32 %v670_v6, %v402_v56 }
 0x17d   : > { %v408_v28 = vadd.f32 %v404_v11, %v396_v7  ;;  %v407_v22 = vadd.f32 %v403_v2, %v395_v5  ;;  %v409_v12 = vadd.f32 %v405_v15, %v397_v0  ;;  %v398_v26 = vmul.f32 %v672_v17, %v386_v50  ;;  %v394_v50 = vld [vmem:[%s893_s3 + $0x3] sm:$0x1] }
 0x17e   : > { %v423_v37 = vmul.f32 %v419_v18, %v387_v13  ;;  %v424_v41 = vmul.f32 %v420_v19, %v388_v29  ;;  %v425_v45 = vmul.f32 %v421_v20, %v389_v27  ;;  %v426_v49 = vmul.f32 %v422_v21, %v390_v34 }
 0x17f   : > { %v412_v24 = vmul.f32 %v408_v28, %v388_v29  ;;  %v411_v25 = vmul.f32 %v407_v22, %v387_v13  ;;  %v413_v32 = vmul.f32 %v409_v12, %v389_v27  ;;  %v410_v33 = vadd.f32 %v406_v23, %v398_v26 }
 0x180   : > { %v427_v40 = vadd.f32 %v423_v37, %v391_v38  ;;  %v428_v44 = vadd.f32 %v424_v41, %v392_v42  ;;  %v429_v48 = vadd.f32 %v425_v45, %v393_v46  ;;  %v430_v52 = vadd.f32 %v426_v49, %v394_v50 }
 0x181   : > { %v442_v30 = vrot.slane %v412_v24, %v437_v10  ;;  %v438_v31 = vrot.slane %v411_v25, %v437_v10  ;;  %v446_v35 = vrot.slane %v413_v32, %v437_v10  ;;  %v414_v36 = vmul.f32 %v410_v33, %v390_v34 }
 0x182   : > { %v482_v43 = vrot.slane %v427_v40, %v437_v10  ;;  %v486_v47 = vrot.slane %v428_v44, %v437_v10  ;;  %v490_v51 = vrot.slane %v429_v48, %v437_v10  ;;  %v494_v53 = vrot.slane %v430_v52, %v437_v10 }
 0x183   : > { %456 = vperm.xlu1 %662, %v442_v30   ;;  %452 = vperm.xlu0 %661, %v438_v31   ;;  %v450_v39 = vrot.slane %v414_v36, %v437_v10 }
 0x187   : > { %460 = vperm.xlu1 %662, %v446_v35  }
 0x18b   : > { %464 = vperm.xlu1 %662, %v450_v39  }
 0x18f   : > { %496 = vperm.xlu1 %662, %v482_v43  }
 0x193   : > { %500 = vperm.xlu1 %662, %v486_v47  }
 0x197   : > { %504 = vperm.xlu1 %662, %v490_v51  }
 0x19b   : > { %508 = vperm.xlu1 %662, %v494_v53  }
 0x202   : > { %v457_v54 = vpop.permute.xlu1 %456  ;;  %v453_v56 = vpop.permute.xlu0 %452 }
 0x203   : > { %v467_v58 = vmul.f32 %v453_v56, %v757_v61  ;;  %v468_v59 = vmul.f32 %v453_v56, %v754_v60  ;;  %v469_v7 = vmul.f32 %v457_v54, %v763_v3  ;;  %v470_v5 = vmul.f32 %v457_v54, %v760_v63 }
 0x206   : > { %v461_v55 = vpop.permute.xlu1 %460 }
 0x207   : > { %v471_v3 = vmul.f32 %v461_v55, %v779_v16  ;;  %v472_v63 = vmul.f32 %v461_v55, %v776_v14 }
 0x20a   : > { %v465_v57 = vpop.permute.xlu1 %464 }
 0x20b   : > { %v473_v22 = vmul.f32 %v465_v57, %v791_v9  ;;  %v474_v12 = vmul.f32 %v465_v57, %v788_v8 }
 0x20e   : > { %v497_v62 = vpop.permute.xlu1 %496 }
 0x20f   : > { %v511_v4 = vadd.f32 %v497_v62, %v467_v58  ;;  %v512_v6 = vadd.f32 %v497_v62, %v468_v59 }
 0x211   : > { %v519_v1 = vmax.f32 %v511_v4, 0.0  ;;  %v520_v11 = vmax.f32 %v512_v6, 0.0 }
 0x212   : > { %v501_v61 = vpop.permute.xlu1 %500 }
 0x213   : > { %v644_v60 = vpack.c.bf16 %v519_v1, %v519_v1  ;;  %v645_v10 = vpack.c.bf16 %v520_v11, %v520_v11  ;;  %v513_v2 = vadd.f32 %v501_v61, %v469_v7  ;;  %v514_v0 = vadd.f32 %v501_v61, %v470_v5 }
 0x215   : > { %560 = vst.msk [vmem:[%s865_s24] sm:$0xf] %vm559_vm1, %v644_v60  ;;  %561 = vst.msk [vmem:[%s865_s24 + $0x4] sm:$0xf] %vm559_vm1, %v645_v10  ;;  %v521_v15 = vmax.f32 %v513_v2, 0.0  ;;  %v522_v17 = vmax.f32 %v514_v0, 0.0 }
 0x216   : > { %v505_v18 = vpop.permute.xlu1 %504 }
 0x217   : > { %v646_v19 = vpack.c.bf16 %v521_v15, %v521_v15  ;;  %v647_v20 = vpack.c.bf16 %v522_v17, %v522_v17  ;;  %v515_v21 = vadd.f32 %v505_v18, %v471_v3  ;;  %v516_v28 = vadd.f32 %v505_v18, %v472_v63 }
 0x219   : > { %562 = vst.msk [vmem:[%s865_s24 + $0x8] sm:$0xf] %vm559_vm1, %v646_v19  ;;  %563 = vst.msk [vmem:[%s865_s24 + $0xc] sm:$0xf] %vm559_vm1, %v647_v20  ;;  %v523_v14 = vmax.f32 %v515_v21, 0.0  ;;  %v524_v16 = vmax.f32 %v516_v28, 0.0 }
 0x21a   : > { %v509_v23 = vpop.permute.xlu1 %508 }
 0x21b   : > { %v648_v29 = vpack.c.bf16 %v523_v14, %v523_v14  ;;  %v649_v13 = vpack.c.bf16 %v524_v16, %v524_v16  ;;  %v517_v24 = vadd.f32 %v509_v23, %v473_v22  ;;  %v518_v25 = vadd.f32 %v509_v23, %v474_v12 }
 0x21d   : > { %564 = vst.msk [vmem:[%s865_s24 + $0x10] sm:$0xf] %vm559_vm1, %v648_v29  ;;  %565 = vst.msk [vmem:[%s865_s24 + $0x14] sm:$0xf] %vm559_vm1, %v649_v13  ;;  %v525_v9 = vmax.f32 %v517_v24, 0.0  ;;  %v526_v26 = vmax.f32 %v518_v25, 0.0 }
 0x21f   : > { %v650_v8 = vpack.c.bf16 %v525_v9, %v525_v9  ;;  %v651_v27 = vpack.c.bf16 %v526_v26, %v526_v26 }
 0x221   : > { %566 = vst.msk [vmem:[%s865_s24 + $0x18] sm:$0xf] %vm559_vm1, %v650_v8  ;;  %567 = vst.msk [vmem:[%s865_s24 + $0x1c] sm:$0xf] %vm559_vm1, %v651_v27 }
 0x222 PF: > { %s14_s15 = sadd.s32 1, %s679_s15  }
 0x223   : > { %p11_p4 = scmp.ge.s32.totalorder %s14_s15, 4  }
 0x225   :  { %13 = sbr.rel (!%p11_p4) target bundleno = 1 (0x1), region = 66 }

// kernel: upsample_block.5
= control target key start
LH: loop header
LB: loop body
LE: loop exit
PB: predicated region body
PF: predicated region fallthrough
CT: control target
= control target key end

     0   :  { %s1406_s9 = smov 0   ;;  %s1538_s0 = inlined_call_operand.vmem [shape: bf16[2,8,324], index: 0, kind: input, shape index: {}]   ;;  %s1539_s1 = inlined_call_operand.vmem [shape: bf16[9,8,8], index: 1, kind: input, shape index: {}]   ;;  %s1540_s2 = inlined_call_operand.vmem [shape: f32[2,8,288], index: 2, kind: output, shape index: {}]  }
   0x1 LB: > { %s1165_s10 = sadd.s32 4294967295, %s1378_s9   ;;  %p1169_p0 = scmp.ge.s32.totalorder %s1378_s9, 1  ;;  %s1378_s9 = sphi %s1406_s9, %s12_s9  }
   0x2   : > { %p112_p1 = scmp.lt.s32.totalorder %s1378_s9, 3 }
   0x4   : > { %p113_p2 = pnand %p1169_p0, %p112_p1 }
   0x5   : > { %p134_p3 = scmp.lt.s32.totalorder (!%p113_p2), %s1165_s10, 1  ;;  %v1380_v0 = vmov (!%p113_p2), 0.0   ;;  %vm1381_vm0 = vmmov (!%p113_p2), 0   ;;  %v1382_v1 = vmov (!%p113_p2), 0   ;;  %s1383_s15 = smov (!%p113_p2), 127   ;;  %vm171_vm1 = vcmask (!%p113_p2), 1043456  }
   0x6   : > { %116 = sbr.rel (%p113_p2) target bundleno = 455 (0x1c7), region = 28  ;;  %1230 = vmatprep.subr.bf16.mxu1 (!%p113_p2), %v1380_v0  ;;  %1232 = vmatprep.mubr.msk.bf16.mxu1 (!%p113_p2), %vm1381_vm0, %v1380_v0  ;;  %s1384_s16 = smov (!%p113_p2), 126   ;;  %v1172_v9 = vld [vmem:[%s1539_s1 + $0x4] sm:$0xf] (!%p113_p2)  ;;  %vm167_vm2 = vcmask (!%p113_p2), 64512   ;;  %vm164_vm3 = vcmask (!%p113_p2), 1039360  }
   0x7   : > { %213 = vmatprep.mubr.bf16.mxu0 (!%p113_p2), %v1382_v1  ;;  %s1385_s17 = smov (!%p113_p2), 110   ;;  %s1386_s18 = smov (!%p113_p2), 109   ;;  %vm363_vm4 = vcmask (!%p113_p2), 1031168   ;;  %v147_v21 = vld [vmem:[%s1539_s1] sm:$0xf] (!%p113_p2)  ;;  %vm470_vm5 = vcmask (!%p113_p2), 900096  }
   0x8   : > { %s1387_s19 = smov (!%p113_p2), 108   ;;  %s1388_s20 = smov (!%p113_p2), 92   ;;  %v1182_v29 = vld [vmem:[%s1539_s1 + $0x8] sm:$0xf] (!%p113_p2)  ;;  %vm577_vm6 = vcmask (!%p113_p2), 891904   ;;  %vm684_vm7 = vcmask (!%p113_p2), 883712  }
   0x9   : > { %s1389_s21 = smov (!%p113_p2), 91   ;;  %s1390_s22 = smov (!%p113_p2), 90   ;;  %v1186_v37 = vld [vmem:[%s1539_s1 + $0xc] sm:$0xf] (!%p113_p2)  ;;  %v1190_v45 = vld [vmem:[%s1539_s1 + $0x10] sm:$0xf] (!%p113_p2) }
   0xa   : > { %vm791_vm8 = vcmask (!%p113_p2), 752640   ;;  %v1194_v53 = vld [vmem:[%s1539_s1 + $0x14] sm:$0xf] (!%p113_p2)  ;;  %vm898_vm9 = vcmask (!%p113_p2), 744448   ;;  %v1198_v61 = vld [vmem:[%s1539_s1 + $0x18] sm:$0xf] (!%p113_p2) }
   0xb   : > { %vm1005_vm10 = vcmask (!%p113_p2), 736256   ;;  %vm1106_vm11 = vcmask (!%p113_p2), 244736   ;;  %vm1108_vm12 = vcmask (!%p113_p2), 261360  }
   0xd   : > { %s1542_s10 = smov (!%p134_p3, %s1165_s10), 1 }
   0xe   : > { %s1348_s11 = smul.u32 12, %s1542_s10 }
  0x10   : > { %s138_s14 = scalar_lea.vmem %s1538_s0, %s1348_s11 }
  0x11   : > { %v1369_v2 = vld [vmem:[%s138_s14 + $0x8] ss:$0 sps:$4 sm:$0xff]   ;;  %v145_v3 = vld [vmem:[%s138_s14] sm:$0xff] }
  0x12   : > { %v1173_v4 = vcombine.low %v145_v3, %v145_v3  ;;  %162 = vrot.lane.b32.xlu1 %v1369_v2, %s1383_s15  ;;  %v1174_v5 = vcombine.high %v145_v3, %v145_v3  ;;  %v272_v10 = vsel %vm171_vm1, %v1369_v2, 0 }
  0x14   : > { %158 = vrot.lane.b32.xlu0 %v1173_v4, %s1383_s15  ;;  %v266_v17 = vsel %vm171_vm1, %v1173_v4, 0 }
  0x16   : > { %357 = vrot.lane.b32.xlu1 %v1173_v4, %s1384_s16 }
  0x18   : > { %160 = vrot.lane.b32.xlu0 %v1174_v5, %s1383_s15  ;;  %s1349_s15 = smul.u32 24, %s1542_s10 }
  0x1a   : > { %361 = vrot.lane.b32.xlu1 %v1369_v2, %s1384_s16 }
  0x1c   : > { %359 = vrot.lane.b32.xlu0 %v1174_v5, %s1384_s16 }
  0x1e   : > { %466 = vrot.lane.b32.xlu1 %v1174_v5, %s1385_s17 }
  0x20   : > { %464 = vrot.lane.b32.xlu0 %v1173_v4, %s1385_s17 }
  0x22   : > { %571 = vrot.lane.b32.xlu1 %v1173_v4, %s1386_s18 }
  0x24   : > { %468 = vrot.lane.b32.xlu0 %v1369_v2, %s1385_s17 }
  0x26   : > { %575 = vrot.lane.b32.xlu1 %v1369_v2, %s1386_s18 }
  0x28   : > { %573 = vrot.lane.b32.xlu0 %v1174_v5, %s1386_s18  ;;  %s143_s18 = scalar_lea.vmem %s1540_s2, %s1349_s15 }
  0x2a   : > { %680 = vrot.lane.b32.xlu1 %v1174_v5, %s1387_s19 }
  0x2c   : > { %678 = vrot.lane.b32.xlu0 %v1173_v4, %s1387_s19 }
  0x2e   : > { %785 = vrot.lane.b32.xlu1 %v1173_v4, %s1388_s20 }
  0x30   : > { %682 = vrot.lane.b32.xlu0 %v1369_v2, %s1387_s19 }
  0x32   : > { %789 = vrot.lane.b32.xlu1 %v1369_v2, %s1388_s20 }
  0x34   : > { %787 = vrot.lane.b32.xlu0 %v1174_v5, %s1388_s20 }
  0x36   : > { %894 = vrot.lane.b32.xlu1 %v1174_v5, %s1389_s21 }
  0x38   : > { %892 = vrot.lane.b32.xlu0 %v1173_v4, %s1389_s21 }
  0x3a   : > { %999 = vrot.lane.b32.xlu1 %v1173_v4, %s1390_s22 }
  0x3c   : > { %896 = vrot.lane.b32.xlu0 %v1369_v2, %s1389_s21 }
  0x3e   : > { %1003 = vrot.lane.b32.xlu1 %v1369_v2, %s1390_s22 }
  0x40   : > { %1001 = vrot.lane.b32.xlu0 %v1174_v5, %s1390_s22 }
  0x84   : > { %v163_v6 = vpop.permute.xlu1 %162 }
  0x85   : > { %v179_v8 = vsel %vm171_vm1, %v163_v6, 0 }
  0x86   : > { %v159_v7 = vpop.permute.xlu0 %158  ;;  %1231 = vmatpush3.bf16.msra.mxu1 %v179_v8 }
  0x87   : > { %1236 = vmatprep.subr.bf16.mxu1 %v1380_v0 }
  0x88   : > { %v358_v11 = vpop.permute.xlu1 %357 }
  0x89   : > { %1233 = vmatmul.mubr.msk.bf16.vlgmr.msra.gmra.mrb[0].mxu1 %vm167_vm2, %v1172_v9 }
  0x8a   : > { %v161_v12 = vpop.permute.xlu0 %160  ;;  %1237 = vmatpush3.bf16.msra.mxu1 %v272_v10  ;;  %1238 = vmatprep.mubr.msk.bf16.mxu1 %vm1381_vm0, %v1380_v0  ;;  %v1206_v10 = vld [vmem:[%s1539_s1 + $0x20] sm:$0xf] }
  0x8b   : > { %v166_v13 = vsel %vm164_vm3, %v161_v12, %v163_v6  ;;  %v165_v14 = vsel %vm164_vm3, %v159_v7, %v161_v12  ;;  %1242 = vmatprep.subr.bf16.mxu1 %v1380_v0  ;;  %v1202_v6 = vld [vmem:[%s1539_s1 + $0x1c] sm:$0xf] }
  0x8c   : > { %1176 = vmatprep.subr.msk.bf16.mxu0 %vm171_vm1, %v166_v13  ;;  %v173_v15 = vsel %vm171_vm1, %v165_v14, 0  ;;  %v362_v16 = vpop.permute.xlu1 %361 }
  0x8d   : > { %182 = vmatpush1.bf16.msra.mxu0 %v173_v15  ;;  %v376_v22 = vsel %vm171_vm1, %v362_v16, 0 }
  0x8e   : > { %1179 = vmatprep.subr.msk.bf16.mxu0 %vm171_vm1, %v1174_v5  ;;  %v360_v18 = vpop.permute.xlu0 %359 }
  0x8f   : > { %v365_v19 = vsel %vm363_vm4, %v360_v18, %v362_v16  ;;  %v364_v23 = vsel %vm363_vm4, %v358_v11, %v360_v18 }
  0x90   : > { %1177 = vmatmul.mubr.msk.bf16.vlgmr.msra.gmra.mrb[0].mxu0 %vm167_vm2, %v1172_v9  ;;  %v467_v24 = vpop.permute.xlu1 %466  ;;  %v370_v26 = vsel %vm171_vm1, %v364_v23, 0 }
  0x91   : > { %275 = vmatpush1.bf16.msra.mxu0 %v266_v17  ;;  %306 = vmatprep.mubr.bf16.mxu0 %v1382_v1 }
  0x92   : > { %1183 = vmatprep.subr.msk.bf16.mxu0 %vm171_vm1, %v365_v19  ;;  %v465_v20 = vpop.permute.xlu0 %464 }
  0x93   : > { %v471_v31 = vsel %vm470_vm5, %v465_v20, %v467_v24 }
  0x94   : > { %v572_v28 = vpop.permute.xlu1 %571  ;;  %v477_v34 = vsel %vm171_vm1, %v471_v31, 0 }
  0x95   : > { %1239 = vmatmul.mubr.msk.bf16.vlgmr.msra.gmra.mrb[0].mxu1 %vm167_vm2, %v147_v21 }
  0x96   : > { %1243 = vmatpush3.bf16.msra.mxu1 %v376_v22  ;;  %1244 = vmatprep.mubr.msk.bf16.mxu1 %vm1381_vm0, %v1380_v0  ;;  %v469_v25 = vpop.permute.xlu0 %468 }
  0x97   : > { %1248 = vmatprep.subr.bf16.mxu1 %v1380_v0  ;;  %v472_v27 = vsel %vm470_vm5, %v467_v24, %v469_v25  ;;  %v483_v30 = vsel %vm171_vm1, %v469_v25, 0 }
  0x98   : > { %v576_v33 = vpop.permute.xlu1 %575 }
  0x99   : > { %v590_v38 = vsel %vm171_vm1, %v576_v33, 0 }
  0x9a   : > { %v574_v32 = vpop.permute.xlu0 %573 }
  0x9b   : > { %v579_v35 = vsel %vm577_vm6, %v574_v32, %v576_v33  ;;  %v578_v39 = vsel %vm577_vm6, %v572_v28, %v574_v32 }
  0x9c   : > { %1180 = vmatmul.mubr.msk.bf16.vlgmr.msra.gmra.mrb[0].mxu0 %vm167_vm2, %v147_v21  ;;  %v681_v40 = vpop.permute.xlu1 %680  ;;  %v584_v42 = vsel %vm171_vm1, %v578_v39, 0 }
  0x9d   : > { %379 = vmatpush1.bf16.msra.mxu0 %v370_v26  ;;  %410 = vmatprep.mubr.bf16.mxu0 %v1382_v1 }
  0x9e   : > { %1187 = vmatprep.subr.msk.bf16.mxu0 %vm171_vm1, %v472_v27  ;;  %v679_v36 = vpop.permute.xlu0 %678 }
  0x9f   : > { %v685_v47 = vsel %vm684_vm7, %v679_v36, %v681_v40 }
  0xa0   : > { %v786_v44 = vpop.permute.xlu1 %785  ;;  %v691_v50 = vsel %vm171_vm1, %v685_v47, 0 }
  0xa1   : > { %1245 = vmatmul.mubr.msk.bf16.vlgmr.msra.gmra.mrb[0].mxu1 %vm167_vm2, %v1182_v29 }
  0xa2   : > { %1249 = vmatpush3.bf16.msra.mxu1 %v483_v30  ;;  %1250 = vmatprep.mubr.msk.bf16.mxu1 %vm1381_vm0, %v1380_v0  ;;  %v683_v41 = vpop.permute.xlu0 %682 }
  0xa3   : > { %1254 = vmatprep.subr.bf16.mxu1 %v1380_v0  ;;  %v686_v43 = vsel %vm684_vm7, %v681_v40, %v683_v41  ;;  %v697_v46 = vsel %vm171_vm1, %v683_v41, 0 }
  0xa4   : > { %v790_v49 = vpop.permute.xlu1 %789 }
  0xa5   : > { %v804_v54 = vsel %vm171_vm1, %v790_v49, 0 }
  0xa6   : > { %v788_v48 = vpop.permute.xlu0 %787 }
  0xa7   : > { %v793_v51 = vsel %vm791_vm8, %v788_v48, %v790_v49  ;;  %v792_v55 = vsel %vm791_vm8, %v786_v44, %v788_v48 }
  0xa8   : > { %1184 = vmatmul.mubr.msk.bf16.vlgmr.msra.gmra.mrb[0].mxu0 %vm167_vm2, %v1182_v29  ;;  %v895_v56 = vpop.permute.xlu1 %894  ;;  %v798_v58 = vsel %vm171_vm1, %v792_v55, 0 }
  0xa9   : > { %486 = vmatpush1.bf16.msra.mxu0 %v477_v34  ;;  %517 = vmatprep.mubr.bf16.mxu0 %v1382_v1 }
  0xaa   : > { %1191 = vmatprep.subr.msk.bf16.mxu0 %vm171_vm1, %v579_v35  ;;  %v893_v52 = vpop.permute.xlu0 %892 }
  0xab   : > { %v899_v63 = vsel %vm898_vm9, %v893_v52, %v895_v56 }
  0xac   : > { %v1000_v60 = vpop.permute.xlu1 %999  ;;  %v905_v4 = vsel %vm171_vm1, %v899_v63, 0 }
  0xad   : > { %1251 = vmatmul.mubr.msk.bf16.vlgmr.msra.gmra.mrb[0].mxu1 %vm167_vm2, %v1186_v37 }
  0xae   : > { %1255 = vmatpush3.bf16.msra.mxu1 %v590_v38  ;;  %1256 = vmatprep.mubr.msk.bf16.mxu1 %vm1381_vm0, %v1380_v0  ;;  %v897_v57 = vpop.permute.xlu0 %896 }
  0xaf   : > { %1260 = vmatprep.subr.bf16.mxu1 %v1380_v0  ;;  %v900_v59 = vsel %vm898_vm9, %v895_v56, %v897_v57  ;;  %v911_v62 = vsel %vm171_vm1, %v897_v57, 0 }
  0xb0   : > { %v1004_v3 = vpop.permute.xlu1 %1003 }
  0xb1   : > { %v1018_v7 = vsel %vm171_vm1, %v1004_v3, 0 }
  0xb2   : > { %v1002_v2 = vpop.permute.xlu0 %1001 }
  0xb3   : > { %v1007_v5 = vsel %vm1005_vm10, %v1002_v2, %v1004_v3  ;;  %v1006_v8 = vsel %vm1005_vm10, %v1000_v60, %v1002_v2 }
  0xb4   : > { %1188 = vmatmul.mubr.msk.bf16.vlgmr.msra.gmra.mrb[0].mxu0 %vm167_vm2, %v1186_v37  ;;  %v1012_v9 = vsel %vm171_vm1, %v1006_v8, 0 }
  0xb5   : > { %593 = vmatpush1.bf16.msra.mxu0 %v584_v42  ;;  %624 = vmatprep.mubr.bf16.mxu0 %v1382_v1 }
  0xb6   : > { %1195 = vmatprep.subr.msk.bf16.mxu0 %vm171_vm1, %v686_v43 }
  0xb9   : > { %1257 = vmatmul.mubr.msk.bf16.vlgmr.msra.gmra.mrb[0].mxu1 %vm167_vm2, %v1190_v45 }
  0xba   : > { %1261 = vmatpush3.bf16.msra.mxu1 %v697_v46  ;;  %1262 = vmatprep.mubr.msk.bf16.mxu1 %vm1381_vm0, %v1380_v0 }
  0xbb   : > { %1266 = vmatprep.subr.bf16.mxu1 %v1380_v0 }
  0xc0   : > { %1192 = vmatmul.mubr.msk.bf16.vlgmr.msra.gmra.mrb[0].mxu0 %vm167_vm2, %v1190_v45 }
  0xc1   : > { %700 = vmatpush1.bf16.msra.mxu0 %v691_v50  ;;  %731 = vmatprep.mubr.bf16.mxu0 %v1382_v1 }
  0xc2   : > { %1199 = vmatprep.subr.msk.bf16.mxu0 %vm171_vm1, %v793_v51 }
  0xc5   : > { %1263 = vmatmul.mubr.msk.bf16.vlgmr.msra.gmra.mrb[0].mxu1 %vm167_vm2, %v1194_v53 }
  0xc6   : > { %1267 = vmatpush3.bf16.msra.mxu1 %v804_v54  ;;  %1268 = vmatprep.mubr.msk.bf16.mxu1 %vm1381_vm0, %v1380_v0 }
  0xc7   : > { %1272 = vmatprep.subr.bf16.mxu1 %v1380_v0 }
  0xcc   : > { %1196 = vmatmul.mubr.msk.bf16.vlgmr.msra.gmra.mrb[0].mxu0 %vm167_vm2, %v1194_v53 }
  0xcd   : > { %807 = vmatpush1.bf16.msra.mxu0 %v798_v58  ;;  %838 = vmatprep.mubr.bf16.mxu0 %v1382_v1 }
  0xce   : > { %1203 = vmatprep.subr.msk.bf16.mxu0 %vm171_vm1, %v900_v59 }
  0xd1   : > { %1269 = vmatmul.mubr.msk.bf16.vlgmr.msra.gmra.mrb[0].mxu1 %vm167_vm2, %v1198_v61 }
  0xd2   : > { %1273 = vmatpush3.bf16.msra.mxu1 %v911_v62  ;;  %1274 = vmatprep.mubr.msk.bf16.mxu1 %vm1381_vm0, %v1380_v0 }
  0xd3   : > { %1278 = vmatprep.subr.bf16.mxu1 %v1380_v0 }
  0xd8   : > { %1200 = vmatmul.mubr.msk.bf16.vlgmr.msra.gmra.mrb[0].mxu0 %vm167_vm2, %v1198_v61 }
  0xd9   : > { %914 = vmatpush1.bf16.msra.mxu0 %v905_v4  ;;  %945 = vmatprep.mubr.bf16.mxu0 %v1382_v1 }
  0xda   : > { %1207 = vmatprep.subr.msk.bf16.mxu0 %vm171_vm1, %v1007_v5 }
  0xdd   : > { %1275 = vmatmul.mubr.msk.bf16.vlgmr.msra.gmra.mrb[0].mxu1 %vm167_vm2, %v1202_v6 }
  0xde   : > { %1279 = vmatpush3.bf16.msra.mxu1 %v1018_v7  ;;  %1280 = vmatprep.mubr.msk.bf16.mxu1 %vm1381_vm0, %v1380_v0 }
  0xe4   : > { %1204 = vmatmul.mubr.msk.bf16.vlgmr.msra.gmra.mrb[0].mxu0 %vm167_vm2, %v1202_v6 }
  0xe5   : > { %1021 = vmatpush1.bf16.msra.mxu0 %v1012_v9  ;;  %1052 = vmatprep.mubr.bf16.mxu0 %v1382_v1 }
  0xe9   : > { %1281 = vmatmul.mubr.msk.bf16.vlgmr.msra.gmra.mrb[0].mxu1 %vm167_vm2, %v1206_v10 }
  0xf0   : > { %1208 = vmatmul.mubr.msk.bf16.vlgmr.msra.gmra.mrb[0].mxu0 %vm167_vm2, %v1206_v10 }
 0x1bc   : > { %v1095_v11 = vpop.f32.mrb[0].mxu1 }
 0x1bd   : > { %1107 = vst.msk [vmem:[%s143_s18 + $0x10] sm:$0xff] %vm1106_vm11, %v1095_v11  ;;  %v1282_v12 = vpop.f32.mrb[1].mxu1 }
 0x1be   : > { %1109 = vst.msk [vmem:[%s143_s18 + $0x10] sm:$0xff] %vm1108_vm12, %v1380_v0  ;;  %v1098_v1 = vpop.f32.mrb[2].mxu1 }
 0x1bf   : > { %v1283_v13 = vpop.f32.mrb[3].mxu1 }
 0x1c3   : > { %v1054_v14 = vpop.f32.mrb[0].mxu0 }
 0x1c4   : > { %1104 = vst [vmem:[%s143_s18] sm:$0xff] %v1054_v14  ;;  %v1056_v15 = vpop.f32.mrb[1].mxu0 }
 0x1c5   : > { %1105 = vst [vmem:[%s143_s18 + $0x8] sm:$0xff] %v1056_v15  ;;  %v1058_v16 = vpop.f32.mrb[2].mxu0 }
 0x1c6   : > { %v1059_v17 = vpop.f32.mrb[3].mxu0 }
 0x1c7 PF: > { %s12_s9 = sadd.s32 1, %s1378_s9  }
 0x1c8   : > { %p9_p4 = scmp.ge.s32.totalorder %s12_s9, 4  }
 0x1ca   :  { %11 = sbr.rel (!%p9_p4) target bundleno = 1 (0x1), region = 66 }

// kernel: upsample_block.8
= control target key start
LH: loop header
LB: loop body
LE: loop exit
PB: predicated region body
PF: predicated region fallthrough
CT: control target
= control target key end

     0   :  { %s605_s15 = smov 0   ;;  %s722_s0 = inlined_call_operand.vmem [shape: f32[2,8,32,34], index: 0, kind: input, shape index: {}]   ;;  %s723_s1 = inlined_call_operand.vmem [shape: f32[2,1,1], index: 1, kind: input, shape index: {}]   ;;  %s724_s2 = inlined_call_operand.vmem [shape: f32[2,1,1], index: 2, kind: input, shape index: {}]   ;;  %s725_s3 = inlined_call_operand.vmem [shape: f32[2,1,1], index: 3, kind: input, shape index: {}]   ;;  %s726_s4 = inlined_call_operand.vmem [shape: bf16[2,2,32,32], index: 4, kind: output, shape index: {}]  }
   0x1 LB: > { %s525_s16 = sadd.s32 4294967295, %s577_s15   ;;  %p529_p0 = scmp.ge.s32.totalorder %s577_s15, 1  ;;  %s577_s15 = sphi %s605_s15, %s14_s15  }
   0x2   : > { %p162_p1 = scmp.lt.s32.totalorder %s577_s15, 3 }
   0x4   : > { %p163_p2 = pnand %p529_p0, %p162_p1 }
   0x5   : > { %p188_p3 = scmp.lt.s32.totalorder (!%p163_p2), %s525_s16, 1  ;;  %vm206_vm0 = vcmask (!%p163_p2), 261120   ;;  %vm461_vm1 = vcmask (!%p163_p2), 257024  }
   0x6   : > { %166 = sbr.rel (%p163_p2) target bundleno = 540 (0x21c), region = 36 }
   0xd   : > { %s728_s16 = smov (!%p188_p3, %s525_s16), 1 }
   0xe   : > { %s544_s17 = sshll.u32 %s728_s16, 8  ;;  %s545_s7 = sshll.u32 %s728_s16, 5 }
   0xf   : > { %s192_s20 = scalar_lea.vmem %s722_s0, %s544_s17  ;;  %s197_s10 = scalar_lea.vmem %s726_s4, %s545_s7 }
  0x10   : > { %v619_v0 = vld [vmem:[%s192_s20 + $0x20] sm:$0xff]  ;;  %v203_v2 = vld [vmem:[%s192_s20 + $0x28] sm:$0xff]  ;;  %v204_v8 = vld [vmem:[%s192_s20 + $0x30] sm:$0xff] }
  0x11   : > { %v198_v1 = vld [vmem:[%s192_s20] sm:$0xff]  ;;  %v219_v3 = vsel %vm206_vm0, %v619_v0, 0.0  ;;  %v199_v5 = vld [vmem:[%s192_s20 + $0x8] sm:$0xff]  ;;  %v222_v6 = vsel %vm206_vm0, %v203_v2, 0.0  ;;  %v200_v9 = vld [vmem:[%s192_s20 + $0x10] sm:$0xff]  ;;  %v225_v10 = vsel %vm206_vm0, %v204_v8, 0.0 }
  0x12   : > { %v207_v4 = vsel %vm206_vm0, %v198_v1, 0.0  ;;  %220 = vadd.xlane.f32.xlu1 %v219_v3  ;;  %v210_v7 = vsel %vm206_vm0, %v199_v5, 0.0  ;;  %v213_v11 = vsel %vm206_vm0, %v200_v9, 0.0  ;;  %v205_v12 = vld [vmem:[%s192_s20 + $0x38] sm:$0xff] }
  0x13   : > { %208 = vadd.xlane.f32.xlu0 %v207_v4  ;;  %v201_v13 = vld [vmem:[%s192_s20 + $0x18] sm:$0xff]  ;;  %v228_v14 = vsel %vm206_vm0, %v205_v12, 0.0 }
  0x14   : > { %v216_v15 = vsel %vm206_vm0, %v201_v13, 0.0 }
  0x16   : > { %223 = vadd.xlane.f32.xlu1 %v222_v6 }
  0x17   : > { %211 = vadd.xlane.f32.xlu0 %v210_v7 }
  0x1a   : > { %226 = vadd.xlane.f32.xlu1 %v225_v10 }
  0x1b   : > { %214 = vadd.xlane.f32.xlu0 %v213_v11 }
  0x1e   : > { %229 = vadd.xlane.f32.xlu1 %v228_v14 }
  0x1f   : > { %217 = vadd.xlane.f32.xlu0 %v216_v15 }
  0x9f   : > { %v221_v16 = vpop.xlane.xlu1 %220 }
  0xa0   : > { %v209_v17 = vpop.xlane.xlu0 %208  ;;  %v236_v20 = vmul.f32 0.03125, %v221_v16  ;;  %v579_v16 = vmov 0  }
  0xa1   : > { %v232_v25 = vmul.f32 0.03125, %v209_v17  ;;  %564 = vset.pattern.permute.xlu1 %v579_v16  ;;  %563 = vset.pattern.permute.xlu0 %v579_v16 }
  0xa3   : > { %v224_v18 = vpop.xlane.xlu1 %223 }
  0xa4   : > { %v212_v19 = vpop.xlane.xlu0 %211  ;;  %v237_v21 = vmul.f32 0.03125, %v224_v18 }
  0xa5   : > { %v233_v22 = vmul.f32 0.03125, %v212_v19 }
  0xa6   : > { %v249_v28 = vadd.f32 %v237_v21, %v236_v20 }
  0xa7   : > { %v227_v23 = vpop.xlane.xlu1 %226  ;;  %v240_v29 = vadd.f32 %v233_v22, %v232_v25 }
  0xa8   : > { %v215_v24 = vpop.xlane.xlu0 %214  ;;  %v238_v26 = vmul.f32 0.03125, %v227_v23 }
  0xa9   : > { %v234_v27 = vmul.f32 0.03125, %v215_v24 }
  0xaa   : > { %v250_v32 = vadd.f32 %v249_v28, %v238_v26 }
  0xab   : > { %v230_v30 = vpop.xlane.xlu1 %229  ;;  %v241_v33 = vadd.f32 %v240_v29, %v234_v27 }
  0xac   : > { %v218_v31 = vpop.xlane.xlu0 %217  ;;  %v239_v34 = vmul.f32 0.03125, %v230_v30 }
  0xad   : > { %v235_v35 = vmul.f32 0.03125, %v218_v31 }
  0xae   : > { %v251_v36 = vadd.f32 %v250_v32, %v239_v34 }
  0xaf   : > { %v242_v37 = vadd.f32 %v241_v33, %v235_v35 }
  0xb0   : > { %v252_v38 = vrot.slane %v251_v36, 4 }
  0xb1   : > { %v243_v39 = vrot.slane %v242_v37, 4 }
  0xb2   : > { %v253_v40 = vadd.f32 %v252_v38, %v251_v36 }
  0xb3   : > { %v244_v41 = vadd.f32 %v243_v39, %v242_v37 }
  0xb4   : > { %v254_v42 = vrot.slane %v253_v40, 2 }
  0xb5   : > { %v245_v43 = vrot.slane %v244_v41, 2 }
  0xb6   : > { %v255_v44 = vadd.f32 %v254_v42, %v253_v40 }
  0xb7   : > { %v246_v45 = vadd.f32 %v245_v43, %v244_v41 }
  0xb8   : > { %v256_v46 = vrot.slane %v255_v44, 1 }
  0xb9   : > { %v247_v47 = vrot.slane %v246_v45, 1 }
  0xba   : > { %v257_v48 = vadd.f32 %v256_v46, %v255_v44 }
  0xbb   : > { %v248_v49 = vadd.f32 %v247_v47, %v246_v45 }
  0xbc   : > { %v259_v50 = vmul.f32 0.03125, %v257_v48 }
  0xbd   : > { %v258_v51 = vmul.f32 0.03125, %v248_v49 }
  0xbe   : > { %v634_v54 = vsub.f32 %v203_v2, %v259_v50  ;;  %v637_v55 = vsub.f32 %v619_v0, %v259_v50  ;;  %v643_v58 = vsub.f32 %v204_v8, %v259_v50  ;;  %v655_v2 = vsub.f32 %v205_v12, %v259_v50 }
  0xbf   : > { %v630_v52 = vsub.f32 %v199_v5, %v258_v51  ;;  %v632_v53 = vsub.f32 %v198_v1, %v258_v51  ;;  %v645_v59 = vsub.f32 %v200_v9, %v258_v51  ;;  %v332_v0 = vadd.f32 %v259_v50, %v258_v51 }
  0xc0   : > { %v273_v62 = vmul.f32 %v634_v54, %v634_v54  ;;  %v272_v63 = vmul.f32 %v637_v55, %v637_v55  ;;  %v274_v1 = vmul.f32 %v643_v58, %v643_v58  ;;  %v657_v3 = vsub.f32 %v201_v13, %v258_v51 }
  0xc1   : > { %v269_v56 = vmul.f32 %v630_v52, %v630_v52  ;;  %v268_v57 = vmul.f32 %v632_v53, %v632_v53  ;;  %v270_v6 = vmul.f32 %v645_v59, %v645_v59  ;;  %v334_v7 = vmul.f32 0.5, %v332_v0 }
  0xc2   : > { %v291_v4 = vsel %vm206_vm0, %v273_v62, 0.0  ;;  %v288_v5 = vsel %vm206_vm0, %v272_v63, 0.0  ;;  %v294_v10 = vsel %vm206_vm0, %v274_v1, 0.0  ;;  %v275_v12 = vmul.f32 %v655_v2, %v655_v2 }
  0xc3   : > { %v279_v60 = vsel %vm206_vm0, %v269_v56, 0.0  ;;  %v276_v61 = vsel %vm206_vm0, %v268_v57, 0.0  ;;  %v663_v8 = vsub.f32 %v259_v50, %v334_v7  ;;  %v665_v9 = vsub.f32 %v258_v51, %v334_v7  ;;  %v345_v7 = vld [vmem:[%s723_s1] sm:$0x1] }
  0xc4   : > { %280 = vadd.xlane.f32.xlu1 %v279_v60  ;;  %277 = vadd.xlane.f32.xlu0 %v276_v61  ;;  %v282_v11 = vsel %vm206_vm0, %v270_v6, 0.0  ;;  %v271_v13 = vmul.f32 %v657_v3, %v657_v3  ;;  %v297_v14 = vsel %vm206_vm0, %v275_v12, 0.0  ;;  %v346_v6 = vld [vmem:[%s723_s1 + $0x1] sm:$0x1]  ;;  %v353_v12 = vsub.f32 1.0, %v345_v7 }
  0xc5   : > { %v338_v51 = vmul.f32 %v663_v8, %v663_v8  ;;  %v337_v57 = vmul.f32 %v665_v9, %v665_v9 }
  0xc6   : > { %v285_v15 = vsel %vm206_vm0, %v271_v13, 0.0  ;;  %v361_v16 = vmul.f32 %v353_v12, %v665_v9  ;;  %v348_v9 = vld [vmem:[%s724_s2 + $0x1] sm:$0x1] }
  0xc8   : > { %292 = vadd.xlane.f32.xlu1 %v291_v4  ;;  %289 = vadd.xlane.f32.xlu0 %v288_v5 }
  0xcc   : > { %295 = vadd.xlane.f32.xlu1 %v294_v10  ;;  %283 = vadd.xlane.f32.xlu0 %v282_v11  ;;  %v354_v10 = vsub.f32 1.0, %v346_v6  ;;  %v371_v11 = vlaneseq }
  0xd0   : > { %298 = vadd.xlane.f32.xlu1 %v297_v14  ;;  %286 = vadd.xlane.f32.xlu0 %v285_v15  ;;  %v372_v15 = vshrl.u32 %v371_v11, 7 }
 0x151   : > { %v281_v17 = vpop.xlane.xlu1 %280  ;;  %v278_v18 = vpop.xlane.xlu0 %277 }
 0x152   : > { %v301_v21 = vmul.f32 0.03125, %v281_v17  ;;  %v300_v22 = vmul.f32 0.03125, %v278_v18  ;;  %v362_v17 = vmul.f32 %v354_v10, %v663_v8  ;;  %v349_v8 = vld [vmem:[%s725_s3] sm:$0x1] }
 0x154   : > { %v308_v29 = vadd.f32 %v301_v21, %v300_v22 }
 0x155   : > { %v293_v19 = vpop.xlane.xlu1 %292  ;;  %v290_v20 = vpop.xlane.xlu0 %289 }
 0x156   : > { %v305_v23 = vmul.f32 0.03125, %v293_v19  ;;  %v304_v24 = vmul.f32 0.03125, %v290_v20  ;;  %v347_v20 = vld [vmem:[%s724_s2] sm:$0x1] }
 0x158   : > { %v317_v30 = vadd.f32 %v305_v23, %v304_v24 }
 0x159   : > { %v296_v25 = vpop.xlane.xlu1 %295  ;;  %v284_v26 = vpop.xlane.xlu0 %283 }
 0x15a   : > { %v306_v27 = vmul.f32 0.03125, %v296_v25  ;;  %v302_v28 = vmul.f32 0.03125, %v284_v26 }
 0x15c   : > { %v318_v33 = vadd.f32 %v317_v30, %v306_v27  ;;  %v309_v34 = vadd.f32 %v308_v29, %v302_v28  ;;  %v373_v27 = vsub.s32 0, %v372_v15 }
 0x15d   : > { %v299_v31 = vpop.xlane.xlu1 %298  ;;  %v287_v32 = vpop.xlane.xlu0 %286 }
 0x15e   : > { %v307_v35 = vmul.f32 0.03125, %v299_v31  ;;  %v303_v36 = vmul.f32 0.03125, %v287_v32 }
 0x160   : > { %v319_v37 = vadd.f32 %v318_v33, %v307_v35  ;;  %v310_v38 = vadd.f32 %v309_v34, %v303_v36  ;;  %v350_v36 = vld [vmem:[%s725_s3 + $0x1] sm:$0x1] }
 0x162   : > { %v320_v39 = vrot.slane %v319_v37, 4  ;;  %v311_v40 = vrot.slane %v310_v38, 4 }
 0x164   : > { %v321_v41 = vadd.f32 %v320_v39, %v319_v37  ;;  %v312_v42 = vadd.f32 %v311_v40, %v310_v38 }
 0x166   : > { %v322_v43 = vrot.slane %v321_v41, 2  ;;  %v313_v44 = vrot.slane %v312_v42, 2 }
 0x168   : > { %v323_v45 = vadd.f32 %v322_v43, %v321_v41  ;;  %v314_v46 = vadd.f32 %v313_v44, %v312_v42 }
 0x16a   : > { %v324_v47 = vrot.slane %v323_v45, 1  ;;  %v315_v48 = vrot.slane %v314_v46, 1 }
 0x16c   : > { %v325_v49 = vadd.f32 %v324_v47, %v323_v45  ;;  %v316_v50 = vadd.f32 %v315_v48, %v314_v46 }
 0x16e   : > { %v327_v56 = vmul.f32 0.03125, %v325_v49  ;;  %v326_v60 = vmul.f32 0.03125, %v316_v50 }
 0x170   : > { %v329_v61 = vadd.f32 1e-08, %v327_v56  ;;  %v340_v62 = vadd.f32 %v338_v51, %v327_v56  ;;  %v339_v63 = vadd.f32 %v337_v57, %v326_v60  ;;  %v328_v0 = vadd.f32 1e-08, %v326_v60 }
 0x172   : > { %v341_v1 = vadd.f32 %v340_v62, %v339_v63  ;;  %565 = vrsqrt.f32 %v329_v61 }
 0x173   : > { %567 = vrsqrt.f32 %v328_v0 }
 0x174   : > { %v342_v4 = vmul.f32 0.5, %v341_v1 }
 0x176   : > { %v343_v5 = vadd.f32 1e-08, %v342_v4 }
 0x178   : > { %569 = vrsqrt.f32 %v343_v5 }
 0x17c   : > { %v566_v13 = vpop.eup %565 }
 0x17d   : > { %v568_v14 = vpop.eup %567  ;;  %v352_v19 = vmul.f32 %v566_v13, %v346_v6 }
 0x17e   : > { %v351_v21 = vmul.f32 %v568_v14, %v345_v7 }
 0x182   : > { %v570_v18 = vpop.eup %569 }
 0x183   : > { %v356_v22 = vmul.f32 %v570_v18, %v354_v10  ;;  %v355_v23 = vmul.f32 %v570_v18, %v353_v12  ;;  %v363_v24 = vmul.f32 %v570_v18, %v361_v16  ;;  %v364_v25 = vmul.f32 %v570_v18, %v362_v17 }
 0x185   : > { %v358_v26 = vadd.f32 %v356_v22, %v352_v19  ;;  %v357_v28 = vadd.f32 %v355_v23, %v351_v21  ;;  %v365_v29 = vmul.f32 %v363_v24, %v347_v20  ;;  %v366_v35 = vmul.f32 %v364_v25, %v348_v9 }
 0x187   : > { %v360_v30 = vmul.f32 %v358_v26, %v348_v9  ;;  %v359_v31 = vmul.f32 %v357_v28, %v347_v20  ;;  %v367_v34 = vadd.f32 %v365_v29, %v349_v8  ;;  %v368_v38 = vadd.f32 %v366_v35, %v350_v36 }
 0x189   : > { %v378_v32 = vrot.slane %v360_v30, %v373_v27  ;;  %v374_v33 = vrot.slane %v359_v31, %v373_v27  ;;  %v400_v37 = vrot.slane %v367_v34, %v373_v27  ;;  %v404_v39 = vrot.slane %v368_v38, %v373_v27 }
 0x18b   : > { %384 = vperm.xlu1 %564, %v378_v32   ;;  %380 = vperm.xlu0 %563, %v374_v33  }
 0x18f   : > { %406 = vperm.xlu1 %564, %v400_v37  }
 0x193   : > { %410 = vperm.xlu1 %564, %v404_v39  }
 0x20a   : > { %v385_v40 = vpop.permute.xlu1 %384  ;;  %v381_v41 = vpop.permute.xlu0 %380 }
 0x20b   : > { %v387_v42 = vmul.f32 %v381_v41, %v632_v53  ;;  %v388_v43 = vmul.f32 %v381_v41, %v630_v52  ;;  %v389_v44 = vmul.f32 %v381_v41, %v645_v59  ;;  %v390_v45 = vmul.f32 %v381_v41, %v657_v3 }
 0x20c   : > { %v391_v52 = vmul.f32 %v385_v40, %v637_v55  ;;  %v392_v53 = vmul.f32 %v385_v40, %v634_v54  ;;  %v393_v59 = vmul.f32 %v385_v40, %v643_v58  ;;  %v394_v3 = vmul.f32 %v385_v40, %v655_v2 }
 0x20e   : > { %v407_v46 = vpop.permute.xlu1 %406 }
 0x20f   : > { %v413_v47 = vadd.f32 %v407_v46, %v387_v42  ;;  %v414_v48 = vadd.f32 %v407_v46, %v388_v43  ;;  %v415_v49 = vadd.f32 %v407_v46, %v389_v44  ;;  %v416_v50 = vadd.f32 %v407_v46, %v390_v45 }
 0x211   : > { %v421_v51 = vmax.f32 %v413_v47, 0.0  ;;  %v422_v56 = vmax.f32 %v414_v48, 0.0  ;;  %v423_v57 = vmax.f32 %v415_v49, 0.0  ;;  %v424_v60 = vmax.f32 %v416_v50, 0.0 }
 0x212   : > { %v411_v61 = vpop.permute.xlu1 %410 }
 0x213   : > { %v546_v62 = vpack.c.bf16 %v421_v51, %v421_v51  ;;  %v547_v63 = vpack.c.bf16 %v422_v56, %v422_v56  ;;  %v548_v0 = vpack.c.bf16 %v423_v57, %v423_v57  ;;  %v549_v1 = vpack.c.bf16 %v424_v60, %v424_v60 }
 0x214   : > { %v417_v4 = vadd.f32 %v411_v61, %v391_v52  ;;  %v418_v5 = vadd.f32 %v411_v61, %v392_v53  ;;  %v419_v6 = vadd.f32 %v411_v61, %v393_v59  ;;  %v420_v7 = vadd.f32 %v411_v61, %v394_v3 }
 0x215   : > { %462 = vst.msk [vmem:[%s197_s10] sm:$0xf] %vm461_vm1, %v546_v62  ;;  %463 = vst.msk [vmem:[%s197_s10 + $0x4] sm:$0xf] %vm461_vm1, %v547_v63 }
 0x216   : > { %464 = vst.msk [vmem:[%s197_s10 + $0x8] sm:$0xf] %vm461_vm1, %v548_v0  ;;  %465 = vst.msk [vmem:[%s197_s10 + $0xc] sm:$0xf] %vm461_vm1, %v549_v1  ;;  %v425_v54 = vmax.f32 %v417_v4, 0.0  ;;  %v426_v55 = vmax.f32 %v418_v5, 0.0 }
 0x217   : > { %v427_v58 = vmax.f32 %v419_v6, 0.0  ;;  %v428_v2 = vmax.f32 %v420_v7, 0.0 }
 0x218   : > { %v550_v10 = vpack.c.bf16 %v425_v54, %v425_v54  ;;  %v551_v11 = vpack.c.bf16 %v426_v55, %v426_v55 }
 0x219   : > { %v552_v12 = vpack.c.bf16 %v427_v58, %v427_v58  ;;  %v553_v13 = vpack.c.bf16 %v428_v2, %v428_v2 }
 0x21a   : > { %466 = vst.msk [vmem:[%s197_s10 + $0x10] sm:$0xf] %vm461_vm1, %v550_v10  ;;  %467 = vst.msk [vmem:[%s197_s10 + $0x14] sm:$0xf] %vm461_vm1, %v551_v11 }
 0x21b   : > { %468 = vst.msk [vmem:[%s197_s10 + $0x18] sm:$0xf] %vm461_vm1, %v552_v12  ;;  %469 = vst.msk [vmem:[%s197_s10 + $0x1c] sm:$0xf] %vm461_vm1, %v553_v13 }
 0x21c PF: > { %s14_s15 = sadd.s32 1, %s577_s15  }
 0x21d   : > { %p11_p4 = scmp.ge.s32.totalorder %s14_s15, 4  }
 0x21f   :  { %13 = sbr.rel (!%p11_p4) target bundleno = 1 (0x1), region = 66 }

// kernel: upsample_block.7
= control target key start
LH: loop header
LB: loop body
LE: loop exit
PB: predicated region body
PF: predicated region fallthrough
CT: control target
= control target key end

     0   :  { %s3091_s9 = smov 0   ;;  %s3696_s0 = inlined_call_operand.vmem [shape: bf16[2,8,1156], index: 0, kind: input, shape index: {}]   ;;  %s3697_s1 = inlined_call_operand.vmem [shape: bf16[9,8,8], index: 1, kind: input, shape index: {}]   ;;  %s3698_s2 = inlined_call_operand.vmem [shape: f32[2,8,1088], index: 2, kind: output, shape index: {}]  }
   0x1 LB: > { %s2683_s10 = sadd.s32 4294967295, %s3063_s9   ;;  %p2687_p0 = scmp.ge.s32.totalorder %s3063_s9, 1  ;;  %s3063_s9 = sphi %s3091_s9, %s12_s9  }
   0x2   : > { %p112_p1 = scmp.lt.s32.totalorder %s3063_s9, 3 }
   0x4   : > { %p113_p2 = pnand %p2687_p0, %p112_p1 }
   0x5   : > { %p134_p3 = scmp.lt.s32.totalorder (!%p113_p2), %s2683_s10, 1  ;;  %v3065_v0 = vmov (!%p113_p2), 0   ;;  %vm207_vm0 = vcmask (!%p113_p2), 1043456   ;;  %s3066_s15 = smov (!%p113_p2), 127   ;;  %v3134_v11 = vld [vmem:[%s3697_s1] sm:$0xf] (!%p113_p2) }
   0x6   : > { %116 = sbr.rel (%p113_p2) target bundleno = 531 (0x213), region = 28  ;;  %583 = vmatprep.mubr.bf16.mxu0 (!%p113_p2), %v3065_v0  ;;  %267 = vmatprep.mubr.bf16.mxu1 (!%p113_p2), %v3065_v0  ;;  %vm203_vm1 = vcmask (!%p113_p2), 64512   ;;  %v3067_v12 = vmov (!%p113_p2), 0.0   ;;  %s3068_s18 = smov (!%p113_p2), 126   ;;  %vm3069_vm2 = vmmov (!%p113_p2), 0   ;;  %vm194_vm3 = vcmask (!%p113_p2), 1039360  }
   0x7   : > { %s3070_s19 = smov (!%p113_p2), 94   ;;  %s3071_s20 = smov (!%p113_p2), 93   ;;  %vm693_vm4 = vcmask (!%p113_p2), 1031168   ;;  %v3240_v28 = vld [vmem:[%s3697_s1 + $0x4] sm:$0xf] (!%p113_p2)  ;;  %vm965_vm5 = vcmask (!%p113_p2), 769024  }
   0x8   : > { %s3072_s21 = smov (!%p113_p2), 92   ;;  %s3073_s22 = smov (!%p113_p2), 60   ;;  %v3256_v34 = vld [vmem:[%s3697_s1 + $0x8] sm:$0xf] (!%p113_p2)  ;;  %vm1237_vm6 = vcmask (!%p113_p2), 760832   ;;  %vm1509_vm7 = vcmask (!%p113_p2), 752640  }
   0x9   : > { %s3074_s23 = smov (!%p113_p2), 59   ;;  %s3075_s28 = smov (!%p113_p2), 58   ;;  %vm1813_vm8 = vcmask (!%p113_p2), 490496   ;;  %vm2088_vm9 = vcmask (!%p113_p2), 482304   ;;  %vm2363_vm10 = vcmask (!%p113_p2), 474112   ;;  %vm2624_vm11 = vcmask (!%p113_p2), 506880  }
   0xa   : > { %vm2626_vm12 = vcmask (!%p113_p2), 523760  }
   0xd   : > { %s3700_s10 = smov (!%p134_p3, %s2683_s10), 1 }
   0xe   : > { %s3025_s11 = smul.u32 40, %s3700_s10 }
  0x10   : > { %s3107_s14 = scalar_lea.vmem %s3696_s0, %s3025_s11 }
  0x11   : > { %v146_v1 = vld [vmem:[%s3107_s14 + $0x8] sm:$0xff]  ;;  %v145_v2 = vld [vmem:[%s3107_s14] sm:$0xff]  ;;  %v147_v3 = vld [vmem:[%s3107_s14 + $0x10] sm:$0xff] }
  0x12   : > { %v3112_v4 = vcombine.low %v146_v1, %v146_v1  ;;  %v3114_v5 = vcombine.low %v145_v2, %v145_v2  ;;  %v3116_v6 = vcombine.low %v147_v3, %v147_v3  ;;  %v3118_v7 = vcombine.high %v147_v3, %v147_v3  ;;  %v3054_v10 = vld [vmem:[%s3107_s14 + $0x20] ss:$0 sps:$4 sm:$0xff]   ;;  %v148_v15 = vld [vmem:[%s3107_s14 + $0x18] sm:$0xff]  ;;  %v3344_v3 = vld [vmem:[%s3697_s1 + $0xc] sm:$0xf] }
  0x13   : > { %v3124_v8 = vcombine.high %v145_v2, %v145_v2  ;;  %v467_v13 = vsel %vm207_vm0, %v3054_v10, 0  ;;  %v3150_v14 = vcombine.high %v146_v1, %v146_v1  ;;  %v3164_v16 = vcombine.low %v148_v15, %v148_v15  ;;  %v1765_v18 = vld [vmem:[%s3107_s14 + $0x20] sm:$0xff] }
  0x14   : > { %180 = vrot.lane.b32.xlu1 %v3112_v4, %s3066_s15  ;;  %176 = vrot.lane.b32.xlu0 %v3114_v5, %s3066_s15  ;;  %v455_v9 = vsel %vm207_vm0, %v3116_v6, 0  ;;  %v3170_v17 = vcombine.high %v148_v15, %v148_v15  ;;  %v3212_v19 = vcombine.low %v1765_v18, %v1765_v18  ;;  %v3214_v20 = vcombine.high %v1765_v18, %v1765_v18 }
  0x15   : > { %2713 = vmatprep.subr.msk.bf16.mxu0 %vm207_vm0, %v3118_v7 }
  0x16   : > { %552 = vmatpush1.bf16.msra.mxu0 %v455_v9 }
  0x17   : > { %2824 = vmatprep.subr.bf16.mxu0 %v3067_v12 }
  0x18   : > { %675 = vrot.lane.b32.xlu1 %v3114_v5, %s3068_s18  ;;  %178 = vrot.lane.b32.xlu0 %v3124_v8, %s3066_s15 }
  0x19   : > { %2714 = vmatmul.mubr.msk.bf16.vlgmr.msra.gmra.mrb[0].mxu0 %vm203_vm1, %v3134_v11 }
  0x1a   : > { %2825 = vmatpush3.bf16.msra.mxu0 %v467_v13  ;;  %2826 = vmatprep.mubr.msk.bf16.mxu0 %vm3069_vm2, %v3067_v12 }
  0x1c   : > { %679 = vrot.lane.b32.xlu1 %v3112_v4, %s3068_s18  ;;  %677 = vrot.lane.b32.xlu0 %v3124_v8, %s3068_s18 }
  0x20   : > { %184 = vrot.lane.b32.xlu1 %v3116_v6, %s3066_s15  ;;  %182 = vrot.lane.b32.xlu0 %v3150_v14, %s3066_s15 }
  0x21   : > { %2827 = vmatmul.mubr.msk.bf16.vlgmr.msra.gmra.mrb[4].mxu0 %vm203_vm1, %v3134_v11 }
  0x22   : > { %764 = vmatprep.mubr.bf16.mxu0 %v3065_v0 }
  0x24   : > { %685 = vrot.lane.b32.xlu1 %v3118_v7, %s3068_s18  ;;  %683 = vrot.lane.b32.xlu0 %v3116_v6, %s3068_s18 }
  0x28   : > { %186 = vrot.lane.b32.xlu1 %v3118_v7, %s3066_s15  ;;  %687 = vrot.lane.b32.xlu0 %v3164_v16, %s3068_s18 }
  0x2c   : > { %190 = vrot.lane.b32.xlu1 %v3170_v17, %s3066_s15  ;;  %188 = vrot.lane.b32.xlu0 %v3164_v16, %s3066_s15 }
  0x30   : > { %691 = vrot.lane.b32.xlu1 %v3054_v10, %s3068_s18  ;;  %192 = vrot.lane.b32.xlu0 %v3054_v10, %s3066_s15  ;;  %s3026_s15 = smul.u32 72, %s3700_s10 }
  0x34   : > { %949 = vrot.lane.b32.xlu1 %v3124_v8, %s3070_s19  ;;  %947 = vrot.lane.b32.xlu0 %v3114_v5, %s3070_s19 }
  0x38   : > { %955 = vrot.lane.b32.xlu1 %v3116_v6, %s3070_s19  ;;  %951 = vrot.lane.b32.xlu0 %v3112_v4, %s3070_s19 }
  0x3c   : > { %959 = vrot.lane.b32.xlu1 %v3164_v16, %s3070_s19  ;;  %957 = vrot.lane.b32.xlu0 %v3118_v7, %s3070_s19 }
  0x40   : > { %1219 = vrot.lane.b32.xlu1 %v3114_v5, %s3071_s20  ;;  %963 = vrot.lane.b32.xlu0 %v3054_v10, %s3070_s19 }
  0x44   : > { %1223 = vrot.lane.b32.xlu1 %v3112_v4, %s3071_s20  ;;  %1221 = vrot.lane.b32.xlu0 %v3124_v8, %s3071_s20 }
  0x48   : > { %1229 = vrot.lane.b32.xlu1 %v3118_v7, %s3071_s20  ;;  %1227 = vrot.lane.b32.xlu0 %v3116_v6, %s3071_s20 }
  0x4c   : > { %681 = vrot.lane.b32.xlu1 %v3150_v14, %s3068_s18  ;;  %1231 = vrot.lane.b32.xlu0 %v3164_v16, %s3071_s20 }
  0x50   : > { %1235 = vrot.lane.b32.xlu1 %v3054_v10, %s3071_s20  ;;  %689 = vrot.lane.b32.xlu0 %v3170_v17, %s3068_s18  ;;  %s3680_s18 = scalar_lea.vmem %s3698_s2, %s3026_s15 }
  0x54   : > { %1493 = vrot.lane.b32.xlu1 %v3124_v8, %s3072_s21  ;;  %1491 = vrot.lane.b32.xlu0 %v3114_v5, %s3072_s21 }
  0x58   : > { %953 = vrot.lane.b32.xlu1 %v3150_v14, %s3070_s19  ;;  %1495 = vrot.lane.b32.xlu0 %v3112_v4, %s3072_s21 }
  0x5c   : > { %1501 = vrot.lane.b32.xlu1 %v3118_v7, %s3072_s21  ;;  %1499 = vrot.lane.b32.xlu0 %v3116_v6, %s3072_s21 }
  0x60   : > { %961 = vrot.lane.b32.xlu1 %v3170_v17, %s3070_s19  ;;  %1503 = vrot.lane.b32.xlu0 %v3164_v16, %s3072_s21 }
  0x64   : > { %1507 = vrot.lane.b32.xlu1 %v3054_v10, %s3072_s21  ;;  %1225 = vrot.lane.b32.xlu0 %v3150_v14, %s3071_s20 }
  0x68   : > { %1795 = vrot.lane.b32.xlu1 %v3124_v8, %s3073_s22  ;;  %1793 = vrot.lane.b32.xlu0 %v3114_v5, %s3073_s22 }
  0x6c   : > { %1233 = vrot.lane.b32.xlu1 %v3170_v17, %s3071_s20  ;;  %1797 = vrot.lane.b32.xlu0 %v3112_v4, %s3073_s22 }
  0x70   : > { %1803 = vrot.lane.b32.xlu1 %v3118_v7, %s3073_s22  ;;  %1801 = vrot.lane.b32.xlu0 %v3116_v6, %s3073_s22 }
  0x74   : > { %1497 = vrot.lane.b32.xlu1 %v3150_v14, %s3072_s21  ;;  %1805 = vrot.lane.b32.xlu0 %v3164_v16, %s3073_s22 }
  0x78   : > { %1809 = vrot.lane.b32.xlu0 %v3212_v19, %s3073_s22  ;;  %1811 = vrot.lane.b32.xlu1 %v3214_v20, %s3073_s22 }
  0x7c   : > { %1505 = vrot.lane.b32.xlu0 %v3170_v17, %s3072_s21  ;;  %2068 = vrot.lane.b32.xlu1 %v3114_v5, %s3074_s23 }
  0x80   : > { %2070 = vrot.lane.b32.xlu0 %v3124_v8, %s3074_s23  ;;  %2072 = vrot.lane.b32.xlu1 %v3112_v4, %s3074_s23 }
  0x84   : > { %1799 = vrot.lane.b32.xlu0 %v3150_v14, %s3073_s22  ;;  %2076 = vrot.lane.b32.xlu1 %v3116_v6, %s3074_s23 }
  0x86   : > { %v181_v21 = vpop.permute.xlu1 %180  ;;  %v177_v22 = vpop.permute.xlu0 %176 }
  0x88   : > { %2078 = vrot.lane.b32.xlu0 %v3118_v7, %s3074_s23  ;;  %2080 = vrot.lane.b32.xlu1 %v3164_v16, %s3074_s23 }
  0x8a   : > { %v676_v23 = vpop.permute.xlu1 %675  ;;  %v179_v24 = vpop.permute.xlu0 %178 }
  0x8b   : > { %v196_v25 = vsel %vm194_vm3, %v179_v24, %v181_v21  ;;  %v195_v26 = vsel %vm194_vm3, %v177_v22, %v179_v24  ;;  %v449_v24 = vsel %vm207_vm0, %v3112_v4, 0 }
  0x8c   : > { %1807 = vrot.lane.b32.xlu0 %v3170_v17, %s3073_s22  ;;  %2700 = vmatprep.subr.msk.bf16.mxu1 %vm207_vm0, %v196_v25  ;;  %v209_v27 = vsel %vm207_vm0, %v195_v26, 0 }
  0x8d   : > { %236 = vmatpush1.bf16.msra.mxu1 %v209_v27  ;;  %2084 = vrot.lane.b32.xlu1 %v3212_v19, %s3074_s23 }
  0x8e   : > { %v3244_v29 = vpop.permute.xlu1 %679  ;;  %v678_v30 = vpop.permute.xlu0 %677 }
  0x8f   : > { %v694_v31 = vsel %vm693_vm4, %v676_v23, %v678_v30  ;;  %v695_v32 = vsel %vm693_vm4, %v678_v30, %v3244_v29 }
  0x90   : > { %v706_v33 = vsel %vm207_vm0, %v694_v31, 0  ;;  %2719 = vmatprep.subr.msk.bf16.mxu0 %vm207_vm0, %v695_v32  ;;  %2701 = vmatmul.mubr.msk.bf16.vlgmr.msra.gmra.mrb[0].mxu1 %vm203_vm1, %v3240_v28  ;;  %v461_v31 = vsel %vm207_vm0, %v3164_v16, 0 }
  0x91   : > { %733 = vmatpush1.bf16.msra.mxu0 %v706_v33  ;;  %2074 = vrot.lane.b32.xlu1 %v3150_v14, %s3074_s23  ;;  %v3414_v33 = vld [vmem:[%s3697_s1 + $0x10] sm:$0xf] }
  0x92   : > { %v185_v35 = vpop.permute.xlu1 %184  ;;  %v183_v36 = vpop.permute.xlu0 %182  ;;  %308 = vmatprep.mubr.bf16.mxu1 %v3065_v0  ;;  %2086 = vrot.lane.b32.xlu0 %v3214_v20, %s3074_s23 }
  0x93   : > { %v197_v37 = vsel %vm194_vm3, %v181_v21, %v183_v36  ;;  %v198_v38 = vsel %vm194_vm3, %v183_v36, %v185_v35 }
  0x94   : > { %v215_v39 = vsel %vm207_vm0, %v197_v37, 0  ;;  %2702 = vmatprep.subr.msk.bf16.mxu1 %vm207_vm0, %v198_v38  ;;  %2720 = vmatmul.mubr.msk.bf16.vlgmr.msra.gmra.mrb[8].mxu0 %vm203_vm1, %v3256_v34 }
  0x95   : > { %277 = vmatpush1.bf16.msra.mxu1 %v215_v39  ;;  %2345 = vrot.lane.b32.xlu1 %v3124_v8, %s3075_s28 }
  0x96   : > { %v686_v40 = vpop.permute.xlu1 %685  ;;  %v3271_v41 = vpop.permute.xlu0 %683  ;;  %846 = vmatprep.mubr.bf16.mxu0 %v3065_v0  ;;  %2343 = vrot.lane.b32.xlu0 %v3114_v5, %s3075_s28 }
  0x97   : > { %v698_v42 = vsel %vm693_vm4, %v3271_v41, %v686_v40 }
  0x98   : > { %2703 = vmatmul.mubr.msk.bf16.vlgmr.msra.gmra.mrb[4].mxu1 %vm203_vm1, %v3240_v28  ;;  %v718_v46 = vsel %vm207_vm0, %v698_v42, 0 }
  0x99   : > { %2082 = vrot.lane.b32.xlu1 %v3170_v17, %s3074_s23  ;;  %349 = vmatprep.mubr.bf16.mxu1 %v3065_v0 }
  0x9a   : > { %v187_v43 = vpop.permute.xlu1 %186  ;;  %v3283_v44 = vpop.permute.xlu0 %687  ;;  %2347 = vrot.lane.b32.xlu0 %v3112_v4, %s3075_s28 }
  0x9b   : > { %v699_v45 = vsel %vm693_vm4, %v686_v40, %v3283_v44  ;;  %v199_v47 = vsel %vm194_vm3, %v185_v35, %v187_v43 }
  0x9c   : > { %2723 = vmatprep.subr.msk.bf16.mxu0 %vm207_vm0, %v699_v45  ;;  %v221_v51 = vsel %vm207_vm0, %v199_v47, 0 }
  0x9d   : > { %815 = vmatpush1.bf16.msra.mxu0 %v718_v46  ;;  %2353 = vrot.lane.b32.xlu1 %v3118_v7, %s3075_s28 }
  0x9e   : > { %v191_v48 = vpop.permute.xlu1 %190  ;;  %v189_v49 = vpop.permute.xlu0 %188  ;;  %2830 = vmatprep.subr.bf16.mxu0 %v3067_v12  ;;  %2351 = vrot.lane.b32.xlu0 %v3116_v6, %s3075_s28 }
  0x9f   : > { %v200_v50 = vsel %vm194_vm3, %v187_v43, %v189_v49  ;;  %v201_v52 = vsel %vm194_vm3, %v189_v49, %v191_v48 }
  0xa0   : > { %2704 = vmatprep.subr.msk.bf16.mxu1 %vm207_vm0, %v200_v50  ;;  %2724 = vmatmul.mubr.msk.bf16.vlgmr.msra.gmra.mrb[0].mxu0 %vm203_vm1, %v3256_v34  ;;  %v227_v57 = vsel %vm207_vm0, %v201_v52, 0 }
  0xa1   : > { %318 = vmatpush1.bf16.msra.mxu1 %v221_v51  ;;  %2832 = vmatprep.mubr.msk.bf16.mxu0 %vm3069_vm2, %v3067_v12 }
  0xa2   : > { %v3305_v53 = vpop.permute.xlu1 %691  ;;  %v193_v54 = vpop.permute.xlu0 %192  ;;  %2349 = vrot.lane.b32.xlu1 %v3150_v14, %s3075_s28  ;;  %2355 = vrot.lane.b32.xlu0 %v3164_v16, %s3075_s28 }
  0xa3   : > { %v730_v55 = vsel %vm207_vm0, %v3305_v53, 0  ;;  %v202_v56 = vsel %vm194_vm3, %v191_v48, %v193_v54  ;;  %v233_v2 = vsel %vm207_vm0, %v193_v54, 0 }
  0xa4   : > { %2705 = vmatmul.mubr.msk.bf16.vlgmr.msra.gmra.mrb[8].mxu1 %vm203_vm1, %v3240_v28  ;;  %2706 = vmatprep.subr.msk.bf16.mxu1 %vm207_vm0, %v202_v56 }
  0xa5   : > { %359 = vmatpush1.bf16.msra.mxu1 %v227_v57  ;;  %2831 = vmatpush3.bf16.msra.mxu0 %v730_v55 }
  0xa6   : > { %v950_v58 = vpop.permute.xlu1 %949  ;;  %v948_v59 = vpop.permute.xlu0 %947  ;;  %390 = vmatprep.mubr.bf16.mxu1 %v3065_v0  ;;  %2818 = vmatprep.subr.bf16.mxu1 %v3067_v12 }
  0xa7   : > { %v966_v60 = vsel %vm965_vm5, %v948_v59, %v950_v58  ;;  %2359 = vrot.lane.b32.xlu0 %v3212_v19, %s3075_s28  ;;  %2361 = vrot.lane.b32.xlu1 %v3214_v20, %s3075_s28 }
  0xa8   : > { %2833 = vmatmul.mubr.msk.bf16.vlgmr.msra.gmra.mrb[4].mxu0 %vm203_vm1, %v3256_v34  ;;  %v978_v61 = vsel %vm207_vm0, %v966_v60, 0  ;;  %v3478_v60 = vld [vmem:[%s3697_s1 + $0x14] sm:$0xf] }
  0xa9   : > { %1036 = vmatprep.mubr.bf16.mxu0 %v3065_v0 }
  0xaa   : > { %v3329_v62 = vpop.permute.xlu1 %955  ;;  %v3331_v63 = vpop.permute.xlu0 %951 }
  0xab   : > { %v967_v1 = vsel %vm965_vm5, %v950_v58, %v3331_v63  ;;  %2357 = vrot.lane.b32.xlu0 %v3170_v17, %s3075_s28 }
  0xac   : > { %2707 = vmatmul.mubr.msk.bf16.vlgmr.msra.gmra.mrb[12].mxu1 %vm203_vm1, %v3240_v28  ;;  %2729 = vmatprep.subr.msk.bf16.mxu0 %vm207_vm0, %v967_v1 }
  0xad   : > { %2819 = vmatpush3.bf16.msra.mxu1 %v233_v2  ;;  %1005 = vmatpush1.bf16.msra.mxu0 %v978_v61 }
  0xae   : > { %v3346_v6 = vpop.permute.xlu1 %959  ;;  %v958_v7 = vpop.permute.xlu0 %957  ;;  %2820 = vmatprep.mubr.msk.bf16.mxu1 %vm3069_vm2, %v3067_v12  ;;  %2709 = vmatprep.subr.msk.bf16.mxu1 %vm207_vm0, %v3124_v8  ;;  %v443_v8 = vsel %vm207_vm0, %v3114_v5, 0 }
  0xaf   : > { %v970_v9 = vsel %vm965_vm5, %v3329_v62, %v958_v7  ;;  %v971_v10 = vsel %vm965_vm5, %v958_v7, %v3346_v6 }
  0xb0   : > { %v990_v13 = vsel %vm207_vm0, %v970_v9, 0  ;;  %2730 = vmatmul.mubr.msk.bf16.vlgmr.msra.gmra.mrb[8].mxu0 %vm203_vm1, %v3344_v3  ;;  %2733 = vmatprep.subr.msk.bf16.mxu0 %vm207_vm0, %v971_v10 }
  0xb1   : > { %1087 = vmatpush1.bf16.msra.mxu0 %v990_v13  ;;  %1118 = vmatprep.mubr.bf16.mxu0 %v3065_v0 }
  0xb2   : > { %v1220_v15 = vpop.permute.xlu1 %1219  ;;  %v3361_v18 = vpop.permute.xlu0 %963  ;;  %2836 = vmatprep.subr.bf16.mxu0 %v3067_v12 }
  0xb3   : > { %v1002_v19 = vsel %vm207_vm0, %v3361_v18, 0 }
  0xb4   : > { %2821 = vmatmul.mubr.msk.bf16.vlgmr.msra.gmra.mrb[16].mxu1 %vm203_vm1, %v3240_v28 }
  0xb5   : > { %470 = vmatpush1.bf16.msra.mxu1 %v443_v8  ;;  %501 = vmatprep.mubr.bf16.mxu1 %v3065_v0 }
  0xb6   : > { %v3371_v20 = vpop.permute.xlu1 %1223  ;;  %v1222_v21 = vpop.permute.xlu0 %1221  ;;  %2711 = vmatprep.subr.msk.bf16.mxu1 %vm207_vm0, %v3150_v14 }
  0xb7   : > { %v1239_v5 = vsel %vm1237_vm6, %v1222_v21, %v3371_v20  ;;  %v1238_v14 = vsel %vm1237_vm6, %v1220_v15, %v1222_v21 }
  0xb8   : > { %2734 = vmatmul.mubr.msk.bf16.vlgmr.msra.gmra.mrb[0].mxu0 %vm203_vm1, %v3344_v3  ;;  %v1250_v25 = vsel %vm207_vm0, %v1238_v14, 0 }
  0xb9   : > { %2837 = vmatpush3.bf16.msra.mxu0 %v1002_v19  ;;  %2838 = vmatprep.mubr.msk.bf16.mxu0 %vm3069_vm2, %v3067_v12 }
  0xba   : > { %v1230_v22 = vpop.permute.xlu1 %1229  ;;  %v3381_v23 = vpop.permute.xlu0 %1227  ;;  %2739 = vmatprep.subr.msk.bf16.mxu0 %vm207_vm0, %v1239_v5 }
  0xbc   : > { %2710 = vmatmul.mubr.msk.bf16.vlgmr.msra.gmra.mrb[0].mxu1 %vm203_vm1, %v3134_v11 }
  0xbd   : > { %511 = vmatpush1.bf16.msra.mxu1 %v449_v24  ;;  %542 = vmatprep.mubr.bf16.mxu1 %v3065_v0 }
  0xbe   : > { %v682_v26 = vpop.permute.xlu1 %681  ;;  %v3391_v27 = vpop.permute.xlu0 %1231  ;;  %2715 = vmatprep.subr.msk.bf16.mxu1 %vm207_vm0, %v3170_v17  ;;  %v1242_v17 = vsel %vm1237_vm6, %v3381_v23, %v1230_v22 }
  0xbf   : > { %v1243_v4 = vsel %vm1237_vm6, %v1230_v22, %v3391_v27  ;;  %v697_v32 = vsel %vm693_vm4, %v682_v26, %v3271_v41  ;;  %v1262_v16 = vsel %vm207_vm0, %v1242_v17, 0  ;;  %v696_v37 = vsel %vm693_vm4, %v3244_v29, %v682_v26 }
  0xc0   : > { %2839 = vmatmul.mubr.msk.bf16.vlgmr.msra.gmra.mrb[4].mxu0 %vm203_vm1, %v3344_v3  ;;  %v712_v40 = vsel %vm207_vm0, %v696_v37, 0 }
  0xc1   : > { %1277 = vmatpush1.bf16.msra.mxu0 %v1250_v25  ;;  %1308 = vmatprep.mubr.bf16.mxu0 %v3065_v0 }
  0xc2   : > { %v3400_v28 = vpop.permute.xlu1 %1235  ;;  %v690_v30 = vpop.permute.xlu0 %689  ;;  %2743 = vmatprep.subr.msk.bf16.mxu0 %vm207_vm0, %v1243_v4 }
  0xc3   : > { %v701_v41 = vsel %vm693_vm4, %v690_v30, %v3305_v53  ;;  %v1274_v29 = vsel %vm207_vm0, %v3400_v28, 0 }
  0xc4   : > { %2712 = vmatmul.mubr.msk.bf16.vlgmr.msra.gmra.mrb[4].mxu1 %vm203_vm1, %v3134_v11 }
  0xc5   : > { %593 = vmatpush1.bf16.msra.mxu1 %v461_v31  ;;  %624 = vmatprep.mubr.bf16.mxu1 %v3065_v0 }
  0xc6   : > { %2721 = vmatprep.subr.msk.bf16.mxu1 %vm207_vm0, %v697_v32  ;;  %v1494_v35 = vpop.permute.xlu1 %1493  ;;  %v1492_v36 = vpop.permute.xlu0 %1491 }
  0xc7   : > { %v1510_v48 = vsel %vm1509_vm7, %v1492_v36, %v1494_v35 }
  0xc8   : > { %2740 = vmatmul.mubr.msk.bf16.vlgmr.msra.gmra.mrb[8].mxu0 %vm203_vm1, %v3414_v33 }
  0xc9   : > { %1359 = vmatpush1.bf16.msra.mxu0 %v1262_v16  ;;  %1390 = vmatprep.mubr.bf16.mxu0 %v3065_v0 }
  0xca   : > { %v954_v38 = vpop.permute.xlu1 %953  ;;  %v3424_v39 = vpop.permute.xlu0 %1495  ;;  %2842 = vmatprep.subr.bf16.mxu0 %v3067_v12 }
  0xcb   : > { %v1511_v45 = vsel %vm1509_vm7, %v1494_v35, %v3424_v39  ;;  %v969_v50 = vsel %vm965_vm5, %v954_v38, %v3329_v62  ;;  %v968_v54 = vsel %vm965_vm5, %v3331_v63, %v954_v38 }
  0xcc   : > { %2716 = vmatmul.mubr.msk.bf16.vlgmr.msra.gmra.mrb[12].mxu1 %vm203_vm1, %v3134_v11  ;;  %v700_v11 = vsel %vm693_vm4, %v3283_v44, %v690_v30  ;;  %v1522_v44 = vsel %vm207_vm0, %v1510_v48, 0  ;;  %v984_v58 = vsel %vm207_vm0, %v968_v54, 0  ;;  %v3602_v54 = vld [vmem:[%s3697_s1 + $0x1c] sm:$0xf] }
  0xcd   : > { %774 = vmatpush1.bf16.msra.mxu1 %v712_v40  ;;  %805 = vmatprep.mubr.bf16.mxu1 %v3065_v0  ;;  %v724_v49 = vsel %vm207_vm0, %v700_v11, 0 }
  0xce   : > { %2725 = vmatprep.subr.msk.bf16.mxu1 %vm207_vm0, %v701_v41  ;;  %v1502_v42 = vpop.permute.xlu1 %1501  ;;  %v3436_v43 = vpop.permute.xlu0 %1499 }
  0xcf   : > { %v1514_v57 = vsel %vm1509_vm7, %v3436_v43, %v1502_v42 }
  0xd0   : > { %2744 = vmatmul.mubr.msk.bf16.vlgmr.msra.gmra.mrb[0].mxu0 %vm203_vm1, %v3414_v33  ;;  %v1534_v61 = vsel %vm207_vm0, %v1514_v57, 0 }
  0xd1   : > { %2843 = vmatpush3.bf16.msra.mxu0 %v1274_v29  ;;  %2844 = vmatprep.mubr.msk.bf16.mxu0 %vm3069_vm2, %v3067_v12 }
  0xd2   : > { %v962_v46 = vpop.permute.xlu1 %961  ;;  %v3446_v47 = vpop.permute.xlu0 %1503  ;;  %2749 = vmatprep.subr.msk.bf16.mxu0 %vm207_vm0, %v1511_v45 }
  0xd3   : > { %v1515_v53 = vsel %vm1509_vm7, %v1502_v42, %v3446_v47  ;;  %v973_v59 = vsel %vm965_vm5, %v962_v46, %v3361_v18 }
  0xd4   : > { %2722 = vmatmul.mubr.msk.bf16.vlgmr.msra.gmra.mrb[4].mxu1 %vm203_vm1, %v3256_v34 }
  0xd5   : > { %856 = vmatpush1.bf16.msra.mxu1 %v724_v49  ;;  %887 = vmatprep.mubr.bf16.mxu1 %v3065_v0 }
  0xd6   : > { %2731 = vmatprep.subr.msk.bf16.mxu1 %vm207_vm0, %v969_v50  ;;  %v3458_v51 = vpop.permute.xlu1 %1507  ;;  %v1226_v52 = vpop.permute.xlu0 %1225 }
  0xd7   : > { %v1241_v9 = vsel %vm1237_vm6, %v1226_v52, %v3381_v23  ;;  %v1240_v18 = vsel %vm1237_vm6, %v3371_v20, %v1226_v52 }
  0xd8   : > { %2845 = vmatmul.mubr.msk.bf16.vlgmr.msra.gmra.mrb[4].mxu0 %vm203_vm1, %v3414_v33  ;;  %v1256_v5 = vsel %vm207_vm0, %v1240_v18, 0 }
  0xd9   : > { %1549 = vmatpush1.bf16.msra.mxu0 %v1522_v44  ;;  %1580 = vmatprep.mubr.bf16.mxu0 %v3065_v0 }
  0xda   : > { %v1796_v55 = vpop.permute.xlu1 %1795  ;;  %v1794_v56 = vpop.permute.xlu0 %1793  ;;  %2753 = vmatprep.subr.msk.bf16.mxu0 %vm207_vm0, %v1515_v53 }
  0xdb   : > { %v1814_v21 = vsel %vm1813_vm8, %v1794_v56, %v1796_v55 }
  0xdc   : > { %2726 = vmatmul.mubr.msk.bf16.vlgmr.msra.gmra.mrb[12].mxu1 %vm203_vm1, %v3256_v34  ;;  %v972_v34 = vsel %vm965_vm5, %v3346_v6, %v962_v46  ;;  %v1546_v6 = vsel %vm207_vm0, %v3458_v51, 0  ;;  %v1827_v20 = vsel %vm207_vm0, %v1814_v21, 0 }
  0xdd   : > { %1046 = vmatpush1.bf16.msra.mxu1 %v984_v58  ;;  %1077 = vmatprep.mubr.bf16.mxu1 %v3065_v0  ;;  %v996_v7 = vsel %vm207_vm0, %v972_v34, 0 }
  0xde   : > { %2735 = vmatprep.subr.msk.bf16.mxu1 %vm207_vm0, %v973_v59  ;;  %v1234_v62 = vpop.permute.xlu1 %1233  ;;  %v3483_v63 = vpop.permute.xlu0 %1797 }
  0xdf   : > { %v1815_v15 = vsel %vm1813_vm8, %v1796_v55, %v3483_v63  ;;  %v1245_v22 = vsel %vm1237_vm6, %v1234_v62, %v3400_v28 }
  0xe0   : > { %2750 = vmatmul.mubr.msk.bf16.vlgmr.msra.gmra.mrb[8].mxu0 %vm203_vm1, %v3478_v60 }
  0xe1   : > { %1631 = vmatpush1.bf16.msra.mxu0 %v1534_v61  ;;  %1662 = vmatprep.mubr.bf16.mxu0 %v3065_v0 }
  0xe2   : > { %v1804_v1 = vpop.permute.xlu1 %1803  ;;  %v3490_v2 = vpop.permute.xlu0 %1801  ;;  %2848 = vmatprep.subr.bf16.mxu0 %v3067_v12 }
  0xe3   : > { %v1818_v26 = vsel %vm1813_vm8, %v3490_v2, %v1804_v1 }
  0xe4   : > { %2732 = vmatmul.mubr.msk.bf16.vlgmr.msra.gmra.mrb[4].mxu1 %vm203_vm1, %v3344_v3  ;;  %v1839_v31 = vsel %vm207_vm0, %v1818_v26, 0 }
  0xe5   : > { %1128 = vmatpush1.bf16.msra.mxu1 %v996_v7  ;;  %1159 = vmatprep.mubr.bf16.mxu1 %v3065_v0 }
  0xe6   : > { %2741 = vmatprep.subr.msk.bf16.mxu1 %vm207_vm0, %v1241_v9  ;;  %v1498_v10 = vpop.permute.xlu1 %1497  ;;  %v3502_v13 = vpop.permute.xlu0 %1805 }
  0xe7   : > { %v1819_v14 = vsel %vm1813_vm8, %v1804_v1, %v3502_v13  ;;  %v1513_v30 = vsel %vm1509_vm7, %v1498_v10, %v3436_v43  ;;  %v1512_v32 = vsel %vm1509_vm7, %v3424_v39, %v1498_v10 }
  0xe8   : > { %2754 = vmatmul.mubr.msk.bf16.vlgmr.msra.gmra.mrb[0].mxu0 %vm203_vm1, %v3478_v60  ;;  %v1528_v36 = vsel %vm207_vm0, %v1512_v32, 0 }
  0xe9   : > { %2849 = vmatpush3.bf16.msra.mxu0 %v1546_v6  ;;  %2850 = vmatprep.mubr.msk.bf16.mxu0 %vm3069_vm2, %v3067_v12 }
  0xea   : > { %v3512_v8 = vpop.permute.xlu0 %1809  ;;  %2769 = vmatprep.subr.msk.bf16.mxu0 %vm207_vm0, %v1815_v15  ;;  %v1812_v19 = vpop.permute.xlu1 %1811 }
  0xeb   : > { %v1822_v35 = vsel %vm1813_vm8, %v3512_v8, %v1812_v19 }
  0xec   : > { %2736 = vmatmul.mubr.msk.bf16.vlgmr.msra.gmra.mrb[12].mxu1 %vm203_vm1, %v3344_v3  ;;  %v1244_v3 = vsel %vm1237_vm6, %v3391_v27, %v1234_v62  ;;  %v3544_v27 = vld [vmem:[%s3697_s1 + $0x18] sm:$0xf]  ;;  %v1851_v39 = vsel %vm207_vm0, %v1822_v35, 0 }
  0xed   : > { %1318 = vmatpush1.bf16.msra.mxu1 %v1256_v5  ;;  %1349 = vmatprep.mubr.bf16.mxu1 %v3065_v0  ;;  %v1268_v4 = vsel %vm207_vm0, %v1244_v3, 0 }
  0xee   : > { %2745 = vmatprep.subr.msk.bf16.mxu1 %vm207_vm0, %v1245_v22  ;;  %v1506_v23 = vpop.permute.xlu0 %1505  ;;  %v2069_v24 = vpop.permute.xlu1 %2068 }
  0xef   : > { %v1517_v38 = vsel %vm1509_vm7, %v1506_v23, %v3458_v51 }
  0xf0   : > { %2851 = vmatmul.mubr.msk.bf16.vlgmr.msra.gmra.mrb[4].mxu0 %vm203_vm1, %v3478_v60 }
  0xf1   : > { %1854 = vmatpush1.bf16.msra.mxu0 %v1827_v20  ;;  %1885 = vmatprep.mubr.bf16.mxu0 %v3065_v0 }
  0xf2   : > { %v2071_v25 = vpop.permute.xlu0 %2070  ;;  %2773 = vmatprep.subr.msk.bf16.mxu0 %vm207_vm0, %v1819_v14  ;;  %v3537_v28 = vpop.permute.xlu1 %2072 }
  0xf3   : > { %v2090_v40 = vsel %vm2088_vm9, %v2071_v25, %v3537_v28  ;;  %v2089_v42 = vsel %vm2088_vm9, %v2069_v24, %v2071_v25 }
  0xf4   : > { %2742 = vmatmul.mubr.msk.bf16.vlgmr.msra.gmra.mrb[4].mxu1 %vm203_vm1, %v3414_v33  ;;  %v2102_v11 = vsel %vm207_vm0, %v2089_v42, 0 }
  0xf5   : > { %1400 = vmatpush1.bf16.msra.mxu1 %v1268_v4  ;;  %1431 = vmatprep.mubr.bf16.mxu1 %v3065_v0 }
  0xf6   : > { %2751 = vmatprep.subr.msk.bf16.mxu1 %vm207_vm0, %v1513_v30  ;;  %v1800_v17 = vpop.permute.xlu0 %1799  ;;  %v2077_v16 = vpop.permute.xlu1 %2076 }
  0xf7   : > { %v1817_v45 = vsel %vm1813_vm8, %v1800_v17, %v3490_v2  ;;  %v1816_v49 = vsel %vm1813_vm8, %v3483_v63, %v1800_v17 }
  0xf8   : > { %2770 = vmatmul.mubr.msk.bf16.vlgmr.msra.gmra.mrb[8].mxu0 %vm203_vm1, %v3544_v27  ;;  %v1833_v44 = vsel %vm207_vm0, %v1816_v49, 0 }
  0xf9   : > { %1936 = vmatpush1.bf16.msra.mxu0 %v1839_v31  ;;  %1967 = vmatprep.mubr.bf16.mxu0 %v3065_v0 }
  0xfa   : > { %2854 = vmatprep.subr.bf16.mxu0 %v3067_v12  ;;  %v2079_v37 = vpop.permute.xlu0 %2078  ;;  %v3569_v41 = vpop.permute.xlu1 %2080 }
  0xfb   : > { %v2094_v48 = vsel %vm2088_vm9, %v2079_v37, %v3569_v41  ;;  %v2093_v50 = vsel %vm2088_vm9, %v2077_v16, %v2079_v37 }
  0xfc   : > { %2746 = vmatmul.mubr.msk.bf16.vlgmr.msra.gmra.mrb[12].mxu1 %vm203_vm1, %v3414_v33  ;;  %v1516_v33 = vsel %vm1509_vm7, %v3446_v47, %v1506_v23  ;;  %v2114_v55 = vsel %vm207_vm0, %v2093_v50, 0  ;;  %v2788_v23 = vld [vmem:[%s3697_s1 + $0x20] sm:$0xf] }
  0xfd   : > { %1590 = vmatpush1.bf16.msra.mxu1 %v1528_v36  ;;  %1621 = vmatprep.mubr.bf16.mxu1 %v3065_v0  ;;  %v1540_v43 = vsel %vm207_vm0, %v1516_v33, 0 }
  0xfe   : > { %2755 = vmatprep.subr.msk.bf16.mxu1 %vm207_vm0, %v1517_v38  ;;  %v1808_v29 = vpop.permute.xlu0 %1807 }
  0xff   : > { %v2085_v46 = vpop.permute.xlu1 %2084  ;;  %v1821_v53 = vsel %vm1813_vm8, %v1808_v29, %v3512_v8  ;;  %v1820_v56 = vsel %vm1813_vm8, %v3502_v13, %v1808_v29 }
 0x100   : > { %2774 = vmatmul.mubr.msk.bf16.vlgmr.msra.gmra.mrb[0].mxu0 %vm203_vm1, %v3544_v27 }
 0x101   : > { %2855 = vmatpush3.bf16.msra.mxu0 %v1851_v39  ;;  %2856 = vmatprep.mubr.msk.bf16.mxu0 %vm3069_vm2, %v3067_v12 }
 0x102   : > { %2779 = vmatprep.subr.msk.bf16.mxu0 %vm207_vm0, %v2090_v40 }
 0x103   : > { %v2075_v51 = vpop.permute.xlu1 %2074 }
 0x104   : > { %2752 = vmatmul.mubr.msk.bf16.vlgmr.msra.gmra.mrb[4].mxu1 %vm203_vm1, %v3478_v60  ;;  %v2087_v47 = vpop.permute.xlu0 %2086  ;;  %v2092_v61 = vsel %vm2088_vm9, %v2075_v51, %v2077_v16  ;;  %v2091_v2 = vsel %vm2088_vm9, %v3537_v28, %v2075_v51 }
 0x105   : > { %1672 = vmatpush1.bf16.msra.mxu1 %v1540_v43  ;;  %1703 = vmatprep.mubr.bf16.mxu1 %v3065_v0  ;;  %v2097_v59 = vsel %vm2088_vm9, %v2085_v46, %v2087_v47  ;;  %v2108_v6 = vsel %vm207_vm0, %v2091_v2, 0 }
 0x106   : > { %2771 = vmatprep.subr.msk.bf16.mxu1 %vm207_vm0, %v1817_v45  ;;  %v2126_v62 = vsel %vm207_vm0, %v2097_v59, 0 }
 0x107   : > { %v2346_v57 = vpop.permute.xlu1 %2345 }
 0x108   : > { %2857 = vmatmul.mubr.msk.bf16.vlgmr.msra.gmra.mrb[4].mxu0 %vm203_vm1, %v3544_v27  ;;  %v2344_v52 = vpop.permute.xlu0 %2343 }
 0x109   : > { %2129 = vmatpush1.bf16.msra.mxu0 %v2102_v11  ;;  %2160 = vmatprep.mubr.bf16.mxu0 %v3065_v0  ;;  %v2364_v9 = vsel %vm2363_vm10, %v2344_v52, %v2346_v57 }
 0x10a   : > { %2783 = vmatprep.subr.msk.bf16.mxu0 %vm207_vm0, %v2094_v48  ;;  %v2377_v13 = vsel %vm207_vm0, %v2364_v9, 0 }
 0x10b   : > { %v2083_v34 = vpop.permute.xlu1 %2082 }
 0x10c   : > { %2756 = vmatmul.mubr.msk.bf16.vlgmr.msra.gmra.mrb[12].mxu1 %vm203_vm1, %v3478_v60  ;;  %v2348_v58 = vpop.permute.xlu0 %2347  ;;  %v1845_v60 = vsel %vm207_vm0, %v1820_v56, 0  ;;  %v2096_v7 = vsel %vm2088_vm9, %v2083_v34, %v2085_v46  ;;  %v2095_v8 = vsel %vm2088_vm9, %v3569_v41, %v2083_v34 }
 0x10d   : > { %1895 = vmatpush1.bf16.msra.mxu1 %v1833_v44  ;;  %1926 = vmatprep.mubr.bf16.mxu1 %v3065_v0  ;;  %v2365_v63 = vsel %vm2363_vm10, %v2346_v57, %v2348_v58  ;;  %v2120_v22 = vsel %vm207_vm0, %v2095_v8, 0 }
 0x10e   : > { %2775 = vmatprep.subr.msk.bf16.mxu1 %vm207_vm0, %v1821_v53 }
 0x10f   : > { %v2354_v10 = vpop.permute.xlu1 %2353 }
 0x110   : > { %2780 = vmatmul.mubr.msk.bf16.vlgmr.msra.gmra.mrb[8].mxu0 %vm203_vm1, %v3602_v54  ;;  %v2352_v1 = vpop.permute.xlu0 %2351 }
 0x111   : > { %2211 = vmatpush1.bf16.msra.mxu0 %v2114_v55  ;;  %2242 = vmatprep.mubr.bf16.mxu0 %v3065_v0  ;;  %v2368_v21 = vsel %vm2363_vm10, %v2352_v1, %v2354_v10 }
 0x112   : > { %2860 = vmatprep.subr.bf16.mxu0 %v3067_v12  ;;  %v2389_v24 = vsel %vm207_vm0, %v2368_v21, 0 }
 0x114   : > { %2772 = vmatmul.mubr.msk.bf16.vlgmr.msra.gmra.mrb[4].mxu1 %vm203_vm1, %v3544_v27  ;;  %v2356_v15 = vpop.permute.xlu0 %2355  ;;  %v2350_v19 = vpop.permute.xlu1 %2349 }
 0x115   : > { %1977 = vmatpush1.bf16.msra.mxu1 %v1845_v60  ;;  %2008 = vmatprep.mubr.bf16.mxu1 %v3065_v0  ;;  %v2369_v18 = vsel %vm2363_vm10, %v2354_v10, %v2356_v15  ;;  %v2367_v5 = vsel %vm2363_vm10, %v2350_v19, %v2352_v1  ;;  %v2366_v3 = vsel %vm2363_vm10, %v2348_v58, %v2350_v19 }
 0x116   : > { %2781 = vmatprep.subr.msk.bf16.mxu1 %vm207_vm0, %v2092_v61  ;;  %v2383_v28 = vsel %vm207_vm0, %v2366_v3, 0 }
 0x118   : > { %2784 = vmatmul.mubr.msk.bf16.vlgmr.msra.gmra.mrb[0].mxu0 %vm203_vm1, %v3602_v54 }
 0x119   : > { %2861 = vmatpush3.bf16.msra.mxu0 %v2126_v62  ;;  %2862 = vmatprep.mubr.msk.bf16.mxu0 %vm3069_vm2, %v3067_v12  ;;  %v2360_v20 = vpop.permute.xlu0 %2359  ;;  %v2362_v14 = vpop.permute.xlu1 %2361 }
 0x11a   : > { %2789 = vmatprep.subr.msk.bf16.mxu0 %vm207_vm0, %v2365_v63  ;;  %v2372_v4 = vsel %vm2363_vm10, %v2360_v20, %v2362_v14 }
 0x11b   : > { %v2401_v30 = vsel %vm207_vm0, %v2372_v4, 0 }
 0x11c   : > { %2776 = vmatmul.mubr.msk.bf16.vlgmr.msra.gmra.mrb[12].mxu1 %vm203_vm1, %v3544_v27 }
 0x11d   : > { %2170 = vmatpush1.bf16.msra.mxu1 %v2108_v6  ;;  %2201 = vmatprep.mubr.bf16.mxu1 %v3065_v0  ;;  %v2358_v25 = vpop.permute.xlu0 %2357 }
 0x11e   : > { %2785 = vmatprep.subr.msk.bf16.mxu1 %vm207_vm0, %v2096_v7  ;;  %v2371_v26 = vsel %vm2363_vm10, %v2358_v25, %v2360_v20  ;;  %v2370_v27 = vsel %vm2363_vm10, %v2356_v15, %v2358_v25 }
 0x11f   : > { %v2395_v31 = vsel %vm207_vm0, %v2370_v27, 0 }
 0x120   : > { %2863 = vmatmul.mubr.msk.bf16.vlgmr.msra.gmra.mrb[4].mxu0 %vm203_vm1, %v3602_v54 }
 0x121   : > { %2404 = vmatpush1.bf16.msra.mxu0 %v2377_v13  ;;  %2435 = vmatprep.mubr.bf16.mxu0 %v3065_v0 }
 0x122   : > { %2793 = vmatprep.subr.msk.bf16.mxu0 %vm207_vm0, %v2369_v18 }
 0x124   : > { %2782 = vmatmul.mubr.msk.bf16.vlgmr.msra.gmra.mrb[4].mxu1 %vm203_vm1, %v3602_v54 }
 0x125   : > { %2252 = vmatpush1.bf16.msra.mxu1 %v2120_v22  ;;  %2283 = vmatprep.mubr.bf16.mxu1 %v3065_v0 }
 0x126   : > { %2791 = vmatprep.subr.msk.bf16.mxu1 %vm207_vm0, %v2367_v5 }
 0x128   : > { %2790 = vmatmul.mubr.msk.bf16.vlgmr.msra.gmra.mrb[8].mxu0 %vm203_vm1, %v2788_v23 }
 0x129   : > { %2486 = vmatpush1.bf16.msra.mxu0 %v2389_v24  ;;  %2517 = vmatprep.mubr.bf16.mxu0 %v3065_v0 }
 0x12a   : > { %2866 = vmatprep.subr.bf16.mxu0 %v3067_v12 }
 0x12c   : > { %2786 = vmatmul.mubr.msk.bf16.vlgmr.msra.gmra.mrb[12].mxu1 %vm203_vm1, %v3602_v54 }
 0x12d   : > { %2445 = vmatpush1.bf16.msra.mxu1 %v2383_v28  ;;  %2476 = vmatprep.mubr.bf16.mxu1 %v3065_v0 }
 0x12e   : > { %2795 = vmatprep.subr.msk.bf16.mxu1 %vm207_vm0, %v2371_v26 }
 0x130   : > { %2794 = vmatmul.mubr.msk.bf16.vlgmr.msra.gmra.mrb[0].mxu0 %vm203_vm1, %v2788_v23 }
 0x131   : > { %2867 = vmatpush3.bf16.msra.mxu0 %v2401_v30  ;;  %2868 = vmatprep.mubr.msk.bf16.mxu0 %vm3069_vm2, %v3067_v12 }
 0x134   : > { %2792 = vmatmul.mubr.msk.bf16.vlgmr.msra.gmra.mrb[4].mxu1 %vm203_vm1, %v2788_v23 }
 0x135   : > { %2527 = vmatpush1.bf16.msra.mxu1 %v2395_v31  ;;  %2558 = vmatprep.mubr.bf16.mxu1 %v3065_v0 }
 0x138   : > { %2869 = vmatmul.mubr.msk.bf16.vlgmr.msra.gmra.mrb[4].mxu0 %vm203_vm1, %v2788_v23 }
 0x13c   : > { %2796 = vmatmul.mubr.msk.bf16.vlgmr.msra.gmra.mrb[12].mxu1 %vm203_vm1, %v2788_v23 }
 0x177   : > { %v351_v17 = vpop.f32.mrb[8].mxu1 }
 0x178   : > { %v353_v32 = vpop.f32.mrb[9].mxu1 }
 0x179   : > { %v355_v16 = vpop.f32.mrb[10].mxu1 }
 0x17a   : > { %v356_v35 = vpop.f32.mrb[11].mxu1 }
 0x187   : > { %v433_v36 = vpop.f32.mrb[16].mxu1 }
 0x188   : > { %v2822_v37 = vpop.f32.mrb[17].mxu1 }
 0x189   : > { %v436_v38 = vpop.f32.mrb[18].mxu1 }
 0x18a   : > { %v2823_v39 = vpop.f32.mrb[19].mxu1 }
 0x18f   : > { %v503_v40 = vpop.f32.mrb[0].mxu1 }
 0x190   : > { %v505_v41 = vpop.f32.mrb[1].mxu1 }
 0x191   : > { %v507_v33 = vpop.f32.mrb[2].mxu1 }
 0x192   : > { %v508_v29 = vpop.f32.mrb[3].mxu1 }
 0x1fb   : > { %v2437_v0 = vpop.f32.mrb[8].mxu0 }
 0x1fc   : > { %v2872_v42 = vadd.f32 %v2437_v0, %v503_v40  ;;  %v2439_v43 = vpop.f32.mrb[9].mxu0 }
 0x1fd   : > { %v2873_v45 = vadd.f32 %v2439_v43, %v505_v41  ;;  %v2441_v11 = vpop.f32.mrb[10].mxu0 }
 0x1fe   : > { %2616 = vst [vmem:[%s3680_s18] sm:$0xff] %v2872_v42  ;;  %v2442_v46 = vpop.f32.mrb[11].mxu0 }
 0x1ff   : > { %2617 = vst [vmem:[%s3680_s18 + $0x8] sm:$0xff] %v2873_v45 }
 0x203   : > { %v2519_v47 = vpop.f32.mrb[0].mxu0 }
 0x204   : > { %v2874_v48 = vadd.f32 %v2519_v47, %v351_v17  ;;  %v2521_v49 = vpop.f32.mrb[1].mxu0 }
 0x205   : > { %v2875_v50 = vadd.f32 %v2521_v49, %v353_v32  ;;  %v2523_v44 = vpop.f32.mrb[2].mxu0 }
 0x206   : > { %2620 = vst [vmem:[%s3680_s18 + $0x20] sm:$0xff] %v2874_v48  ;;  %v2524_v51 = vpop.f32.mrb[3].mxu0 }
 0x207   : > { %2621 = vst [vmem:[%s3680_s18 + $0x28] sm:$0xff] %v2875_v50  ;;  %v2478_v52 = vpop.f32.mrb[4].mxu1 }
 0x208   : > { %2618 = vst [vmem:[%s3680_s18 + $0x10] sm:$0xff] %v2478_v52  ;;  %v2480_v53 = vpop.f32.mrb[5].mxu1 }
 0x209   : > { %2619 = vst [vmem:[%s3680_s18 + $0x18] sm:$0xff] %v2480_v53  ;;  %v2482_v54 = vpop.f32.mrb[6].mxu1 }
 0x20a   : > { %v2483_v55 = vpop.f32.mrb[7].mxu1 }
 0x20b   : > { %v2601_v56 = vpop.f32.mrb[4].mxu0 }
 0x20c   : > { %v2876_v57 = vadd.f32 %v2601_v56, %v433_v36  ;;  %v2870_v58 = vpop.f32.mrb[5].mxu0 }
 0x20d   : > { %v2604_v59 = vpop.f32.mrb[6].mxu0 }
 0x20e   : > { %2625 = vst.msk [vmem:[%s3680_s18 + $0x40] sm:$0xff] %vm2624_vm11, %v2876_v57  ;;  %v2871_v60 = vpop.f32.mrb[7].mxu0 }
 0x20f   : > { %2627 = vst.msk [vmem:[%s3680_s18 + $0x40] sm:$0xff] %vm2626_vm12, %v3067_v12  ;;  %v2560_v61 = vpop.f32.mrb[12].mxu1 }
 0x210   : > { %2622 = vst [vmem:[%s3680_s18 + $0x30] sm:$0xff] %v2560_v61  ;;  %v2562_v62 = vpop.f32.mrb[13].mxu1 }
 0x211   : > { %2623 = vst [vmem:[%s3680_s18 + $0x38] sm:$0xff] %v2562_v62  ;;  %v2564_v63 = vpop.f32.mrb[14].mxu1 }
 0x212   : > { %v2565_v34 = vpop.f32.mrb[15].mxu1 }
 0x213 PF: > { %s12_s9 = sadd.s32 1, %s3063_s9  }
 0x214   : > { %p9_p4 = scmp.ge.s32.totalorder %s12_s9, 4  }
 0x216   :  { %11 = sbr.rel (!%p9_p4) target bundleno = 1 (0x1), region = 66 }

// kernel: upsample_block.9
= control target key start
LH: loop header
LB: loop body
LE: loop exit
PB: predicated region body
PF: predicated region fallthrough
CT: control target
= control target key end

     0   :  { %s15840_s9 = smov 0   ;;  %s19545_s0 = inlined_call_operand.vmem [shape: bf16[2,8,1444], index: 0, kind: input, shape index: {}]   ;;  %s19546_s1 = inlined_call_operand.vmem [shape: bf16[49,8,8], index: 1, kind: input, shape index: {}]   ;;  %s19547_s2 = inlined_call_operand.vmem [shape: f32[2,8,1216], index: 2, kind: output, shape index: {}]  }
   0x1 LB: > { %s14085_s10 = sadd.s32 4294967295, %s15773_s9   ;;  %p14089_p0 = scmp.ge.s32.totalorder %s15773_s9, 1  ;;  %s15773_s9 = sphi %s15840_s9, %s12_s9  }
   0x2   : > { %p112_p1 = scmp.lt.s32.totalorder %s15773_s9, 3 }
   0x4   : > { %p113_p2 = pnand %p14089_p0, %p112_p1 }
   0x6   : > { %116 = sbr.rel (%p113_p2) target bundleno = 1397 (0x575), region = 28 }
   0xd   : > { %p134_p3 = scmp.lt.s32.totalorder %s14085_s10, 1  ;;  %v19548_v0 = vmov 0   ;;  %s15776_s15 = smov 89   ;;  %vm2388_vm0 = vcmask 728064   ;;  %vm212_vm1 = vcmask 1043456   ;;  %vm208_vm2 = vcmask 64512  }
   0xe   : > { %2463 = vmatprep.mubr.bf16.mxu0 %v19548_v0  ;;  %275 = vmatprep.mubr.bf16.mxu1 %v19548_v0  ;;  %s15777_s16 = smov 127   ;;  %s15778_s17 = smov 88   ;;  %v14189_v25 = vld [vmem:[%s19546_s1 + $0x20] sm:$0xf]  ;;  %vm198_vm3 = vcmask 1039360   ;;  %vm2668_vm4 = vcmask 719872  }
   0xf   : > { %s19600_s10 = smov (!%p134_p3, %s14085_s10), 1  ;;  %s15779_s18 = smov 87   ;;  %v16041_v38 = vld [vmem:[%s19546_s1 + $0x4] sm:$0xf]  ;;  %vm2948_vm5 = vcmask 711680   ;;  %vm3228_vm6 = vcmask 703488  }
  0x10   : > { %s15628_s11 = smul.u32 48, %s19600_s10  ;;  %s15780_s19 = smov 86   ;;  %v14200_v53 = vld [vmem:[%s19546_s1 + $0x24] sm:$0xf]  ;;  %vm708_vm7 = vcmask 1031168   ;;  %vm3508_vm8 = vcmask 695296  }
  0x11   : > { %s15781_s20 = smov 126   ;;  %s15782_s21 = smov 85   ;;  %vm3788_vm9 = vcmask 687104   ;;  %vm988_vm10 = vcmask 1022976   ;;  %vm4104_vm11 = vcmask 424960   ;;  %vm4387_vm12 = vcmask 416768  }
  0x12   : > { %s15854_s14 = scalar_lea.vmem %s19545_s0, %s15628_s11  ;;  %s15783_s22 = smov 84   ;;  %vm1268_vm13 = vcmask 1014784   ;;  %vm4670_vm14 = vcmask 408576   ;;  %vm1548_vm15 = vcmask 1006592  }
  0x13   : > { %v146_v1 = vld [vmem:[%s15854_s14 + $0x8] sm:$0xff]  ;;  %v145_v2 = vld [vmem:[%s15854_s14] sm:$0xff]  ;;  %v147_v3 = vld [vmem:[%s15854_s14 + $0x10] sm:$0xff]  ;;  %s15784_s25 = smov 125   ;;  %s15785_s28 = smov 52  }
  0x14   : > { %v15861_v4 = vcombine.low %v146_v1, %v146_v1  ;;  %v15863_v5 = vcombine.low %v145_v2, %v145_v2  ;;  %v15869_v6 = vcombine.low %v147_v3, %v147_v3  ;;  %v15871_v7 = vcombine.high %v145_v2, %v145_v2  ;;  %v148_v8 = vld [vmem:[%s15854_s14 + $0x18] sm:$0xff]  ;;  %v149_v11 = vld [vmem:[%s15854_s14 + $0x20] sm:$0xff]  ;;  %s15786_s3 = smov 51   ;;  %s15787_s8 = smov 124  }
  0x15   : > { %v15878_v9 = vcombine.low %v148_v8, %v148_v8  ;;  %v15880_v10 = vcombine.high %v147_v3, %v147_v3  ;;  %v15889_v12 = vcombine.low %v149_v11, %v149_v11  ;;  %v15894_v13 = vcombine.high %v146_v1, %v146_v1  ;;  %s15788_s13 = smov 50   ;;  %s15790_s26 = smov 49  }
  0x16   : > { %2372 = vrot.lane.b32.xlu1 %v15861_v4, %s15776_s15  ;;  %2368 = vrot.lane.b32.xlu0 %v15863_v5, %s15776_s15  ;;  %v15896_v14 = vcombine.high %v149_v11, %v149_v11  ;;  %v15914_v15 = vcombine.high %v148_v8, %v148_v8  ;;  %s15791_s5 = smov 48   ;;  %s15794_s24 = smov 46  }
  0x17   : > { %s15795_s29 = smov 90   ;;  %s15796_s6 = smov 14  }
  0x18   : > { %s15797_s11 = smov 13   ;;  %s15800_s7 = smov 10  }
  0x19   : > { %s15811_s4 = smov 65   ;;  %s15814_s27 = smov 62  }
  0x1a   : > { %2376 = vrot.lane.b32.xlu1 %v15869_v6, %s15776_s15  ;;  %2370 = vrot.lane.b32.xlu0 %v15871_v7, %s15776_s15 }
  0x1e   : > { %2380 = vrot.lane.b32.xlu1 %v15878_v9, %s15776_s15  ;;  %2378 = vrot.lane.b32.xlu0 %v15880_v10, %s15776_s15 }
  0x22   : > { %180 = vrot.lane.b32.xlu1 %v15871_v7, %s15777_s16  ;;  %178 = vrot.lane.b32.xlu0 %v15863_v5, %s15777_s16 }
  0x26   : > { %2384 = vrot.lane.b32.xlu1 %v15889_v12, %s15776_s15  ;;  %182 = vrot.lane.b32.xlu0 %v15861_v4, %s15777_s16 }
  0x2a   : > { %184 = vrot.lane.b32.xlu1 %v15894_v13, %s15777_s16  ;;  %2386 = vrot.lane.b32.xlu0 %v15896_v14, %s15776_s15 }
  0x2e   : > { %2648 = vrot.lane.b32.xlu1 %v15863_v5, %s15778_s17  ;;  %186 = vrot.lane.b32.xlu0 %v15869_v6, %s15777_s16 }
  0x32   : > { %2652 = vrot.lane.b32.xlu1 %v15861_v4, %s15778_s17  ;;  %2650 = vrot.lane.b32.xlu0 %v15871_v7, %s15778_s17 }
  0x36   : > { %190 = vrot.lane.b32.xlu1 %v15878_v9, %s15777_s16  ;;  %188 = vrot.lane.b32.xlu0 %v15880_v10, %s15777_s16 }
  0x3a   : > { %2658 = vrot.lane.b32.xlu1 %v15880_v10, %s15778_s17  ;;  %2656 = vrot.lane.b32.xlu0 %v15869_v6, %s15778_s17 }
  0x3e   : > { %192 = vrot.lane.b32.xlu1 %v15914_v15, %s15777_s16  ;;  %2660 = vrot.lane.b32.xlu0 %v15878_v9, %s15778_s17 }
  0x42   : > { %2664 = vrot.lane.b32.xlu1 %v15889_v12, %s15778_s17  ;;  %194 = vrot.lane.b32.xlu0 %v15889_v12, %s15777_s16 }
  0x46   : > { %196 = vrot.lane.b32.xlu1 %v15896_v14, %s15777_s16  ;;  %2666 = vrot.lane.b32.xlu0 %v15896_v14, %s15778_s17  ;;  %s15793_s16 = smov 47  }
  0x4a   : > { %2930 = vrot.lane.b32.xlu1 %v15871_v7, %s15779_s18  ;;  %2928 = vrot.lane.b32.xlu0 %v15863_v5, %s15779_s18 }
  0x4e   : > { %2936 = vrot.lane.b32.xlu1 %v15869_v6, %s15779_s18  ;;  %2932 = vrot.lane.b32.xlu0 %v15861_v4, %s15779_s18 }
  0x52   : > { %2940 = vrot.lane.b32.xlu1 %v15878_v9, %s15779_s18  ;;  %2938 = vrot.lane.b32.xlu0 %v15880_v10, %s15779_s18 }
  0x56   : > { %2946 = vrot.lane.b32.xlu1 %v15896_v14, %s15779_s18  ;;  %2944 = vrot.lane.b32.xlu0 %v15889_v12, %s15779_s18 }
  0x5a   : > { %3210 = vrot.lane.b32.xlu1 %v15871_v7, %s15780_s19  ;;  %3208 = vrot.lane.b32.xlu0 %v15863_v5, %s15780_s19 }
  0x5e   : > { %3216 = vrot.lane.b32.xlu1 %v15869_v6, %s15780_s19  ;;  %3212 = vrot.lane.b32.xlu0 %v15861_v4, %s15780_s19 }
  0x62   : > { %3220 = vrot.lane.b32.xlu1 %v15878_v9, %s15780_s19  ;;  %3218 = vrot.lane.b32.xlu0 %v15880_v10, %s15780_s19 }
  0x66   : > { %3226 = vrot.lane.b32.xlu1 %v15896_v14, %s15780_s19  ;;  %3224 = vrot.lane.b32.xlu0 %v15889_v12, %s15780_s19 }
  0x6a   : > { %690 = vrot.lane.b32.xlu1 %v15871_v7, %s15781_s20  ;;  %688 = vrot.lane.b32.xlu0 %v15863_v5, %s15781_s20 }
  0x6e   : > { %3488 = vrot.lane.b32.xlu1 %v15863_v5, %s15782_s21  ;;  %692 = vrot.lane.b32.xlu0 %v15861_v4, %s15781_s20 }
  0x72   : > { %3492 = vrot.lane.b32.xlu1 %v15861_v4, %s15782_s21  ;;  %3490 = vrot.lane.b32.xlu0 %v15871_v7, %s15782_s21 }
  0x76   : > { %696 = vrot.lane.b32.xlu1 %v15869_v6, %s15781_s20  ;;  %694 = vrot.lane.b32.xlu0 %v15894_v13, %s15781_s20 }
  0x7a   : > { %3498 = vrot.lane.b32.xlu1 %v15880_v10, %s15782_s21  ;;  %3496 = vrot.lane.b32.xlu0 %v15869_v6, %s15782_s21 }
  0x7e   : > { %698 = vrot.lane.b32.xlu1 %v15880_v10, %s15781_s20  ;;  %3500 = vrot.lane.b32.xlu0 %v15878_v9, %s15782_s21 }
  0x82   : > { %3504 = vrot.lane.b32.xlu1 %v15889_v12, %s15782_s21  ;;  %700 = vrot.lane.b32.xlu0 %v15878_v9, %s15781_s20 }
  0x86   : > { %702 = vrot.lane.b32.xlu1 %v15914_v15, %s15781_s20  ;;  %3506 = vrot.lane.b32.xlu0 %v15896_v14, %s15782_s21 }
  0x88   : > { %v15989_v16 = vpop.permute.xlu1 %2372  ;;  %v2369_v17 = vpop.permute.xlu0 %2368 }
  0x8a   : > { %3768 = vrot.lane.b32.xlu1 %v15863_v5, %s15783_s22  ;;  %704 = vrot.lane.b32.xlu0 %v15889_v12, %s15781_s20 }
  0x8c   : > { %v15995_v18 = vpop.permute.xlu1 %2376  ;;  %v2371_v19 = vpop.permute.xlu0 %2370 }
  0x8d   : > { %v2390_v20 = vsel %vm2388_vm0, %v2371_v19, %v15989_v16  ;;  %v2389_v21 = vsel %vm2388_vm0, %v2369_v17, %v2371_v19 }
  0x8e   : > { %3772 = vrot.lane.b32.xlu1 %v15861_v4, %s15783_s22  ;;  %3770 = vrot.lane.b32.xlu0 %v15871_v7, %s15783_s22  ;;  %v2402_v22 = vsel %vm212_vm1, %v2389_v21, 0 }
  0x8f   : > { %14190 = vmatprep.subr.msk.bf16.mxu0 %vm212_vm1, %v2390_v20 }
  0x90   : > { %2432 = vmatpush1.bf16.msra.mxu0 %v2402_v22  ;;  %v16006_v23 = vpop.permute.xlu1 %2380  ;;  %v2379_v24 = vpop.permute.xlu0 %2378 }
  0x91   : > { %v2393_v26 = vsel %vm2388_vm0, %v15995_v18, %v2379_v24  ;;  %v2394_v27 = vsel %vm2388_vm0, %v2379_v24, %v16006_v23 }
  0x92   : > { %3776 = vrot.lane.b32.xlu1 %v15869_v6, %s15783_s22  ;;  %706 = vrot.lane.b32.xlu0 %v15896_v14, %s15781_s20  ;;  %v2414_v28 = vsel %vm212_vm1, %v2393_v26, 0  ;;  %s15805_s20 = smov 102  }
  0x93   : > { %14194 = vmatprep.subr.msk.bf16.mxu0 %vm212_vm1, %v2394_v27  ;;  %14191 = vmatmul.mubr.msk.bf16.vlgmr.msra.gmra.mrb[0].mxu0 %vm208_vm2, %v14189_v25 }
  0x94   : > { %2514 = vmatpush1.bf16.msra.mxu0 %v2414_v28  ;;  %v181_v29 = vpop.permute.xlu1 %180  ;;  %v179_v30 = vpop.permute.xlu0 %178  ;;  %2545 = vmatprep.mubr.bf16.mxu0 %v19548_v0 }
  0x95   : > { %v199_v33 = vsel %vm198_vm3, %v179_v30, %v181_v29 }
  0x96   : > { %3780 = vrot.lane.b32.xlu1 %v15878_v9, %s15783_s22  ;;  %3778 = vrot.lane.b32.xlu0 %v15880_v10, %s15783_s22  ;;  %v214_v35 = vsel %vm212_vm1, %v199_v33, 0  ;;  %v452_v33 = vsel %vm212_vm1, %v15863_v5, 0 }
  0x98   : > { %v16027_v31 = vpop.permute.xlu1 %2384  ;;  %v183_v32 = vpop.permute.xlu0 %182 }
  0x99   : > { %v200_v34 = vsel %vm198_vm3, %v181_v29, %v183_v32 }
  0x9a   : > { %970 = vrot.lane.b32.xlu1 %v15871_v7, %s15784_s25  ;;  %968 = vrot.lane.b32.xlu0 %v15863_v5, %s15784_s25 }
  0x9b   : > { %14103 = vmatprep.subr.msk.bf16.mxu1 %vm212_vm1, %v200_v34  ;;  %14195 = vmatmul.mubr.msk.bf16.vlgmr.msra.gmra.mrb[4].mxu0 %vm208_vm2, %v14189_v25 }
  0x9c   : > { %244 = vmatpush1.bf16.msra.mxu1 %v214_v35  ;;  %v185_v36 = vpop.permute.xlu1 %184  ;;  %v2387_v37 = vpop.permute.xlu0 %2386  ;;  %2627 = vmatprep.mubr.bf16.mxu0 %v19548_v0 }
  0x9d   : > { %v2397_v39 = vsel %vm2388_vm0, %v16027_v31, %v2387_v37  ;;  %14198 = vmatprep.subr.msk.bf16.mxu0 %vm212_vm1, %v2387_v37  ;;  %v201_v41 = vsel %vm198_vm3, %v183_v32, %v185_v36  ;;  %v14211_v37 = vld [vmem:[%s19546_s1 + $0x28] sm:$0xf] }
  0x9e   : > { %3784 = vrot.lane.b32.xlu1 %v15889_v12, %s15783_s22  ;;  %972 = vrot.lane.b32.xlu0 %v15861_v4, %s15784_s25  ;;  %v2426_v40 = vsel %vm212_vm1, %v2397_v39, 0  ;;  %v220_v45 = vsel %vm212_vm1, %v201_v41, 0 }
  0x9f   : > { %2596 = vmatpush1.bf16.msra.mxu0 %v2426_v40  ;;  %14104 = vmatmul.mubr.msk.bf16.vlgmr.msra.gmra.mrb[0].mxu1 %vm208_vm2, %v16041_v38 }
  0xa0   : > { %v2649_v42 = vpop.permute.xlu1 %2648  ;;  %v187_v43 = vpop.permute.xlu0 %186  ;;  %316 = vmatprep.mubr.bf16.mxu1 %v19548_v0 }
  0xa1   : > { %v202_v44 = vsel %vm198_vm3, %v185_v36, %v187_v43 }
  0xa2   : > { %974 = vrot.lane.b32.xlu1 %v15894_v13, %s15784_s25  ;;  %3786 = vrot.lane.b32.xlu0 %v15896_v14, %s15783_s22 }
  0xa3   : > { %14105 = vmatprep.subr.msk.bf16.mxu1 %vm212_vm1, %v202_v44  ;;  %14199 = vmatmul.mubr.msk.bf16.vlgmr.msra.gmra.mrb[8].mxu0 %vm208_vm2, %v14189_v25  ;;  %v16137_v25 = vld [vmem:[%s15854_s14 + $0x28] ss:$0 sps:$4 sm:$0xff]   ;;  %v458_v44 = vsel %vm212_vm1, %v15861_v4, 0 }
  0xa4   : > { %285 = vmatpush1.bf16.msra.mxu1 %v220_v45  ;;  %v16064_v46 = vpop.permute.xlu1 %2652  ;;  %v2651_v47 = vpop.permute.xlu0 %2650  ;;  %2743 = vmatprep.mubr.bf16.mxu0 %v19548_v0 }
  0xa5   : > { %v2669_v48 = vsel %vm2668_vm4, %v2649_v42, %v2651_v47  ;;  %v2670_v49 = vsel %vm2668_vm4, %v2651_v47, %v16064_v46 }
  0xa6   : > { %4082 = vrot.lane.b32.xlu1 %v15863_v5, %s15785_s28  ;;  %976 = vrot.lane.b32.xlu0 %v15869_v6, %s15784_s25  ;;  %v2682_v50 = vsel %vm212_vm1, %v2669_v48, 0 }
  0xa7   : > { %14201 = vmatprep.subr.msk.bf16.mxu0 %vm212_vm1, %v2670_v49  ;;  %14106 = vmatmul.mubr.msk.bf16.vlgmr.msra.gmra.mrb[4].mxu1 %vm208_vm2, %v16041_v38 }
  0xa8   : > { %2712 = vmatpush1.bf16.msra.mxu0 %v2682_v50  ;;  %v191_v51 = vpop.permute.xlu1 %190  ;;  %v189_v52 = vpop.permute.xlu0 %188  ;;  %357 = vmatprep.mubr.bf16.mxu1 %v19548_v0 }
  0xa9   : > { %v203_v54 = vsel %vm198_vm3, %v187_v43, %v189_v52  ;;  %v204_v55 = vsel %vm198_vm3, %v189_v52, %v191_v51  ;;  %v16191_v43 = vld [vmem:[%s19546_s1] sm:$0xf] }
  0xaa   : > { %4086 = vrot.lane.b32.xlu1 %v15861_v4, %s15785_s28  ;;  %4084 = vrot.lane.b32.xlu0 %v15871_v7, %s15785_s28  ;;  %v226_v56 = vsel %vm212_vm1, %v203_v54, 0 }
  0xab   : > { %14107 = vmatprep.subr.msk.bf16.mxu1 %vm212_vm1, %v204_v55  ;;  %14202 = vmatmul.mubr.msk.bf16.vlgmr.msra.gmra.mrb[0].mxu0 %vm208_vm2, %v14200_v53 }
  0xac   : > { %326 = vmatpush1.bf16.msra.mxu1 %v226_v56  ;;  %v2659_v57 = vpop.permute.xlu1 %2658  ;;  %v16091_v58 = vpop.permute.xlu0 %2656  ;;  %2825 = vmatprep.mubr.bf16.mxu0 %v19548_v0 }
  0xad   : > { %v2673_v59 = vsel %vm2668_vm4, %v16091_v58, %v2659_v57 }
  0xae   : > { %980 = vrot.lane.b32.xlu1 %v15878_v9, %s15784_s25  ;;  %978 = vrot.lane.b32.xlu0 %v15880_v10, %s15784_s25  ;;  %v2694_v63 = vsel %vm212_vm1, %v2673_v59, 0 }
  0xaf   : > { %14108 = vmatmul.mubr.msk.bf16.vlgmr.msra.gmra.mrb[8].mxu1 %vm208_vm2, %v16041_v38 }
  0xb0   : > { %v193_v60 = vpop.permute.xlu1 %192  ;;  %v16102_v61 = vpop.permute.xlu0 %2660  ;;  %398 = vmatprep.mubr.bf16.mxu1 %v19548_v0 }
  0xb1   : > { %v2674_v62 = vsel %vm2668_vm4, %v2659_v57, %v16102_v61  ;;  %v205_v1 = vsel %vm198_vm3, %v191_v51, %v193_v60 }
  0xb2   : > { %4092 = vrot.lane.b32.xlu1 %v15880_v10, %s15785_s28  ;;  %4090 = vrot.lane.b32.xlu0 %v15869_v6, %s15785_s28  ;;  %v232_v11 = vsel %vm212_vm1, %v205_v1, 0 }
  0xb3   : > { %14205 = vmatprep.subr.msk.bf16.mxu0 %vm212_vm1, %v2674_v62 }
  0xb4   : > { %2794 = vmatpush1.bf16.msra.mxu0 %v2694_v63  ;;  %v16114_v2 = vpop.permute.xlu1 %2664  ;;  %v195_v3 = vpop.permute.xlu0 %194  ;;  %v470_v63 = vsel %vm212_vm1, %v15878_v9, 0 }
  0xb5   : > { %v206_v8 = vsel %vm198_vm3, %v193_v60, %v195_v3 }
  0xb6   : > { %982 = vrot.lane.b32.xlu1 %v15914_v15, %s15784_s25  ;;  %4094 = vrot.lane.b32.xlu0 %v15878_v9, %s15785_s28 }
  0xb7   : > { %14109 = vmatprep.subr.msk.bf16.mxu1 %vm212_vm1, %v206_v8  ;;  %14206 = vmatmul.mubr.msk.bf16.vlgmr.msra.gmra.mrb[4].mxu0 %vm208_vm2, %v14200_v53 }
  0xb8   : > { %367 = vmatpush1.bf16.msra.mxu1 %v232_v11  ;;  %v197_v17 = vpop.permute.xlu1 %196  ;;  %v2667_v19 = vpop.permute.xlu0 %2666  ;;  %2907 = vmatprep.mubr.bf16.mxu0 %v19548_v0  ;;  %v14222_v11 = vld [vmem:[%s19546_s1 + $0x2c] sm:$0xf] }
  0xb9   : > { %v207_v20 = vsel %vm198_vm3, %v195_v3, %v197_v17  ;;  %v2677_v21 = vsel %vm2668_vm4, %v16114_v2, %v2667_v19  ;;  %14209 = vmatprep.subr.msk.bf16.mxu0 %vm212_vm1, %v2667_v19  ;;  %14111 = vmatprep.subr.msk.bf16.mxu1 %vm212_vm1, %v197_v17  ;;  %vm4953_vm3 = vcmask 400384  }
  0xba   : > { %4098 = vrot.lane.b32.xlu1 %v15889_v12, %s15785_s28  ;;  %984 = vrot.lane.b32.xlu0 %v15889_v12, %s15784_s25  ;;  %v238_v22 = vsel %vm212_vm1, %v207_v20, 0  ;;  %v2706_v24 = vsel %vm212_vm1, %v2677_v21, 0  ;;  %v476_v21 = vsel %vm212_vm1, %v15889_v12, 0 }
  0xbb   : > { %14110 = vmatmul.mubr.msk.bf16.vlgmr.msra.gmra.mrb[12].mxu1 %vm208_vm2, %v16041_v38  ;;  %2876 = vmatpush1.bf16.msra.mxu0 %v2706_v24 }
  0xbc   : > { %408 = vmatpush1.bf16.msra.mxu1 %v238_v22  ;;  %v2931_v26 = vpop.permute.xlu1 %2930  ;;  %v2929_v27 = vpop.permute.xlu0 %2928  ;;  %439 = vmatprep.mubr.bf16.mxu1 %v19548_v0 }
  0xbd   : > { %14113 = vmatprep.subr.msk.bf16.mxu1 %vm212_vm1, %v15871_v7  ;;  %v2949_v28 = vsel %vm2948_vm5, %v2929_v27, %v2931_v26 }
  0xbe   : > { %4102 = vrot.lane.b32.xlu1 %v16137_v25, %s15785_s28  ;;  %4100 = vrot.lane.b32.xlu0 %v15896_v14, %s15785_s28  ;;  %v2962_v34 = vsel %vm212_vm1, %v2949_v28, 0 }
  0xbf   : > { %14210 = vmatmul.mubr.msk.bf16.vlgmr.msra.gmra.mrb[8].mxu0 %vm208_vm2, %v14200_v53  ;;  %v464_v53 = vsel %vm212_vm1, %v15869_v6, 0 }
  0xc0   : > { %v16150_v29 = vpop.permute.xlu1 %2936  ;;  %v16152_v30 = vpop.permute.xlu0 %2932  ;;  %3023 = vmatprep.mubr.bf16.mxu0 %v19548_v0 }
  0xc1   : > { %v2950_v32 = vsel %vm2948_vm5, %v2931_v26, %v16152_v30 }
  0xc2   : > { %4365 = vrot.lane.b32.xlu1 %v15863_v5, %s15786_s3  ;;  %986 = vrot.lane.b32.xlu0 %v15896_v14, %s15784_s25  ;;  %s15789_s25 = smov 123  }
  0xc3   : > { %14112 = vmatmul.mubr.msk.bf16.vlgmr.msra.gmra.mrb[16].mxu1 %vm208_vm2, %v16041_v38  ;;  %14212 = vmatprep.subr.msk.bf16.mxu0 %vm212_vm1, %v2950_v32 }
  0xc4   : > { %2992 = vmatpush1.bf16.msra.mxu0 %v2962_v34  ;;  %v16167_v35 = vpop.permute.xlu1 %2940  ;;  %v2939_v36 = vpop.permute.xlu0 %2938  ;;  %482 = vmatpush1.bf16.msra.mxu1 %v452_v33 }
  0xc5   : > { %v2953_v39 = vsel %vm2948_vm5, %v16150_v29, %v2939_v36  ;;  %v2954_v40 = vsel %vm2948_vm5, %v2939_v36, %v16167_v35  ;;  %513 = vmatprep.mubr.bf16.mxu1 %v19548_v0  ;;  %14115 = vmatprep.subr.msk.bf16.mxu1 %vm212_vm1, %v15894_v13 }
  0xc6   : > { %4369 = vrot.lane.b32.xlu1 %v15861_v4, %s15786_s3  ;;  %4367 = vrot.lane.b32.xlu0 %v15871_v7, %s15786_s3  ;;  %v2974_v38 = vsel %vm212_vm1, %v2953_v39, 0 }
  0xc7   : > { %14213 = vmatmul.mubr.msk.bf16.vlgmr.msra.gmra.mrb[0].mxu0 %vm208_vm2, %v14211_v37  ;;  %14216 = vmatprep.subr.msk.bf16.mxu0 %vm212_vm1, %v2954_v40 }
  0xc8   : > { %3074 = vmatpush1.bf16.msra.mxu0 %v2974_v38  ;;  %v2947_v41 = vpop.permute.xlu1 %2946  ;;  %v16186_v42 = vpop.permute.xlu0 %2944  ;;  %3105 = vmatprep.mubr.bf16.mxu0 %v19548_v0 }
  0xc9   : > { %14220 = vmatprep.subr.msk.bf16.mxu0 %vm212_vm1, %v2947_v41  ;;  %v2957_v45 = vsel %vm2948_vm5, %v16186_v42, %v2947_v41 }
  0xca   : > { %1250 = vrot.lane.b32.xlu1 %v15871_v7, %s15787_s8  ;;  %1248 = vrot.lane.b32.xlu0 %v15863_v5, %s15787_s8  ;;  %v2986_v49 = vsel %vm212_vm1, %v2957_v45, 0 }
  0xcb   : > { %14114 = vmatmul.mubr.msk.bf16.vlgmr.msra.gmra.mrb[0].mxu1 %vm208_vm2, %v16191_v43 }
  0xcc   : > { %v3211_v47 = vpop.permute.xlu1 %3210  ;;  %v3209_v48 = vpop.permute.xlu0 %3208  ;;  %523 = vmatpush1.bf16.msra.mxu1 %v458_v44  ;;  %554 = vmatprep.mubr.bf16.mxu1 %v19548_v0 }
  0xcd   : > { %14117 = vmatprep.subr.msk.bf16.mxu1 %vm212_vm1, %v15880_v10  ;;  %v3229_v54 = vsel %vm3228_vm6, %v3209_v48, %v3211_v47  ;;  %v16323_v48 = vld [vmem:[%s19546_s1 + $0x8] sm:$0xf] }
  0xce   : > { %4373 = vrot.lane.b32.xlu1 %v15869_v6, %s15786_s3  ;;  %1252 = vrot.lane.b32.xlu0 %v15861_v4, %s15787_s8  ;;  %v3242_v59 = vsel %vm212_vm1, %v3229_v54, 0 }
  0xcf   : > { %14217 = vmatmul.mubr.msk.bf16.vlgmr.msra.gmra.mrb[4].mxu0 %vm208_vm2, %v14211_v37 }
  0xd0   : > { %3156 = vmatpush1.bf16.msra.mxu0 %v2986_v49  ;;  %v16214_v50 = vpop.permute.xlu1 %3216  ;;  %v16216_v51 = vpop.permute.xlu0 %3212  ;;  %3187 = vmatprep.mubr.bf16.mxu0 %v19548_v0 }
  0xd1   : > { %v3230_v52 = vsel %vm3228_vm6, %v3211_v47, %v16216_v51 }
  0xd2   : > { %4377 = vrot.lane.b32.xlu1 %v15878_v9, %s15786_s3  ;;  %4375 = vrot.lane.b32.xlu0 %v15880_v10, %s15786_s3 }
  0xd3   : > { %14116 = vmatmul.mubr.msk.bf16.vlgmr.msra.gmra.mrb[4].mxu1 %vm208_vm2, %v16191_v43  ;;  %14223 = vmatprep.subr.msk.bf16.mxu0 %vm212_vm1, %v3230_v52 }
  0xd4   : > { %v16231_v55 = vpop.permute.xlu1 %3220  ;;  %v3219_v56 = vpop.permute.xlu0 %3218  ;;  %564 = vmatpush1.bf16.msra.mxu1 %v464_v53  ;;  %595 = vmatprep.mubr.bf16.mxu1 %v19548_v0 }
  0xd5   : > { %14119 = vmatprep.subr.msk.bf16.mxu1 %vm212_vm1, %v15914_v15  ;;  %v3234_v57 = vsel %vm3228_vm6, %v3219_v56, %v16231_v55  ;;  %v3233_v1 = vsel %vm3228_vm6, %v16214_v50, %v3219_v56 }
  0xd6   : > { %1256 = vrot.lane.b32.xlu1 %v15869_v6, %s15787_s8  ;;  %1254 = vrot.lane.b32.xlu0 %v15894_v13, %s15787_s8  ;;  %v3254_v17 = vsel %vm212_vm1, %v3233_v1, 0 }
  0xd7   : > { %14221 = vmatmul.mubr.msk.bf16.vlgmr.msra.gmra.mrb[8].mxu0 %vm208_vm2, %v14211_v37 }
  0xd8   : > { %3272 = vmatpush1.bf16.msra.mxu0 %v3242_v59  ;;  %v3227_v60 = vpop.permute.xlu1 %3226  ;;  %v16244_v62 = vpop.permute.xlu0 %3224  ;;  %3303 = vmatprep.mubr.bf16.mxu0 %v19548_v0 }
  0xd9   : > { %14227 = vmatprep.subr.msk.bf16.mxu0 %vm212_vm1, %v3234_v57  ;;  %v3237_v24 = vsel %vm3228_vm6, %v16244_v62, %v3227_v60  ;;  %v14233_v57 = vld [vmem:[%s19546_s1 + $0x30] sm:$0xf] }
  0xda   : > { %4383 = vrot.lane.b32.xlu1 %v15896_v14, %s15786_s3  ;;  %4381 = vrot.lane.b32.xlu0 %v15889_v12, %s15786_s3  ;;  %v3266_v32 = vsel %vm212_vm1, %v3237_v24, 0 }
  0xdb   : > { %14118 = vmatmul.mubr.msk.bf16.vlgmr.msra.gmra.mrb[8].mxu1 %vm208_vm2, %v16191_v43 }
  0xdc   : > { %v691_v3 = vpop.permute.xlu1 %690  ;;  %v689_v8 = vpop.permute.xlu0 %688  ;;  %605 = vmatpush1.bf16.msra.mxu1 %v470_v63  ;;  %636 = vmatprep.mubr.bf16.mxu1 %v19548_v0 }
  0xdd   : > { %14121 = vmatprep.subr.msk.bf16.mxu1 %vm212_vm1, %v15896_v14  ;;  %v709_v33 = vsel %vm708_vm7, %v689_v8, %v691_v3 }
  0xde   : > { %1258 = vrot.lane.b32.xlu1 %v15880_v10, %s15787_s8  ;;  %4385 = vrot.lane.b32.xlu0 %v16137_v25, %s15786_s3  ;;  %v722_v39 = vsel %vm212_vm1, %v709_v33, 0 }
  0xdf   : > { %14224 = vmatmul.mubr.msk.bf16.vlgmr.msra.gmra.mrb[0].mxu0 %vm208_vm2, %v14222_v11 }
  0xe0   : > { %3354 = vmatpush1.bf16.msra.mxu0 %v3254_v17  ;;  %v3489_v19 = vpop.permute.xlu1 %3488  ;;  %v693_v20 = vpop.permute.xlu0 %692  ;;  %3385 = vmatprep.mubr.bf16.mxu0 %v19548_v0 }
  0xe1   : > { %14231 = vmatprep.subr.msk.bf16.mxu0 %vm212_vm1, %v3227_v60  ;;  %v710_v22 = vsel %vm708_vm7, %v691_v3, %v693_v20 }
  0xe2   : > { %4648 = vrot.lane.b32.xlu1 %v15863_v5, %s15788_s13  ;;  %1260 = vrot.lane.b32.xlu0 %v15878_v9, %s15787_s8 }
  0xe3   : > { %14120 = vmatmul.mubr.msk.bf16.vlgmr.msra.gmra.mrb[12].mxu1 %vm208_vm2, %v16191_v43 }
  0xe4   : > { %646 = vmatpush1.bf16.msra.mxu1 %v476_v21  ;;  %v16283_v26 = vpop.permute.xlu1 %3492  ;;  %v3491_v27 = vpop.permute.xlu0 %3490  ;;  %677 = vmatprep.mubr.bf16.mxu1 %v19548_v0 }
  0xe5   : > { %14124 = vmatprep.subr.msk.bf16.mxu1 %vm212_vm1, %v710_v22  ;;  %v3510_v28 = vsel %vm3508_vm8, %v3491_v27, %v16283_v26  ;;  %v3509_v40 = vsel %vm3508_vm8, %v3489_v19, %v3491_v27 }
  0xe6   : > { %4652 = vrot.lane.b32.xlu1 %v15861_v4, %s15788_s13  ;;  %4650 = vrot.lane.b32.xlu0 %v15871_v7, %s15788_s13 }
  0xe7   : > { %14228 = vmatmul.mubr.msk.bf16.vlgmr.msra.gmra.mrb[4].mxu0 %vm208_vm2, %v14222_v11 }
  0xe8   : > { %3436 = vmatpush1.bf16.msra.mxu0 %v3266_v32  ;;  %v697_v34 = vpop.permute.xlu1 %696  ;;  %v695_v36 = vpop.permute.xlu0 %694  ;;  %3467 = vmatprep.mubr.bf16.mxu0 %v19548_v0 }
  0xe9   : > { %14234 = vmatprep.subr.msk.bf16.mxu0 %vm212_vm1, %v3510_v28  ;;  %v712_v37 = vsel %vm708_vm7, %v695_v36, %v697_v34  ;;  %v711_v44 = vsel %vm708_vm7, %v693_v20, %v695_v36 }
  0xea   : > { %1264 = vrot.lane.b32.xlu1 %v15889_v12, %s15787_s8  ;;  %1262 = vrot.lane.b32.xlu0 %v15914_v15, %s15787_s8  ;;  %v728_v52 = vsel %vm212_vm1, %v711_v44, 0 }
  0xeb   : > { %14122 = vmatmul.mubr.msk.bf16.vlgmr.msra.gmra.mrb[16].mxu1 %vm208_vm2, %v16191_v43  ;;  %v3522_v43 = vsel %vm212_vm1, %v3509_v40, 0 }
  0xec   : > { %752 = vmatpush1.bf16.msra.mxu1 %v722_v39  ;;  %v3499_v38 = vpop.permute.xlu1 %3498  ;;  %v16307_v41 = vpop.permute.xlu0 %3496  ;;  %783 = vmatprep.mubr.bf16.mxu1 %v19548_v0 }
  0xed   : > { %14126 = vmatprep.subr.msk.bf16.mxu1 %vm212_vm1, %v712_v37  ;;  %v3513_v53 = vsel %vm3508_vm8, %v16307_v41, %v3499_v38 }
  0xee   : > { %4658 = vrot.lane.b32.xlu1 %v15880_v10, %s15788_s13  ;;  %4656 = vrot.lane.b32.xlu0 %v15869_v6, %s15788_s13  ;;  %v3534_v60 = vsel %vm212_vm1, %v3513_v53, 0  ;;  %v14244_v53 = vld [vmem:[%s19546_s1 + $0x34] sm:$0xf] }
  0xef   : > { %14232 = vmatmul.mubr.msk.bf16.vlgmr.msra.gmra.mrb[8].mxu0 %vm208_vm2, %v14222_v11 }
  0xf0   : > { %3552 = vmatpush1.bf16.msra.mxu0 %v3522_v43  ;;  %v699_v45 = vpop.permute.xlu1 %698  ;;  %v16318_v47 = vpop.permute.xlu0 %3500  ;;  %3583 = vmatprep.mubr.bf16.mxu0 %v19548_v0 }
  0xf1   : > { %v3514_v49 = vsel %vm3508_vm8, %v3499_v38, %v16318_v47  ;;  %v713_v63 = vsel %vm708_vm7, %v697_v34, %v699_v45 }
  0xf2   : > { %1266 = vrot.lane.b32.xlu1 %v15896_v14, %s15787_s8  ;;  %4660 = vrot.lane.b32.xlu0 %v15878_v9, %s15788_s13  ;;  %v734_v8 = vsel %vm212_vm1, %v713_v63, 0  ;;  %s15792_s8 = smov 122  }
  0xf3   : > { %14125 = vmatmul.mubr.msk.bf16.vlgmr.msra.gmra.mrb[0].mxu1 %vm208_vm2, %v16323_v48  ;;  %14238 = vmatprep.subr.msk.bf16.mxu0 %vm212_vm1, %v3514_v49 }
  0xf4   : > { %793 = vmatpush1.bf16.msra.mxu1 %v728_v52  ;;  %v16338_v54 = vpop.permute.xlu1 %3504  ;;  %v701_v56 = vpop.permute.xlu0 %700  ;;  %824 = vmatprep.mubr.bf16.mxu1 %v19548_v0 }
  0xf5   : > { %v714_v59 = vsel %vm708_vm7, %v699_v45, %v701_v56 }
  0xf6   : > { %4666 = vrot.lane.b32.xlu1 %v15896_v14, %s15788_s13  ;;  %4664 = vrot.lane.b32.xlu0 %v15889_v12, %s15788_s13 }
  0xf7   : > { %14128 = vmatprep.subr.msk.bf16.mxu1 %vm212_vm1, %v714_v59  ;;  %14235 = vmatmul.mubr.msk.bf16.vlgmr.msra.gmra.mrb[0].mxu0 %vm208_vm2, %v14233_v57 }
  0xf8   : > { %3634 = vmatpush1.bf16.msra.mxu0 %v3534_v60  ;;  %v703_v1 = vpop.permute.xlu1 %702  ;;  %v3507_v3 = vpop.permute.xlu0 %3506  ;;  %3665 = vmatprep.mubr.bf16.mxu0 %v19548_v0 }
  0xf9   : > { %14242 = vmatprep.subr.msk.bf16.mxu0 %vm212_vm1, %v3507_v3  ;;  %v3517_v11 = vsel %vm3508_vm8, %v16338_v54, %v3507_v3  ;;  %v715_v22 = vsel %vm708_vm7, %v701_v56, %v703_v1 }
  0xfa   : > { %1528 = vrot.lane.b32.xlu1 %v15863_v5, %s15789_s25  ;;  %4668 = vrot.lane.b32.xlu0 %v16137_v25, %s15788_s13  ;;  %v3546_v21 = vsel %vm212_vm1, %v3517_v11, 0  ;;  %v740_v32 = vsel %vm212_vm1, %v715_v22, 0 }
  0xfb   : > { %14127 = vmatmul.mubr.msk.bf16.vlgmr.msra.gmra.mrb[4].mxu1 %vm208_vm2, %v16323_v48 }
  0xfc   : > { %834 = vmatpush1.bf16.msra.mxu1 %v734_v8  ;;  %v3769_v17 = vpop.permute.xlu1 %3768  ;;  %v705_v19 = vpop.permute.xlu0 %704  ;;  %865 = vmatprep.mubr.bf16.mxu1 %v19548_v0 }
  0xfd   : > { %v716_v20 = vsel %vm708_vm7, %v703_v1, %v705_v19 }
  0xfe   : > { %1532 = vrot.lane.b32.xlu1 %v15861_v4, %s15789_s25  ;;  %1530 = vrot.lane.b32.xlu0 %v15871_v7, %s15789_s25 }
  0xff   : > { %14130 = vmatprep.subr.msk.bf16.mxu1 %vm212_vm1, %v716_v20  ;;  %14239 = vmatmul.mubr.msk.bf16.vlgmr.msra.gmra.mrb[4].mxu0 %vm208_vm2, %v14233_v57 }
 0x100   : > { %3716 = vmatpush1.bf16.msra.mxu0 %v3546_v21  ;;  %v16374_v24 = vpop.permute.xlu1 %3772  ;;  %v3771_v27 = vpop.permute.xlu0 %3770  ;;  %3747 = vmatprep.mubr.bf16.mxu0 %v19548_v0  ;;  %v16451_v21 = vld [vmem:[%s19546_s1 + $0xc] sm:$0xf] }
 0x101   : > { %v3790_v28 = vsel %vm3788_vm9, %v3771_v27, %v16374_v24  ;;  %v3789_v33 = vsel %vm3788_vm9, %v3769_v17, %v3771_v27 }
 0x102   : > { %4933 = vrot.lane.b32.xlu1 %v15871_v7, %s15790_s26  ;;  %4931 = vrot.lane.b32.xlu0 %v15863_v5, %s15790_s26  ;;  %v3802_v37 = vsel %vm212_vm1, %v3789_v33, 0 }
 0x103   : > { %14129 = vmatmul.mubr.msk.bf16.vlgmr.msra.gmra.mrb[8].mxu1 %vm208_vm2, %v16323_v48  ;;  %14245 = vmatprep.subr.msk.bf16.mxu0 %vm212_vm1, %v3790_v28 }
 0x104   : > { %875 = vmatpush1.bf16.msra.mxu1 %v740_v32  ;;  %v16388_v34 = vpop.permute.xlu1 %3776  ;;  %v707_v36 = vpop.permute.xlu0 %706  ;;  %906 = vmatprep.mubr.bf16.mxu1 %v19548_v0 }
 0x105   : > { %14132 = vmatprep.subr.msk.bf16.mxu1 %vm212_vm1, %v707_v36  ;;  %v717_v39 = vsel %vm708_vm7, %v705_v19, %v707_v36  ;;  %vm5236_vm7 = vcmask 392192  }
 0x106   : > { %1534 = vrot.lane.b32.xlu1 %v15894_v13, %s15789_s25  ;;  %4935 = vrot.lane.b32.xlu0 %v15861_v4, %s15790_s26  ;;  %v746_v44 = vsel %vm212_vm1, %v717_v39, 0 }
 0x107   : > { %14243 = vmatmul.mubr.msk.bf16.vlgmr.msra.gmra.mrb[8].mxu0 %vm208_vm2, %v14233_v57 }
 0x108   : > { %3832 = vmatpush1.bf16.msra.mxu0 %v3802_v37  ;;  %v16399_v40 = vpop.permute.xlu1 %3780  ;;  %v3779_v38 = vpop.permute.xlu0 %3778  ;;  %3863 = vmatprep.mubr.bf16.mxu0 %v19548_v0 }
 0x109   : > { %v3794_v43 = vsel %vm3788_vm9, %v3779_v38, %v16399_v40  ;;  %v3793_v45 = vsel %vm3788_vm9, %v16388_v34, %v3779_v38 }
 0x10a   : > { %4939 = vrot.lane.b32.xlu1 %v15869_v6, %s15790_s26  ;;  %1536 = vrot.lane.b32.xlu0 %v15869_v6, %s15789_s25  ;;  %v3814_v56 = vsel %vm212_vm1, %v3793_v45, 0 }
 0x10b   : > { %14131 = vmatmul.mubr.msk.bf16.vlgmr.msra.gmra.mrb[12].mxu1 %vm208_vm2, %v16323_v48  ;;  %14249 = vmatprep.subr.msk.bf16.mxu0 %vm212_vm1, %v3794_v43 }
 0x10c   : > { %916 = vmatpush1.bf16.msra.mxu1 %v746_v44  ;;  %v971_v49 = vpop.permute.xlu1 %970  ;;  %v969_v52 = vpop.permute.xlu0 %968  ;;  %947 = vmatprep.mubr.bf16.mxu1 %v19548_v0 }
 0x10d   : > { %v989_v57 = vsel %vm988_vm10, %v969_v52, %v971_v49 }
 0x10e   : > { %4943 = vrot.lane.b32.xlu1 %v15878_v9, %s15790_s26  ;;  %4941 = vrot.lane.b32.xlu0 %v15880_v10, %s15790_s26  ;;  %v1002_v1 = vsel %vm212_vm1, %v989_v57, 0 }
 0x10f   : > { %14246 = vmatmul.mubr.msk.bf16.vlgmr.msra.gmra.mrb[0].mxu0 %vm208_vm2, %v14244_v53 }
 0x110   : > { %3914 = vmatpush1.bf16.msra.mxu0 %v3814_v56  ;;  %v16425_v59 = vpop.permute.xlu1 %3784  ;;  %v973_v60 = vpop.permute.xlu0 %972  ;;  %3945 = vmatprep.mubr.bf16.mxu0 %v19548_v0 }
 0x111   : > { %v990_v63 = vsel %vm988_vm10, %v971_v49, %v973_v60 }
 0x112   : > { %1540 = vrot.lane.b32.xlu1 %v15878_v9, %s15789_s25  ;;  %1538 = vrot.lane.b32.xlu0 %v15880_v10, %s15789_s25 }
 0x113   : > { %14135 = vmatprep.subr.msk.bf16.mxu1 %vm212_vm1, %v990_v63  ;;  %14133 = vmatmul.mubr.msk.bf16.vlgmr.msra.gmra.mrb[16].mxu1 %vm208_vm2, %v16323_v48 }
 0x114   : > { %1032 = vmatpush1.bf16.msra.mxu1 %v1002_v1  ;;  %v975_v3 = vpop.permute.xlu1 %974  ;;  %v3787_v8 = vpop.permute.xlu0 %3786  ;;  %1063 = vmatprep.mubr.bf16.mxu1 %v19548_v0 }
 0x115   : > { %v3797_v11 = vsel %vm3788_vm9, %v16425_v59, %v3787_v8  ;;  %14253 = vmatprep.subr.msk.bf16.mxu0 %vm212_vm1, %v3787_v8  ;;  %v991_v48 = vsel %vm988_vm10, %v973_v60, %v975_v3 }
 0x116   : > { %4949 = vrot.lane.b32.xlu1 %v15896_v14, %s15790_s26  ;;  %4947 = vrot.lane.b32.xlu0 %v15889_v12, %s15790_s26  ;;  %v3826_v17 = vsel %vm212_vm1, %v3797_v11, 0  ;;  %v1008_v27 = vsel %vm212_vm1, %v991_v48, 0 }
 0x117   : > { %14250 = vmatmul.mubr.msk.bf16.vlgmr.msra.gmra.mrb[4].mxu0 %vm208_vm2, %v14244_v53 }
 0x118   : > { %3996 = vmatpush1.bf16.msra.mxu0 %v3826_v17  ;;  %v4083_v19 = vpop.permute.xlu1 %4082  ;;  %v977_v20 = vpop.permute.xlu0 %976  ;;  %4027 = vmatprep.mubr.bf16.mxu0 %v19548_v0 }
 0x119   : > { %v992_v22 = vsel %vm988_vm10, %v975_v3, %v977_v20 }
 0x11a   : > { %1542 = vrot.lane.b32.xlu1 %v15914_v15, %s15789_s25  ;;  %4951 = vrot.lane.b32.xlu0 %v16137_v25, %s15790_s26 }
 0x11b   : > { %14137 = vmatprep.subr.msk.bf16.mxu1 %vm212_vm1, %v992_v22  ;;  %14136 = vmatmul.mubr.msk.bf16.vlgmr.msra.gmra.mrb[0].mxu1 %vm208_vm2, %v16451_v21 }
 0x11c   : > { %1073 = vmatpush1.bf16.msra.mxu1 %v1008_v27  ;;  %v16463_v28 = vpop.permute.xlu1 %4086  ;;  %v4085_v32 = vpop.permute.xlu0 %4084  ;;  %1104 = vmatprep.mubr.bf16.mxu1 %v19548_v0 }
 0x11d   : > { %v4105_v33 = vsel %vm4104_vm11, %v4083_v19, %v4085_v32  ;;  %v4106_v36 = vsel %vm4104_vm11, %v4085_v32, %v16463_v28 }
 0x11e   : > { %5214 = vrot.lane.b32.xlu1 %v15863_v5, %s15791_s5  ;;  %1544 = vrot.lane.b32.xlu0 %v15889_v12, %s15789_s25  ;;  %v4119_v37 = vsel %vm212_vm1, %v4105_v33, 0 }
 0x11f   : > { %14267 = vmatprep.subr.msk.bf16.mxu0 %vm212_vm1, %v4106_v36  ;;  %14254 = vmatmul.mubr.msk.bf16.vlgmr.msra.gmra.mrb[8].mxu0 %vm208_vm2, %v14244_v53  ;;  %v14255_v53 = vld [vmem:[%s19546_s1 + $0x38] sm:$0xf] }
 0x120   : > { %4149 = vmatpush1.bf16.msra.mxu0 %v4119_v37  ;;  %v981_v39 = vpop.permute.xlu1 %980  ;;  %v979_v38 = vpop.permute.xlu0 %978  ;;  %4180 = vmatprep.mubr.bf16.mxu0 %v19548_v0 }
 0x121   : > { %v993_v43 = vsel %vm988_vm10, %v977_v20, %v979_v38  ;;  %v994_v44 = vsel %vm988_vm10, %v979_v38, %v981_v39 }
 0x122   : > { %5218 = vrot.lane.b32.xlu1 %v15861_v4, %s15791_s5  ;;  %5216 = vrot.lane.b32.xlu0 %v15871_v7, %s15791_s5  ;;  %v1014_v45 = vsel %vm212_vm1, %v993_v43, 0 }
 0x123   : > { %14139 = vmatprep.subr.msk.bf16.mxu1 %vm212_vm1, %v994_v44  ;;  %14138 = vmatmul.mubr.msk.bf16.vlgmr.msra.gmra.mrb[4].mxu1 %vm208_vm2, %v16451_v21 }
 0x124   : > { %1114 = vmatpush1.bf16.msra.mxu1 %v1014_v45  ;;  %v4093_v49 = vpop.permute.xlu1 %4092  ;;  %v16487_v52 = vpop.permute.xlu0 %4090  ;;  %1145 = vmatprep.mubr.bf16.mxu1 %v19548_v0 }
 0x125   : > { %v4109_v56 = vsel %vm4104_vm11, %v16487_v52, %v4093_v49 }
 0x126   : > { %5222 = vrot.lane.b32.xlu1 %v15869_v6, %s15791_s5  ;;  %1546 = vrot.lane.b32.xlu0 %v15896_v14, %s15789_s25  ;;  %v4131_v1 = vsel %vm212_vm1, %v4109_v56, 0  ;;  %s15798_s25 = smov 12  }
 0x127   : > { %14268 = vmatmul.mubr.msk.bf16.vlgmr.msra.gmra.mrb[0].mxu0 %vm208_vm2, %v14255_v53 }
 0x128   : > { %v983_v57 = vpop.permute.xlu1 %982  ;;  %v16500_v60 = vpop.permute.xlu0 %4094  ;;  %4262 = vmatprep.mubr.bf16.mxu0 %v19548_v0 }
 0x129   : > { %v4110_v63 = vsel %vm4104_vm11, %v4093_v49, %v16500_v60  ;;  %v995_v3 = vsel %vm988_vm10, %v981_v39, %v983_v57 }
 0x12a   : > { %5226 = vrot.lane.b32.xlu1 %v15878_v9, %s15791_s5  ;;  %5224 = vrot.lane.b32.xlu0 %v15880_v10, %s15791_s5  ;;  %v1020_v48 = vsel %vm212_vm1, %v995_v3, 0 }
 0x12b   : > { %14271 = vmatprep.subr.msk.bf16.mxu0 %vm212_vm1, %v4110_v63  ;;  %14140 = vmatmul.mubr.msk.bf16.vlgmr.msra.gmra.mrb[8].mxu1 %vm208_vm2, %v16451_v21 }
 0x12c   : > { %4231 = vmatpush1.bf16.msra.mxu0 %v4131_v1  ;;  %v16514_v8 = vpop.permute.xlu1 %4098  ;;  %v985_v11 = vpop.permute.xlu0 %984  ;;  %1186 = vmatprep.mubr.bf16.mxu1 %v19548_v0 }
 0x12d   : > { %v996_v17 = vsel %vm988_vm10, %v983_v57, %v985_v11  ;;  %v16563_v57 = vld [vmem:[%s19546_s1 + $0x3c] sm:$0xf] }
 0x12e   : > { %1810 = vrot.lane.b32.xlu1 %v15871_v7, %s15792_s8  ;;  %1808 = vrot.lane.b32.xlu0 %v15863_v5, %s15792_s8 }
 0x12f   : > { %14141 = vmatprep.subr.msk.bf16.mxu1 %vm212_vm1, %v996_v17  ;;  %14272 = vmatmul.mubr.msk.bf16.vlgmr.msra.gmra.mrb[4].mxu0 %vm208_vm2, %v14255_v53 }
 0x130   : > { %1155 = vmatpush1.bf16.msra.mxu1 %v1020_v48  ;;  %v4103_v19 = vpop.permute.xlu1 %4102  ;;  %v4101_v20 = vpop.permute.xlu0 %4100  ;;  %4344 = vmatprep.mubr.bf16.mxu0 %v19548_v0 }
 0x131   : > { %v4113_v22 = vsel %vm4104_vm11, %v16514_v8, %v4101_v20  ;;  %v4114_v27 = vsel %vm4104_vm11, %v4101_v20, %v4103_v19  ;;  %v16588_v19 = vld [vmem:[%s19546_s1 + $0x10] sm:$0xf] }
 0x132   : > { %5230 = vrot.lane.b32.xlu1 %v15889_v12, %s15791_s5  ;;  %1812 = vrot.lane.b32.xlu0 %v15861_v4, %s15792_s8  ;;  %v4143_v32 = vsel %vm212_vm1, %v4113_v22, 0 }
 0x133   : > { %14275 = vmatprep.subr.msk.bf16.mxu0 %vm212_vm1, %v4114_v27  ;;  %14142 = vmatmul.mubr.msk.bf16.vlgmr.msra.gmra.mrb[12].mxu1 %vm208_vm2, %v16451_v21 }
 0x134   : > { %4313 = vmatpush1.bf16.msra.mxu0 %v4143_v32  ;;  %v4366_v33 = vpop.permute.xlu1 %4365  ;;  %v987_v36 = vpop.permute.xlu0 %986  ;;  %1227 = vmatprep.mubr.bf16.mxu1 %v19548_v0 }
 0x135   : > { %v997_v37 = vsel %vm988_vm10, %v985_v11, %v987_v36  ;;  %14143 = vmatprep.subr.msk.bf16.mxu1 %vm212_vm1, %v987_v36  ;;  %vm1828_vm10 = vcmask 998400  }
 0x136   : > { %5234 = vrot.lane.b32.xlu1 %v16137_v25, %s15791_s5  ;;  %5232 = vrot.lane.b32.xlu0 %v15896_v14, %s15791_s5  ;;  %v1026_v39 = vsel %vm212_vm1, %v997_v37, 0 }
 0x137   : > { %1196 = vmatpush1.bf16.msra.mxu1 %v1026_v39  ;;  %14276 = vmatmul.mubr.msk.bf16.vlgmr.msra.gmra.mrb[8].mxu0 %vm208_vm2, %v14255_v53 }
 0x138   : > { %v16546_v38 = vpop.permute.xlu1 %4369  ;;  %v4368_v43 = vpop.permute.xlu0 %4367  ;;  %4463 = vmatprep.mubr.bf16.mxu0 %v19548_v0 }
 0x139   : > { %v4388_v44 = vsel %vm4387_vm12, %v4366_v33, %v4368_v43  ;;  %v4389_v45 = vsel %vm4387_vm12, %v4368_v43, %v16546_v38 }
 0x13a   : > { %1816 = vrot.lane.b32.xlu1 %v15869_v6, %s15792_s8  ;;  %1814 = vrot.lane.b32.xlu0 %v15894_v13, %s15792_s8  ;;  %v4402_v49 = vsel %vm212_vm1, %v4388_v44, 0 }
 0x13b   : > { %14278 = vmatprep.subr.msk.bf16.mxu0 %vm212_vm1, %v4389_v45  ;;  %14144 = vmatmul.mubr.msk.bf16.vlgmr.msra.gmra.mrb[16].mxu1 %vm208_vm2, %v16451_v21 }
 0x13c   : > { %4432 = vmatpush1.bf16.msra.mxu0 %v4402_v49  ;;  %v1251_v53 = vpop.permute.xlu1 %1250  ;;  %v1249_v56 = vpop.permute.xlu0 %1248  ;;  %1343 = vmatprep.mubr.bf16.mxu1 %v19548_v0 }
 0x13d   : > { %v1269_v21 = vsel %vm1268_vm13, %v1249_v56, %v1251_v53 }
 0x13e   : > { %5499 = vrot.lane.b32.xlu1 %v15871_v7, %s15793_s16  ;;  %5497 = vrot.lane.b32.xlu0 %v15863_v5, %s15793_s16  ;;  %v1282_v11 = vsel %vm212_vm1, %v1269_v21, 0 }
 0x13f   : > { %14279 = vmatmul.mubr.msk.bf16.vlgmr.msra.gmra.mrb[0].mxu0 %vm208_vm2, %v16563_v57 }
 0x140   : > { %v16573_v63 = vpop.permute.xlu1 %4373  ;;  %v1253_v1 = vpop.permute.xlu0 %1252  ;;  %4545 = vmatprep.mubr.bf16.mxu0 %v19548_v0 }
 0x141   : > { %v1270_v3 = vsel %vm1268_vm13, %v1251_v53, %v1253_v1 }
 0x142   : > { %1818 = vrot.lane.b32.xlu1 %v15880_v10, %s15792_s8  ;;  %5501 = vrot.lane.b32.xlu0 %v15861_v4, %s15793_s16 }
 0x143   : > { %14146 = vmatprep.subr.msk.bf16.mxu1 %vm212_vm1, %v1270_v3 }
 0x144   : > { %1312 = vmatpush1.bf16.msra.mxu1 %v1282_v11  ;;  %v16583_v17 = vpop.permute.xlu1 %4377  ;;  %v4376_v48 = vpop.permute.xlu0 %4375 }
 0x145   : > { %v4392_v20 = vsel %vm4387_vm12, %v16573_v63, %v4376_v48  ;;  %v4393_v22 = vsel %vm4387_vm12, %v4376_v48, %v16583_v17 }
 0x146   : > { %5505 = vrot.lane.b32.xlu1 %v15869_v6, %s15793_s16  ;;  %1820 = vrot.lane.b32.xlu0 %v15878_v9, %s15792_s8  ;;  %v4414_v27 = vsel %vm212_vm1, %v4392_v20, 0 }
 0x147   : > { %14282 = vmatprep.subr.msk.bf16.mxu0 %vm212_vm1, %v4393_v22  ;;  %14147 = vmatmul.mubr.msk.bf16.vlgmr.msra.gmra.mrb[0].mxu1 %vm208_vm2, %v16588_v19 }
 0x148   : > { %4514 = vmatpush1.bf16.msra.mxu0 %v4414_v27  ;;  %v1257_v32 = vpop.permute.xlu1 %1256  ;;  %v1255_v33 = vpop.permute.xlu0 %1254  ;;  %1384 = vmatprep.mubr.bf16.mxu1 %v19548_v0 }
 0x149   : > { %v1271_v36 = vsel %vm1268_vm13, %v1253_v1, %v1255_v33  ;;  %v1272_v37 = vsel %vm1268_vm13, %v1255_v33, %v1257_v32 }
 0x14a   : > { %5509 = vrot.lane.b32.xlu1 %v15878_v9, %s15793_s16  ;;  %5507 = vrot.lane.b32.xlu0 %v15880_v10, %s15793_s16  ;;  %v1288_v39 = vsel %vm212_vm1, %v1271_v36, 0 }
 0x14b   : > { %14148 = vmatprep.subr.msk.bf16.mxu1 %vm212_vm1, %v1272_v37  ;;  %14283 = vmatmul.mubr.msk.bf16.vlgmr.msra.gmra.mrb[4].mxu0 %vm208_vm2, %v16563_v57 }
 0x14c   : > { %1353 = vmatpush1.bf16.msra.mxu1 %v1288_v39  ;;  %v4384_v43 = vpop.permute.xlu1 %4383  ;;  %v16613_v44 = vpop.permute.xlu0 %4381  ;;  %4627 = vmatprep.mubr.bf16.mxu0 %v19548_v0  ;;  %v14288_v39 = vld [vmem:[%s19546_s1 + $0x40] sm:$0xf] }
 0x14d   : > { %v4396_v45 = vsel %vm4387_vm12, %v16613_v44, %v4384_v43 }
 0x14e   : > { %1824 = vrot.lane.b32.xlu1 %v15889_v12, %s15792_s8  ;;  %1822 = vrot.lane.b32.xlu0 %v15914_v15, %s15792_s8  ;;  %v4426_v21 = vsel %vm212_vm1, %v4396_v45, 0 }
 0x14f   : > { %14149 = vmatmul.mubr.msk.bf16.vlgmr.msra.gmra.mrb[4].mxu1 %vm208_vm2, %v16588_v19 }
 0x150   : > { %v1259_v49 = vpop.permute.xlu1 %1258  ;;  %v4386_v53 = vpop.permute.xlu0 %4385  ;;  %1425 = vmatprep.mubr.bf16.mxu1 %v19548_v0 }
 0x151   : > { %v4397_v56 = vsel %vm4387_vm12, %v4384_v43, %v4386_v53  ;;  %v1273_v1 = vsel %vm1268_vm13, %v1257_v32, %v1259_v49 }
 0x152   : > { %5515 = vrot.lane.b32.xlu1 %v15896_v14, %s15793_s16  ;;  %5513 = vrot.lane.b32.xlu0 %v15889_v12, %s15793_s16  ;;  %v1294_v20 = vsel %vm212_vm1, %v1273_v1, 0 }
 0x153   : > { %14286 = vmatprep.subr.msk.bf16.mxu0 %vm212_vm1, %v4397_v56 }
 0x154   : > { %4596 = vmatpush1.bf16.msra.mxu0 %v4426_v21  ;;  %v4649_v3 = vpop.permute.xlu1 %4648  ;;  %v1261_v11 = vpop.permute.xlu0 %1260 }
 0x155   : > { %v1274_v48 = vsel %vm1268_vm13, %v1259_v49, %v1261_v11 }
 0x156   : > { %1826 = vrot.lane.b32.xlu1 %v15896_v14, %s15792_s8  ;;  %5517 = vrot.lane.b32.xlu0 %v16137_v25, %s15793_s16 }
 0x157   : > { %14150 = vmatprep.subr.msk.bf16.mxu1 %vm212_vm1, %v1274_v48  ;;  %14287 = vmatmul.mubr.msk.bf16.vlgmr.msra.gmra.mrb[8].mxu0 %vm208_vm2, %v16563_v57 }
 0x158   : > { %1394 = vmatpush1.bf16.msra.mxu1 %v1294_v20  ;;  %v16642_v22 = vpop.permute.xlu1 %4652  ;;  %v4651_v27 = vpop.permute.xlu0 %4650  ;;  %4746 = vmatprep.mubr.bf16.mxu0 %v19548_v0 }
 0x159   : > { %v4671_v32 = vsel %vm4670_vm14, %v4649_v3, %v4651_v27  ;;  %v4672_v33 = vsel %vm4670_vm14, %v4651_v27, %v16642_v22 }
 0x15a   : > { %5782 = vrot.lane.b32.xlu1 %v15871_v7, %s15794_s24  ;;  %5780 = vrot.lane.b32.xlu0 %v15863_v5, %s15794_s24  ;;  %v4685_v57 = vsel %vm212_vm1, %v4671_v32, 0 }
 0x15b   : > { %14289 = vmatprep.subr.msk.bf16.mxu0 %vm212_vm1, %v4672_v33  ;;  %14151 = vmatmul.mubr.msk.bf16.vlgmr.msra.gmra.mrb[8].mxu1 %vm208_vm2, %v16588_v19 }
 0x15c   : > { %4715 = vmatpush1.bf16.msra.mxu0 %v4685_v57  ;;  %v1265_v36 = vpop.permute.xlu1 %1264  ;;  %v1263_v37 = vpop.permute.xlu0 %1262  ;;  %1466 = vmatprep.mubr.bf16.mxu1 %v19548_v0 }
 0x15d   : > { %v1275_v43 = vsel %vm1268_vm13, %v1261_v11, %v1263_v37  ;;  %v1276_v45 = vsel %vm1268_vm13, %v1263_v37, %v1265_v36 }
 0x15e   : > { %2088 = vrot.lane.b32.xlu1 %v15863_v5, %s15795_s29  ;;  %5784 = vrot.lane.b32.xlu0 %v15861_v4, %s15794_s24  ;;  %v1300_v49 = vsel %vm212_vm1, %v1275_v43, 0 }
 0x15f   : > { %14152 = vmatprep.subr.msk.bf16.mxu1 %vm212_vm1, %v1276_v45  ;;  %14290 = vmatmul.mubr.msk.bf16.vlgmr.msra.gmra.mrb[0].mxu0 %vm208_vm2, %v14288_v39 }
 0x160   : > { %1435 = vmatpush1.bf16.msra.mxu1 %v1300_v49  ;;  %v4659_v53 = vpop.permute.xlu1 %4658  ;;  %v16669_v56 = vpop.permute.xlu0 %4656  ;;  %4828 = vmatprep.mubr.bf16.mxu0 %v19548_v0 }
 0x161   : > { %v4675_v21 = vsel %vm4670_vm14, %v16669_v56, %v4659_v53 }
 0x162   : > { %2092 = vrot.lane.b32.xlu1 %v15861_v4, %s15795_s29  ;;  %2090 = vrot.lane.b32.xlu0 %v15871_v7, %s15795_s29  ;;  %v4697_v27 = vsel %vm212_vm1, %v4675_v21, 0 }
 0x163   : > { %14153 = vmatmul.mubr.msk.bf16.vlgmr.msra.gmra.mrb[12].mxu1 %vm208_vm2, %v16588_v19 }
 0x164   : > { %v1267_v1 = vpop.permute.xlu1 %1266  ;;  %v16680_v3 = vpop.permute.xlu0 %4660  ;;  %1507 = vmatprep.mubr.bf16.mxu1 %v19548_v0 }
 0x165   : > { %v1277_v11 = vsel %vm1268_vm13, %v1265_v36, %v1267_v1  ;;  %14154 = vmatprep.subr.msk.bf16.mxu1 %vm212_vm1, %v1267_v1  ;;  %v4676_v48 = vsel %vm4670_vm14, %v4659_v53, %v16680_v3  ;;  %vm5519_vm13 = vcmask 384000  }
 0x166   : > { %5790 = vrot.lane.b32.xlu1 %v15880_v10, %s15794_s24  ;;  %5788 = vrot.lane.b32.xlu0 %v15869_v6, %s15794_s24  ;;  %v1306_v20 = vsel %vm212_vm1, %v1277_v11, 0 }
 0x167   : > { %14293 = vmatprep.subr.msk.bf16.mxu0 %vm212_vm1, %v4676_v48  ;;  %1476 = vmatpush1.bf16.msra.mxu1 %v1306_v20  ;;  %v16726_v20 = vld [vmem:[%s19546_s1 + $0x14] sm:$0xf] }
 0x168   : > { %4797 = vmatpush1.bf16.msra.mxu0 %v4697_v27  ;;  %v4667_v32 = vpop.permute.xlu1 %4666  ;;  %v16694_v33 = vpop.permute.xlu0 %4664 }
 0x169   : > { %v4679_v57 = vsel %vm4670_vm14, %v16694_v33, %v4667_v32 }
 0x16a   : > { %2094 = vrot.lane.b32.xlu1 %v15894_v13, %s15795_s29  ;;  %5792 = vrot.lane.b32.xlu0 %v15878_v9, %s15794_s24 }
 0x16b   : > { %14294 = vmatmul.mubr.msk.bf16.vlgmr.msra.gmra.mrb[4].mxu0 %vm208_vm2, %v14288_v39  ;;  %14155 = vmatmul.mubr.msk.bf16.vlgmr.msra.gmra.mrb[16].mxu1 %vm208_vm2, %v16588_v19  ;;  %v4709_v19 = vsel %vm212_vm1, %v4679_v57, 0 }
 0x16c   : > { %v1529_v36 = vpop.permute.xlu1 %1528  ;;  %v4669_v37 = vpop.permute.xlu0 %4668  ;;  %4910 = vmatprep.mubr.bf16.mxu0 %v19548_v0  ;;  %1623 = vmatprep.mubr.bf16.mxu1 %v19548_v0 }
 0x16d   : > { %v4680_v43 = vsel %vm4670_vm14, %v4667_v32, %v4669_v37 }
 0x16e   : > { %5796 = vrot.lane.b32.xlu1 %v15889_v12, %s15794_s24  ;;  %2096 = vrot.lane.b32.xlu0 %v15869_v6, %s15795_s29 }
 0x16f   : > { %14297 = vmatprep.subr.msk.bf16.mxu0 %vm212_vm1, %v4680_v43 }
 0x170   : > { %4879 = vmatpush1.bf16.msra.mxu0 %v4709_v19  ;;  %v1533_v45 = vpop.permute.xlu1 %1532  ;;  %v1531_v49 = vpop.permute.xlu0 %1530  ;;  %v14299_v19 = vld [vmem:[%s19546_s1 + $0x44] sm:$0xf] }
 0x171   : > { %v1549_v53 = vsel %vm1548_vm15, %v1529_v36, %v1531_v49  ;;  %v1550_v21 = vsel %vm1548_vm15, %v1531_v49, %v1533_v45 }
 0x172   : > { %5800 = vrot.lane.b32.xlu1 %v16137_v25, %s15794_s24  ;;  %5798 = vrot.lane.b32.xlu0 %v15896_v14, %s15794_s24  ;;  %v1562_v1 = vsel %vm212_vm1, %v1549_v53, 0 }
 0x173   : > { %14157 = vmatprep.subr.msk.bf16.mxu1 %vm212_vm1, %v1550_v21  ;;  %14298 = vmatmul.mubr.msk.bf16.vlgmr.msra.gmra.mrb[8].mxu0 %vm208_vm2, %v14288_v39 }
 0x174   : > { %1592 = vmatpush1.bf16.msra.mxu1 %v1562_v1  ;;  %v4934_v11 = vpop.permute.xlu1 %4933  ;;  %v4932_v48 = vpop.permute.xlu0 %4931  ;;  %5029 = vmatprep.mubr.bf16.mxu0 %v19548_v0 }
 0x175   : > { %v4954_v25 = vsel %vm4953_vm3, %v4932_v48, %v4934_v11 }
 0x176   : > { %2100 = vrot.lane.b32.xlu1 %v15878_v9, %s15795_s29  ;;  %2098 = vrot.lane.b32.xlu0 %v15880_v10, %s15795_s29  ;;  %v4968_v57 = vsel %vm212_vm1, %v4954_v25, 0 }
 0x177   : > { %14158 = vmatmul.mubr.msk.bf16.vlgmr.msra.gmra.mrb[0].mxu1 %vm208_vm2, %v16726_v20 }
 0x178   : > { %v1535_v39 = vpop.permute.xlu1 %1534  ;;  %v16736_v27 = vpop.permute.xlu0 %4935  ;;  %1664 = vmatprep.mubr.bf16.mxu1 %v19548_v0 }
 0x179   : > { %v4955_v32 = vsel %vm4953_vm3, %v4934_v11, %v16736_v27  ;;  %v1551_v36 = vsel %vm1548_vm15, %v1533_v45, %v1535_v39 }
 0x17a   : > { %6065 = vrot.lane.b32.xlu1 %v15871_v7, %s15796_s6  ;;  %6063 = vrot.lane.b32.xlu0 %v15863_v5, %s15796_s6  ;;  %v1568_v45 = vsel %vm212_vm1, %v1551_v36, 0 }
 0x17b   : > { %14300 = vmatprep.subr.msk.bf16.mxu0 %vm212_vm1, %v4955_v32 }
 0x17c   : > { %4998 = vmatpush1.bf16.msra.mxu0 %v4968_v57  ;;  %v16748_v37 = vpop.permute.xlu1 %4939  ;;  %v1537_v43 = vpop.permute.xlu0 %1536 }
 0x17d   : > { %v1552_v49 = vsel %vm1548_vm15, %v1535_v39, %v1537_v43 }
 0x17e   : > { %2102 = vrot.lane.b32.xlu1 %v15914_v15, %s15795_s29  ;;  %6067 = vrot.lane.b32.xlu0 %v15861_v4, %s15796_s6 }
 0x17f   : > { %14159 = vmatprep.subr.msk.bf16.mxu1 %vm212_vm1, %v1552_v49  ;;  %14301 = vmatmul.mubr.msk.bf16.vlgmr.msra.gmra.mrb[0].mxu0 %vm208_vm2, %v14299_v19 }
 0x180   : > { %1633 = vmatpush1.bf16.msra.mxu1 %v1568_v45  ;;  %v16761_v53 = vpop.permute.xlu1 %4943  ;;  %v4942_v21 = vpop.permute.xlu0 %4941  ;;  %5111 = vmatprep.mubr.bf16.mxu0 %v19548_v0 }
 0x181   : > { %v4958_v1 = vsel %vm4953_vm3, %v16748_v37, %v4942_v21  ;;  %v4959_v11 = vsel %vm4953_vm3, %v4942_v21, %v16761_v53 }
 0x182   : > { %6071 = vrot.lane.b32.xlu1 %v15869_v6, %s15796_s6  ;;  %2104 = vrot.lane.b32.xlu0 %v15889_v12, %s15795_s29  ;;  %v4980_v48 = vsel %vm212_vm1, %v4958_v1, 0 }
 0x183   : > { %14304 = vmatprep.subr.msk.bf16.mxu0 %vm212_vm1, %v4959_v11  ;;  %14160 = vmatmul.mubr.msk.bf16.vlgmr.msra.gmra.mrb[4].mxu1 %vm208_vm2, %v16726_v20 }
 0x184   : > { %5080 = vmatpush1.bf16.msra.mxu0 %v4980_v48  ;;  %v1541_v25 = vpop.permute.xlu1 %1540  ;;  %v1539_v39 = vpop.permute.xlu0 %1538  ;;  %1705 = vmatprep.mubr.bf16.mxu1 %v19548_v0  ;;  %v16800_v48 = vld [vmem:[%s15854_s14 + $0x28] ss:$0 sps:$4 sm:$0xff]  }
 0x185   : > { %v1553_v32 = vsel %vm1548_vm15, %v1537_v43, %v1539_v39  ;;  %v1554_v57 = vsel %vm1548_vm15, %v1539_v39, %v1541_v25 }
 0x186   : > { %6075 = vrot.lane.b32.xlu1 %v15878_v9, %s15796_s6  ;;  %6073 = vrot.lane.b32.xlu0 %v15880_v10, %s15796_s6  ;;  %v1574_v36 = vsel %vm212_vm1, %v1553_v32, 0 }
 0x187   : > { %14161 = vmatprep.subr.msk.bf16.mxu1 %vm212_vm1, %v1554_v57  ;;  %14305 = vmatmul.mubr.msk.bf16.vlgmr.msra.gmra.mrb[4].mxu0 %vm208_vm2, %v14299_v19 }
 0x188   : > { %1674 = vmatpush1.bf16.msra.mxu1 %v1574_v36  ;;  %v4950_v49 = vpop.permute.xlu1 %4949  ;;  %v16786_v45 = vpop.permute.xlu0 %4947  ;;  %5193 = vmatprep.mubr.bf16.mxu0 %v19548_v0 }
 0x189   : > { %19564 = vst [vmem:[#allocation2_spill] sm:$0xff] %v16786_v45  ;;  %v4962_v43 = vsel %vm4953_vm3, %v16786_v45, %v4950_v49 }
 0x18a   : > { %6079 = vrot.lane.b32.xlu1 %v15889_v12, %s15796_s6  ;;  %2106 = vrot.lane.b32.xlu0 %v15896_v14, %s15795_s29  ;;  %v4992_v39 = vsel %vm212_vm1, %v4962_v43, 0 }
 0x18b   : > { %14162 = vmatmul.mubr.msk.bf16.vlgmr.msra.gmra.mrb[8].mxu1 %vm208_vm2, %v16726_v20 }
 0x18c   : > { %v1543_v21 = vpop.permute.xlu1 %1542  ;;  %v4952_v1 = vpop.permute.xlu0 %4951  ;;  %1746 = vmatprep.mubr.bf16.mxu1 %v19548_v0 }
 0x18d   : > { %v4963_v11 = vsel %vm4953_vm3, %v4950_v49, %v4952_v1  ;;  %v1555_v32 = vsel %vm1548_vm15, %v1541_v25, %v1543_v21  ;;  %v19566_v1 = vmov 0  }
 0x18e   : > { %6083 = vrot.lane.b32.xlu1 %v16800_v48, %s15796_s6  ;;  %6081 = vrot.lane.b32.xlu0 %v15896_v14, %s15796_s6  ;;  %v1580_v49 = vsel %vm212_vm1, %v1555_v32, 0  ;;  %v14310_v32 = vld [vmem:[%s19546_s1 + $0x48] sm:$0xf] }
 0x18f   : > { %14308 = vmatprep.subr.msk.bf16.mxu0 %vm212_vm1, %v4963_v11 }
 0x190   : > { %5162 = vmatpush1.bf16.msra.mxu0 %v4992_v39  ;;  %v5215_v57 = vpop.permute.xlu1 %5214  ;;  %v1545_v36 = vpop.permute.xlu0 %1544 }
 0x191   : > { %v1556_v0 = vsel %vm1548_vm15, %v1543_v21, %v1545_v36 }
 0x192   : > { %6346 = vrot.lane.b32.xlu1 %v15863_v5, %s15797_s11  ;;  %2374 = vrot.lane.b32.xlu0 %v15894_v13, %s15776_s15 }
 0x193   : > { %14163 = vmatprep.subr.msk.bf16.mxu1 %vm212_vm1, %v1556_v0  ;;  %14309 = vmatmul.mubr.msk.bf16.vlgmr.msra.gmra.mrb[8].mxu0 %vm208_vm2, %v14299_v19 }
 0x194   : > { %1715 = vmatpush1.bf16.msra.mxu1 %v1580_v49  ;;  %v16817_v25 = vpop.permute.xlu1 %5218  ;;  %v5217_v43 = vpop.permute.xlu0 %5216  ;;  %5312 = vmatprep.mubr.bf16.mxu0 %v19566_v1 }
 0x195   : > { %19565 = vst [vmem:[#allocation3_spill] sm:$0xff] %v16817_v25  ;;  %v5237_v21 = vsel %vm5236_vm7, %v5215_v57, %v5217_v43  ;;  %v5238_v11 = vsel %vm5236_vm7, %v5217_v43, %v16817_v25 }
 0x196   : > { %6350 = vrot.lane.b32.xlu1 %v15861_v4, %s15797_s11  ;;  %6348 = vrot.lane.b32.xlu0 %v15871_v7, %s15797_s11  ;;  %v5251_v0 = vsel %vm212_vm1, %v5237_v21, 0 }
 0x197   : > { %14311 = vmatprep.subr.msk.bf16.mxu0 %vm212_vm1, %v5238_v11  ;;  %14164 = vmatmul.mubr.msk.bf16.vlgmr.msra.gmra.mrb[12].mxu1 %vm208_vm2, %v16726_v20 }
 0x198   : > { %5281 = vmatpush1.bf16.msra.mxu0 %v5251_v0  ;;  %v16831_v19 = vpop.permute.xlu1 %5222  ;;  %v1547_v39 = vpop.permute.xlu0 %1546  ;;  %1787 = vmatprep.mubr.bf16.mxu1 %v19566_v1 }
 0x199   : > { %19567 = vst [vmem:[#allocation4_spill] sm:$0xff] %v16831_v19  ;;  %v1557_v57 = vsel %vm1548_vm15, %v1545_v36, %v1547_v39  ;;  %14165 = vmatprep.subr.msk.bf16.mxu1 %vm212_vm1, %v1547_v39  ;;  %vm19561_vm15 = vcmask 375808  }
 0x19a   : > { %6354 = vrot.lane.b32.xlu1 %v15869_v6, %s15797_s11  ;;  %2382 = vrot.lane.b32.xlu0 %v15914_v15, %s15776_s15  ;;  %v1586_v49 = vsel %vm212_vm1, %v1557_v57, 0 }
 0x19b   : > { %1756 = vmatpush1.bf16.msra.mxu1 %v1586_v49  ;;  %14312 = vmatmul.mubr.msk.bf16.vlgmr.msra.gmra.mrb[0].mxu0 %vm208_vm2, %v14310_v32 }
 0x19c   : > { %v16845_v43 = vpop.permute.xlu1 %5226  ;;  %v5225_v21 = vpop.permute.xlu0 %5224  ;;  %5394 = vmatprep.mubr.bf16.mxu0 %v19566_v1 }
 0x19d   : > { %19568 = vst [vmem:[#allocation5_spill] sm:$0xff] %v16845_v43  ;;  %v5241_v36 = vsel %vm5236_vm7, %v16831_v19, %v5225_v21  ;;  %v5242_v11 = vsel %vm5236_vm7, %v5225_v21, %v16845_v43  ;;  %v16880_v43 = vld [vmem:[%s19546_s1 + $0x18] sm:$0xf] }
 0x19e   : > { %6358 = vrot.lane.b32.xlu1 %v15878_v9, %s15797_s11  ;;  %6356 = vrot.lane.b32.xlu0 %v15880_v10, %s15797_s11  ;;  %v5263_v0 = vsel %vm212_vm1, %v5241_v36, 0 }
 0x19f   : > { %14315 = vmatprep.subr.msk.bf16.mxu0 %vm212_vm1, %v5242_v11  ;;  %14166 = vmatmul.mubr.msk.bf16.vlgmr.msra.gmra.mrb[16].mxu1 %vm208_vm2, %v16726_v20 }
 0x1a0   : > { %5363 = vmatpush1.bf16.msra.mxu0 %v5263_v0  ;;  %v1811_v39 = vpop.permute.xlu1 %1810  ;;  %v1809_v57 = vpop.permute.xlu0 %1808  ;;  %1903 = vmatprep.mubr.bf16.mxu1 %v19566_v1 }
 0x1a1   : > { %v1829_v49 = vsel %vm1828_vm10, %v1809_v57, %v1811_v39 }
 0x1a2   : > { %6362 = vrot.lane.b32.xlu1 %v15889_v12, %s15797_s11  ;;  %2654 = vrot.lane.b32.xlu0 %v15894_v13, %s15778_s17  ;;  %v1842_v11 = vsel %vm212_vm1, %v1829_v49, 0 }
 0x1a3   : > { %14316 = vmatmul.mubr.msk.bf16.vlgmr.msra.gmra.mrb[4].mxu0 %vm208_vm2, %v14310_v32 }
 0x1a4   : > { %v16867_v21 = vpop.permute.xlu1 %5230  ;;  %v1813_v36 = vpop.permute.xlu0 %1812  ;;  %5476 = vmatprep.mubr.bf16.mxu0 %v19566_v1 }
 0x1a5   : > { %19569 = vst [vmem:[#allocation6_spill] sm:$0xff] %v16867_v21  ;;  %v1830_v20 = vsel %vm1828_vm10, %v1811_v39, %v1813_v36 }
 0x1a6   : > { %6366 = vrot.lane.b32.xlu1 %v16800_v48, %s15797_s11  ;;  %6364 = vrot.lane.b32.xlu0 %v15896_v14, %s15797_s11 }
 0x1a7   : > { %14168 = vmatprep.subr.msk.bf16.mxu1 %vm212_vm1, %v1830_v20 }
 0x1a8   : > { %1872 = vmatpush1.bf16.msra.mxu1 %v1842_v11  ;;  %v5235_v0 = vpop.permute.xlu1 %5234  ;;  %v5233_v57 = vpop.permute.xlu0 %5232 }
 0x1a9   : > { %v5245_v39 = vsel %vm5236_vm7, %v16867_v21, %v5233_v57  ;;  %v5246_v19 = vsel %vm5236_vm7, %v5233_v57, %v5235_v0 }
 0x1aa   : > { %6629 = vrot.lane.b32.xlu1 %v15863_v5, %s15798_s25  ;;  %2662 = vrot.lane.b32.xlu0 %v15914_v15, %s15778_s17  ;;  %v5275_v49 = vsel %vm212_vm1, %v5245_v39, 0 }
 0x1ab   : > { %14319 = vmatprep.subr.msk.bf16.mxu0 %vm212_vm1, %v5246_v19  ;;  %14169 = vmatmul.mubr.msk.bf16.vlgmr.msra.gmra.mrb[0].mxu1 %vm208_vm2, %v16880_v43 }
 0x1ac   : > { %5445 = vmatpush1.bf16.msra.mxu0 %v5275_v49  ;;  %v1817_v20 = vpop.permute.xlu1 %1816  ;;  %v1815_v11 = vpop.permute.xlu0 %1814  ;;  %1944 = vmatprep.mubr.bf16.mxu1 %v19566_v1 }
 0x1ad   : > { %v1831_v0 = vsel %vm1828_vm10, %v1813_v36, %v1815_v11  ;;  %v1832_v57 = vsel %vm1828_vm10, %v1815_v11, %v1817_v20 }
 0x1ae   : > { %6633 = vrot.lane.b32.xlu1 %v15861_v4, %s15798_s25  ;;  %6631 = vrot.lane.b32.xlu0 %v15871_v7, %s15798_s25  ;;  %v1848_v19 = vsel %vm212_vm1, %v1831_v0, 0 }
 0x1af   : > { %14170 = vmatprep.subr.msk.bf16.mxu1 %vm212_vm1, %v1832_v57  ;;  %14320 = vmatmul.mubr.msk.bf16.vlgmr.msra.gmra.mrb[8].mxu0 %vm208_vm2, %v14310_v32 }
 0x1b0   : > { %1913 = vmatpush1.bf16.msra.mxu1 %v1848_v19  ;;  %v5500_v39 = vpop.permute.xlu1 %5499  ;;  %v5498_v49 = vpop.permute.xlu0 %5497  ;;  %5595 = vmatprep.mubr.bf16.mxu0 %v19566_v1 }
 0x1b1   : > { %v5520_v36 = vsel %vm5519_vm13, %v5498_v49, %v5500_v39 }
 0x1b2   : > { %6637 = vrot.lane.b32.xlu1 %v15869_v6, %s15798_s25  ;;  %2934 = vrot.lane.b32.xlu0 %v15894_v13, %s15779_s18  ;;  %v5534_v57 = vsel %vm212_vm1, %v5520_v36, 0 }
 0x1b3   : > { %14171 = vmatmul.mubr.msk.bf16.vlgmr.msra.gmra.mrb[4].mxu1 %vm208_vm2, %v16880_v43 }
 0x1b4   : > { %v1819_v11 = vpop.permute.xlu1 %1818  ;;  %v16911_v0 = vpop.permute.xlu0 %5501  ;;  %1985 = vmatprep.mubr.bf16.mxu1 %v19566_v1 }
 0x1b5   : > { %19570 = vst [vmem:[#allocation7_spill] sm:$0xff] %v16911_v0  ;;  %v5521_v32 = vsel %vm5519_vm13, %v5500_v39, %v16911_v0  ;;  %v1833_v19 = vsel %vm1828_vm10, %v1817_v20, %v1819_v11  ;;  %v14321_v39 = vld [vmem:[%s19546_s1 + $0x4c] sm:$0xf] }
 0x1b6   : > { %6641 = vrot.lane.b32.xlu1 %v15878_v9, %s15798_s25  ;;  %6639 = vrot.lane.b32.xlu0 %v15880_v10, %s15798_s25  ;;  %v1854_v20 = vsel %vm212_vm1, %v1833_v19, 0 }
 0x1b7   : > { %14322 = vmatprep.subr.msk.bf16.mxu0 %vm212_vm1, %v5521_v32 }
 0x1b8   : > { %5564 = vmatpush1.bf16.msra.mxu0 %v5534_v57  ;;  %v16923_v49 = vpop.permute.xlu1 %5505  ;;  %v1821_v21 = vpop.permute.xlu0 %1820 }
 0x1b9   : > { %19571 = vst [vmem:[#allocation8_spill] sm:$0xff] %v16923_v49  ;;  %v1834_v0 = vsel %vm1828_vm10, %v1819_v11, %v1821_v21 }
 0x1ba   : > { %6645 = vrot.lane.b32.xlu1 %v15889_v12, %s15798_s25  ;;  %2942 = vrot.lane.b32.xlu0 %v15914_v15, %s15779_s18  ;;  %s15799_s18 = smov 11  }
 0x1bb   : > { %14172 = vmatprep.subr.msk.bf16.mxu1 %vm212_vm1, %v1834_v0  ;;  %14323 = vmatmul.mubr.msk.bf16.vlgmr.msra.gmra.mrb[0].mxu0 %vm208_vm2, %v14321_v39 }
 0x1bc   : > { %1954 = vmatpush1.bf16.msra.mxu1 %v1854_v20  ;;  %v16936_v36 = vpop.permute.xlu1 %5509  ;;  %v5508_v32 = vpop.permute.xlu0 %5507  ;;  %5677 = vmatprep.mubr.bf16.mxu0 %v19566_v1 }
 0x1bd   : > { %19572 = vst [vmem:[#allocation9_spill] sm:$0xff] %v16936_v36  ;;  %v5524_v11 = vsel %vm5519_vm13, %v16923_v49, %v5508_v32  ;;  %v5525_v57 = vsel %vm5519_vm13, %v5508_v32, %v16936_v36 }
 0x1be   : > { %6649 = vrot.lane.b32.xlu1 %v16800_v48, %s15798_s25  ;;  %6647 = vrot.lane.b32.xlu0 %v15896_v14, %s15798_s25  ;;  %v5546_v0 = vsel %vm212_vm1, %v5524_v11, 0 }
 0x1bf   : > { %14326 = vmatprep.subr.msk.bf16.mxu0 %vm212_vm1, %v5525_v57  ;;  %14173 = vmatmul.mubr.msk.bf16.vlgmr.msra.gmra.mrb[8].mxu1 %vm208_vm2, %v16880_v43 }
 0x1c0   : > { %5646 = vmatpush1.bf16.msra.mxu0 %v5546_v0  ;;  %v1825_v19 = vpop.permute.xlu1 %1824  ;;  %v1823_v20 = vpop.permute.xlu0 %1822  ;;  %2026 = vmatprep.mubr.bf16.mxu1 %v19566_v1 }
 0x1c1   : > { %v1835_v32 = vsel %vm1828_vm10, %v1821_v21, %v1823_v20  ;;  %v1836_v36 = vsel %vm1828_vm10, %v1823_v20, %v1825_v19 }
 0x1c2   : > { %6912 = vrot.lane.b32.xlu1 %v15863_v5, %s15799_s18  ;;  %3214 = vrot.lane.b32.xlu0 %v15894_v13, %s15780_s19  ;;  %v1860_v11 = vsel %vm212_vm1, %v1835_v32, 0 }
 0x1c3   : > { %14174 = vmatprep.subr.msk.bf16.mxu1 %vm212_vm1, %v1836_v36  ;;  %14327 = vmatmul.mubr.msk.bf16.vlgmr.msra.gmra.mrb[4].mxu0 %vm208_vm2, %v14321_v39 }
 0x1c4   : > { %1995 = vmatpush1.bf16.msra.mxu1 %v1860_v11  ;;  %v5516_v57 = vpop.permute.xlu1 %5515  ;;  %v16961_v0 = vpop.permute.xlu0 %5513  ;;  %5759 = vmatprep.mubr.bf16.mxu0 %v19566_v1 }
 0x1c5   : > { %19573 = vst [vmem:[#allocation10_spill] sm:$0xff] %v16961_v0  ;;  %v5528_v21 = vsel %vm5519_vm13, %v16961_v0, %v5516_v57 }
 0x1c6   : > { %6916 = vrot.lane.b32.xlu1 %v15861_v4, %s15799_s18  ;;  %6914 = vrot.lane.b32.xlu0 %v15871_v7, %s15799_s18  ;;  %v5558_v0 = vsel %vm212_vm1, %v5528_v21, 0 }
 0x1c7   : > { %14175 = vmatmul.mubr.msk.bf16.vlgmr.msra.gmra.mrb[12].mxu1 %vm208_vm2, %v16880_v43 }
 0x1c8   : > { %v1827_v36 = vpop.permute.xlu1 %1826  ;;  %v5518_v20 = vpop.permute.xlu0 %5517  ;;  %2067 = vmatprep.mubr.bf16.mxu1 %v19566_v1 }
 0x1c9   : > { %v1837_v32 = vsel %vm1828_vm10, %v1825_v19, %v1827_v36  ;;  %v5529_v11 = vsel %vm5519_vm13, %v5516_v57, %v5518_v20  ;;  %14176 = vmatprep.subr.msk.bf16.mxu1 %vm212_vm1, %v1827_v36  ;;  %vm2108_vm10 = vcmask 736256   ;;  %v14332_v20 = vld [vmem:[%s19546_s1 + $0x50] sm:$0xf] }
 0x1ca   : > { %6920 = vrot.lane.b32.xlu1 %v15869_v6, %s15799_s18  ;;  %3222 = vrot.lane.b32.xlu0 %v15914_v15, %s15780_s19  ;;  %v1866_v49 = vsel %vm212_vm1, %v1837_v32, 0 }
 0x1cb   : > { %14330 = vmatprep.subr.msk.bf16.mxu0 %vm212_vm1, %v5529_v11  ;;  %2036 = vmatpush1.bf16.msra.mxu1 %v1866_v49 }
 0x1cc   : > { %5728 = vmatpush1.bf16.msra.mxu0 %v5558_v0  ;;  %v5783_v25 = vpop.permute.xlu1 %5782  ;;  %v5781_v19 = vpop.permute.xlu0 %5780 }
 0x1cd   : > { %v5803_v57 = vsel %vm19561_vm15, %v5781_v19, %v5783_v25 }
 0x1ce   : > { %6924 = vrot.lane.b32.xlu1 %v15878_v9, %s15799_s18  ;;  %6922 = vrot.lane.b32.xlu0 %v15880_v10, %s15799_s18 }
 0x1cf   : > { %14177 = vmatmul.mubr.msk.bf16.vlgmr.msra.gmra.mrb[16].mxu1 %vm208_vm2, %v16880_v43  ;;  %14331 = vmatmul.mubr.msk.bf16.vlgmr.msra.gmra.mrb[8].mxu0 %vm208_vm2, %v14321_v39  ;;  %v5817_v43 = vsel %vm212_vm1, %v5803_v57, 0 }
 0x1d0   : > { %v2089_v49 = vpop.permute.xlu1 %2088  ;;  %v16991_v36 = vpop.permute.xlu0 %5784  ;;  %2183 = vmatprep.mubr.bf16.mxu1 %v19566_v1  ;;  %5878 = vmatprep.mubr.bf16.mxu0 %v19566_v1 }
 0x1d1   : > { %19574 = vst [vmem:[#allocation11_spill] sm:$0xff] %v16991_v36  ;;  %v5804_v0 = vsel %vm19561_vm15, %v5783_v25, %v16991_v36 }
 0x1d2   : > { %6928 = vrot.lane.b32.xlu1 %v15889_v12, %s15799_s18  ;;  %3494 = vrot.lane.b32.xlu0 %v15894_v13, %s15782_s21 }
 0x1d3   : > { %14333 = vmatprep.subr.msk.bf16.mxu0 %vm212_vm1, %v5804_v0 }
 0x1d4   : > { %5847 = vmatpush1.bf16.msra.mxu0 %v5817_v43  ;;  %v2093_v39 = vpop.permute.xlu1 %2092  ;;  %v2091_v21 = vpop.permute.xlu0 %2090 }
 0x1d5   : > { %v2109_v25 = vsel %vm2108_vm10, %v2089_v49, %v2091_v21  ;;  %v2110_v32 = vsel %vm2108_vm10, %v2091_v21, %v2093_v39  ;;  %v17020_v49 = vld [vmem:[%s19546_s1 + $0x1c] sm:$0xf] }
 0x1d6   : > { %6932 = vrot.lane.b32.xlu1 %v16800_v48, %s15799_s18  ;;  %6930 = vrot.lane.b32.xlu0 %v15896_v14, %s15799_s18  ;;  %v2122_v11 = vsel %vm212_vm1, %v2109_v25, 0 }
 0x1d7   : > { %14179 = vmatprep.subr.msk.bf16.mxu1 %vm212_vm1, %v2110_v32  ;;  %14334 = vmatmul.mubr.msk.bf16.vlgmr.msra.gmra.mrb[0].mxu0 %vm208_vm2, %v14332_v20 }
 0x1d8   : > { %2152 = vmatpush1.bf16.msra.mxu1 %v2122_v11  ;;  %v5791_v19 = vpop.permute.xlu1 %5790  ;;  %v17015_v57 = vpop.permute.xlu0 %5788  ;;  %5960 = vmatprep.mubr.bf16.mxu0 %v19566_v1 }
 0x1d9   : > { %19575 = vst [vmem:[#allocation12_spill] sm:$0xff] %v17015_v57  ;;  %v5807_v0 = vsel %vm19561_vm15, %v17015_v57, %v5791_v19 }
 0x1da   : > { %7195 = vrot.lane.b32.xlu1 %v15863_v5, %s15800_s7  ;;  %3502 = vrot.lane.b32.xlu0 %v15914_v15, %s15782_s21  ;;  %v5829_v32 = vsel %vm212_vm1, %v5807_v0, 0  ;;  %s15801_s21 = smov 9  }
 0x1db   : > { %14180 = vmatmul.mubr.msk.bf16.vlgmr.msra.gmra.mrb[0].mxu1 %vm208_vm2, %v17020_v49 }
 0x1dc   : > { %v2095_v43 = vpop.permute.xlu1 %2094  ;;  %v17031_v21 = vpop.permute.xlu0 %5792  ;;  %2224 = vmatprep.mubr.bf16.mxu1 %v19566_v1 }
 0x1dd   : > { %v5808_v25 = vsel %vm19561_vm15, %v5791_v19, %v17031_v21  ;;  %v2111_v11 = vsel %vm2108_vm10, %v2093_v39, %v2095_v43 }
 0x1de   : > { %7199 = vrot.lane.b32.xlu1 %v15861_v4, %s15800_s7  ;;  %7197 = vrot.lane.b32.xlu0 %v15871_v7, %s15800_s7  ;;  %v2128_v19 = vsel %vm212_vm1, %v2111_v11, 0 }
 0x1df   : > { %14337 = vmatprep.subr.msk.bf16.mxu0 %vm212_vm1, %v5808_v25 }
 0x1e0   : > { %5929 = vmatpush1.bf16.msra.mxu0 %v5829_v32  ;;  %v17043_v57 = vpop.permute.xlu1 %5796  ;;  %v2097_v36 = vpop.permute.xlu0 %2096 }
 0x1e1   : > { %19576 = vst [vmem:[#allocation13_spill] sm:$0xff] %v17043_v57  ;;  %v2112_v45 = vsel %vm2108_vm10, %v2095_v43, %v2097_v36 }
 0x1e2   : > { %7203 = vrot.lane.b32.xlu1 %v15869_v6, %s15800_s7  ;;  %3774 = vrot.lane.b32.xlu0 %v15894_v13, %s15783_s22 }
 0x1e3   : > { %14181 = vmatprep.subr.msk.bf16.mxu1 %vm212_vm1, %v2112_v45  ;;  %14338 = vmatmul.mubr.msk.bf16.vlgmr.msra.gmra.mrb[4].mxu0 %vm208_vm2, %v14332_v20 }
 0x1e4   : > { %2193 = vmatpush1.bf16.msra.mxu1 %v2128_v19  ;;  %v5801_v39 = vpop.permute.xlu1 %5800  ;;  %v5799_v0 = vpop.permute.xlu0 %5798  ;;  %6042 = vmatprep.mubr.bf16.mxu0 %v19566_v1 }
 0x1e5   : > { %v5811_v43 = vsel %vm19561_vm15, %v17043_v57, %v5799_v0  ;;  %v5812_v25 = vsel %vm19561_vm15, %v5799_v0, %v5801_v39  ;;  %vm6085_vm15 = vcmask 113664  }
 0x1e6   : > { %7207 = vrot.lane.b32.xlu1 %v15878_v9, %s15800_s7  ;;  %7205 = vrot.lane.b32.xlu0 %v15880_v10, %s15800_s7  ;;  %v5841_v13 = vsel %vm212_vm1, %v5811_v43, 0 }
 0x1e7   : > { %14182 = vmatmul.mubr.msk.bf16.vlgmr.msra.gmra.mrb[4].mxu1 %vm208_vm2, %v17020_v49  ;;  %14341 = vmatprep.subr.msk.bf16.mxu0 %vm212_vm1, %v5812_v25 }
 0x1e8   : > { %6011 = vmatpush1.bf16.msra.mxu0 %v5841_v13  ;;  %v2101_v45 = vpop.permute.xlu1 %2100  ;;  %v2099_v32 = vpop.permute.xlu0 %2098  ;;  %2265 = vmatprep.mubr.bf16.mxu1 %v19566_v1 }
 0x1e9   : > { %v2113_v11 = vsel %vm2108_vm10, %v2097_v36, %v2099_v32  ;;  %v2114_v19 = vsel %vm2108_vm10, %v2099_v32, %v2101_v45  ;;  %v15743_v36 = vld [vmem:[%s15854_s14 + $0x8] sm:$0xff] }
 0x1ea   : > { %7211 = vrot.lane.b32.xlu1 %v15889_v12, %s15800_s7  ;;  %3782 = vrot.lane.b32.xlu0 %v15914_v15, %s15783_s22  ;;  %v2134_v39 = vsel %vm212_vm1, %v2113_v11, 0  ;;  %v17081_v15 = vcombine.high %v15743_v36, %v15743_v36 }
 0x1eb   : > { %14183 = vmatprep.subr.msk.bf16.mxu1 %vm212_vm1, %v2114_v19  ;;  %14342 = vmatmul.mubr.msk.bf16.vlgmr.msra.gmra.mrb[8].mxu0 %vm208_vm2, %v14332_v20 }
 0x1ec   : > { %2234 = vmatpush1.bf16.msra.mxu1 %v2134_v39  ;;  %v6066_v0 = vpop.permute.xlu1 %6065  ;;  %v6064_v43 = vpop.permute.xlu0 %6063  ;;  %6161 = vmatprep.mubr.bf16.mxu0 %v19566_v1 }
 0x1ed   : > { %v6086_v20 = vsel %vm6085_vm15, %v6064_v43, %v6066_v0 }
 0x1ee   : > { %7215 = vrot.lane.b32.xlu1 %v16800_v48, %s15800_s7  ;;  %7213 = vrot.lane.b32.xlu0 %v15896_v14, %s15800_s7  ;;  %v6100_v11 = vsel %vm212_vm1, %v6086_v20, 0  ;;  %v15744_v20 = vld [vmem:[%s15854_s14 + $0x18] sm:$0xff] }
 0x1ef   : > { %14184 = vmatmul.mubr.msk.bf16.vlgmr.msra.gmra.mrb[8].mxu1 %vm208_vm2, %v17020_v49 }
 0x1f0   : > { %v2103_v25 = vpop.permute.xlu1 %2102  ;;  %v17086_v13 = vpop.permute.xlu0 %6067  ;;  %2306 = vmatprep.mubr.bf16.mxu1 %v19566_v1 }
 0x1f1   : > { %19577 = vst [vmem:[#allocation14_spill] sm:$0xff] %v17086_v13  ;;  %v6087_v32 = vsel %vm6085_vm15, %v6066_v0, %v17086_v13  ;;  %v2115_v19 = vsel %vm2108_vm10, %v2101_v45, %v2103_v25  ;;  %v14343_v0 = vld [vmem:[%s19546_s1 + $0x54] sm:$0xf] }
 0x1f2   : > { %7478 = vrot.lane.b32.xlu1 %v15863_v5, %s15801_s21  ;;  %4088 = vrot.lane.b32.xlu0 %v17081_v15, %s15785_s28  ;;  %v2140_v45 = vsel %vm212_vm1, %v2115_v19, 0 }
 0x1f3   : > { %14344 = vmatprep.subr.msk.bf16.mxu0 %vm212_vm1, %v6087_v32  ;;  %v17109_v32 = vcombine.high %v15744_v20, %v15744_v20 }
 0x1f4   : > { %6130 = vmatpush1.bf16.msra.mxu0 %v6100_v11  ;;  %v17098_v39 = vpop.permute.xlu1 %6071  ;;  %v2105_v43 = vpop.permute.xlu0 %2104 }
 0x1f5   : > { %v2116_v36 = vsel %vm2108_vm10, %v2103_v25, %v2105_v43 }
 0x1f6   : > { %7482 = vrot.lane.b32.xlu1 %v15861_v4, %s15801_s21  ;;  %7480 = vrot.lane.b32.xlu0 %v15871_v7, %s15801_s21 }
 0x1f7   : > { %14185 = vmatprep.subr.msk.bf16.mxu1 %vm212_vm1, %v2116_v36  ;;  %14345 = vmatmul.mubr.msk.bf16.vlgmr.msra.gmra.mrb[0].mxu0 %vm208_vm2, %v14343_v0 }
 0x1f8   : > { %2275 = vmatpush1.bf16.msra.mxu1 %v2140_v45  ;;  %v17114_v11 = vpop.permute.xlu1 %6075  ;;  %v6074_v13 = vpop.permute.xlu0 %6073  ;;  %6243 = vmatprep.mubr.bf16.mxu0 %v19566_v1 }
 0x1f9   : > { %v6090_v25 = vsel %vm6085_vm15, %v17098_v39, %v6074_v13  ;;  %v6091_v57 = vsel %vm6085_vm15, %v6074_v13, %v17114_v11 }
 0x1fa   : > { %7486 = vrot.lane.b32.xlu1 %v15869_v6, %s15801_s21  ;;  %4096 = vrot.lane.b32.xlu0 %v17109_v32, %s15785_s28  ;;  %v6112_v19 = vsel %vm212_vm1, %v6090_v25, 0  ;;  %s15802_s28 = smov 8  }
 0x1fb   : > { %14186 = vmatmul.mubr.msk.bf16.vlgmr.msra.gmra.mrb[12].mxu1 %vm208_vm2, %v17020_v49  ;;  %14348 = vmatprep.subr.msk.bf16.mxu0 %vm212_vm1, %v6091_v57 }
 0x1fc   : > { %6212 = vmatpush1.bf16.msra.mxu0 %v6112_v19  ;;  %v17129_v36 = vpop.permute.xlu1 %6079  ;;  %v2107_v20 = vpop.permute.xlu0 %2106  ;;  %2347 = vmatprep.mubr.bf16.mxu1 %v19566_v1 }
 0x1fd   : > { %v2117_v13 = vsel %vm2108_vm10, %v2105_v43, %v2107_v20  ;;  %14187 = vmatprep.subr.msk.bf16.mxu1 %vm212_vm1, %v2107_v20  ;;  %vm6368_vm10 = vcmask 105472  }
 0x1fe   : > { %7490 = vrot.lane.b32.xlu1 %v15878_v9, %s15801_s21  ;;  %7488 = vrot.lane.b32.xlu0 %v15880_v10, %s15801_s21  ;;  %v2146_v45 = vsel %vm212_vm1, %v2117_v13, 0 }
 0x1ff   : > { %14349 = vmatmul.mubr.msk.bf16.vlgmr.msra.gmra.mrb[4].mxu0 %vm208_vm2, %v14343_v0  ;;  %2316 = vmatpush1.bf16.msra.mxu1 %v2146_v45 }
 0x200   : > { %v6084_v57 = vpop.permute.xlu1 %6083  ;;  %v6082_v25 = vpop.permute.xlu0 %6081  ;;  %6325 = vmatprep.mubr.bf16.mxu0 %v19566_v1 }
 0x201   : > { %v6094_v43 = vsel %vm6085_vm15, %v17129_v36, %v6082_v25  ;;  %v6095_v19 = vsel %vm6085_vm15, %v6082_v25, %v6084_v57 }
 0x202   : > { %7494 = vrot.lane.b32.xlu1 %v15889_v12, %s15801_s21  ;;  %4371 = vrot.lane.b32.xlu0 %v17081_v15, %s15786_s3  ;;  %v6124_v20 = vsel %vm212_vm1, %v6094_v43, 0 }
 0x203   : > { %14188 = vmatmul.mubr.msk.bf16.vlgmr.msra.gmra.mrb[16].mxu1 %vm208_vm2, %v17020_v49  ;;  %14352 = vmatprep.subr.msk.bf16.mxu0 %vm212_vm1, %v6095_v19 }
 0x204   : > { %6294 = vmatpush1.bf16.msra.mxu0 %v6124_v20  ;;  %v6347_v13 = vpop.permute.xlu1 %6346  ;;  %v2375_v45 = vpop.permute.xlu0 %2374  ;;  %2504 = vmatprep.mubr.bf16.mxu1 %v19566_v1  ;;  %v15745_v20 = vld [vmem:[%s19546_s1 + $0x20] sm:$0xf] }
 0x205   : > { %v2391_v57 = vsel %vm2388_vm0, %v15989_v16, %v2375_v45  ;;  %v2392_v25 = vsel %vm2388_vm0, %v2375_v45, %v15995_v18 }
 0x206   : > { %7498 = vrot.lane.b32.xlu1 %v16800_v48, %s15801_s21  ;;  %7496 = vrot.lane.b32.xlu0 %v15896_v14, %s15801_s21  ;;  %v2408_v49 = vsel %vm212_vm1, %v2391_v57, 0 }
 0x207   : > { %14192 = vmatprep.subr.msk.bf16.mxu1 %vm212_vm1, %v2392_v25  ;;  %14353 = vmatmul.mubr.msk.bf16.vlgmr.msra.gmra.mrb[8].mxu0 %vm208_vm2, %v14343_v0 }
 0x208   : > { %2473 = vmatpush1.bf16.msra.mxu1 %v2408_v49  ;;  %v17164_v43 = vpop.permute.xlu1 %6350  ;;  %v6349_v16 = vpop.permute.xlu0 %6348  ;;  %6444 = vmatprep.mubr.bf16.mxu0 %v19566_v1 }
 0x209   : > { %v6369_v18 = vsel %vm6368_vm10, %v6347_v13, %v6349_v16  ;;  %v6370_v19 = vsel %vm6368_vm10, %v6349_v16, %v17164_v43 }
 0x20a   : > { %7761 = vrot.lane.b32.xlu1 %v15863_v5, %s15802_s28  ;;  %4379 = vrot.lane.b32.xlu0 %v17109_v32, %s15786_s3  ;;  %v6383_v0 = vsel %vm212_vm1, %v6369_v18, 0  ;;  %v14354_v5 = vld [vmem:[%s19546_s1 + $0x58] sm:$0xf]  ;;  %s15813_s3 = smov 63  }
 0x20b   : > { %14193 = vmatmul.mubr.msk.bf16.vlgmr.msra.gmra.mrb[4].mxu1 %vm208_vm2, %v15745_v20  ;;  %14355 = vmatprep.subr.msk.bf16.mxu0 %vm212_vm1, %v6370_v19 }
 0x20c   : > { %6413 = vmatpush1.bf16.msra.mxu0 %v6383_v0  ;;  %v17180_v13 = vpop.permute.xlu1 %6354  ;;  %v2383_v45 = vpop.permute.xlu0 %2382  ;;  %2586 = vmatprep.mubr.bf16.mxu1 %v19566_v1 }
 0x20d   : > { %v2395_v57 = vsel %vm2388_vm0, %v16006_v23, %v2383_v45  ;;  %v2396_v25 = vsel %vm2388_vm0, %v2383_v45, %v16027_v31  ;;  %vm6651_vm0 = vcmask 97280  }
 0x20e   : > { %7765 = vrot.lane.b32.xlu1 %v15861_v4, %s15802_s28  ;;  %7763 = vrot.lane.b32.xlu0 %v15871_v7, %s15802_s28  ;;  %v2420_v49 = vsel %vm212_vm1, %v2395_v57, 0 }
 0x20f   : > { %14196 = vmatprep.subr.msk.bf16.mxu1 %vm212_vm1, %v2396_v25  ;;  %14356 = vmatmul.mubr.msk.bf16.vlgmr.msra.gmra.mrb[0].mxu0 %vm208_vm2, %v14354_v5  ;;  %v8042_v25 = vld [vmem:[%s15854_s14 + $0x4] sm:$0xff] }
 0x210   : > { %2555 = vmatpush1.bf16.msra.mxu1 %v2420_v49  ;;  %v17197_v16 = vpop.permute.xlu1 %6358  ;;  %v6357_v18 = vpop.permute.xlu0 %6356  ;;  %6526 = vmatprep.mubr.bf16.mxu0 %v19566_v1 }
 0x211   : > { %v6373_v23 = vsel %vm6368_vm10, %v17180_v13, %v6357_v18  ;;  %v6374_v4 = vsel %vm6368_vm10, %v6357_v18, %v17197_v16 }
 0x212   : > { %7769 = vrot.lane.b32.xlu1 %v15869_v6, %s15802_s28  ;;  %4654 = vrot.lane.b32.xlu0 %v17081_v15, %s15788_s13  ;;  %v6395_v7 = vsel %vm212_vm1, %v6373_v23, 0 }
 0x213   : > { %14197 = vmatmul.mubr.msk.bf16.vlgmr.msra.gmra.mrb[12].mxu1 %vm208_vm2, %v15745_v20  ;;  %14359 = vmatprep.subr.msk.bf16.mxu0 %vm212_vm1, %v6374_v4 }
 0x214   : > { %6495 = vmatpush1.bf16.msra.mxu0 %v6395_v7  ;;  %v17211_v31 = vpop.permute.xlu1 %6362  ;;  %v2655_v19 = vpop.permute.xlu0 %2654  ;;  %2784 = vmatprep.mubr.bf16.mxu1 %v19566_v1  ;;  %v17250_v7 = vcombine.low %v8042_v25, %v8042_v25 }
 0x215   : > { %v2671_v0 = vsel %vm2668_vm4, %v16064_v46, %v2655_v19  ;;  %v2672_v6 = vsel %vm2668_vm4, %v2655_v19, %v16091_v58  ;;  %v15746_v58 = vld [vmem:[%s19546_s1 + $0x24] sm:$0xf] }
 0x216   : > { %7773 = vrot.lane.b32.xlu1 %v15878_v9, %s15802_s28  ;;  %7771 = vrot.lane.b32.xlu0 %v15880_v10, %s15802_s28  ;;  %v2688_v20 = vsel %vm212_vm1, %v2671_v0, 0 }
 0x217   : > { %14203 = vmatprep.subr.msk.bf16.mxu1 %vm212_vm1, %v2672_v6  ;;  %14360 = vmatmul.mubr.msk.bf16.vlgmr.msra.gmra.mrb[4].mxu0 %vm208_vm2, %v14354_v5  ;;  %v17272_v6 = vcombine.high %v8042_v25, %v8042_v25 }
 0x218   : > { %2753 = vmatpush1.bf16.msra.mxu1 %v2688_v20  ;;  %v6367_v45 = vpop.permute.xlu1 %6366  ;;  %v6365_v57 = vpop.permute.xlu0 %6364  ;;  %6608 = vmatprep.mubr.bf16.mxu0 %v19566_v1  ;;  %v8044_v20 = vld [vmem:[%s15854_s14 + $0x14] sm:$0xff] }
 0x219   : > { %v6377_v46 = vsel %vm6368_vm10, %v17211_v31, %v6365_v57  ;;  %v6378_v9 = vsel %vm6368_vm10, %v6365_v57, %v6367_v45  ;;  %v17292_v25 = vcombine.low %v8044_v20, %v8044_v20 }
 0x21a   : > { %7777 = vrot.lane.b32.xlu1 %v15889_v12, %s15802_s28  ;;  %4662 = vrot.lane.b32.xlu0 %v17109_v32, %s15788_s13  ;;  %v6407_v10 = vsel %vm212_vm1, %v6377_v46, 0  ;;  %s15803_s13 = smov 104   ;;  %v14365_v46 = vld [vmem:[%s19546_s1 + $0x5c] sm:$0xf] }
 0x21b   : > { %14204 = vmatmul.mubr.msk.bf16.vlgmr.msra.gmra.mrb[4].mxu1 %vm208_vm2, %v15746_v58  ;;  %14363 = vmatprep.subr.msk.bf16.mxu0 %vm212_vm1, %v6378_v9 }
 0x21c   : > { %6577 = vmatpush1.bf16.msra.mxu0 %v6407_v10  ;;  %v6630_v49 = vpop.permute.xlu1 %6629  ;;  %v2663_v18 = vpop.permute.xlu0 %2662  ;;  %2866 = vmatprep.mubr.bf16.mxu1 %v19566_v1 }
 0x21d   : > { %v2675_v12 = vsel %vm2668_vm4, %v16102_v61, %v2663_v18  ;;  %v2676_v23 = vsel %vm2668_vm4, %v2663_v18, %v16114_v2  ;;  %v17255_v61 = vld [vmem:[%s15854_s14 + $0xc] sm:$0xff]  ;;  %vm6934_vm4 = vcmask 89088  }
 0x21e   : > { %7781 = vrot.lane.b32.xlu1 %v16800_v48, %s15802_s28  ;;  %7779 = vrot.lane.b32.xlu0 %v15896_v14, %s15802_s28  ;;  %v2700_v4 = vsel %vm212_vm1, %v2675_v12, 0  ;;  %v17270_v0 = vcombine.low %v17255_v61, %v17255_v61 }
 0x21f   : > { %14207 = vmatprep.subr.msk.bf16.mxu1 %vm212_vm1, %v2676_v23  ;;  %14364 = vmatmul.mubr.msk.bf16.vlgmr.msra.gmra.mrb[8].mxu0 %vm208_vm2, %v14354_v5 }
 0x220   : > { %2835 = vmatpush1.bf16.msra.mxu1 %v2700_v4  ;;  %v17257_v2 = vpop.permute.xlu1 %6633  ;;  %v6632_v19 = vpop.permute.xlu0 %6631  ;;  %6727 = vmatprep.mubr.bf16.mxu0 %v19566_v1 }
 0x221   : > { %v6652_v14 = vsel %vm6651_vm0, %v6630_v49, %v6632_v19  ;;  %v6653_v48 = vsel %vm6651_vm0, %v6632_v19, %v17257_v2  ;;  %v17297_v49 = vld [vmem:[%s15854_s14 + $0x1c] sm:$0xff]  ;;  %v17315_v19 = vcombine.high %v8044_v20, %v8044_v20 }
 0x222   : > { %8074 = vrot.lane.b32.xlu1 %v17250_v7, %s15803_s13  ;;  %4937 = vrot.lane.b32.xlu0 %v17081_v15, %s15790_s26  ;;  %v6666_v5 = vsel %vm212_vm1, %v6652_v14, 0  ;;  %v17313_v4 = vcombine.low %v17297_v49, %v17297_v49  ;;  %v15747_v14 = vld [vmem:[%s19546_s1 + $0x28] sm:$0xf] }
 0x223   : > { %14208 = vmatmul.mubr.msk.bf16.vlgmr.msra.gmra.mrb[12].mxu1 %vm208_vm2, %v15746_v58  ;;  %14366 = vmatprep.subr.msk.bf16.mxu0 %vm212_vm1, %v6653_v48  ;;  %v8046_v48 = vld [vmem:[%s15854_s14 + $0x24] sm:$0xff] }
 0x224   : > { %6696 = vmatpush1.bf16.msra.mxu0 %v6666_v5  ;;  %v17277_v45 = vpop.permute.xlu1 %6637  ;;  %v2935_v57 = vpop.permute.xlu0 %2934  ;;  %3064 = vmatprep.mubr.bf16.mxu1 %v19566_v1 }
 0x225   : > { %v2951_v9 = vsel %vm2948_vm5, %v16152_v30, %v2935_v57  ;;  %v2952_v10 = vsel %vm2948_vm5, %v2935_v57, %v16150_v29 }
 0x226   : > { %8078 = vrot.lane.b32.xlu1 %v17270_v0, %s15803_s13  ;;  %8076 = vrot.lane.b32.xlu0 %v17272_v6, %s15803_s13  ;;  %v2968_v58 = vsel %vm212_vm1, %v2951_v9, 0 }
 0x227   : > { %14214 = vmatprep.subr.msk.bf16.mxu1 %vm212_vm1, %v2952_v10  ;;  %14367 = vmatmul.mubr.msk.bf16.vlgmr.msra.gmra.mrb[0].mxu0 %vm208_vm2, %v14365_v46 }
 0x228   : > { %3033 = vmatpush1.bf16.msra.mxu1 %v2968_v58  ;;  %v17299_v30 = vpop.permute.xlu1 %6641  ;;  %v6640_v29 = vpop.permute.xlu0 %6639  ;;  %6809 = vmatprep.mubr.bf16.mxu0 %v19566_v1  ;;  %v17335_v58 = vcombine.low %v8046_v48, %v8046_v48 }
 0x229   : > { %v6656_v18 = vsel %vm6651_vm0, %v17277_v45, %v6640_v29  ;;  %v6657_v12 = vsel %vm6651_vm0, %v6640_v29, %v17299_v30 }
 0x22a   : > { %8082 = vrot.lane.b32.xlu1 %v17292_v25, %s15803_s13  ;;  %4945 = vrot.lane.b32.xlu0 %v17109_v32, %s15790_s26  ;;  %v6678_v23 = vsel %vm212_vm1, %v6656_v18, 0  ;;  %s15804_s26 = smov 103  }
 0x22b   : > { %14215 = vmatmul.mubr.msk.bf16.vlgmr.msra.gmra.mrb[4].mxu1 %vm208_vm2, %v15747_v14  ;;  %14370 = vmatprep.subr.msk.bf16.mxu0 %vm212_vm1, %v6657_v12 }
 0x22c   : > { %6778 = vmatpush1.bf16.msra.mxu0 %v6678_v23  ;;  %v17323_v5 = vpop.permute.xlu1 %6645  ;;  %v2943_v57 = vpop.permute.xlu0 %2942  ;;  %3146 = vmatprep.mubr.bf16.mxu1 %v19566_v1  ;;  %v17348_v23 = vcombine.high %v8046_v48, %v8046_v48 }
 0x22d   : > { %v2955_v9 = vsel %vm2948_vm5, %v16167_v35, %v2943_v57  ;;  %v2956_v20 = vsel %vm2948_vm5, %v2943_v57, %v16186_v42  ;;  %vm7217_vm5 = vcmask 80896  }
 0x22e   : > { %8086 = vrot.lane.b32.xlu1 %v17313_v4, %s15803_s13  ;;  %8084 = vrot.lane.b32.xlu0 %v17315_v19, %s15803_s13  ;;  %v2980_v10 = vsel %vm212_vm1, %v2955_v9, 0 }
 0x22f   : > { %14218 = vmatprep.subr.msk.bf16.mxu1 %vm212_vm1, %v2956_v20  ;;  %14371 = vmatmul.mubr.msk.bf16.vlgmr.msra.gmra.mrb[4].mxu0 %vm208_vm2, %v14365_v46 }
 0x230   : > { %3115 = vmatpush1.bf16.msra.mxu1 %v2980_v10  ;;  %v6650_v29 = vpop.permute.xlu1 %6649  ;;  %v6648_v35 = vpop.permute.xlu0 %6647  ;;  %6891 = vmatprep.mubr.bf16.mxu0 %v19566_v1 }
 0x231   : > { %v6660_v42 = vsel %vm6651_vm0, %v17323_v5, %v6648_v35  ;;  %v6661_v18 = vsel %vm6651_vm0, %v6648_v35, %v6650_v29  ;;  %v15748_v35 = vld [vmem:[%s19546_s1 + $0x2c] sm:$0xf] }
 0x232   : > { %8090 = vrot.lane.b32.xlu1 %v17335_v58, %s15803_s13  ;;  %5220 = vrot.lane.b32.xlu0 %v17081_v15, %s15791_s5  ;;  %v6690_v12 = vsel %vm212_vm1, %v6660_v42, 0 }
 0x233   : > { %14219 = vmatmul.mubr.msk.bf16.vlgmr.msra.gmra.mrb[12].mxu1 %vm208_vm2, %v15747_v14  ;;  %14374 = vmatprep.subr.msk.bf16.mxu0 %vm212_vm1, %v6661_v18 }
 0x234   : > { %6860 = vmatpush1.bf16.msra.mxu0 %v6690_v12  ;;  %v6913_v57 = vpop.permute.xlu1 %6912  ;;  %v3215_v9 = vpop.permute.xlu0 %3214  ;;  %3344 = vmatprep.mubr.bf16.mxu1 %v19566_v1  ;;  %v14376_v12 = vld [vmem:[%s19546_s1 + $0x60] sm:$0xf] }
 0x235   : > { %v3231_v20 = vsel %vm3228_vm6, %v16216_v51, %v3215_v9  ;;  %v3232_v10 = vsel %vm3228_vm6, %v3215_v9, %v16214_v50 }
 0x236   : > { %5228 = vrot.lane.b32.xlu1 %v17109_v32, %s15791_s5  ;;  %8092 = vrot.lane.b32.xlu0 %v17348_v23, %s15803_s13  ;;  %v3248_v14 = vsel %vm212_vm1, %v3231_v20, 0  ;;  %s15822_s5 = smov 23  }
 0x237   : > { %14225 = vmatprep.subr.msk.bf16.mxu1 %vm212_vm1, %v3232_v10  ;;  %14375 = vmatmul.mubr.msk.bf16.vlgmr.msra.gmra.mrb[8].mxu0 %vm208_vm2, %v14365_v46 }
 0x238   : > { %3313 = vmatpush1.bf16.msra.mxu1 %v3248_v14  ;;  %v17364_v48 = vpop.permute.xlu1 %6916  ;;  %v6915_v51 = vpop.permute.xlu0 %6914  ;;  %7010 = vmatprep.mubr.bf16.mxu0 %v19566_v1 }
 0x239   : > { %v6935_v50 = vsel %vm6934_vm4, %v6913_v57, %v6915_v51  ;;  %v6936_v29 = vsel %vm6934_vm4, %v6915_v51, %v17364_v48 }
 0x23a   : > { %8356 = vrot.lane.b32.xlu1 %v17272_v6, %s15804_s26  ;;  %8354 = vrot.lane.b32.xlu0 %v17250_v7, %s15804_s26  ;;  %v6949_v46 = vsel %vm212_vm1, %v6935_v50, 0 }
 0x23b   : > { %14226 = vmatmul.mubr.msk.bf16.vlgmr.msra.gmra.mrb[4].mxu1 %vm208_vm2, %v15748_v35  ;;  %14377 = vmatprep.subr.msk.bf16.mxu0 %vm212_vm1, %v6936_v29 }
 0x23c   : > { %6979 = vmatpush1.bf16.msra.mxu0 %v6949_v46  ;;  %v17380_v42 = vpop.permute.xlu1 %6920  ;;  %v3223_v18 = vpop.permute.xlu0 %3222  ;;  %3426 = vmatprep.mubr.bf16.mxu1 %v19566_v1 }
 0x23d   : > { %v3235_v57 = vsel %vm3228_vm6, %v16231_v55, %v3223_v18  ;;  %v3236_v9 = vsel %vm3228_vm6, %v3223_v18, %v16244_v62  ;;  %vm7500_vm6 = vcmask 72704  }
 0x23e   : > { %5503 = vrot.lane.b32.xlu1 %v17081_v15, %s15793_s16  ;;  %8358 = vrot.lane.b32.xlu0 %v17270_v0, %s15804_s26  ;;  %v3260_v20 = vsel %vm212_vm1, %v3235_v57, 0 }
 0x23f   : > { %14229 = vmatprep.subr.msk.bf16.mxu1 %vm212_vm1, %v3236_v9  ;;  %14378 = vmatmul.mubr.msk.bf16.vlgmr.msra.gmra.mrb[0].mxu0 %vm208_vm2, %v14376_v12 }
 0x240   : > { %3395 = vmatpush1.bf16.msra.mxu1 %v3260_v20  ;;  %v17397_v10 = vpop.permute.xlu1 %6924  ;;  %v6923_v14 = vpop.permute.xlu0 %6922  ;;  %7092 = vmatprep.mubr.bf16.mxu0 %v19566_v1 }
 0x241   : > { %v6939_v55 = vsel %vm6934_vm4, %v17380_v42, %v6923_v14  ;;  %v6940_v62 = vsel %vm6934_vm4, %v6923_v14, %v17397_v10  ;;  %v15749_v14 = vld [vmem:[%s19546_s1 + $0x30] sm:$0xf] }
 0x242   : > { %8364 = vrot.lane.b32.xlu1 %v17315_v19, %s15804_s26  ;;  %8362 = vrot.lane.b32.xlu0 %v17292_v25, %s15804_s26  ;;  %v6961_v51 = vsel %vm212_vm1, %v6939_v55, 0 }
 0x243   : > { %14230 = vmatmul.mubr.msk.bf16.vlgmr.msra.gmra.mrb[12].mxu1 %vm208_vm2, %v15748_v35  ;;  %14381 = vmatprep.subr.msk.bf16.mxu0 %vm212_vm1, %v6940_v62 }
 0x244   : > { %7061 = vmatpush1.bf16.msra.mxu0 %v6961_v51  ;;  %v17411_v50 = vpop.permute.xlu1 %6928  ;;  %v3495_v29 = vpop.permute.xlu0 %3494  ;;  %3624 = vmatprep.mubr.bf16.mxu1 %v19566_v1 }
 0x245   : > { %v3511_v46 = vsel %vm3508_vm8, %v16283_v26, %v3495_v29  ;;  %v3512_v18 = vsel %vm3508_vm8, %v3495_v29, %v16307_v41 }
 0x246   : > { %5511 = vrot.lane.b32.xlu1 %v17109_v32, %s15793_s16  ;;  %8366 = vrot.lane.b32.xlu0 %v17313_v4, %s15804_s26  ;;  %v3528_v35 = vsel %vm212_vm1, %v3511_v46, 0 }
 0x247   : > { %14236 = vmatprep.subr.msk.bf16.mxu1 %vm212_vm1, %v3512_v18  ;;  %14382 = vmatmul.mubr.msk.bf16.vlgmr.msra.gmra.mrb[4].mxu0 %vm208_vm2, %v14376_v12 }
 0x248   : > { %3593 = vmatpush1.bf16.msra.mxu1 %v3528_v35  ;;  %v6933_v57 = vpop.permute.xlu1 %6932  ;;  %v6931_v9 = vpop.permute.xlu0 %6930  ;;  %7174 = vmatprep.mubr.bf16.mxu0 %v19566_v1 }
 0x249   : > { %v6943_v26 = vsel %vm6934_vm4, %v17411_v50, %v6931_v9  ;;  %v6944_v41 = vsel %vm6934_vm4, %v6931_v9, %v6933_v57 }
 0x24a   : > { %8372 = vrot.lane.b32.xlu1 %v17348_v23, %s15804_s26  ;;  %8370 = vrot.lane.b32.xlu0 %v17335_v58, %s15804_s26  ;;  %v6973_v20 = vsel %vm212_vm1, %v6943_v26, 0  ;;  %v14387_v26 = vld [vmem:[%s19546_s1 + $0x64] sm:$0xf] }
 0x24b   : > { %14237 = vmatmul.mubr.msk.bf16.vlgmr.msra.gmra.mrb[4].mxu1 %vm208_vm2, %v15749_v14  ;;  %14385 = vmatprep.subr.msk.bf16.mxu0 %vm212_vm1, %v6944_v41 }
 0x24c   : > { %7143 = vmatpush1.bf16.msra.mxu0 %v6973_v20  ;;  %v7196_v55 = vpop.permute.xlu1 %7195  ;;  %v3503_v62 = vpop.permute.xlu0 %3502  ;;  %3706 = vmatprep.mubr.bf16.mxu1 %v19566_v1 }
 0x24d   : > { %v3515_v51 = vsel %vm3508_vm8, %v16318_v47, %v3503_v62  ;;  %v3516_v29 = vsel %vm3508_vm8, %v3503_v62, %v16338_v54  ;;  %vm8094_vm8 = vcmask 850944  }
 0x24e   : > { %8634 = vrot.lane.b32.xlu1 %v17250_v7, %s15805_s20  ;;  %5786 = vrot.lane.b32.xlu0 %v17081_v15, %s15794_s24  ;;  %v3540_v46 = vsel %vm212_vm1, %v3515_v51, 0 }
 0x24f   : > { %14240 = vmatprep.subr.msk.bf16.mxu1 %vm212_vm1, %v3516_v29  ;;  %14386 = vmatmul.mubr.msk.bf16.vlgmr.msra.gmra.mrb[8].mxu0 %vm208_vm2, %v14376_v12  ;;  %v15750_v29 = vld [vmem:[%s19546_s1 + $0x34] sm:$0xf] }
 0x250   : > { %3675 = vmatpush1.bf16.msra.mxu1 %v3540_v46  ;;  %v17451_v18 = vpop.permute.xlu1 %7199  ;;  %v7198_v47 = vpop.permute.xlu0 %7197  ;;  %7293 = vmatprep.mubr.bf16.mxu0 %v19566_v1 }
 0x251   : > { %v7218_v54 = vsel %vm7217_vm5, %v7196_v55, %v7198_v47  ;;  %v7219_v35 = vsel %vm7217_vm5, %v7198_v47, %v17451_v18 }
 0x252   : > { %8638 = vrot.lane.b32.xlu1 %v17270_v0, %s15805_s20  ;;  %8636 = vrot.lane.b32.xlu0 %v17272_v6, %s15805_s20  ;;  %v7232_v57 = vsel %vm212_vm1, %v7218_v54, 0 }
 0x253   : > { %14241 = vmatmul.mubr.msk.bf16.vlgmr.msra.gmra.mrb[12].mxu1 %vm208_vm2, %v15749_v14  ;;  %14388 = vmatprep.subr.msk.bf16.mxu0 %vm212_vm1, %v7219_v35 }
 0x254   : > { %7262 = vmatpush1.bf16.msra.mxu0 %v7232_v57  ;;  %v17464_v12 = vpop.permute.xlu1 %7203  ;;  %v3775_v9 = vpop.permute.xlu0 %3774  ;;  %3904 = vmatprep.mubr.bf16.mxu1 %v19566_v1 }
 0x255   : > { %v3791_v41 = vsel %vm3788_vm9, %v16374_v24, %v3775_v9  ;;  %v3792_v20 = vsel %vm3788_vm9, %v3775_v9, %v16388_v34 }
 0x256   : > { %8642 = vrot.lane.b32.xlu1 %v17292_v25, %s15805_s20  ;;  %5794 = vrot.lane.b32.xlu0 %v17109_v32, %s15794_s24  ;;  %v3808_v14 = vsel %vm212_vm1, %v3791_v41, 0 }
 0x257   : > { %14247 = vmatprep.subr.msk.bf16.mxu1 %vm212_vm1, %v3792_v20  ;;  %14389 = vmatmul.mubr.msk.bf16.vlgmr.msra.gmra.mrb[0].mxu0 %vm208_vm2, %v14387_v26 }
 0x258   : > { %3873 = vmatpush1.bf16.msra.mxu1 %v3808_v14  ;;  %v17481_v55 = vpop.permute.xlu1 %7207  ;;  %v7206_v62 = vpop.permute.xlu0 %7205  ;;  %7375 = vmatprep.mubr.bf16.mxu0 %v19566_v1 }
 0x259   : > { %v7222_v24 = vsel %vm7217_vm5, %v17464_v12, %v7206_v62  ;;  %v7223_v34 = vsel %vm7217_vm5, %v7206_v62, %v17481_v55 }
 0x25a   : > { %8646 = vrot.lane.b32.xlu1 %v17313_v4, %s15805_s20  ;;  %8644 = vrot.lane.b32.xlu0 %v17315_v19, %s15805_s20  ;;  %v7244_v51 = vsel %vm212_vm1, %v7222_v24, 0 }
 0x25b   : > { %14248 = vmatmul.mubr.msk.bf16.vlgmr.msra.gmra.mrb[4].mxu1 %vm208_vm2, %v15750_v29  ;;  %14392 = vmatprep.subr.msk.bf16.mxu0 %vm212_vm1, %v7223_v34 }
 0x25c   : > { %7344 = vmatpush1.bf16.msra.mxu0 %v7244_v51  ;;  %v17498_v46 = vpop.permute.xlu1 %7211  ;;  %v3783_v47 = vpop.permute.xlu0 %3782  ;;  %3986 = vmatprep.mubr.bf16.mxu1 %v19566_v1 }
 0x25d   : > { %v3795_v54 = vsel %vm3788_vm9, %v16399_v40, %v3783_v47  ;;  %v3796_v35 = vsel %vm3788_vm9, %v3783_v47, %v16425_v59  ;;  %vm8374_vm9 = vcmask 842752  }
 0x25e   : > { %8650 = vrot.lane.b32.xlu1 %v17335_v58, %s15805_s20  ;;  %6069 = vrot.lane.b32.xlu0 %v17081_v15, %s15796_s6  ;;  %v3820_v57 = vsel %vm212_vm1, %v3795_v54, 0 }
 0x25f   : > { %14251 = vmatprep.subr.msk.bf16.mxu1 %vm212_vm1, %v3796_v35  ;;  %14393 = vmatmul.mubr.msk.bf16.vlgmr.msra.gmra.mrb[4].mxu0 %vm208_vm2, %v14387_v26 }
 0x260   : > { %3955 = vmatpush1.bf16.msra.mxu1 %v3820_v57  ;;  %v7216_v9 = vpop.permute.xlu1 %7215  ;;  %v7214_v41 = vpop.permute.xlu0 %7213  ;;  %7457 = vmatprep.mubr.bf16.mxu0 %v19566_v1 }
 0x261   : > { %v7226_v40 = vsel %vm7217_vm5, %v17498_v46, %v7214_v41  ;;  %v7227_v59 = vsel %vm7217_vm5, %v7214_v41, %v7216_v9  ;;  %v14398_v9 = vld [vmem:[%s19546_s1 + $0x68] sm:$0xf] }
 0x262   : > { %6077 = vrot.lane.b32.xlu1 %v17109_v32, %s15796_s6  ;;  %8652 = vrot.lane.b32.xlu0 %v17348_v23, %s15805_s20  ;;  %v7256_v20 = vsel %vm212_vm1, %v7226_v40, 0  ;;  %s15806_s6 = smov 101  }
 0x263   : > { %14252 = vmatmul.mubr.msk.bf16.vlgmr.msra.gmra.mrb[12].mxu1 %vm208_vm2, %v15750_v29  ;;  %14396 = vmatprep.subr.msk.bf16.mxu0 %vm212_vm1, %v7227_v59 }
 0x264   : > { %7426 = vmatpush1.bf16.msra.mxu0 %v7256_v20  ;;  %v7479_v14 = vpop.permute.xlu1 %7478  ;;  %v4089_v62 = vpop.permute.xlu0 %4088  ;;  %4221 = vmatprep.mubr.bf16.mxu1 %v19566_v1 }
 0x265   : > { %v4107_v24 = vsel %vm4104_vm11, %v16463_v28, %v4089_v62  ;;  %v4108_v34 = vsel %vm4104_vm11, %v4089_v62, %v16487_v52 }
 0x266   : > { %8916 = vrot.lane.b32.xlu1 %v17272_v6, %s15806_s6  ;;  %8914 = vrot.lane.b32.xlu0 %v17250_v7, %s15806_s6  ;;  %v4125_v51 = vsel %vm212_vm1, %v4107_v24, 0 }
 0x267   : > { %14269 = vmatprep.subr.msk.bf16.mxu1 %vm212_vm1, %v4108_v34  ;;  %14397 = vmatmul.mubr.msk.bf16.vlgmr.msra.gmra.mrb[8].mxu0 %vm208_vm2, %v14387_v26  ;;  %v15751_v26 = vld [vmem:[%s19546_s1 + $0x38] sm:$0xf] }
 0x268   : > { %4190 = vmatpush1.bf16.msra.mxu1 %v4125_v51  ;;  %v17535_v29 = vpop.permute.xlu1 %7482  ;;  %v7481_v28 = vpop.permute.xlu0 %7480  ;;  %7576 = vmatprep.mubr.bf16.mxu0 %v19566_v1 }
 0x269   : > { %v7501_v52 = vsel %vm7500_vm6, %v7479_v14, %v7481_v28  ;;  %v7502_v47 = vsel %vm7500_vm6, %v7481_v28, %v17535_v29 }
 0x26a   : > { %6352 = vrot.lane.b32.xlu1 %v17081_v15, %s15797_s11  ;;  %8918 = vrot.lane.b32.xlu0 %v17270_v0, %s15806_s6  ;;  %v7515_v54 = vsel %vm212_vm1, %v7501_v52, 0 }
 0x26b   : > { %14270 = vmatmul.mubr.msk.bf16.vlgmr.msra.gmra.mrb[4].mxu1 %vm208_vm2, %v15751_v26  ;;  %14399 = vmatprep.subr.msk.bf16.mxu0 %vm212_vm1, %v7502_v47 }
 0x26c   : > { %7545 = vmatpush1.bf16.msra.mxu0 %v7515_v54  ;;  %v17551_v35 = vpop.permute.xlu1 %7486  ;;  %v4097_v57 = vpop.permute.xlu0 %4096  ;;  %4303 = vmatprep.mubr.bf16.mxu1 %v19566_v1 }
 0x26d   : > { %v4111_v41 = vsel %vm4104_vm11, %v16500_v60, %v4097_v57  ;;  %v4112_v40 = vsel %vm4104_vm11, %v4097_v57, %v16514_v8  ;;  %v15752_v57 = vld [vmem:[%s19546_s1 + $0x3c] sm:$0xf]  ;;  %vm19588_vm11 = vcmask 375808  }
 0x26e   : > { %8924 = vrot.lane.b32.xlu1 %v17315_v19, %s15806_s6  ;;  %8922 = vrot.lane.b32.xlu0 %v17292_v25, %s15806_s6  ;;  %v4137_v59 = vsel %vm212_vm1, %v4111_v41, 0 }
 0x26f   : > { %14273 = vmatprep.subr.msk.bf16.mxu1 %vm212_vm1, %v4112_v40  ;;  %14400 = vmatmul.mubr.msk.bf16.vlgmr.msra.gmra.mrb[0].mxu0 %vm208_vm2, %v14398_v9 }
 0x270   : > { %4272 = vmatpush1.bf16.msra.mxu1 %v4137_v59  ;;  %v17568_v20 = vpop.permute.xlu1 %7490  ;;  %v7489_v14 = vpop.permute.xlu0 %7488  ;;  %7658 = vmatprep.mubr.bf16.mxu0 %v19566_v1 }
 0x271   : > { %v7505_v60 = vsel %vm7500_vm6, %v17551_v35, %v7489_v14  ;;  %v7506_v8 = vsel %vm7500_vm6, %v7489_v14, %v17568_v20 }
 0x272   : > { %6360 = vrot.lane.b32.xlu1 %v17109_v32, %s15797_s11  ;;  %8926 = vrot.lane.b32.xlu0 %v17313_v4, %s15806_s6  ;;  %v7527_v62 = vsel %vm212_vm1, %v7505_v60, 0  ;;  %s15807_s11 = smov 100  }
 0x273   : > { %14274 = vmatmul.mubr.msk.bf16.vlgmr.msra.gmra.mrb[12].mxu1 %vm208_vm2, %v15751_v26  ;;  %14403 = vmatprep.subr.msk.bf16.mxu0 %vm212_vm1, %v7506_v8 }
 0x274   : > { %7627 = vmatpush1.bf16.msra.mxu0 %v7527_v62  ;;  %v17582_v24 = vpop.permute.xlu1 %7494  ;;  %v4372_v34 = vpop.permute.xlu0 %4371  ;;  %4504 = vmatprep.mubr.bf16.mxu1 %v19566_v1 }
 0x275   : > { %v4390_v51 = vsel %vm4387_vm12, %v16546_v38, %v4372_v34  ;;  %v4391_v28 = vsel %vm4387_vm12, %v4372_v34, %v16573_v63 }
 0x276   : > { %8932 = vrot.lane.b32.xlu1 %v17348_v23, %s15806_s6  ;;  %8930 = vrot.lane.b32.xlu0 %v17335_v58, %s15806_s6  ;;  %v4408_v52 = vsel %vm212_vm1, %v4390_v51, 0 }
 0x277   : > { %14280 = vmatprep.subr.msk.bf16.mxu1 %vm212_vm1, %v4391_v28  ;;  %14404 = vmatmul.mubr.msk.bf16.vlgmr.msra.gmra.mrb[4].mxu0 %vm208_vm2, %v14398_v9  ;;  %v14409_v28 = vld [vmem:[%s19546_s1 + $0x6c] sm:$0xf] }
 0x278   : > { %4473 = vmatpush1.bf16.msra.mxu1 %v4408_v52  ;;  %v7499_v47 = vpop.permute.xlu1 %7498  ;;  %v7497_v54 = vpop.permute.xlu0 %7496  ;;  %7740 = vmatprep.mubr.bf16.mxu0 %v19566_v1 }
 0x279   : > { %v7509_v38 = vsel %vm7500_vm6, %v17582_v24, %v7497_v54  ;;  %v7510_v63 = vsel %vm7500_vm6, %v7497_v54, %v7499_v47 }
 0x27a   : > { %9194 = vrot.lane.b32.xlu1 %v17250_v7, %s15807_s11  ;;  %6635 = vrot.lane.b32.xlu0 %v17081_v15, %s15798_s25  ;;  %v7539_v26 = vsel %vm212_vm1, %v7509_v38, 0 }
 0x27b   : > { %14281 = vmatmul.mubr.msk.bf16.vlgmr.msra.gmra.mrb[4].mxu1 %vm208_vm2, %v15752_v57  ;;  %14407 = vmatprep.subr.msk.bf16.mxu0 %vm212_vm1, %v7510_v63 }
 0x27c   : > { %7709 = vmatpush1.bf16.msra.mxu0 %v7539_v26  ;;  %v7762_v41 = vpop.permute.xlu1 %7761  ;;  %v4380_v40 = vpop.permute.xlu0 %4379  ;;  %4586 = vmatprep.mubr.bf16.mxu1 %v19566_v1 }
 0x27d   : > { %v4394_v59 = vsel %vm4387_vm12, %v16583_v17, %v4380_v40  ;;  %v4395_v14 = vsel %vm4387_vm12, %v4380_v40, %v16613_v44  ;;  %vm19591_vm12 = vmmov %vm19588_vm11 }
 0x27e   : > { %9198 = vrot.lane.b32.xlu1 %v17270_v0, %s15807_s11  ;;  %9196 = vrot.lane.b32.xlu0 %v17272_v6, %s15807_s11  ;;  %v4420_v60 = vsel %vm212_vm1, %v4394_v59, 0 }
 0x27f   : > { %14284 = vmatprep.subr.msk.bf16.mxu1 %vm212_vm1, %v4395_v14  ;;  %14408 = vmatmul.mubr.msk.bf16.vlgmr.msra.gmra.mrb[8].mxu0 %vm208_vm2, %v14398_v9 }
 0x280   : > { %4555 = vmatpush1.bf16.msra.mxu1 %v4420_v60  ;;  %v17622_v8 = vpop.permute.xlu1 %7765  ;;  %v7764_v62 = vpop.permute.xlu0 %7763  ;;  %7859 = vmatprep.mubr.bf16.mxu0 %v19566_v1 }
 0x281   : > { %v7784_v17 = vsel %vm208_vm2, %v7762_v41, %v7764_v62  ;;  %v7785_v44 = vsel %vm208_vm2, %v7764_v62, %v17622_v8 }
 0x282   : > { %9202 = vrot.lane.b32.xlu1 %v17292_v25, %s15807_s11  ;;  %6643 = vrot.lane.b32.xlu0 %v17109_v32, %s15798_s25  ;;  %v7798_v34 = vsel %vm212_vm1, %v7784_v17, 0  ;;  %s15823_s25 = smov 22  }
 0x283   : > { %14285 = vmatmul.mubr.msk.bf16.vlgmr.msra.gmra.mrb[12].mxu1 %vm208_vm2, %v15752_v57  ;;  %14410 = vmatprep.subr.msk.bf16.mxu0 %vm212_vm1, %v7785_v44  ;;  %v15753_v57 = vld [vmem:[%s19546_s1 + $0x40] sm:$0xf] }
 0x284   : > { %7828 = vmatpush1.bf16.msra.mxu0 %v7798_v34  ;;  %v17635_v9 = vpop.permute.xlu1 %7769  ;;  %v4655_v51 = vpop.permute.xlu0 %4654  ;;  %4787 = vmatprep.mubr.bf16.mxu1 %v19566_v1 }
 0x285   : > { %v4673_v52 = vsel %vm4670_vm14, %v16642_v22, %v4655_v51  ;;  %v4674_v47 = vsel %vm4670_vm14, %v4655_v51, %v16669_v56 }
 0x286   : > { %9206 = vrot.lane.b32.xlu1 %v17313_v4, %s15807_s11  ;;  %9204 = vrot.lane.b32.xlu0 %v17315_v19, %s15807_s11  ;;  %v4691_v54 = vsel %vm212_vm1, %v4673_v52, 0 }
 0x287   : > { %14291 = vmatprep.subr.msk.bf16.mxu1 %vm212_vm1, %v4674_v47  ;;  %14411 = vmatmul.mubr.msk.bf16.vlgmr.msra.gmra.mrb[0].mxu0 %vm208_vm2, %v14409_v28 }
 0x288   : > { %4756 = vmatpush1.bf16.msra.mxu1 %v4691_v54  ;;  %v17652_v38 = vpop.permute.xlu1 %7773  ;;  %v7772_v63 = vpop.permute.xlu0 %7771  ;;  %7941 = vmatprep.mubr.bf16.mxu0 %v19566_v1 }
 0x289   : > { %v7788_v22 = vsel %vm208_vm2, %v17635_v9, %v7772_v63  ;;  %v7789_v56 = vsel %vm208_vm2, %v7772_v63, %v17652_v38 }
 0x28a   : > { %9210 = vrot.lane.b32.xlu1 %v17335_v58, %s15807_s11  ;;  %6918 = vrot.lane.b32.xlu0 %v17081_v15, %s15799_s18  ;;  %v7810_v26 = vsel %vm212_vm1, %v7788_v22, 0 }
 0x28b   : > { %14292 = vmatmul.mubr.msk.bf16.vlgmr.msra.gmra.mrb[4].mxu1 %vm208_vm2, %v15753_v57  ;;  %14414 = vmatprep.subr.msk.bf16.mxu0 %vm212_vm1, %v7789_v56 }
 0x28c   : > { %7910 = vmatpush1.bf16.msra.mxu0 %v7810_v26  ;;  %v17669_v41 = vpop.permute.xlu1 %7777  ;;  %v4663_v40 = vpop.permute.xlu0 %4662  ;;  %4869 = vmatprep.mubr.bf16.mxu1 %v19566_v1 }
 0x28d   : > { %v4677_v59 = vsel %vm4670_vm14, %v16680_v3, %v4663_v40  ;;  %v4678_v14 = vsel %vm4670_vm14, %v4663_v40, %v16694_v33  ;;  %v14420_v40 = vld [vmem:[%s19546_s1 + $0x70] sm:$0xf]  ;;  %vm8654_vm14 = vcmask 834560  }
 0x28e   : > { %6926 = vrot.lane.b32.xlu1 %v17109_v32, %s15799_s18  ;;  %9212 = vrot.lane.b32.xlu0 %v17348_v23, %s15807_s11  ;;  %v4703_v60 = vsel %vm212_vm1, %v4677_v59, 0  ;;  %s15808_s18 = smov 99  }
 0x28f   : > { %14295 = vmatprep.subr.msk.bf16.mxu1 %vm212_vm1, %v4678_v14  ;;  %14415 = vmatmul.mubr.msk.bf16.vlgmr.msra.gmra.mrb[4].mxu0 %vm208_vm2, %v14409_v28  ;;  %v19578_v14 = vld [vmem:[#allocation2_spill] sm:$0xff] }
 0x290   : > { %4838 = vmatpush1.bf16.msra.mxu1 %v4703_v60  ;;  %v7782_v62 = vpop.permute.xlu1 %7781  ;;  %v7780_v17 = vpop.permute.xlu0 %7779  ;;  %8023 = vmatprep.mubr.bf16.mxu0 %v19566_v1 }
 0x291   : > { %v7792_v3 = vsel %vm208_vm2, %v17669_v41, %v7780_v17  ;;  %v7793_v33 = vsel %vm208_vm2, %v7780_v17, %v7782_v62 }
 0x292   : > { %9476 = vrot.lane.b32.xlu1 %v17272_v6, %s15808_s18  ;;  %9474 = vrot.lane.b32.xlu0 %v17250_v7, %s15808_s18  ;;  %v7822_v44 = vsel %vm212_vm1, %v7792_v3, 0 }
 0x293   : > { %14296 = vmatmul.mubr.msk.bf16.vlgmr.msra.gmra.mrb[12].mxu1 %vm208_vm2, %v15753_v57  ;;  %14418 = vmatprep.subr.msk.bf16.mxu0 %vm212_vm1, %v7793_v33 }
 0x294   : > { %7992 = vmatpush1.bf16.msra.mxu0 %v7822_v44  ;;  %v8075_v34 = vpop.permute.xlu1 %8074  ;;  %v4938_v51 = vpop.permute.xlu0 %4937  ;;  %5070 = vmatprep.mubr.bf16.mxu1 %v19566_v1 }
 0x295   : > { %v4956_v52 = vsel %vm4953_vm3, %v16736_v27, %v4938_v51  ;;  %v4957_v47 = vsel %vm4953_vm3, %v4938_v51, %v16748_v37 }
 0x296   : > { %7201 = vrot.lane.b32.xlu1 %v17081_v15, %s15800_s7  ;;  %9478 = vrot.lane.b32.xlu0 %v17270_v0, %s15808_s18  ;;  %v4974_v54 = vsel %vm212_vm1, %v4956_v52, 0  ;;  %v19579_v52 = vld [vmem:[#allocation3_spill] sm:$0xff] }
 0x297   : > { %14302 = vmatprep.subr.msk.bf16.mxu1 %vm212_vm1, %v4957_v47  ;;  %14419 = vmatmul.mubr.msk.bf16.vlgmr.msra.gmra.mrb[8].mxu0 %vm208_vm2, %v14409_v28  ;;  %v15754_v28 = vld [vmem:[%s19546_s1 + $0x44] sm:$0xf] }
 0x298   : > { %5039 = vmatpush1.bf16.msra.mxu1 %v4974_v54  ;;  %v17706_v63 = vpop.permute.xlu1 %8078  ;;  %v8077_v27 = vpop.permute.xlu0 %8076  ;;  %8169 = vmatprep.mubr.bf16.mxu0 %v19566_v1  ;;  %v19580_v54 = vld [vmem:[#allocation4_spill] sm:$0xff] }
 0x299   : > { %v8095_v37 = vsel %vm8094_vm8, %v8075_v34, %v8077_v27  ;;  %v8096_v22 = vsel %vm8094_vm8, %v8077_v27, %v17706_v63 }
 0x29a   : > { %9484 = vrot.lane.b32.xlu1 %v17315_v19, %s15808_s18  ;;  %9482 = vrot.lane.b32.xlu0 %v17292_v25, %s15808_s18  ;;  %v8108_v56 = vsel %vm212_vm1, %v8095_v37, 0 }
 0x29b   : > { %14303 = vmatmul.mubr.msk.bf16.vlgmr.msra.gmra.mrb[4].mxu1 %vm208_vm2, %v15754_v28  ;;  %14431 = vmatprep.subr.msk.bf16.mxu0 %vm212_vm1, %v8096_v22 }
 0x29c   : > { %8138 = vmatpush1.bf16.msra.mxu0 %v8108_v56  ;;  %v17722_v26 = vpop.permute.xlu1 %8082  ;;  %v4946_v57 = vpop.permute.xlu0 %4945  ;;  %5152 = vmatprep.mubr.bf16.mxu1 %v19566_v1 }
 0x29d   : > { %v4960_v59 = vsel %vm4953_vm3, %v16761_v53, %v4946_v57  ;;  %v4961_v60 = vsel %vm4953_vm3, %v4946_v57, %v19578_v14  ;;  %v19582_v14 = vld [vmem:[#allocation6_spill] sm:$0xff]  ;;  %vm19593_vm3 = vmmov %vm19588_vm11 }
 0x29e   : > { %7209 = vrot.lane.b32.xlu1 %v17109_v32, %s15800_s7  ;;  %9486 = vrot.lane.b32.xlu0 %v17313_v4, %s15808_s18  ;;  %v4986_v62 = vsel %vm212_vm1, %v4960_v59, 0  ;;  %s15809_s7 = smov 98  }
 0x29f   : > { %14306 = vmatprep.subr.msk.bf16.mxu1 %vm212_vm1, %v4961_v60  ;;  %14432 = vmatmul.mubr.msk.bf16.vlgmr.msra.gmra.mrb[0].mxu0 %vm208_vm2, %v14420_v40 }
 0x2a0   : > { %5121 = vmatpush1.bf16.msra.mxu1 %v4986_v62  ;;  %v17739_v17 = vpop.permute.xlu1 %8086  ;;  %v8085_v3 = vpop.permute.xlu0 %8084  ;;  %8251 = vmatprep.mubr.bf16.mxu0 %v19566_v1 }
 0x2a1   : > { %v8099_v53 = vsel %vm8094_vm8, %v17722_v26, %v8085_v3  ;;  %v8100_v33 = vsel %vm8094_vm8, %v8085_v3, %v17739_v17 }
 0x2a2   : > { %9492 = vrot.lane.b32.xlu1 %v17348_v23, %s15808_s18  ;;  %9490 = vrot.lane.b32.xlu0 %v17335_v58, %s15808_s18  ;;  %v8120_v44 = vsel %vm212_vm1, %v8099_v53, 0  ;;  %v15755_v53 = vld [vmem:[%s19546_s1 + $0x48] sm:$0xf] }
 0x2a3   : > { %14307 = vmatmul.mubr.msk.bf16.vlgmr.msra.gmra.mrb[12].mxu1 %vm208_vm2, %v15754_v28  ;;  %14435 = vmatprep.subr.msk.bf16.mxu0 %vm212_vm1, %v8100_v33  ;;  %v19581_v28 = vld [vmem:[#allocation5_spill] sm:$0xff] }
 0x2a4   : > { %8220 = vmatpush1.bf16.msra.mxu0 %v8120_v44  ;;  %v17753_v34 = vpop.permute.xlu1 %8090  ;;  %v5221_v51 = vpop.permute.xlu0 %5220  ;;  %5353 = vmatprep.mubr.bf16.mxu1 %v19566_v1 }
 0x2a5   : > { %v5239_v47 = vsel %vm5236_vm7, %v19579_v52, %v5221_v51  ;;  %v5240_v27 = vsel %vm5236_vm7, %v5221_v51, %v19580_v54 }
 0x2a6   : > { %9754 = vrot.lane.b32.xlu1 %v17250_v7, %s15809_s7  ;;  %7484 = vrot.lane.b32.xlu0 %v17081_v15, %s15801_s21  ;;  %v5257_v37 = vsel %vm212_vm1, %v5239_v47, 0 }
 0x2a7   : > { %14313 = vmatprep.subr.msk.bf16.mxu1 %vm212_vm1, %v5240_v27  ;;  %14436 = vmatmul.mubr.msk.bf16.vlgmr.msra.gmra.mrb[4].mxu0 %vm208_vm2, %v14420_v40 }
 0x2a8   : > { %5322 = vmatpush1.bf16.msra.mxu1 %v5257_v37  ;;  %v5229_v22 = vpop.permute.xlu1 %5228  ;;  %v8093_v56 = vpop.permute.xlu0 %8092  ;;  %8333 = vmatprep.mubr.bf16.mxu0 %v19566_v1  ;;  %v19583_v37 = vld [vmem:[#allocation7_spill] sm:$0xff] }
 0x2a9   : > { %v5243_v57 = vsel %vm5236_vm7, %v19581_v28, %v5229_v22  ;;  %v8103_v59 = vsel %vm8094_vm8, %v17753_v34, %v8093_v56  ;;  %v5244_v60 = vsel %vm5236_vm7, %v5229_v22, %v19582_v14  ;;  %14439 = vmatprep.subr.msk.bf16.mxu0 %vm212_vm1, %v8093_v56  ;;  %vm19595_vm7 = vmmov %vm19593_vm3 }
 0x2aa   : > { %9758 = vrot.lane.b32.xlu1 %v17270_v0, %s15809_s7  ;;  %9756 = vrot.lane.b32.xlu0 %v17272_v6, %s15809_s7  ;;  %v5269_v62 = vsel %vm212_vm1, %v5243_v57, 0  ;;  %v8132_v3 = vsel %vm212_vm1, %v8103_v59, 0  ;;  %v19584_v57 = vld [vmem:[#allocation8_spill] sm:$0xff] }
 0x2ab   : > { %14314 = vmatmul.mubr.msk.bf16.vlgmr.msra.gmra.mrb[4].mxu1 %vm208_vm2, %v15755_v53  ;;  %14317 = vmatprep.subr.msk.bf16.mxu1 %vm212_vm1, %v5244_v60 }
 0x2ac   : > { %5404 = vmatpush1.bf16.msra.mxu1 %v5269_v62  ;;  %8302 = vmatpush1.bf16.msra.mxu0 %v8132_v3  ;;  %v8357_v33 = vpop.permute.xlu1 %8356  ;;  %v8355_v44 = vpop.permute.xlu0 %8354 }
 0x2ad   : > { %5435 = vmatprep.mubr.bf16.mxu1 %v19566_v1  ;;  %v8375_v27 = vsel %vm8374_vm9, %v8355_v44, %v8357_v33  ;;  %v17820_v44 = vld [vmem:[%s19546_s1 + $0x74] sm:$0xf] }
 0x2ae   : > { %v17787_v51 = vpop.f32.mrb[0].mxu1  ;;  %9762 = vrot.lane.b32.xlu1 %v17292_v25, %s15809_s7  ;;  %7492 = vrot.lane.b32.xlu0 %v17109_v32, %s15801_s21  ;;  %v8388_v60 = vsel %vm212_vm1, %v8375_v27, 0  ;;  %s15819_s21 = smov 26  }
 0x2af   : > { %v17793_v52 = vpop.f32.mrb[1].mxu1  ;;  %14440 = vmatmul.mubr.msk.bf16.vlgmr.msra.gmra.mrb[8].mxu0 %vm208_vm2, %v14420_v40 }
 0x2b0   : > { %v2189_v47 = vpop.f32.mrb[2].mxu1  ;;  %v5504_v54 = vpop.permute.xlu1 %5503  ;;  %8449 = vmatprep.mubr.bf16.mxu0 %v19566_v1 }
 0x2b1   : > { %v5522_v22 = vsel %vm5519_vm13, %v19583_v37, %v5504_v54  ;;  %v17800_v56 = vpop.permute.xlu0 %8358  ;;  %v2190_v28 = vpop.f32.mrb[3].mxu1  ;;  %v5523_v59 = vsel %vm5519_vm13, %v5504_v54, %v19584_v57  ;;  %v19585_v47 = vld [vmem:[#allocation9_spill] sm:$0xff]  ;;  %v19586_v37 = vld [vmem:[#allocation10_spill] sm:$0xff]  ;;  %v15756_v57 = vld [vmem:[%s19546_s1 + $0x4c] sm:$0xf] }
 0x2b2   : > { %9766 = vrot.lane.b32.xlu1 %v17313_v4, %s15809_s7  ;;  %9764 = vrot.lane.b32.xlu0 %v17315_v19, %s15809_s7  ;;  %v8376_v40 = vsel %vm8374_vm9, %v8357_v33, %v17800_v56  ;;  %v5540_v14 = vsel %vm212_vm1, %v5522_v22, 0 }
 0x2b3   : > { %14318 = vmatmul.mubr.msk.bf16.vlgmr.msra.gmra.mrb[12].mxu1 %vm208_vm2, %v15755_v53  ;;  %14324 = vmatprep.subr.msk.bf16.mxu1 %vm212_vm1, %v5523_v59 }
 0x2b4   : > { %14442 = vmatprep.subr.msk.bf16.mxu0 %vm212_vm1, %v8376_v40  ;;  %5605 = vmatpush1.bf16.msra.mxu1 %v5540_v14  ;;  %v8365_v62 = vpop.permute.xlu1 %8364 }
 0x2b5   : > { %8418 = vmatpush1.bf16.msra.mxu0 %v8388_v60  ;;  %v17815_v3 = vpop.permute.xlu0 %8362  ;;  %5636 = vmatprep.mubr.bf16.mxu1 %v19566_v1  ;;  %v17863_v60 = vcombine.high %v17255_v61, %v17255_v61  ;;  %v19590_v61 = vld [vmem:[#allocation12_spill] sm:$0xff] }
 0x2b6   : > { %9770 = vrot.lane.b32.xlu1 %v17335_v58, %s15809_s7  ;;  %7767 = vrot.lane.b32.xlu0 %v17081_v15, %s15802_s28  ;;  %v8379_v33 = vsel %vm8374_vm9, %v17815_v3, %v8365_v62 }
 0x2b8   : > { %14443 = vmatmul.mubr.msk.bf16.vlgmr.msra.gmra.mrb[0].mxu0 %vm208_vm2, %v17820_v44  ;;  %v5512_v53 = vpop.permute.xlu1 %5511 }
 0x2b9   : > { %v5526_v54 = vsel %vm5519_vm13, %v19585_v47, %v5512_v53  ;;  %v17833_v27 = vpop.permute.xlu0 %8366  ;;  %v5527_v22 = vsel %vm5519_vm13, %v5512_v53, %v19586_v37  ;;  %8531 = vmatprep.mubr.bf16.mxu0 %v19566_v1  ;;  %v19587_v47 = vld [vmem:[#allocation11_spill] sm:$0xff]  ;;  %vm8934_vm13 = vcmask 826368  }
 0x2ba   : > { %7775 = vrot.lane.b32.xlu1 %v17109_v32, %s15802_s28  ;;  %9772 = vrot.lane.b32.xlu0 %v17348_v23, %s15809_s7  ;;  %v8380_v15 = vsel %vm8374_vm9, %v8365_v62, %v17833_v27  ;;  %v5552_v28 = vsel %vm212_vm1, %v5526_v54, 0  ;;  %v8400_v32 = vsel %vm212_vm1, %v8379_v33, 0  ;;  %s15810_s28 = smov 66  }
 0x2bb   : > { %14325 = vmatmul.mubr.msk.bf16.vlgmr.msra.gmra.mrb[4].mxu1 %vm208_vm2, %v15756_v57  ;;  %14328 = vmatprep.subr.msk.bf16.mxu1 %vm212_vm1, %v5527_v22 }
 0x2bc   : > { %14446 = vmatprep.subr.msk.bf16.mxu0 %vm212_vm1, %v8380_v15  ;;  %5687 = vmatpush1.bf16.msra.mxu1 %v5552_v28  ;;  %v8373_v59 = vpop.permute.xlu1 %8372 }
 0x2bd   : > { %8500 = vmatpush1.bf16.msra.mxu0 %v8400_v32  ;;  %v17852_v40 = vpop.permute.xlu0 %8370  ;;  %5718 = vmatprep.mubr.bf16.mxu1 %v19566_v1 }
 0x2be   : > { %v8383_v14 = vsel %vm8374_vm9, %v17852_v40, %v8373_v59  ;;  %10036 = vrot.lane.b32.xlu1 %v17272_v6, %s15810_s28  ;;  %10034 = vrot.lane.b32.xlu0 %v17250_v7, %s15810_s28 }
 0x2bf   : > { %14450 = vmatprep.subr.msk.bf16.mxu0 %vm212_vm1, %v8373_v59  ;;  %v8412_v62 = vsel %vm212_vm1, %v8383_v14, 0 }
 0x2c0   : > { %14447 = vmatmul.mubr.msk.bf16.vlgmr.msra.gmra.mrb[4].mxu0 %vm208_vm2, %v17820_v44  ;;  %v8635_v53 = vpop.permute.xlu1 %8634 }
 0x2c1   : > { %v5787_v33 = vpop.permute.xlu0 %5786  ;;  %8582 = vmatpush1.bf16.msra.mxu0 %v8412_v62  ;;  %8613 = vmatprep.mubr.bf16.mxu0 %v19566_v1 }
 0x2c2   : > { %v5805_v54 = vsel %vm19588_vm11, %v19587_v47, %v5787_v33  ;;  %v17872_v37 = vpop.f32.mrb[8].mxu1  ;;  %8080 = vrot.lane.b32.xlu1 %v17863_v60, %s15803_s13  ;;  %10038 = vrot.lane.b32.xlu0 %v17270_v0, %s15810_s28  ;;  %v5806_v22 = vsel %vm19591_vm12, %v5787_v33, %v19590_v61  ;;  %v17897_v33 = vcombine.high %v17297_v49, %v17297_v49  ;;  %v19594_v49 = vld [vmem:[#allocation13_spill] sm:$0xff]  ;;  %vm11454_vm11 = vcmask 498688  }
 0x2c3   : > { %19589 = vst [vmem:[#allocation2_spill] sm:$0xff] %v17872_v37  ;;  %v17880_v15 = vpop.f32.mrb[9].mxu1  ;;  %14329 = vmatmul.mubr.msk.bf16.vlgmr.msra.gmra.mrb[12].mxu1 %vm208_vm2, %v15756_v57  ;;  %14335 = vmatprep.subr.msk.bf16.mxu1 %vm212_vm1, %v5806_v22  ;;  %v5823_v28 = vsel %vm212_vm1, %v5805_v54, 0  ;;  %vm11734_vm12 = vcmask 490496  }
 0x2c4   : > { %19592 = vst [vmem:[#allocation3_spill] sm:$0xff] %v17880_v15  ;;  %v2271_v32 = vpop.f32.mrb[10].mxu1  ;;  %5888 = vmatpush1.bf16.msra.mxu1 %v5823_v28  ;;  %v17885_v59 = vpop.permute.xlu1 %8638  ;;  %5919 = vmatprep.mubr.bf16.mxu1 %v19566_v1 }
 0x2c5   : > { %v8637_v14 = vpop.permute.xlu0 %8636  ;;  %v2272_v62 = vpop.f32.mrb[11].mxu1  ;;  %v15757_v32 = vld [vmem:[%s19546_s1 + $0x50] sm:$0xf] }
 0x2c6   : > { %v8655_v47 = vsel %vm8654_vm14, %v8635_v53, %v8637_v14  ;;  %10044 = vrot.lane.b32.xlu1 %v17315_v19, %s15810_s28  ;;  %10042 = vrot.lane.b32.xlu0 %v17292_v25, %s15810_s28  ;;  %v8656_v57 = vsel %vm8654_vm14, %v8637_v14, %v17885_v59 }
 0x2c7   : > { %14453 = vmatprep.subr.msk.bf16.mxu0 %vm212_vm1, %v8656_v57  ;;  %v8668_v54 = vsel %vm212_vm1, %v8655_v47, 0  ;;  %v17926_v47 = vld [vmem:[%s19546_s1 + $0x78] sm:$0xf] }
 0x2c8   : > { %14451 = vmatmul.mubr.msk.bf16.vlgmr.msra.gmra.mrb[8].mxu0 %vm208_vm2, %v17820_v44  ;;  %v17903_v53 = vpop.permute.xlu1 %8642 }
 0x2c9   : > { %8698 = vmatpush1.bf16.msra.mxu0 %v8668_v54  ;;  %v5795_v61 = vpop.permute.xlu0 %5794  ;;  %8729 = vmatprep.mubr.bf16.mxu0 %v19566_v1 }
 0x2ca   : > { %v5809_v22 = vsel %vm19593_vm3, %v17031_v21, %v5795_v61  ;;  %8088 = vrot.lane.b32.xlu1 %v17897_v33, %s15803_s13  ;;  %10046 = vrot.lane.b32.xlu0 %v17313_v4, %s15810_s28  ;;  %v5810_v28 = vsel %vm19595_vm7, %v5795_v61, %v19594_v49  ;;  %vm12333_vm3 = vcmask 220160   ;;  %vm12616_vm7 = vcmask 211968  }
 0x2cb   : > { %14336 = vmatmul.mubr.msk.bf16.vlgmr.msra.gmra.mrb[4].mxu1 %vm208_vm2, %v15757_v32  ;;  %14339 = vmatprep.subr.msk.bf16.mxu1 %vm212_vm1, %v5810_v28  ;;  %v5835_v14 = vsel %vm212_vm1, %v5809_v22, 0  ;;  %v19596_v28 = vld [vmem:[#allocation14_spill] sm:$0xff] }
 0x2cc   : > { %5970 = vmatpush1.bf16.msra.mxu1 %v5835_v14  ;;  %v17920_v21 = vpop.permute.xlu1 %8646  ;;  %6001 = vmatprep.mubr.bf16.mxu1 %v19566_v1 }
 0x2cd   : > { %v8645_v62 = vpop.permute.xlu0 %8644 }
 0x2ce   : > { %v8659_v57 = vsel %vm8654_vm14, %v17903_v53, %v8645_v62  ;;  %10052 = vrot.lane.b32.xlu1 %v17348_v23, %s15810_s28  ;;  %10050 = vrot.lane.b32.xlu0 %v17335_v58, %s15810_s28  ;;  %v8660_v54 = vsel %vm8654_vm14, %v8645_v62, %v17920_v21 }
 0x2cf   : > { %14457 = vmatprep.subr.msk.bf16.mxu0 %vm212_vm1, %v8660_v54  ;;  %v8680_v61 = vsel %vm212_vm1, %v8659_v57, 0 }
 0x2d0   : > { %14454 = vmatmul.mubr.msk.bf16.vlgmr.msra.gmra.mrb[0].mxu0 %vm208_vm2, %v17926_v47  ;;  %v17940_v22 = vpop.permute.xlu1 %8650 }
 0x2d1   : > { %8780 = vmatpush1.bf16.msra.mxu0 %v8680_v61  ;;  %v6070_v49 = vpop.permute.xlu0 %6069  ;;  %8811 = vmatprep.mubr.bf16.mxu0 %v19566_v1 }
 0x2d2   : > { %v6088_v14 = vsel %vm6085_vm15, %v19596_v28, %v6070_v49  ;;  %10314 = vrot.lane.b32.xlu1 %v17250_v7, %s15811_s4  ;;  %8360 = vrot.lane.b32.xlu0 %v17863_v60, %s15804_s26  ;;  %v6089_v62 = vsel %vm6085_vm15, %v6070_v49, %v17098_v39 }
 0x2d3   : > { %14340 = vmatmul.mubr.msk.bf16.vlgmr.msra.gmra.mrb[12].mxu1 %vm208_vm2, %v15757_v32  ;;  %14346 = vmatprep.subr.msk.bf16.mxu1 %vm212_vm1, %v6089_v62  ;;  %v6106_v57 = vsel %vm212_vm1, %v6088_v14, 0 }
 0x2d4   : > { %6171 = vmatpush1.bf16.msra.mxu1 %v6106_v57  ;;  %v6078_v54 = vpop.permute.xlu1 %6077  ;;  %6202 = vmatprep.mubr.bf16.mxu1 %v19566_v1 }
 0x2d5   : > { %v8653_v61 = vpop.permute.xlu0 %8652  ;;  %v6093_v28 = vsel %vm6085_vm15, %v6078_v54, %v17129_v36  ;;  %v6092_v36 = vsel %vm6085_vm15, %v17114_v11, %v6078_v54  ;;  %v15758_v11 = vld [vmem:[%s19546_s1 + $0x54] sm:$0xf]  ;;  %vm9214_vm15 = vcmask 818176  }
 0x2d6   : > { %v8663_v15 = vsel %vm8654_vm14, %v17940_v22, %v8653_v61  ;;  %v17959_v37 = vpop.f32.mrb[16].mxu1  ;;  %10318 = vrot.lane.b32.xlu1 %v17270_v0, %s15811_s4  ;;  %10316 = vrot.lane.b32.xlu0 %v17272_v6, %s15811_s4  ;;  %v6118_v54 = vsel %vm212_vm1, %v6092_v36, 0 }
 0x2d7   : > { %v17965_v39 = vpop.f32.mrb[17].mxu1  ;;  %14350 = vmatprep.subr.msk.bf16.mxu1 %vm212_vm1, %v6093_v28  ;;  %14461 = vmatprep.subr.msk.bf16.mxu0 %vm212_vm1, %v8653_v61  ;;  %v8692_v32 = vsel %vm212_vm1, %v8663_v15, 0 }
 0x2d8   : > { %14458 = vmatmul.mubr.msk.bf16.vlgmr.msra.gmra.mrb[4].mxu0 %vm208_vm2, %v17926_v47  ;;  %v2353_v49 = vpop.f32.mrb[18].mxu1  ;;  %v8917_v14 = vpop.permute.xlu1 %8916 }
 0x2d9   : > { %v8915_v62 = vpop.permute.xlu0 %8914  ;;  %v2354_v57 = vpop.f32.mrb[19].mxu1  ;;  %8862 = vmatpush1.bf16.msra.mxu0 %v8692_v32  ;;  %8893 = vmatprep.mubr.bf16.mxu0 %v19566_v1 }
 0x2da   : > { %10322 = vrot.lane.b32.xlu1 %v17292_v25, %s15811_s4  ;;  %8368 = vrot.lane.b32.xlu0 %v17897_v33, %s15804_s26  ;;  %v8935_v15 = vsel %vm8934_vm13, %v8915_v62, %v8917_v14  ;;  %s15816_s26 = smov 60  }
 0x2db   : > { %14347 = vmatmul.mubr.msk.bf16.vlgmr.msra.gmra.mrb[4].mxu1 %vm208_vm2, %v15758_v11  ;;  %v8948_v49 = vsel %vm212_vm1, %v8935_v15, 0 }
 0x2dc   : > { %6253 = vmatpush1.bf16.msra.mxu1 %v6118_v54  ;;  %v6353_v61 = vpop.permute.xlu1 %6352  ;;  %6284 = vmatprep.mubr.bf16.mxu1 %v19566_v1 }
 0x2dd   : > { %v17986_v28 = vpop.permute.xlu0 %8918  ;;  %v6372_v32 = vsel %vm6368_vm10, %v6353_v61, %v17180_v13  ;;  %v6371_v62 = vsel %vm6368_vm10, %v17164_v43, %v6353_v61 }
 0x2de   : > { %10326 = vrot.lane.b32.xlu1 %v17313_v4, %s15811_s4  ;;  %10324 = vrot.lane.b32.xlu0 %v17315_v19, %s15811_s4  ;;  %v8936_v36 = vsel %vm8934_vm13, %v8917_v14, %v17986_v28  ;;  %v6389_v43 = vsel %vm212_vm1, %v6371_v62, 0 }
 0x2df   : > { %14357 = vmatprep.subr.msk.bf16.mxu1 %vm212_vm1, %v6372_v32  ;;  %14464 = vmatprep.subr.msk.bf16.mxu0 %vm212_vm1, %v8936_v36  ;;  %v18022_v32 = vld [vmem:[%s19546_s1 + $0x7c] sm:$0xf] }
 0x2e0   : > { %14462 = vmatmul.mubr.msk.bf16.vlgmr.msra.gmra.mrb[8].mxu0 %vm208_vm2, %v17926_v47  ;;  %v8925_v13 = vpop.permute.xlu1 %8924 }
 0x2e1   : > { %8978 = vmatpush1.bf16.msra.mxu0 %v8948_v49  ;;  %v18003_v57 = vpop.permute.xlu0 %8922  ;;  %9009 = vmatprep.mubr.bf16.mxu0 %v19566_v1 }
 0x2e2   : > { %10330 = vrot.lane.b32.xlu1 %v17335_v58, %s15811_s4  ;;  %8640 = vrot.lane.b32.xlu0 %v17863_v60, %s15805_s20  ;;  %v8939_v14 = vsel %vm8934_vm13, %v18003_v57, %v8925_v13 }
 0x2e3   : > { %14351 = vmatmul.mubr.msk.bf16.vlgmr.msra.gmra.mrb[12].mxu1 %vm208_vm2, %v15758_v11  ;;  %v8960_v49 = vsel %vm212_vm1, %v8939_v14, 0 }
 0x2e4   : > { %6454 = vmatpush1.bf16.msra.mxu1 %v6389_v43  ;;  %v6361_v15 = vpop.permute.xlu1 %6360  ;;  %6485 = vmatprep.mubr.bf16.mxu1 %v19566_v1 }
 0x2e5   : > { %v18015_v54 = vpop.permute.xlu0 %8926  ;;  %v6376_v61 = vsel %vm6368_vm10, %v6361_v15, %v17211_v31  ;;  %v6375_v31 = vsel %vm6368_vm10, %v17197_v16, %v6361_v15  ;;  %v15759_v16 = vld [vmem:[%s19546_s1 + $0x58] sm:$0xf]  ;;  %vm9494_vm10 = vcmask 809984  }
 0x2e6   : > { %8648 = vrot.lane.b32.xlu1 %v17897_v33, %s15805_s20  ;;  %10332 = vrot.lane.b32.xlu0 %v17348_v23, %s15811_s4  ;;  %v8940_v11 = vsel %vm8934_vm13, %v8925_v13, %v18015_v54  ;;  %s15812_s20 = smov 64   ;;  %v6401_v14 = vsel %vm212_vm1, %v6375_v31, 0 }
 0x2e7   : > { %14361 = vmatprep.subr.msk.bf16.mxu1 %vm212_vm1, %v6376_v61  ;;  %14468 = vmatprep.subr.msk.bf16.mxu0 %vm212_vm1, %v8940_v11 }
 0x2e8   : > { %14465 = vmatmul.mubr.msk.bf16.vlgmr.msra.gmra.mrb[0].mxu0 %vm208_vm2, %v18022_v32  ;;  %v8933_v36 = vpop.permute.xlu1 %8932 }
 0x2e9   : > { %9060 = vmatpush1.bf16.msra.mxu0 %v8960_v49  ;;  %v18037_v62 = vpop.permute.xlu0 %8930  ;;  %9091 = vmatprep.mubr.bf16.mxu0 %v19566_v1 }
 0x2ea   : > { %10596 = vrot.lane.b32.xlu1 %v17272_v6, %s15812_s20  ;;  %10594 = vrot.lane.b32.xlu0 %v17250_v7, %s15812_s20  ;;  %v8943_v13 = vsel %vm8934_vm13, %v18037_v62, %v8933_v36 }
 0x2eb   : > { %14358 = vmatmul.mubr.msk.bf16.vlgmr.msra.gmra.mrb[4].mxu1 %vm208_vm2, %v15759_v16  ;;  %14472 = vmatprep.subr.msk.bf16.mxu0 %vm212_vm1, %v8933_v36  ;;  %v8972_v11 = vsel %vm212_vm1, %v8943_v13, 0 }
 0x2ec   : > { %6536 = vmatpush1.bf16.msra.mxu1 %v6401_v14  ;;  %v9195_v43 = vpop.permute.xlu1 %9194  ;;  %6567 = vmatprep.mubr.bf16.mxu1 %v19566_v1 }
 0x2ed   : > { %v6636_v15 = vpop.permute.xlu0 %6635 }
 0x2ee   : > { %8920 = vrot.lane.b32.xlu1 %v17863_v60, %s15806_s6  ;;  %10598 = vrot.lane.b32.xlu0 %v17270_v0, %s15812_s20  ;;  %v6655_v61 = vsel %vm6651_vm0, %v6636_v15, %v17277_v45  ;;  %v6654_v49 = vsel %vm6651_vm0, %v17257_v2, %v6636_v15 }
 0x2ef   : > { %14368 = vmatprep.subr.msk.bf16.mxu1 %vm212_vm1, %v6655_v61  ;;  %v6672_v13 = vsel %vm212_vm1, %v6654_v49, 0 }
 0x2f0   : > { %14469 = vmatmul.mubr.msk.bf16.vlgmr.msra.gmra.mrb[4].mxu0 %vm208_vm2, %v18022_v32  ;;  %v18065_v31 = vpop.permute.xlu1 %9198 }
 0x2f1   : > { %v9197_v36 = vpop.permute.xlu0 %9196  ;;  %9142 = vmatpush1.bf16.msra.mxu0 %v8972_v11  ;;  %9173 = vmatprep.mubr.bf16.mxu0 %v19566_v1 }
 0x2f2   : > { %10604 = vrot.lane.b32.xlu1 %v17315_v19, %s15812_s20  ;;  %10602 = vrot.lane.b32.xlu0 %v17292_v25, %s15812_s20  ;;  %v9216_v45 = vsel %vm9214_vm15, %v9197_v36, %v18065_v31  ;;  %v9215_v2 = vsel %vm9214_vm15, %v9195_v43, %v9197_v36  ;;  %v15760_v36 = vld [vmem:[%s19546_s1 + $0x5c] sm:$0xf] }
 0x2f3   : > { %14362 = vmatmul.mubr.msk.bf16.vlgmr.msra.gmra.mrb[12].mxu1 %vm208_vm2, %v15759_v16  ;;  %14475 = vmatprep.subr.msk.bf16.mxu0 %vm212_vm1, %v9216_v45  ;;  %v9228_v16 = vsel %vm212_vm1, %v9215_v2, 0 }
 0x2f4   : > { %6737 = vmatpush1.bf16.msra.mxu1 %v6672_v13  ;;  %v18078_v14 = vpop.permute.xlu1 %9202  ;;  %6768 = vmatprep.mubr.bf16.mxu1 %v19566_v1 }
 0x2f5   : > { %v6644_v15 = vpop.permute.xlu0 %6643 }
 0x2f6   : > { %8928 = vrot.lane.b32.xlu1 %v17897_v33, %s15806_s6  ;;  %10606 = vrot.lane.b32.xlu0 %v17313_v4, %s15812_s20  ;;  %v6659_v43 = vsel %vm6651_vm0, %v6644_v15, %v17323_v5  ;;  %v6658_v61 = vsel %vm6651_vm0, %v17299_v30, %v6644_v15  ;;  %v18116_v15 = vld [vmem:[%s19546_s1 + $0x80] sm:$0xf]  ;;  %vm9774_vm0 = vcmask 801792  }
 0x2f7   : > { %14372 = vmatprep.subr.msk.bf16.mxu1 %vm212_vm1, %v6659_v43  ;;  %v6684_v45 = vsel %vm212_vm1, %v6658_v61, 0 }
 0x2f8   : > { %14473 = vmatmul.mubr.msk.bf16.vlgmr.msra.gmra.mrb[8].mxu0 %vm208_vm2, %v18022_v32  ;;  %v18093_v11 = vpop.permute.xlu1 %9206 }
 0x2f9   : > { %9258 = vmatpush1.bf16.msra.mxu0 %v9228_v16  ;;  %v9205_v49 = vpop.permute.xlu0 %9204  ;;  %9289 = vmatprep.mubr.bf16.mxu0 %v19566_v1 }
 0x2fa   : > { %10612 = vrot.lane.b32.xlu1 %v17348_v23, %s15812_s20  ;;  %10610 = vrot.lane.b32.xlu0 %v17335_v58, %s15812_s20  ;;  %v9220_v5 = vsel %vm9214_vm15, %v9205_v49, %v18093_v11  ;;  %v9219_v30 = vsel %vm9214_vm15, %v18078_v14, %v9205_v49 }
 0x2fb   : > { %14369 = vmatmul.mubr.msk.bf16.vlgmr.msra.gmra.mrb[4].mxu1 %vm208_vm2, %v15760_v36  ;;  %14479 = vmatprep.subr.msk.bf16.mxu0 %vm212_vm1, %v9220_v5  ;;  %v9240_v16 = vsel %vm212_vm1, %v9219_v30, 0 }
 0x2fc   : > { %6819 = vmatpush1.bf16.msra.mxu1 %v6684_v45  ;;  %v18110_v2 = vpop.permute.xlu1 %9210  ;;  %6850 = vmatprep.mubr.bf16.mxu1 %v19566_v1 }
 0x2fd   : > { %v6919_v13 = vpop.permute.xlu0 %6918 }
 0x2fe   : > { %10874 = vrot.lane.b32.xlu1 %v17250_v7, %s15813_s3  ;;  %9200 = vrot.lane.b32.xlu0 %v17863_v60, %s15807_s11  ;;  %v6938_v43 = vsel %vm6934_vm4, %v6919_v13, %v17380_v42  ;;  %v6937_v61 = vsel %vm6934_vm4, %v17364_v48, %v6919_v13 }
 0x2ff   : > { %14379 = vmatprep.subr.msk.bf16.mxu1 %vm212_vm1, %v6938_v43  ;;  %v6955_v30 = vsel %vm212_vm1, %v6937_v61, 0 }
 0x300   : > { %14476 = vmatmul.mubr.msk.bf16.vlgmr.msra.gmra.mrb[0].mxu0 %vm208_vm2, %v18116_v15  ;;  %v6927_v49 = vpop.permute.xlu1 %6926 }
 0x301   : > { %9340 = vmatpush1.bf16.msra.mxu0 %v9240_v16  ;;  %v9213_v5 = vpop.permute.xlu0 %9212  ;;  %9371 = vmatprep.mubr.bf16.mxu0 %v19566_v1  ;;  %v6942_v42 = vsel %vm6934_vm4, %v6927_v49, %v17411_v50 }
 0x302   : > { %10878 = vrot.lane.b32.xlu1 %v17270_v0, %s15813_s3  ;;  %10876 = vrot.lane.b32.xlu0 %v17272_v6, %s15813_s3  ;;  %v9223_v48 = vsel %vm9214_vm15, %v18110_v2, %v9213_v5 }
 0x303   : > { %14373 = vmatmul.mubr.msk.bf16.vlgmr.msra.gmra.mrb[12].mxu1 %vm208_vm2, %v15760_v36  ;;  %14483 = vmatprep.subr.msk.bf16.mxu0 %vm212_vm1, %v9213_v5  ;;  %v9252_v50 = vsel %vm212_vm1, %v9223_v48, 0  ;;  %v6941_v36 = vsel %vm6934_vm4, %v17397_v10, %v6927_v49  ;;  %v15761_v5 = vld [vmem:[%s19546_s1 + $0x60] sm:$0xf]  ;;  %vm10054_vm4 = vcmask 539648  }
 0x304   : > { %7020 = vmatpush1.bf16.msra.mxu1 %v6955_v30  ;;  %v9477_v45 = vpop.permute.xlu1 %9476  ;;  %7051 = vmatprep.mubr.bf16.mxu1 %v19566_v1 }
 0x305   : > { %14383 = vmatprep.subr.msk.bf16.mxu1 %vm212_vm1, %v6942_v42  ;;  %v9475_v13 = vpop.permute.xlu0 %9474  ;;  %v6967_v42 = vsel %vm212_vm1, %v6941_v36, 0 }
 0x306   : > { %10882 = vrot.lane.b32.xlu1 %v17292_v25, %s15813_s3  ;;  %9208 = vrot.lane.b32.xlu0 %v17897_v33, %s15807_s11  ;;  %v9495_v49 = vsel %vm9494_vm10, %v9475_v13, %v9477_v45 }
 0x307   : > { %v9508_v30 = vsel %vm212_vm1, %v9495_v49, 0 }
 0x308   : > { %14480 = vmatmul.mubr.msk.bf16.vlgmr.msra.gmra.mrb[4].mxu0 %vm208_vm2, %v18116_v15  ;;  %v7202_v43 = vpop.permute.xlu1 %7201 }
 0x309   : > { %v18153_v16 = vpop.permute.xlu0 %9478  ;;  %9422 = vmatpush1.bf16.msra.mxu0 %v9252_v50  ;;  %9453 = vmatprep.mubr.bf16.mxu0 %v19566_v1  ;;  %v7221_v61 = vsel %vm7217_vm5, %v7202_v43, %v17464_v12 }
 0x30a   : > { %10886 = vrot.lane.b32.xlu1 %v17313_v4, %s15813_s3  ;;  %10884 = vrot.lane.b32.xlu0 %v17315_v19, %s15813_s3  ;;  %v9496_v10 = vsel %vm9494_vm10, %v9477_v45, %v18153_v16  ;;  %v7220_v45 = vsel %vm7217_vm5, %v17451_v18, %v7202_v43 }
 0x30b   : > { %14380 = vmatmul.mubr.msk.bf16.vlgmr.msra.gmra.mrb[4].mxu1 %vm208_vm2, %v15761_v5  ;;  %14486 = vmatprep.subr.msk.bf16.mxu0 %vm212_vm1, %v9496_v10 }
 0x30c   : > { %7102 = vmatpush1.bf16.msra.mxu1 %v6967_v42  ;;  %v9485_v48 = vpop.permute.xlu1 %9484  ;;  %7133 = vmatprep.mubr.bf16.mxu1 %v19566_v1 }
 0x30d   : > { %14390 = vmatprep.subr.msk.bf16.mxu1 %vm212_vm1, %v7221_v61  ;;  %v18173_v12 = vpop.permute.xlu0 %9482  ;;  %v7238_v61 = vsel %vm212_vm1, %v7220_v45, 0 }
 0x30e   : > { %10890 = vrot.lane.b32.xlu1 %v17335_v58, %s15813_s3  ;;  %9480 = vrot.lane.b32.xlu0 %v17863_v60, %s15808_s18  ;;  %v9499_v43 = vsel %vm9494_vm10, %v18173_v12, %v9485_v48 }
 0x310   : > { %14484 = vmatmul.mubr.msk.bf16.vlgmr.msra.gmra.mrb[8].mxu0 %vm208_vm2, %v18116_v15  ;;  %v7210_v13 = vpop.permute.xlu1 %7209 }
 0x311   : > { %9538 = vmatpush1.bf16.msra.mxu0 %v9508_v30  ;;  %v18184_v50 = vpop.permute.xlu0 %9486  ;;  %9569 = vmatprep.mubr.bf16.mxu0 %v19566_v1  ;;  %v7225_v36 = vsel %vm7217_vm5, %v7210_v13, %v17498_v46  ;;  %v18207_v46 = vld [vmem:[%s19546_s1 + $0x84] sm:$0xf]  ;;  %v7224_v42 = vsel %vm7217_vm5, %v17481_v55, %v7210_v13  ;;  %vm10334_vm5 = vcmask 531456  }
 0x312   : > { %9488 = vrot.lane.b32.xlu1 %v17897_v33, %s15808_s18  ;;  %10892 = vrot.lane.b32.xlu0 %v17348_v23, %s15813_s3  ;;  %v9500_v18 = vsel %vm9494_vm10, %v9485_v48, %v18184_v50  ;;  %v15762_v13 = vld [vmem:[%s19546_s1 + $0x64] sm:$0xf]  ;;  %s15629_s18 = smul.u32 80, %s19600_s10 }
 0x313   : > { %14384 = vmatmul.mubr.msk.bf16.vlgmr.msra.gmra.mrb[12].mxu1 %vm208_vm2, %v15761_v5  ;;  %14490 = vmatprep.subr.msk.bf16.mxu0 %vm212_vm1, %v9500_v18  ;;  %v9520_v5 = vsel %vm212_vm1, %v9499_v43, 0 }
 0x314   : > { %7303 = vmatpush1.bf16.msra.mxu1 %v7238_v61  ;;  %v9493_v10 = vpop.permute.xlu1 %9492  ;;  %7334 = vmatprep.mubr.bf16.mxu1 %v19566_v1  ;;  %s19527_s19 = scalar_lea.vmem %s19547_s2, %s15629_s18 }
 0x315   : > { %14394 = vmatprep.subr.msk.bf16.mxu1 %vm212_vm1, %v7225_v36  ;;  %v18202_v49 = vpop.permute.xlu0 %9490  ;;  %v7250_v36 = vsel %vm212_vm1, %v7224_v42, 0 }
 0x316   : > { %11156 = vrot.lane.b32.xlu1 %v17272_v6, %s15814_s27  ;;  %11154 = vrot.lane.b32.xlu0 %v17250_v7, %s15814_s27  ;;  %v9503_v55 = vsel %vm9494_vm10, %v18202_v49, %v9493_v10 }
 0x317   : > { %v9532_v43 = vsel %vm212_vm1, %v9503_v55, 0 }
 0x318   : > { %14487 = vmatmul.mubr.msk.bf16.vlgmr.msra.gmra.mrb[0].mxu0 %vm208_vm2, %v18207_v46  ;;  %v9755_v48 = vpop.permute.xlu1 %9754 }
 0x319   : > { %9620 = vmatpush1.bf16.msra.mxu0 %v9520_v5  ;;  %v7485_v30 = vpop.permute.xlu0 %7484  ;;  %9651 = vmatprep.mubr.bf16.mxu0 %v19566_v1 }
 0x31a   : > { %9760 = vrot.lane.b32.xlu1 %v17863_v60, %s15809_s7  ;;  %11158 = vrot.lane.b32.xlu0 %v17270_v0, %s15814_s27  ;;  %v7504_v45 = vsel %vm7500_vm6, %v7485_v30, %v17551_v35  ;;  %v7503_v61 = vsel %vm7500_vm6, %v17535_v29, %v7485_v30 }
 0x31b   : > { %14391 = vmatmul.mubr.msk.bf16.vlgmr.msra.gmra.mrb[4].mxu1 %vm208_vm2, %v15762_v13  ;;  %14494 = vmatprep.subr.msk.bf16.mxu0 %vm212_vm1, %v9493_v10 }
 0x31c   : > { %7385 = vmatpush1.bf16.msra.mxu1 %v7250_v36  ;;  %v18233_v18 = vpop.permute.xlu1 %9758  ;;  %7416 = vmatprep.mubr.bf16.mxu1 %v19566_v1 }
 0x31d   : > { %14401 = vmatprep.subr.msk.bf16.mxu1 %vm212_vm1, %v7504_v45  ;;  %v9757_v35 = vpop.permute.xlu0 %9756  ;;  %v7521_v45 = vsel %vm212_vm1, %v7503_v61, 0 }
 0x31e   : > { %11164 = vrot.lane.b32.xlu1 %v17315_v19, %s15814_s27  ;;  %11162 = vrot.lane.b32.xlu0 %v17292_v25, %s15814_s27  ;;  %v9776_v5 = vsel %vm9774_vm0, %v9757_v35, %v18233_v18  ;;  %v9775_v30 = vsel %vm9774_vm0, %v9755_v48, %v9757_v35 }
 0x320   : > { %14491 = vmatmul.mubr.msk.bf16.vlgmr.msra.gmra.mrb[4].mxu0 %vm208_vm2, %v18207_v46  ;;  %v18246_v10 = vpop.permute.xlu1 %9762 }
 0x321   : > { %v7493_v42 = vpop.permute.xlu0 %7492  ;;  %9702 = vmatpush1.bf16.msra.mxu0 %v9532_v43  ;;  %9733 = vmatprep.mubr.bf16.mxu0 %v19566_v1 }
 0x322   : > { %9768 = vrot.lane.b32.xlu1 %v17897_v33, %s15809_s7  ;;  %11166 = vrot.lane.b32.xlu0 %v17313_v4, %s15814_s27  ;;  %v7508_v29 = vsel %vm7500_vm6, %v7493_v42, %v17582_v24  ;;  %v9788_v24 = vsel %vm212_vm1, %v9775_v30, 0  ;;  %v7507_v48 = vsel %vm7500_vm6, %v17568_v20, %v7493_v42  ;;  %s15815_s7 = smov 61   ;;  %v18298_v30 = vld [vmem:[%s19546_s1 + $0x88] sm:$0xf]  ;;  %vm10614_vm6 = vcmask 523264  }
 0x323   : > { %14395 = vmatmul.mubr.msk.bf16.vlgmr.msra.gmra.mrb[12].mxu1 %vm208_vm2, %v15762_v13  ;;  %14497 = vmatprep.subr.msk.bf16.mxu0 %vm212_vm1, %v9776_v5  ;;  %v15763_v5 = vld [vmem:[%s19546_s1 + $0x68] sm:$0xf]  ;;  %v7533_v42 = vsel %vm212_vm1, %v7507_v48, 0 }
 0x324   : > { %7586 = vmatpush1.bf16.msra.mxu1 %v7521_v45  ;;  %v18261_v55 = vpop.permute.xlu1 %9766  ;;  %7617 = vmatprep.mubr.bf16.mxu1 %v19566_v1 }
 0x325   : > { %14405 = vmatprep.subr.msk.bf16.mxu1 %vm212_vm1, %v7508_v29  ;;  %v9765_v36 = vpop.permute.xlu0 %9764 }
 0x326   : > { %11172 = vrot.lane.b32.xlu1 %v17348_v23, %s15814_s27  ;;  %11170 = vrot.lane.b32.xlu0 %v17335_v58, %s15814_s27  ;;  %v9780_v35 = vsel %vm9774_vm0, %v9765_v36, %v18261_v55  ;;  %v9779_v61 = vsel %vm9774_vm0, %v18246_v10, %v9765_v36 }
 0x327   : > { %v9800_v45 = vsel %vm212_vm1, %v9779_v61, 0 }
 0x328   : > { %14495 = vmatmul.mubr.msk.bf16.vlgmr.msra.gmra.mrb[8].mxu0 %vm208_vm2, %v18207_v46  ;;  %v18274_v13 = vpop.permute.xlu1 %9770 }
 0x329   : > { %9818 = vmatpush1.bf16.msra.mxu0 %v9788_v24  ;;  %v7768_v43 = vpop.permute.xlu0 %7767  ;;  %9849 = vmatprep.mubr.bf16.mxu0 %v19566_v1 }
 0x32a   : > { %11434 = vrot.lane.b32.xlu1 %v17250_v7, %s15815_s7  ;;  %10040 = vrot.lane.b32.xlu0 %v17863_v60, %s15810_s28  ;;  %v7787_v20 = vsel %vm208_vm2, %v7768_v43, %v17635_v9  ;;  %v7786_v36 = vsel %vm208_vm2, %v17622_v8, %v7768_v43 }
 0x32b   : > { %14402 = vmatmul.mubr.msk.bf16.vlgmr.msra.gmra.mrb[4].mxu1 %vm208_vm2, %v15763_v5  ;;  %14501 = vmatprep.subr.msk.bf16.mxu0 %vm212_vm1, %v9780_v35  ;;  %v7804_v8 = vsel %vm212_vm1, %v7786_v36, 0 }
 0x32c   : > { %7668 = vmatpush1.bf16.msra.mxu1 %v7533_v42  ;;  %v7776_v29 = vpop.permute.xlu1 %7775  ;;  %7699 = vmatprep.mubr.bf16.mxu1 %v19566_v1 }
 0x32d   : > { %14412 = vmatprep.subr.msk.bf16.mxu1 %vm212_vm1, %v7787_v20  ;;  %v9773_v9 = vpop.permute.xlu0 %9772  ;;  %v7791_v43 = vsel %vm208_vm2, %v7776_v29, %v17669_v41  ;;  %v7790_v42 = vsel %vm208_vm2, %v17652_v38, %v7776_v29  ;;  %v15764_v29 = vld [vmem:[%s19546_s1 + $0x6c] sm:$0xf] }
 0x32e   : > { %11438 = vrot.lane.b32.xlu1 %v17270_v0, %s15815_s7  ;;  %11436 = vrot.lane.b32.xlu0 %v17272_v6, %s15815_s7  ;;  %v9783_v35 = vsel %vm9774_vm0, %v18274_v13, %v9773_v9  ;;  %v7816_v36 = vsel %vm212_vm1, %v7790_v42, 0 }
 0x330   : > { %14498 = vmatmul.mubr.msk.bf16.vlgmr.msra.gmra.mrb[0].mxu0 %vm208_vm2, %v18298_v30  ;;  %v10037_v24 = vpop.permute.xlu1 %10036 }
 0x331   : > { %9900 = vmatpush1.bf16.msra.mxu0 %v9800_v45  ;;  %v10035_v48 = vpop.permute.xlu0 %10034  ;;  %9931 = vmatprep.mubr.bf16.mxu0 %v19566_v1 }
 0x332   : > { %11442 = vrot.lane.b32.xlu1 %v17292_v25, %s15815_s7  ;;  %10048 = vrot.lane.b32.xlu0 %v17897_v33, %s15810_s28  ;;  %v10055_v38 = vsel %vm10054_vm4, %v10035_v48, %v10037_v24 }
 0x333   : > { %14406 = vmatmul.mubr.msk.bf16.vlgmr.msra.gmra.mrb[12].mxu1 %vm208_vm2, %v15763_v5  ;;  %14505 = vmatprep.subr.msk.bf16.mxu0 %vm212_vm1, %v9773_v9  ;;  %v9812_v5 = vsel %vm212_vm1, %v9783_v35, 0  ;;  %v10068_v48 = vsel %vm212_vm1, %v10055_v38, 0 }
 0x334   : > { %7869 = vmatpush1.bf16.msra.mxu1 %v7804_v8  ;;  %v8081_v20 = vpop.permute.xlu1 %8080  ;;  %7900 = vmatprep.mubr.bf16.mxu1 %v19566_v1 }
 0x335   : > { %14416 = vmatprep.subr.msk.bf16.mxu1 %vm212_vm1, %v7791_v43  ;;  %v18323_v61 = vpop.permute.xlu0 %10038  ;;  %v8098_v35 = vsel %vm8094_vm8, %v8081_v20, %v17722_v26  ;;  %v8097_v43 = vsel %vm8094_vm8, %v17706_v63, %v8081_v20 }
 0x336   : > { %11446 = vrot.lane.b32.xlu1 %v17313_v4, %s15815_s7  ;;  %11444 = vrot.lane.b32.xlu0 %v17315_v19, %s15815_s7  ;;  %v10056_v9 = vsel %vm10054_vm4, %v10037_v24, %v18323_v61  ;;  %v8114_v20 = vsel %vm212_vm1, %v8097_v43, 0 }
 0x338   : > { %14502 = vmatmul.mubr.msk.bf16.vlgmr.msra.gmra.mrb[4].mxu0 %vm208_vm2, %v18298_v30  ;;  %v10045_v41 = vpop.permute.xlu1 %10044 }
 0x339   : > { %v18336_v45 = vpop.permute.xlu0 %10042  ;;  %9982 = vmatpush1.bf16.msra.mxu0 %v9812_v5  ;;  %10013 = vmatprep.mubr.bf16.mxu0 %v19566_v1 }
 0x33a   : > { %11450 = vrot.lane.b32.xlu1 %v17335_v58, %s15815_s7  ;;  %10320 = vrot.lane.b32.xlu0 %v17863_v60, %s15811_s4  ;;  %v10059_v63 = vsel %vm10054_vm4, %v18336_v45, %v10045_v41 }
 0x33b   : > { %14413 = vmatmul.mubr.msk.bf16.vlgmr.msra.gmra.mrb[4].mxu1 %vm208_vm2, %v15764_v29  ;;  %14508 = vmatprep.subr.msk.bf16.mxu0 %vm212_vm1, %v10056_v9 }
 0x33c   : > { %7951 = vmatpush1.bf16.msra.mxu1 %v7816_v36  ;;  %v8089_v8 = vpop.permute.xlu1 %8088  ;;  %7982 = vmatprep.mubr.bf16.mxu1 %v19566_v1 }
 0x33d   : > { %14433 = vmatprep.subr.msk.bf16.mxu1 %vm212_vm1, %v8098_v35  ;;  %v18354_v24 = vpop.permute.xlu0 %10046  ;;  %v8102_v9 = vsel %vm8094_vm8, %v8089_v8, %v17753_v34  ;;  %v8101_v34 = vsel %vm8094_vm8, %v17739_v17, %v8089_v8  ;;  %v15765_v17 = vld [vmem:[%s19546_s1 + $0x70] sm:$0xf]  ;;  %vm10894_vm8 = vcmask 515072  }
 0x33e   : > { %10328 = vrot.lane.b32.xlu1 %v17897_v33, %s15811_s4  ;;  %11452 = vrot.lane.b32.xlu0 %v17348_v23, %s15815_s7  ;;  %v10060_v5 = vsel %vm10054_vm4, %v10045_v41, %v18354_v24  ;;  %v10080_v41 = vsel %vm212_vm1, %v10059_v63, 0  ;;  %v8126_v35 = vsel %vm212_vm1, %v8101_v34, 0 }
 0x340   : > { %14506 = vmatmul.mubr.msk.bf16.vlgmr.msra.gmra.mrb[8].mxu0 %vm208_vm2, %v18298_v30  ;;  %v10053_v26 = vpop.permute.xlu1 %10052 }
 0x341   : > { %10098 = vmatpush1.bf16.msra.mxu0 %v10068_v48  ;;  %v18367_v42 = vpop.permute.xlu0 %10050  ;;  %10129 = vmatprep.mubr.bf16.mxu0 %v19566_v1 }
 0x342   : > { %11716 = vrot.lane.b32.xlu1 %v17272_v6, %s15816_s26  ;;  %11714 = vrot.lane.b32.xlu0 %v17250_v7, %s15816_s26  ;;  %v18386_v7 = vld [vmem:[%s19546_s1 + $0x8c] sm:$0xf] }
 0x343   : > { %14417 = vmatmul.mubr.msk.bf16.vlgmr.msra.gmra.mrb[12].mxu1 %vm208_vm2, %v15764_v29  ;;  %14512 = vmatprep.subr.msk.bf16.mxu0 %vm212_vm1, %v10060_v5 }
 0x344   : > { %8179 = vmatpush1.bf16.msra.mxu1 %v8114_v20  ;;  %v10315_v38 = vpop.permute.xlu1 %10314  ;;  %8210 = vmatprep.mubr.bf16.mxu1 %v19566_v1 }
 0x345   : > { %14437 = vmatprep.subr.msk.bf16.mxu1 %vm212_vm1, %v8102_v9  ;;  %v8361_v6 = vpop.permute.xlu0 %8360 }
 0x346   : > { %10600 = vrot.lane.b32.xlu1 %v17863_v60, %s15812_s20  ;;  %11718 = vrot.lane.b32.xlu0 %v17270_v0, %s15816_s26  ;;  %v10063_v0 = vsel %vm10054_vm4, %v18367_v42, %v10053_v26 }
 0x347   : > { %v10092_v48 = vsel %vm212_vm1, %v10063_v0, 0 }
 0x348   : > { %14509 = vmatmul.mubr.msk.bf16.vlgmr.msra.gmra.mrb[0].mxu0 %vm208_vm2, %v18386_v7  ;;  %v18397_v29 = vpop.permute.xlu1 %10318 }
 0x349   : > { %10180 = vmatpush1.bf16.msra.mxu0 %v10080_v41  ;;  %v10317_v36 = vpop.permute.xlu0 %10316  ;;  %10211 = vmatprep.mubr.bf16.mxu0 %v19566_v1 }
 0x34a   : > { %11724 = vrot.lane.b32.xlu1 %v17315_v19, %s15816_s26  ;;  %11722 = vrot.lane.b32.xlu0 %v17292_v25, %s15816_s26  ;;  %v8378_v19 = vsel %vm8374_vm9, %v8361_v6, %v17815_v3  ;;  %v10336_v43 = vsel %vm10334_vm5, %v10317_v36, %v18397_v29  ;;  %v8377_v3 = vsel %vm8374_vm9, %v17800_v56, %v8361_v6 }
 0x34b   : > { %14434 = vmatmul.mubr.msk.bf16.vlgmr.msra.gmra.mrb[4].mxu1 %vm208_vm2, %v15765_v17  ;;  %14516 = vmatprep.subr.msk.bf16.mxu0 %vm212_vm1, %v10053_v26  ;;  %v10335_v63 = vsel %vm10334_vm5, %v10315_v38, %v10317_v36  ;;  %v8394_v56 = vsel %vm212_vm1, %v8377_v3, 0  ;;  %v18487_v3 = vld [vmem:[%s15854_s14 + $0x1c] sm:$0xff] }
 0x34c   : > { %8261 = vmatpush1.bf16.msra.mxu1 %v8126_v35  ;;  %v18414_v8 = vpop.permute.xlu1 %10322  ;;  %8292 = vmatprep.mubr.bf16.mxu1 %v19566_v1  ;;  %v11994_v35 = vld [vmem:[%s15854_s14 + $0x14] sm:$0xff] }
 0x34d   : > { %14444 = vmatprep.subr.msk.bf16.mxu1 %vm212_vm1, %v8378_v19  ;;  %v8369_v25 = vpop.permute.xlu0 %8368 }
 0x34e   : > { %10608 = vrot.lane.b32.xlu1 %v17897_v33, %s15812_s20  ;;  %11726 = vrot.lane.b32.xlu0 %v17313_v4, %s15816_s26  ;;  %v11992_v4 = vld [vmem:[%s15854_s14 + $0x4] sm:$0xff]  ;;  %v8382_v9 = vsel %vm8374_vm9, %v8369_v25, %v17852_v40  ;;  %s15817_s20 = smov 28   ;;  %v8381_v36 = vsel %vm8374_vm9, %v17833_v27, %v8369_v25  ;;  %v18481_v25 = vcombine.low %v11994_v35, %v11994_v35  ;;  %vm11174_vm9 = vcmask 506880  }
 0x34f   : > { %v18441_v20 = vcombine.low %v11992_v4, %v11992_v4  ;;  %v18455_v41 = vcombine.high %v11992_v4, %v11992_v4  ;;  %v8406_v27 = vsel %vm212_vm1, %v8381_v36, 0 }
 0x350   : > { %14513 = vmatmul.mubr.msk.bf16.vlgmr.msra.gmra.mrb[4].mxu0 %vm208_vm2, %v18386_v7  ;;  %v18429_v26 = vpop.permute.xlu1 %10326 }
 0x351   : > { %v10325_v5 = vpop.permute.xlu0 %10324  ;;  %10262 = vmatpush1.bf16.msra.mxu0 %v10092_v48  ;;  %10293 = vmatprep.mubr.bf16.mxu0 %v19566_v1 }
 0x352   : > { %11730 = vrot.lane.b32.xlu0 %v17335_v58, %s15816_s26  ;;  %14519 = vmatprep.subr.msk.bf16.mxu0 %vm212_vm1, %v10336_v43  ;;  %v18449_v58 = vld [vmem:[%s15854_s14 + $0xc] sm:$0xff]  ;;  %v10340_v40 = vsel %vm10334_vm5, %v10325_v5, %v18429_v26  ;;  %v10339_v19 = vsel %vm10334_vm5, %v18414_v8, %v10325_v5 }
 0x353   : > { %14438 = vmatmul.mubr.msk.bf16.vlgmr.msra.gmra.mrb[12].mxu1 %vm208_vm2, %v15765_v17  ;;  %11732 = vrot.lane.b32.xlu1 %v17348_v23, %s15816_s26  ;;  %v10348_v23 = vsel %vm212_vm1, %v10335_v63, 0  ;;  %v18463_v34 = vcombine.low %v18449_v58, %v18449_v58  ;;  %v18493_v5 = vld [vmem:[%s19546_s1 + $0x90] sm:$0xf]  ;;  %v10360_v4 = vsel %vm212_vm1, %v10339_v19, 0  ;;  %v18504_v63 = vcombine.low %v18487_v3, %v18487_v3 }
 0x354   : > { %8459 = vmatpush1.bf16.msra.mxu1 %v8394_v56  ;;  %v18445_v6 = vpop.permute.xlu1 %10330  ;;  %8490 = vmatprep.mubr.bf16.mxu1 %v19566_v1 }
 0x355   : > { %14448 = vmatprep.subr.msk.bf16.mxu1 %vm212_vm1, %v8382_v9  ;;  %v8641_v38 = vpop.permute.xlu0 %8640 }
 0x356   : > { %10880 = vrot.lane.b32.xlu0 %v17863_v60, %s15813_s3  ;;  %v8658_v48 = vsel %vm8654_vm14, %v8641_v38, %v17903_v53  ;;  %v18498_v53 = vcombine.high %v11994_v35, %v11994_v35  ;;  %v8657_v56 = vsel %vm8654_vm14, %v17885_v59, %v8641_v38  ;;  %v15766_v59 = vld [vmem:[%s19546_s1 + $0x74] sm:$0xf] }
 0x357   : > { %12028 = vrot.lane.b32.xlu1 %v18441_v20, %s15817_s20  ;;  %v8674_v38 = vsel %vm212_vm1, %v8657_v56, 0 }
 0x358   : > { %14517 = vmatmul.mubr.msk.bf16.vlgmr.msra.gmra.mrb[8].mxu0 %vm208_vm2, %v18386_v7  ;;  %v8649_v0 = vpop.permute.xlu1 %8648 }
 0x359   : > { %10378 = vmatpush1.bf16.msra.mxu0 %v10348_v23  ;;  %v10333_v17 = vpop.permute.xlu0 %10332  ;;  %10409 = vmatprep.mubr.bf16.mxu0 %v19566_v1  ;;  %v8662_v19 = vsel %vm8654_vm14, %v8649_v0, %v17940_v22  ;;  %v18544_v22 = vld [vmem:[%s15854_s14 + $0x2c] ss:$0 sps:$4 sm:$0xff]  }
 0x35a   : > { %12030 = vrot.lane.b32.xlu0 %v18455_v41, %s15817_s20  ;;  %14523 = vmatprep.subr.msk.bf16.mxu0 %vm212_vm1, %v10340_v40  ;;  %v11996_v40 = vld [vmem:[%s15854_s14 + $0x24] sm:$0xff]  ;;  %v10343_v36 = vsel %vm10334_vm5, %v18445_v6, %v10333_v17  ;;  %s15818_s14 = smov 27  }
 0x35b   : > { %14445 = vmatmul.mubr.msk.bf16.vlgmr.msra.gmra.mrb[4].mxu1 %vm208_vm2, %v17820_v44  ;;  %12032 = vrot.lane.b32.xlu1 %v18463_v34, %s15817_s20  ;;  %v18526_v35 = vcombine.low %v11996_v40, %v11996_v40 }
 0x35c   : > { %8541 = vmatpush1.bf16.msra.mxu1 %v8406_v27  ;;  %v10597_v43 = vpop.permute.xlu1 %10596  ;;  %8572 = vmatprep.mubr.bf16.mxu1 %v19566_v1 }
 0x35d   : > { %14455 = vmatprep.subr.msk.bf16.mxu1 %vm212_vm1, %v8658_v48  ;;  %v10595_v44 = vpop.permute.xlu0 %10594  ;;  %v18536_v48 = vcombine.high %v11996_v40, %v11996_v40 }
 0x35e   : > { %10888 = vrot.lane.b32.xlu0 %v17897_v33, %s15813_s3  ;;  %v10615_v40 = vsel %vm10614_vm6, %v10595_v44, %v10597_v43 }
 0x35f   : > { %12036 = vrot.lane.b32.xlu1 %v18481_v25, %s15817_s20 }
 0x360   : > { %14520 = vmatmul.mubr.msk.bf16.vlgmr.msra.gmra.mrb[0].mxu0 %vm208_vm2, %v18493_v5  ;;  %v8921_v9 = vpop.permute.xlu1 %8920 }
 0x361   : > { %10460 = vmatpush1.bf16.msra.mxu0 %v10360_v4  ;;  %v18510_v23 = vpop.permute.xlu0 %10598  ;;  %10491 = vmatprep.mubr.bf16.mxu0 %v19566_v1  ;;  %v10372_v4 = vsel %vm212_vm1, %v10343_v36, 0 }
 0x362   : > { %12038 = vrot.lane.b32.xlu0 %v18498_v53, %s15817_s20  ;;  %14527 = vmatprep.subr.msk.bf16.mxu0 %vm212_vm1, %v10333_v17  ;;  %v10616_v56 = vsel %vm10614_vm6, %v10597_v43, %v18510_v23  ;;  %v10628_v43 = vsel %vm212_vm1, %v10615_v40, 0 }
 0x363   : > { %14449 = vmatmul.mubr.msk.bf16.vlgmr.msra.gmra.mrb[12].mxu1 %vm208_vm2, %v15766_v59  ;;  %12040 = vrot.lane.b32.xlu1 %v18504_v63, %s15817_s20  ;;  %v8661_v59 = vsel %vm8654_vm14, %v17920_v21, %v8649_v0  ;;  %v8938_v0 = vsel %vm8934_vm13, %v8921_v9, %v18003_v57  ;;  %v8937_v57 = vsel %vm8934_vm13, %v17986_v28, %v8921_v9  ;;  %vm12050_vm14 = vcmask 228352  }
 0x364   : > { %8739 = vmatpush1.bf16.msra.mxu1 %v8674_v38  ;;  %v10605_v17 = vpop.permute.xlu1 %10604  ;;  %8770 = vmatprep.mubr.bf16.mxu1 %v19566_v1  ;;  %v8686_v21 = vsel %vm212_vm1, %v8661_v59, 0  ;;  %v8954_v28 = vsel %vm212_vm1, %v8937_v57, 0 }
 0x365   : > { %14459 = vmatprep.subr.msk.bf16.mxu1 %vm212_vm1, %v8662_v19  ;;  %v18532_v27 = vpop.permute.xlu0 %10602 }
 0x366   : > { %11160 = vrot.lane.b32.xlu0 %v17863_v60, %s15814_s27  ;;  %v10619_v40 = vsel %vm10614_vm6, %v18532_v27, %v10605_v17 }
 0x367   : > { %12044 = vrot.lane.b32.xlu1 %v18526_v35, %s15817_s20 }
 0x368   : > { %14524 = vmatmul.mubr.msk.bf16.vlgmr.msra.gmra.mrb[4].mxu0 %vm208_vm2, %v18493_v5  ;;  %v8929_v38 = vpop.permute.xlu1 %8928 }
 0x369   : > { %v18550_v19 = vpop.permute.xlu0 %10606  ;;  %10542 = vmatpush1.bf16.msra.mxu0 %v10372_v4  ;;  %10573 = vmatprep.mubr.bf16.mxu0 %v19566_v1  ;;  %v8942_v9 = vsel %vm8934_vm13, %v8929_v38, %v18037_v62  ;;  %v8941_v62 = vsel %vm8934_vm13, %v18015_v54, %v8929_v38  ;;  %vm12899_vm13 = vcmask 203776  }
 0x36a   : > { %12046 = vrot.lane.b32.xlu0 %v18536_v48, %s15817_s20  ;;  %14530 = vmatprep.subr.msk.bf16.mxu0 %vm212_vm1, %v10616_v56  ;;  %v10620_v44 = vsel %vm10614_vm6, %v10605_v17, %v18550_v19  ;;  %v10640_v17 = vsel %vm212_vm1, %v10619_v40, 0  ;;  %v8966_v54 = vsel %vm212_vm1, %v8941_v62, 0 }
 0x36b   : > { %14456 = vmatmul.mubr.msk.bf16.vlgmr.msra.gmra.mrb[4].mxu1 %vm208_vm2, %v17926_v47  ;;  %12048 = vrot.lane.b32.xlu1 %v18544_v22, %s15817_s20 }
 0x36c   : > { %8821 = vmatpush1.bf16.msra.mxu1 %v8686_v21  ;;  %v10613_v36 = vpop.permute.xlu1 %10612  ;;  %8852 = vmatprep.mubr.bf16.mxu1 %v19566_v1 }
 0x36d   : > { %14466 = vmatprep.subr.msk.bf16.mxu1 %vm212_vm1, %v8938_v0  ;;  %v18566_v4 = vpop.permute.xlu0 %10610 }
 0x36e   : > { %11168 = vrot.lane.b32.xlu0 %v17897_v33, %s15814_s27  ;;  %v10623_v57 = vsel %vm10614_vm6, %v18566_v4, %v10613_v36  ;;  %s15820_s27 = smov 25  }
 0x36f   : > { %12311 = vrot.lane.b32.xlu1 %v18441_v20, %s15818_s14 }
 0x370   : > { %14528 = vmatmul.mubr.msk.bf16.vlgmr.msra.gmra.mrb[8].mxu0 %vm208_vm2, %v18493_v5  ;;  %v10875_v56 = vpop.permute.xlu1 %10874 }
 0x371   : > { %10658 = vmatpush1.bf16.msra.mxu0 %v10628_v43  ;;  %v9201_v59 = vpop.permute.xlu0 %9200  ;;  %10689 = vmatprep.mubr.bf16.mxu0 %v19566_v1 }
 0x372   : > { %12313 = vrot.lane.b32.xlu0 %v18455_v41, %s15818_s14  ;;  %14534 = vmatprep.subr.msk.bf16.mxu0 %vm212_vm1, %v10620_v44  ;;  %v9218_v38 = vsel %vm9214_vm15, %v9201_v59, %v18078_v14  ;;  %v9217_v14 = vsel %vm9214_vm15, %v18065_v31, %v9201_v59 }
 0x373   : > { %14460 = vmatmul.mubr.msk.bf16.vlgmr.msra.gmra.mrb[12].mxu1 %vm208_vm2, %v17926_v47  ;;  %12315 = vrot.lane.b32.xlu1 %v18463_v34, %s15818_s14  ;;  %v18599_v47 = vld [vmem:[%s19546_s1 + $0x94] sm:$0xf]  ;;  %v9234_v31 = vsel %vm212_vm1, %v9217_v14, 0 }
 0x374   : > { %9019 = vmatpush1.bf16.msra.mxu1 %v8954_v28  ;;  %v18592_v21 = vpop.permute.xlu1 %10878  ;;  %9050 = vmatprep.mubr.bf16.mxu1 %v19566_v1  ;;  %v10652_v28 = vsel %vm212_vm1, %v10623_v57, 0 }
 0x375   : > { %14470 = vmatprep.subr.msk.bf16.mxu1 %vm212_vm1, %v8942_v9  ;;  %v10877_v0 = vpop.permute.xlu0 %10876 }
 0x376   : > { %11440 = vrot.lane.b32.xlu0 %v17863_v60, %s15815_s7  ;;  %v10896_v9 = vsel %vm10894_vm8, %v10877_v0, %v18592_v21  ;;  %v10895_v57 = vsel %vm10894_vm8, %v10875_v56, %v10877_v0 }
 0x377   : > { %12319 = vrot.lane.b32.xlu1 %v18481_v25, %s15818_s14 }
 0x378   : > { %14531 = vmatmul.mubr.msk.bf16.vlgmr.msra.gmra.mrb[0].mxu0 %vm208_vm2, %v18599_v47  ;;  %v18610_v43 = vpop.permute.xlu1 %10882 }
 0x379   : > { %10740 = vmatpush1.bf16.msra.mxu0 %v10640_v17  ;;  %v9209_v44 = vpop.permute.xlu0 %9208  ;;  %10771 = vmatprep.mubr.bf16.mxu0 %v19566_v1 }
 0x37a   : > { %12321 = vrot.lane.b32.xlu0 %v18498_v53, %s15818_s14  ;;  %14538 = vmatprep.subr.msk.bf16.mxu0 %vm212_vm1, %v10613_v36  ;;  %v9222_v59 = vsel %vm9214_vm15, %v9209_v44, %v18110_v2  ;;  %v9221_v2 = vsel %vm9214_vm15, %v18093_v11, %v9209_v44  ;;  %vm13182_vm15 = vcmask 195584  }
 0x37b   : > { %14467 = vmatmul.mubr.msk.bf16.vlgmr.msra.gmra.mrb[4].mxu1 %vm208_vm2, %v18022_v32  ;;  %12323 = vrot.lane.b32.xlu1 %v18504_v63, %s15818_s14  ;;  %v9246_v11 = vsel %vm212_vm1, %v9221_v2, 0 }
 0x37c   : > { %9101 = vmatpush1.bf16.msra.mxu1 %v8966_v54  ;;  %v18625_v40 = vpop.permute.xlu1 %10886  ;;  %9132 = vmatprep.mubr.bf16.mxu1 %v19566_v1 }
 0x37d   : > { %14477 = vmatprep.subr.msk.bf16.mxu1 %vm212_vm1, %v9218_v38  ;;  %v10885_v36 = vpop.permute.xlu0 %10884 }
 0x37e   : > { %11448 = vrot.lane.b32.xlu0 %v17897_v33, %s15815_s7  ;;  %v10900_v56 = vsel %vm10894_vm8, %v10885_v36, %v18625_v40  ;;  %s15821_s7 = smov 24  }
 0x37f   : > { %12327 = vrot.lane.b32.xlu1 %v18526_v35, %s15818_s14 }
 0x380   : > { %14535 = vmatmul.mubr.msk.bf16.vlgmr.msra.gmra.mrb[4].mxu0 %vm208_vm2, %v18599_v47  ;;  %v18640_v17 = vpop.permute.xlu1 %10890 }
 0x381   : > { %v9481_v62 = vpop.permute.xlu0 %9480  ;;  %10822 = vmatpush1.bf16.msra.mxu0 %v10652_v28  ;;  %10853 = vmatprep.mubr.bf16.mxu0 %v19566_v1 }
 0x382   : > { %12329 = vrot.lane.b32.xlu0 %v18536_v48, %s15818_s14  ;;  %14541 = vmatprep.subr.msk.bf16.mxu0 %vm212_vm1, %v10896_v9  ;;  %v9498_v44 = vsel %vm9494_vm10, %v9481_v62, %v18173_v12  ;;  %v9497_v12 = vsel %vm9494_vm10, %v18153_v16, %v9481_v62 }
 0x383   : > { %14471 = vmatmul.mubr.msk.bf16.vlgmr.msra.gmra.mrb[12].mxu1 %vm208_vm2, %v18022_v32  ;;  %12331 = vrot.lane.b32.xlu1 %v18544_v22, %s15818_s14  ;;  %v10908_v32 = vsel %vm212_vm1, %v10895_v57, 0  ;;  %v9514_v62 = vsel %vm212_vm1, %v9497_v12, 0 }
 0x384   : > { %9299 = vmatpush1.bf16.msra.mxu1 %v9234_v31  ;;  %v9489_v54 = vpop.permute.xlu1 %9488  ;;  %9330 = vmatprep.mubr.bf16.mxu1 %v19566_v1 }
 0x385   : > { %14481 = vmatprep.subr.msk.bf16.mxu1 %vm212_vm1, %v9222_v59  ;;  %v10893_v38 = vpop.permute.xlu0 %10892 }
 0x386   : > { %11720 = vrot.lane.b32.xlu0 %v17863_v60, %s15816_s26  ;;  %v10899_v60 = vsel %vm10894_vm8, %v18610_v43, %v10885_v36  ;;  %v18687_v36 = vld [vmem:[%s19546_s1 + $0x98] sm:$0xf]  ;;  %v10903_v16 = vsel %vm10894_vm8, %v18640_v17, %v10893_v38 }
 0x387   : > { %12594 = vrot.lane.b32.xlu1 %v18441_v20, %s15819_s21  ;;  %v10920_v57 = vsel %vm212_vm1, %v10899_v60, 0 }
 0x388   : > { %14539 = vmatmul.mubr.msk.bf16.vlgmr.msra.gmra.mrb[8].mxu0 %vm208_vm2, %v18599_v47  ;;  %v11157_v0 = vpop.permute.xlu1 %11156 }
 0x389   : > { %10938 = vmatpush1.bf16.msra.mxu0 %v10908_v32  ;;  %v11155_v28 = vpop.permute.xlu0 %11154  ;;  %10969 = vmatprep.mubr.bf16.mxu0 %v19566_v1  ;;  %v9502_v32 = vsel %vm9494_vm10, %v9489_v54, %v18202_v49  ;;  %v9501_v49 = vsel %vm9494_vm10, %v18184_v50, %v9489_v54  ;;  %vm13465_vm10 = vcmask 187392  }
 0x38a   : > { %12596 = vrot.lane.b32.xlu0 %v18455_v41, %s15819_s21  ;;  %14545 = vmatprep.subr.msk.bf16.mxu0 %vm212_vm1, %v10900_v56  ;;  %v11175_v50 = vsel %vm11174_vm9, %v11155_v28, %v11157_v0  ;;  %v9526_v54 = vsel %vm212_vm1, %v9501_v49, 0 }
 0x38b   : > { %14478 = vmatmul.mubr.msk.bf16.vlgmr.msra.gmra.mrb[4].mxu1 %vm208_vm2, %v18116_v15  ;;  %12598 = vrot.lane.b32.xlu1 %v18463_v34, %s15819_s21 }
 0x38c   : > { %9381 = vmatpush1.bf16.msra.mxu1 %v9246_v11  ;;  %v9761_v9 = vpop.permute.xlu1 %9760  ;;  %9412 = vmatprep.mubr.bf16.mxu1 %v19566_v1  ;;  %v18739_v11 = vcombine.high %v18487_v3, %v18487_v3 }
 0x38d   : > { %14488 = vmatprep.subr.msk.bf16.mxu1 %vm212_vm1, %v9498_v44  ;;  %v18682_v14 = vpop.permute.xlu0 %11158  ;;  %v9778_v44 = vsel %vm9774_vm0, %v9761_v9, %v18246_v10  ;;  %v9777_v10 = vsel %vm9774_vm0, %v18233_v18, %v9761_v9 }
 0x38e   : > { %11728 = vrot.lane.b32.xlu0 %v17897_v33, %s15816_s26  ;;  %v18705_v33 = vcombine.high %v18449_v58, %v18449_v58  ;;  %v9794_v18 = vsel %vm212_vm1, %v9777_v10, 0 }
 0x38f   : > { %12602 = vrot.lane.b32.xlu1 %v18481_v25, %s15819_s21 }
 0x390   : > { %14542 = vmatmul.mubr.msk.bf16.vlgmr.msra.gmra.mrb[0].mxu0 %vm208_vm2, %v18687_v36  ;;  %v11165_v31 = vpop.permute.xlu1 %11164 }
 0x391   : > { %11020 = vmatpush1.bf16.msra.mxu0 %v10920_v57  ;;  %v18698_v59 = vpop.permute.xlu0 %11162  ;;  %11051 = vmatprep.mubr.bf16.mxu0 %v19566_v1 }
 0x392   : > { %12604 = vrot.lane.b32.xlu0 %v18498_v53, %s15819_s21  ;;  %14549 = vmatprep.subr.msk.bf16.mxu0 %vm212_vm1, %v10893_v38  ;;  %v11176_v38 = vsel %vm11174_vm9, %v11157_v0, %v18682_v14  ;;  %v11188_v0 = vsel %vm212_vm1, %v11175_v50, 0 }
 0x393   : > { %14482 = vmatmul.mubr.msk.bf16.vlgmr.msra.gmra.mrb[12].mxu1 %vm208_vm2, %v18116_v15  ;;  %12606 = vrot.lane.b32.xlu1 %v18504_v63, %s15819_s21  ;;  %v10932_v15 = vsel %vm212_vm1, %v10903_v16, 0 }
 0x394   : > { %9579 = vmatpush1.bf16.msra.mxu1 %v9514_v62  ;;  %v9769_v58 = vpop.permute.xlu1 %9768  ;;  %9610 = vmatprep.mubr.bf16.mxu1 %v19566_v1  ;;  %v11179_v62 = vsel %vm11174_vm9, %v18698_v59, %v11165_v31 }
 0x395   : > { %14492 = vmatprep.subr.msk.bf16.mxu1 %vm212_vm1, %v9502_v32  ;;  %v18719_v56 = vpop.permute.xlu0 %11166  ;;  %v9782_v9 = vsel %vm9774_vm0, %v9769_v58, %v18274_v13  ;;  %v9781_v13 = vsel %vm9774_vm0, %v18261_v55, %v9769_v58  ;;  %vm13748_vm0 = vcmask 179200  }
 0x396   : > { %12034 = vrot.lane.b32.xlu0 %v18705_v33, %s15817_s20  ;;  %v11180_v28 = vsel %vm11174_vm9, %v11165_v31, %v18719_v56  ;;  %v11200_v31 = vsel %vm212_vm1, %v11179_v62, 0  ;;  %v9806_v55 = vsel %vm212_vm1, %v9781_v13, 0 }
 0x397   : > { %12610 = vrot.lane.b32.xlu1 %v18526_v35, %s15819_s21 }
 0x398   : > { %14546 = vmatmul.mubr.msk.bf16.vlgmr.msra.gmra.mrb[4].mxu0 %vm208_vm2, %v18687_v36  ;;  %v11173_v2 = vpop.permute.xlu1 %11172 }
 0x399   : > { %v18732_v60 = vpop.permute.xlu0 %11170  ;;  %11102 = vmatpush1.bf16.msra.mxu0 %v10932_v15  ;;  %11133 = vmatprep.mubr.bf16.mxu0 %v19566_v1 }
 0x39a   : > { %12612 = vrot.lane.b32.xlu0 %v18536_v48, %s15819_s21  ;;  %14552 = vmatprep.subr.msk.bf16.mxu0 %vm212_vm1, %v11176_v38  ;;  %v11183_v50 = vsel %vm11174_vm9, %v18732_v60, %v11173_v2 }
 0x39b   : > { %14489 = vmatmul.mubr.msk.bf16.vlgmr.msra.gmra.mrb[4].mxu1 %vm208_vm2, %v18207_v46  ;;  %12614 = vrot.lane.b32.xlu1 %v18544_v22, %s15819_s21 }
 0x39c   : > { %9661 = vmatpush1.bf16.msra.mxu1 %v9526_v54  ;;  %v18750_v57 = vpop.permute.xlu1 %11434  ;;  %9692 = vmatprep.mubr.bf16.mxu1 %v19566_v1 }
 0x39d   : > { %14499 = vmatprep.subr.msk.bf16.mxu1 %vm212_vm1, %v9778_v44  ;;  %v10041_v3 = vpop.permute.xlu0 %10040  ;;  %v11212_v44 = vsel %vm212_vm1, %v11183_v50, 0 }
 0x39e   : > { %12042 = vrot.lane.b32.xlu0 %v18739_v11, %s15817_s20  ;;  %v10058_v58 = vsel %vm10054_vm4, %v10041_v3, %v18336_v45  ;;  %v10057_v45 = vsel %vm10054_vm4, %v18323_v61, %v10041_v3 }
 0x39f   : > { %12877 = vrot.lane.b32.xlu1 %v18441_v20, %s15820_s27  ;;  %v10074_v61 = vsel %vm212_vm1, %v10057_v45, 0 }
 0x3a0   : > { %14550 = vmatmul.mubr.msk.bf16.vlgmr.msra.gmra.mrb[8].mxu0 %vm208_vm2, %v18687_v36  ;;  %v18765_v12 = vpop.permute.xlu1 %11438 }
 0x3a1   : > { %11218 = vmatpush1.bf16.msra.mxu0 %v11188_v0  ;;  %v11437_v16 = vpop.permute.xlu0 %11436  ;;  %11249 = vmatprep.mubr.bf16.mxu0 %v19566_v1 }
 0x3a2   : > { %12879 = vrot.lane.b32.xlu0 %v18455_v41, %s15820_s27  ;;  %14556 = vmatprep.subr.msk.bf16.mxu0 %vm212_vm1, %v11180_v28  ;;  %v11456_v0 = vsel %vm11454_vm11, %v11437_v16, %v18765_v12  ;;  %v11455_v62 = vsel %vm11454_vm11, %v18750_v57, %v11437_v16 }
 0x3a3   : > { %14493 = vmatmul.mubr.msk.bf16.vlgmr.msra.gmra.mrb[12].mxu1 %vm208_vm2, %v18207_v46  ;;  %12881 = vrot.lane.b32.xlu1 %v18463_v34, %s15820_s27  ;;  %v18787_v46 = vld [vmem:[%s19546_s1 + $0x9c] sm:$0xf] }
 0x3a4   : > { %9859 = vmatpush1.bf16.msra.mxu1 %v9794_v18  ;;  %v18780_v32 = vpop.permute.xlu1 %11442  ;;  %9890 = vmatprep.mubr.bf16.mxu1 %v19566_v1 }
 0x3a5   : > { %14503 = vmatprep.subr.msk.bf16.mxu1 %vm212_vm1, %v9782_v9  ;;  %v10049_v15 = vpop.permute.xlu0 %10048 }
 0x3a6   : > { %12317 = vrot.lane.b32.xlu0 %v18705_v33, %s15818_s14  ;;  %v10062_v3 = vsel %vm10054_vm4, %v10049_v15, %v18367_v42  ;;  %v10061_v42 = vsel %vm10054_vm4, %v18354_v24, %v10049_v15 }
 0x3a7   : > { %12885 = vrot.lane.b32.xlu1 %v18481_v25, %s15820_s27  ;;  %v10086_v24 = vsel %vm212_vm1, %v10061_v42, 0 }
 0x3a8   : > { %14553 = vmatmul.mubr.msk.bf16.vlgmr.msra.gmra.mrb[0].mxu0 %vm208_vm2, %v18787_v46  ;;  %v18798_v38 = vpop.permute.xlu1 %11446 }
 0x3a9   : > { %11300 = vmatpush1.bf16.msra.mxu0 %v11200_v31  ;;  %v11445_v49 = vpop.permute.xlu0 %11444  ;;  %11331 = vmatprep.mubr.bf16.mxu0 %v19566_v1 }
 0x3aa   : > { %12887 = vrot.lane.b32.xlu0 %v18498_v53, %s15820_s27  ;;  %14560 = vmatprep.subr.msk.bf16.mxu0 %vm212_vm1, %v11173_v2  ;;  %v11460_v57 = vsel %vm11454_vm11, %v11445_v49, %v18798_v38  ;;  %v11459_v13 = vsel %vm11454_vm11, %v18780_v32, %v11445_v49  ;;  %v18884_v49 = vld [vmem:[%s19546_s1 + $0xa0] sm:$0xf] }
 0x3ab   : > { %14500 = vmatmul.mubr.msk.bf16.vlgmr.msra.gmra.mrb[4].mxu1 %vm208_vm2, %v18298_v30  ;;  %12889 = vrot.lane.b32.xlu1 %v18504_v63, %s15820_s27 }
 0x3ac   : > { %9941 = vmatpush1.bf16.msra.mxu1 %v9806_v55  ;;  %v18813_v54 = vpop.permute.xlu1 %11450  ;;  %9972 = vmatprep.mubr.bf16.mxu1 %v19566_v1 }
 0x3ad   : > { %14510 = vmatprep.subr.msk.bf16.mxu1 %vm212_vm1, %v10058_v58  ;;  %v10321_v2 = vpop.permute.xlu0 %10320  ;;  %v11480_v58 = vsel %vm212_vm1, %v11459_v13, 0 }
 0x3ae   : > { %12325 = vrot.lane.b32.xlu0 %v18739_v11, %s15818_s14  ;;  %v10338_v15 = vsel %vm10334_vm5, %v10321_v2, %v18414_v8  ;;  %v10337_v8 = vsel %vm10334_vm5, %v18397_v29, %v10321_v2 }
 0x3af   : > { %12893 = vrot.lane.b32.xlu1 %v18526_v35, %s15820_s27  ;;  %v10354_v29 = vsel %vm212_vm1, %v10337_v8, 0 }
 0x3b0   : > { %14557 = vmatmul.mubr.msk.bf16.vlgmr.msra.gmra.mrb[4].mxu0 %vm208_vm2, %v18787_v46  ;;  %v18828_v28 = vpop.permute.xlu1 %10328 }
 0x3b1   : > { %v11453_v10 = vpop.permute.xlu0 %11452  ;;  %11382 = vmatpush1.bf16.msra.mxu0 %v11212_v44  ;;  %11413 = vmatprep.mubr.bf16.mxu0 %v19566_v1  ;;  %v10342_v2 = vsel %vm10334_vm5, %v18828_v28, %v18445_v6  ;;  %v10341_v6 = vsel %vm10334_vm5, %v18429_v26, %v18828_v28 }
 0x3b2   : > { %12895 = vrot.lane.b32.xlu0 %v18536_v48, %s15820_s27  ;;  %14563 = vmatprep.subr.msk.bf16.mxu0 %vm212_vm1, %v11456_v0  ;;  %v11463_v45 = vsel %vm11454_vm11, %v18813_v54, %v11453_v10 }
 0x3b3   : > { %14504 = vmatmul.mubr.msk.bf16.vlgmr.msra.gmra.mrb[12].mxu1 %vm208_vm2, %v18298_v30  ;;  %12897 = vrot.lane.b32.xlu1 %v18544_v22, %s15820_s27  ;;  %v11468_v30 = vsel %vm212_vm1, %v11455_v62, 0 }
 0x3b4   : > { %10139 = vmatpush1.bf16.msra.mxu1 %v10074_v61  ;;  %v18843_v18 = vpop.permute.xlu1 %11716  ;;  %10170 = vmatprep.mubr.bf16.mxu1 %v19566_v1 }
 0x3b5   : > { %14514 = vmatprep.subr.msk.bf16.mxu1 %vm212_vm1, %v10062_v3  ;;  %v11715_v9 = vpop.permute.xlu0 %11714 }
 0x3b6   : > { %12600 = vrot.lane.b32.xlu0 %v18705_v33, %s15819_s21  ;;  %v11735_v26 = vsel %vm11734_vm12, %v11715_v9, %v18843_v18 }
 0x3b7   : > { %13160 = vrot.lane.b32.xlu1 %v18441_v20, %s15821_s7 }
 0x3b8   : > { %14561 = vmatmul.mubr.msk.bf16.vlgmr.msra.gmra.mrb[8].mxu0 %vm208_vm2, %v18787_v46  ;;  %v18858_v16 = vpop.permute.xlu1 %10600 }
 0x3b9   : > { %11498 = vmatpush1.bf16.msra.mxu0 %v11468_v30  ;;  %v18860_v31 = vpop.permute.xlu0 %11718  ;;  %11529 = vmatprep.mubr.bf16.mxu0 %v19566_v1  ;;  %v10618_v28 = vsel %vm10614_vm6, %v18858_v16, %v18532_v27  ;;  %v10617_v27 = vsel %vm10614_vm6, %v18510_v23, %v18858_v16 }
 0x3ba   : > { %13162 = vrot.lane.b32.xlu0 %v18455_v41, %s15821_s7  ;;  %14567 = vmatprep.subr.msk.bf16.mxu0 %vm212_vm1, %v11460_v57  ;;  %v11736_v61 = vsel %vm11734_vm12, %v18843_v18, %v18860_v31  ;;  %v10366_v57 = vsel %vm212_vm1, %v10341_v6, 0  ;;  %v11748_v18 = vsel %vm212_vm1, %v11735_v26, 0 }
 0x3bb   : > { %14511 = vmatmul.mubr.msk.bf16.vlgmr.msra.gmra.mrb[4].mxu1 %vm208_vm2, %v18386_v7  ;;  %13164 = vrot.lane.b32.xlu1 %v18463_v34, %s15821_s7 }
 0x3bc   : > { %10221 = vmatpush1.bf16.msra.mxu1 %v10086_v24  ;;  %v18875_v50 = vpop.permute.xlu1 %11724  ;;  %10252 = vmatprep.mubr.bf16.mxu1 %v19566_v1 }
 0x3bd   : > { %14521 = vmatprep.subr.msk.bf16.mxu1 %vm212_vm1, %v10338_v15  ;;  %v18879_v55 = vpop.permute.xlu0 %11722 }
 0x3be   : > { %12608 = vrot.lane.b32.xlu0 %v18739_v11, %s15819_s21  ;;  %v11739_v23 = vsel %vm11734_vm12, %v18879_v55, %v18875_v50 }
 0x3bf   : > { %13168 = vrot.lane.b32.xlu1 %v18481_v25, %s15821_s7 }
 0x3c0   : > { %14564 = vmatmul.mubr.msk.bf16.vlgmr.msra.gmra.mrb[0].mxu0 %vm208_vm2, %v18884_v49  ;;  %v18895_v44 = vpop.permute.xlu1 %10608 }
 0x3c1   : > { %11580 = vmatpush1.bf16.msra.mxu0 %v11480_v58  ;;  %v18897_v0 = vpop.permute.xlu0 %11726  ;;  %11611 = vmatprep.mubr.bf16.mxu0 %v19566_v1  ;;  %v10634_v58 = vsel %vm212_vm1, %v10617_v27, 0  ;;  %v10622_v16 = vsel %vm10614_vm6, %v18895_v44, %v18566_v4  ;;  %v10621_v4 = vsel %vm10614_vm6, %v18550_v19, %v18895_v44 }
 0x3c2   : > { %13170 = vrot.lane.b32.xlu0 %v18498_v53, %s15821_s7  ;;  %14571 = vmatprep.subr.msk.bf16.mxu0 %vm212_vm1, %v11453_v10  ;;  %v11740_v9 = vsel %vm11734_vm12, %v18875_v50, %v18897_v0  ;;  %v18989_v50 = vld [vmem:[%s19546_s1 + $0xa4] sm:$0xf] }
 0x3c3   : > { %14515 = vmatmul.mubr.msk.bf16.vlgmr.msra.gmra.mrb[12].mxu1 %vm208_vm2, %v18386_v7  ;;  %13172 = vrot.lane.b32.xlu1 %v18504_v63, %s15821_s7  ;;  %v11492_v7 = vsel %vm212_vm1, %v11463_v45, 0 }
 0x3c4   : > { %10419 = vmatpush1.bf16.msra.mxu1 %v10354_v29  ;;  %10450 = vmatprep.mubr.bf16.mxu1 %v19566_v1 }
 0x3c5   : > { %14525 = vmatprep.subr.msk.bf16.mxu1 %vm212_vm1, %v10342_v2  ;;  %v18915_v62 = vpop.permute.xlu0 %11730  ;;  %v11733_v10 = vpop.permute.xlu1 %11732 }
 0x3c6   : > { %12883 = vrot.lane.b32.xlu0 %v18705_v33, %s15820_s27  ;;  %v11743_v19 = vsel %vm11734_vm12, %v18915_v62, %v11733_v10 }
 0x3c7   : > { %13176 = vrot.lane.b32.xlu1 %v18526_v35, %s15821_s7 }
 0x3c8   : > { %14568 = vmatmul.mubr.msk.bf16.vlgmr.msra.gmra.mrb[4].mxu0 %vm208_vm2, %v18884_v49 }
 0x3c9   : > { %v18930_v3 = vpop.permute.xlu0 %10880  ;;  %11662 = vmatpush1.bf16.msra.mxu0 %v11492_v7  ;;  %11693 = vmatprep.mubr.bf16.mxu0 %v19566_v1  ;;  %v18933_v30 = vpop.permute.xlu1 %12028  ;;  %v10646_v7 = vsel %vm212_vm1, %v10621_v4, 0 }
 0x3ca   : > { %13178 = vrot.lane.b32.xlu0 %v18536_v48, %s15821_s7  ;;  %14574 = vmatprep.subr.msk.bf16.mxu0 %vm212_vm1, %v11736_v61  ;;  %v10898_v44 = vsel %vm10894_vm8, %v18930_v3, %v18610_v43  ;;  %v10897_v43 = vsel %vm10894_vm8, %v18592_v21, %v18930_v3 }
 0x3cb   : > { %14522 = vmatmul.mubr.msk.bf16.vlgmr.msra.gmra.mrb[4].mxu1 %vm208_vm2, %v18493_v5  ;;  %13180 = vrot.lane.b32.xlu1 %v18544_v22, %s15821_s7 }
 0x3cc   : > { %10501 = vmatpush1.bf16.msra.mxu1 %v10366_v57  ;;  %10532 = vmatprep.mubr.bf16.mxu1 %v19566_v1  ;;  %v11772_v57 = vsel %vm212_vm1, %v11743_v19, 0 }
 0x3cd   : > { %14532 = vmatprep.subr.msk.bf16.mxu1 %vm212_vm1, %v10618_v28  ;;  %v12031_v42 = vpop.permute.xlu0 %12030  ;;  %v18950_v13 = vpop.permute.xlu1 %12032 }
 0x3ce   : > { %12891 = vrot.lane.b32.xlu0 %v18739_v11, %s15820_s27  ;;  %v12051_v21 = vsel %vm12050_vm14, %v18933_v30, %v12031_v42 }
 0x3cf   : > { %13443 = vrot.lane.b32.xlu1 %v18441_v20, %s15822_s5  ;;  %v12065_v30 = vsel %vm212_vm1, %v12051_v21, 0 }
 0x3d0   : > { %14572 = vmatmul.mubr.msk.bf16.vlgmr.msra.gmra.mrb[8].mxu0 %vm208_vm2, %v18884_v49 }
 0x3d1   : > { %11778 = vmatpush1.bf16.msra.mxu0 %v11748_v18  ;;  %v18965_v24 = vpop.permute.xlu0 %10888  ;;  %11809 = vmatprep.mubr.bf16.mxu0 %v19566_v1  ;;  %v18968_v15 = vpop.permute.xlu1 %12036  ;;  %v10914_v18 = vsel %vm212_vm1, %v10897_v43, 0 }
 0x3d2   : > { %13445 = vrot.lane.b32.xlu0 %v18455_v41, %s15822_s5  ;;  %14578 = vmatprep.subr.msk.bf16.mxu0 %vm212_vm1, %v11740_v9  ;;  %v10902_v3 = vsel %vm10894_vm8, %v18965_v24, %v18640_v17  ;;  %v10901_v17 = vsel %vm10894_vm8, %v18625_v40, %v18965_v24 }
 0x3d3   : > { %14526 = vmatmul.mubr.msk.bf16.vlgmr.msra.gmra.mrb[12].mxu1 %vm208_vm2, %v18493_v5  ;;  %13447 = vrot.lane.b32.xlu1 %v18463_v34, %s15822_s5  ;;  %v11760_v5 = vsel %vm212_vm1, %v11739_v23, 0  ;;  %v19094_v23 = vld [vmem:[%s19546_s1 + $0xa8] sm:$0xf] }
 0x3d4   : > { %10699 = vmatpush1.bf16.msra.mxu1 %v10634_v58  ;;  %10730 = vmatprep.mubr.bf16.mxu1 %v19566_v1 }
 0x3d5   : > { %14536 = vmatprep.subr.msk.bf16.mxu1 %vm212_vm1, %v10622_v16  ;;  %v12039_v8 = vpop.permute.xlu0 %12038  ;;  %v18991_v45 = vpop.permute.xlu1 %12040 }
 0x3d6   : > { %13166 = vrot.lane.b32.xlu0 %v18705_v33, %s15821_s7  ;;  %v12055_v40 = vsel %vm12050_vm14, %v18968_v15, %v12039_v8 }
 0x3d7   : > { %13451 = vrot.lane.b32.xlu1 %v18481_v25, %s15822_s5 }
 0x3d8   : > { %14575 = vmatmul.mubr.msk.bf16.vlgmr.msra.gmra.mrb[0].mxu0 %vm208_vm2, %v18989_v50 }
 0x3d9   : > { %11860 = vmatpush1.bf16.msra.mxu0 %v11760_v5  ;;  %v19003_v29 = vpop.permute.xlu0 %11160  ;;  %11891 = vmatprep.mubr.bf16.mxu0 %v19566_v1  ;;  %v19006_v2 = vpop.permute.xlu1 %12044 }
 0x3da   : > { %13453 = vrot.lane.b32.xlu0 %v18498_v53, %s15822_s5  ;;  %14582 = vmatprep.subr.msk.bf16.mxu0 %vm212_vm1, %v11733_v10  ;;  %v12052_v10 = vsel %vm12050_vm14, %v12031_v42, %v18950_v13  ;;  %v11178_v24 = vsel %vm11174_vm9, %v19003_v29, %v18698_v59  ;;  %v11177_v59 = vsel %vm11174_vm9, %v18682_v14, %v19003_v29 }
 0x3db   : > { %14533 = vmatmul.mubr.msk.bf16.vlgmr.msra.gmra.mrb[4].mxu1 %vm208_vm2, %v18599_v47  ;;  %13455 = vrot.lane.b32.xlu1 %v18504_v63, %s15822_s5 }
 0x3dc   : > { %10781 = vmatpush1.bf16.msra.mxu1 %v10646_v7  ;;  %10812 = vmatprep.mubr.bf16.mxu1 %v19566_v1 }
 0x3dd   : > { %14543 = vmatprep.subr.msk.bf16.mxu1 %vm212_vm1, %v10898_v44  ;;  %v12047_v61 = vpop.permute.xlu0 %12046  ;;  %v12049_v6 = vpop.permute.xlu1 %12048 }
 0x3de   : > { %13174 = vrot.lane.b32.xlu0 %v18739_v11, %s15821_s7  ;;  %v12059_v7 = vsel %vm12050_vm14, %v19006_v2, %v12047_v61 }
 0x3df   : > { %13459 = vrot.lane.b32.xlu1 %v18526_v35, %s15822_s5  ;;  %v12089_v19 = vsel %vm212_vm1, %v12059_v7, 0 }
 0x3e0   : > { %14579 = vmatmul.mubr.msk.bf16.vlgmr.msra.gmra.mrb[4].mxu0 %vm208_vm2, %v18989_v50 }
 0x3e1   : > { %v19035_v26 = vpop.permute.xlu0 %11168  ;;  %11942 = vmatpush1.bf16.msra.mxu0 %v11772_v57  ;;  %11973 = vmatprep.mubr.bf16.mxu0 %v19566_v1  ;;  %v19038_v28 = vpop.permute.xlu1 %12311 }
 0x3e2   : > { %14596 = vmatprep.subr.msk.bf16.mxu0 %vm212_vm1, %v12052_v10  ;;  %13461 = vrot.lane.b32.xlu0 %v18536_v48, %s15822_s5  ;;  %v11182_v14 = vsel %vm11174_vm9, %v19035_v26, %v18732_v60 }
 0x3e3   : > { %14537 = vmatmul.mubr.msk.bf16.vlgmr.msra.gmra.mrb[12].mxu1 %vm208_vm2, %v18599_v47  ;;  %13463 = vrot.lane.b32.xlu1 %v18544_v22, %s15822_s5  ;;  %v12056_v47 = vsel %vm12050_vm14, %v12039_v8, %v18991_v45  ;;  %v12077_v8 = vsel %vm212_vm1, %v12055_v40, 0 }
 0x3e4   : > { %10979 = vmatpush1.bf16.msra.mxu1 %v10914_v18  ;;  %11010 = vmatprep.mubr.bf16.mxu1 %v19566_v1 }
 0x3e5   : > { %14547 = vmatprep.subr.msk.bf16.mxu1 %vm212_vm1, %v10902_v3  ;;  %v19055_v9 = vpop.permute.xlu0 %12313  ;;  %v19057_v27 = vpop.permute.xlu1 %12315 }
 0x3e6   : > { %13449 = vrot.lane.b32.xlu0 %v18705_v33, %s15822_s5 }
 0x3e7   : > { %13726 = vrot.lane.b32.xlu1 %v18441_v20, %s15823_s25  ;;  %v10926_v20 = vsel %vm212_vm1, %v10901_v17, 0 }
 0x3e8   : > { %14583 = vmatmul.mubr.msk.bf16.vlgmr.msra.gmra.mrb[8].mxu0 %vm208_vm2, %v18989_v50 }
 0x3e9   : > { %12095 = vmatpush1.bf16.msra.mxu0 %v12065_v30  ;;  %v19071_v42 = vpop.permute.xlu0 %11440  ;;  %12126 = vmatprep.mubr.bf16.mxu0 %v19566_v1  ;;  %v19074_v58 = vpop.permute.xlu1 %12319 }
 0x3ea   : > { %14600 = vmatprep.subr.msk.bf16.mxu0 %vm212_vm1, %v12056_v47  ;;  %13728 = vrot.lane.b32.xlu0 %v18455_v41, %s15823_s25 }
 0x3eb   : > { %14544 = vmatmul.mubr.msk.bf16.vlgmr.msra.gmra.mrb[4].mxu1 %vm208_vm2, %v18687_v36  ;;  %13730 = vrot.lane.b32.xlu1 %v18463_v34, %s15823_s25  ;;  %v12060_v34 = vsel %vm12050_vm14, %v12047_v61, %v12049_v6 }
 0x3ec   : > { %11061 = vmatpush1.bf16.msra.mxu1 %v10926_v20  ;;  %11092 = vmatprep.mubr.bf16.mxu1 %v19566_v1 }
 0x3ed   : > { %14554 = vmatprep.subr.msk.bf16.mxu1 %vm212_vm1, %v11178_v24  ;;  %v12322_v41 = vpop.permute.xlu0 %12321  ;;  %v19096_v16 = vpop.permute.xlu1 %12323 }
 0x3ee   : > { %13457 = vrot.lane.b32.xlu0 %v18739_v11, %s15822_s5  ;;  %v12338_v43 = vsel %vm12333_vm3, %v19074_v58, %v12322_v41 }
 0x3ef   : > { %13734 = vrot.lane.b32.xlu1 %v18481_v25, %s15823_s25  ;;  %v11194_v25 = vsel %vm212_vm1, %v11177_v59, 0  ;;  %v12360_v21 = vsel %vm212_vm1, %v12338_v43, 0 }
 0x3f0   : > { %14597 = vmatmul.mubr.msk.bf16.vlgmr.msra.gmra.mrb[0].mxu0 %vm208_vm2, %v19094_v23 }
 0x3f1   : > { %12177 = vmatpush1.bf16.msra.mxu0 %v12077_v8  ;;  %v11449_v5 = vpop.permute.xlu0 %11448  ;;  %12208 = vmatprep.mubr.bf16.mxu0 %v19566_v1  ;;  %v19110_v4 = vpop.permute.xlu1 %12327 }
 0x3f2   : > { %14604 = vmatprep.subr.msk.bf16.mxu0 %vm212_vm1, %v12060_v34  ;;  %13736 = vrot.lane.b32.xlu0 %v18498_v53, %s15823_s25 }
 0x3f3   : > { %14548 = vmatmul.mubr.msk.bf16.vlgmr.msra.gmra.mrb[12].mxu1 %vm208_vm2, %v18687_v36  ;;  %13738 = vrot.lane.b32.xlu1 %v18504_v63, %s15823_s25  ;;  %v12335_v63 = vsel %vm12333_vm3, %v19055_v9, %v19057_v27  ;;  %v11181_v36 = vsel %vm11174_vm9, %v18719_v56, %v19035_v26  ;;  %v11458_v56 = vsel %vm11454_vm11, %v19071_v42, %v18780_v32 }
 0x3f4   : > { %11259 = vmatpush1.bf16.msra.mxu1 %v11194_v25  ;;  %11290 = vmatprep.mubr.bf16.mxu1 %v19566_v1  ;;  %v11457_v32 = vsel %vm11454_vm11, %v18765_v12, %v19071_v42  ;;  %v11462_v12 = vsel %vm11454_vm11, %v11449_v5, %v18813_v54  ;;  %v11461_v54 = vsel %vm11454_vm11, %v18798_v38, %v11449_v5 }
 0x3f5   : > { %14558 = vmatprep.subr.msk.bf16.mxu1 %vm212_vm1, %v11182_v14  ;;  %v12330_v53 = vpop.permute.xlu0 %12329  ;;  %v12332_v29 = vpop.permute.xlu1 %12331  ;;  %v11486_v30 = vsel %vm212_vm1, %v11461_v54, 0 }
 0x3f6   : > { %13732 = vrot.lane.b32.xlu0 %v18705_v33, %s15823_s25  ;;  %v12334_v33 = vsel %vm12333_vm3, %v19038_v28, %v19055_v9  ;;  %v19187_v28 = vld [vmem:[%s19546_s1 + $0xac] sm:$0xf]  ;;  %v12342_v47 = vsel %vm12333_vm3, %v19110_v4, %v12330_v53 }
 0x3f7   : > { %13742 = vrot.lane.b32.xlu1 %v18526_v35, %s15823_s25  ;;  %v11206_v35 = vsel %vm212_vm1, %v11181_v36, 0  ;;  %v12348_v6 = vsel %vm212_vm1, %v12334_v33, 0  ;;  %v12372_v20 = vsel %vm212_vm1, %v12342_v47, 0 }
 0x3f8   : > { %14601 = vmatmul.mubr.msk.bf16.vlgmr.msra.gmra.mrb[4].mxu0 %vm208_vm2, %v19094_v23 }
 0x3f9   : > { %12259 = vmatpush1.bf16.msra.mxu0 %v12089_v19  ;;  %v11721_v60 = vpop.permute.xlu0 %11720  ;;  %12290 = vmatprep.mubr.bf16.mxu0 %v19566_v1  ;;  %v19141_v44 = vpop.permute.xlu1 %12594 }
 0x3fa   : > { %14607 = vmatprep.subr.msk.bf16.mxu0 %vm212_vm1, %v12335_v63  ;;  %13744 = vrot.lane.b32.xlu0 %v18536_v48, %s15823_s25  ;;  %v11738_v38 = vsel %vm11734_vm12, %v11721_v60, %v18879_v55  ;;  %v11737_v24 = vsel %vm11734_vm12, %v18860_v31, %v11721_v60  ;;  %v19253_v63 = vld [vmem:[%s19546_s1 + $0xb0] sm:$0xf] }
 0x3fb   : > { %14555 = vmatmul.mubr.msk.bf16.vlgmr.msra.gmra.mrb[4].mxu1 %vm208_vm2, %v18787_v46  ;;  %13746 = vrot.lane.b32.xlu1 %v18544_v22, %s15823_s25  ;;  %v12339_v22 = vsel %vm12333_vm3, %v12322_v41, %v19096_v16  ;;  %v11754_v8 = vsel %vm212_vm1, %v11737_v24, 0 }
 0x3fc   : > { %11341 = vmatpush1.bf16.msra.mxu1 %v11206_v35  ;;  %11372 = vmatprep.mubr.bf16.mxu1 %v19566_v1 }
 0x3fd   : > { %14565 = vmatprep.subr.msk.bf16.mxu1 %vm212_vm1, %v11458_v56  ;;  %v12597_v48 = vpop.permute.xlu0 %12596  ;;  %v19159_v61 = vpop.permute.xlu1 %12598 }
 0x3fe   : > { %13740 = vrot.lane.b32.xlu0 %v18739_v11, %s15823_s25  ;;  %v11474_v11 = vsel %vm212_vm1, %v11457_v32, 0  ;;  %v12618_v40 = vsel %vm12616_vm7, %v12597_v48, %v19159_v61  ;;  %v12617_v34 = vsel %vm12616_vm7, %v19141_v44, %v12597_v48 }
 0x3ff   : > { %v12631_v25 = vsel %vm212_vm1, %v12617_v34, 0 }
 0x400   : > { %14605 = vmatmul.mubr.msk.bf16.vlgmr.msra.gmra.mrb[8].mxu0 %vm208_vm2, %v19094_v23 }
 0x401   : > { %12378 = vmatpush1.bf16.msra.mxu0 %v12348_v6  ;;  %v11729_v57 = vpop.permute.xlu0 %11728  ;;  %12409 = vmatprep.mubr.bf16.mxu0 %v19566_v1  ;;  %v19172_v10 = vpop.permute.xlu1 %12602 }
 0x402   : > { %14611 = vmatprep.subr.msk.bf16.mxu0 %vm212_vm1, %v12339_v22  ;;  %v11742_v31 = vsel %vm11734_vm12, %v11729_v57, %v18915_v62  ;;  %v11741_v14 = vsel %vm11734_vm12, %v18897_v0, %v11729_v57 }
 0x403   : > { %14559 = vmatmul.mubr.msk.bf16.vlgmr.msra.gmra.mrb[12].mxu1 %vm208_vm2, %v18787_v46  ;;  %v12343_v46 = vsel %vm12333_vm3, %v12330_v53, %v12332_v29  ;;  %v11766_v53 = vsel %vm212_vm1, %v11741_v14, 0 }
 0x404   : > { %11539 = vmatpush1.bf16.msra.mxu1 %v11474_v11  ;;  %11570 = vmatprep.mubr.bf16.mxu1 %v19566_v1 }
 0x405   : > { %14569 = vmatprep.subr.msk.bf16.mxu1 %vm212_vm1, %v11462_v12  ;;  %v12605_v26 = vpop.permute.xlu0 %12604  ;;  %v19189_v18 = vpop.permute.xlu1 %12606 }
 0x406   : > { %v12622_v7 = vsel %vm12616_vm7, %v12605_v26, %v19189_v18  ;;  %v12621_v29 = vsel %vm12616_vm7, %v19172_v10, %v12605_v26 }
 0x407   : > { %v12643_v60 = vsel %vm212_vm1, %v12621_v29, 0 }
 0x408   : > { %14608 = vmatmul.mubr.msk.bf16.vlgmr.msra.gmra.mrb[0].mxu0 %vm208_vm2, %v19187_v28 }
 0x409   : > { %12460 = vmatpush1.bf16.msra.mxu0 %v12360_v21  ;;  %v12035_v3 = vpop.permute.xlu0 %12034  ;;  %12491 = vmatprep.mubr.bf16.mxu0 %v19566_v1  ;;  %v19198_v9 = vpop.permute.xlu1 %12610 }
 0x40a   : > { %14615 = vmatprep.subr.msk.bf16.mxu0 %vm212_vm1, %v12343_v46  ;;  %v12054_v0 = vsel %vm12050_vm14, %v12035_v3, %v18968_v15  ;;  %v12053_v15 = vsel %vm12050_vm14, %v18950_v13, %v12035_v3 }
 0x40b   : > { %14566 = vmatmul.mubr.msk.bf16.vlgmr.msra.gmra.mrb[4].mxu1 %vm208_vm2, %v18884_v49  ;;  %v12071_v56 = vsel %vm212_vm1, %v12053_v15, 0 }
 0x40c   : > { %11621 = vmatpush1.bf16.msra.mxu1 %v11486_v30  ;;  %11652 = vmatprep.mubr.bf16.mxu1 %v19566_v1 }
 0x40d   : > { %14576 = vmatprep.subr.msk.bf16.mxu1 %vm212_vm1, %v11738_v38  ;;  %v12613_v17 = vpop.permute.xlu0 %12612  ;;  %v12615_v42 = vpop.permute.xlu1 %12614 }
 0x40e   : > { %v12626_v44 = vsel %vm12616_vm7, %v12613_v17, %v12615_v42  ;;  %v12625_v48 = vsel %vm12616_vm7, %v19198_v9, %v12613_v17  ;;  %v19318_v42 = vld [vmem:[%s19546_s1 + $0xb4] sm:$0xf] }
 0x40f   : > { %v12655_v32 = vsel %vm212_vm1, %v12625_v48, 0 }
 0x410   : > { %14612 = vmatmul.mubr.msk.bf16.vlgmr.msra.gmra.mrb[4].mxu0 %vm208_vm2, %v19187_v28 }
 0x411   : > { %12542 = vmatpush1.bf16.msra.mxu0 %v12372_v20  ;;  %v12043_v55 = vpop.permute.xlu0 %12042  ;;  %12573 = vmatprep.mubr.bf16.mxu0 %v19566_v1  ;;  %v12878_v41 = vpop.permute.xlu1 %12877 }
 0x412   : > { %14618 = vmatprep.subr.msk.bf16.mxu0 %vm212_vm1, %v12618_v40  ;;  %v12058_v13 = vsel %vm12050_vm14, %v12043_v55, %v19006_v2  ;;  %v12057_v11 = vsel %vm12050_vm14, %v18991_v45, %v12043_v55 }
 0x413   : > { %14570 = vmatmul.mubr.msk.bf16.vlgmr.msra.gmra.mrb[12].mxu1 %vm208_vm2, %v18884_v49  ;;  %v12083_v43 = vsel %vm212_vm1, %v12057_v11, 0 }
 0x414   : > { %11819 = vmatpush1.bf16.msra.mxu1 %v11754_v8  ;;  %11850 = vmatprep.mubr.bf16.mxu1 %v19566_v1 }
 0x415   : > { %14580 = vmatprep.subr.msk.bf16.mxu1 %vm212_vm1, %v11742_v31  ;;  %v12880_v59 = vpop.permute.xlu0 %12879  ;;  %v19228_v5 = vpop.permute.xlu1 %12881 }
 0x416   : > { %v12901_v57 = vsel %vm12899_vm13, %v12880_v59, %v19228_v5  ;;  %v12900_v12 = vsel %vm12899_vm13, %v12878_v41, %v12880_v59 }
 0x417   : > { %v12914_v46 = vsel %vm212_vm1, %v12900_v12, 0 }
 0x418   : > { %14616 = vmatmul.mubr.msk.bf16.vlgmr.msra.gmra.mrb[8].mxu0 %vm208_vm2, %v19187_v28 }
 0x419   : > { %12661 = vmatpush1.bf16.msra.mxu0 %v12631_v25  ;;  %v12318_v49 = vpop.permute.xlu0 %12317  ;;  %12692 = vmatprep.mubr.bf16.mxu0 %v19566_v1  ;;  %v19238_v62 = vpop.permute.xlu1 %12885 }
 0x41a   : > { %14622 = vmatprep.subr.msk.bf16.mxu0 %vm212_vm1, %v12622_v7  ;;  %v12337_v45 = vsel %vm12333_vm3, %v12318_v49, %v19074_v58  ;;  %v12336_v3 = vsel %vm12333_vm3, %v19057_v27, %v12318_v49 }
 0x41b   : > { %14577 = vmatmul.mubr.msk.bf16.vlgmr.msra.gmra.mrb[4].mxu1 %vm208_vm2, %v18989_v50  ;;  %v12354_v47 = vsel %vm212_vm1, %v12336_v3, 0 }
 0x41c   : > { %11901 = vmatpush1.bf16.msra.mxu1 %v11766_v53  ;;  %11932 = vmatprep.mubr.bf16.mxu1 %v19566_v1 }
 0x41d   : > { %14598 = vmatprep.subr.msk.bf16.mxu1 %vm212_vm1, %v12054_v0  ;;  %v12888_v19 = vpop.permute.xlu0 %12887  ;;  %v19255_v36 = vpop.permute.xlu1 %12889 }
 0x41e   : > { %v12905_v54 = vsel %vm12899_vm13, %v12888_v19, %v19255_v36  ;;  %v12904_v38 = vsel %vm12899_vm13, %v19238_v62, %v12888_v19 }
 0x41f   : > { %v12926_v40 = vsel %vm212_vm1, %v12904_v38, 0 }
 0x420   : > { %14619 = vmatmul.mubr.msk.bf16.vlgmr.msra.gmra.mrb[0].mxu0 %vm208_vm2, %v19253_v63 }
 0x421   : > { %12743 = vmatpush1.bf16.msra.mxu0 %v12643_v60  ;;  %v12326_v35 = vpop.permute.xlu0 %12325  ;;  %12774 = vmatprep.mubr.bf16.mxu0 %v19566_v1  ;;  %v19264_v33 = vpop.permute.xlu1 %12893 }
 0x422   : > { %14626 = vmatprep.subr.msk.bf16.mxu0 %vm212_vm1, %v12626_v44  ;;  %v12341_v27 = vsel %vm12333_vm3, %v12326_v35, %v19110_v4  ;;  %v12340_v4 = vsel %vm12333_vm3, %v19096_v16, %v12326_v35 }
 0x423   : > { %14581 = vmatmul.mubr.msk.bf16.vlgmr.msra.gmra.mrb[12].mxu1 %vm208_vm2, %v18989_v50  ;;  %v12366_v41 = vsel %vm212_vm1, %v12340_v4, 0 }
 0x424   : > { %12136 = vmatpush1.bf16.msra.mxu1 %v12071_v56  ;;  %12167 = vmatprep.mubr.bf16.mxu1 %v19566_v1  ;;  %v19383_v56 = vld [vmem:[%s19546_s1 + $0xb8] sm:$0xf] }
 0x425   : > { %14602 = vmatprep.subr.msk.bf16.mxu1 %vm212_vm1, %v12058_v13  ;;  %v12896_v6 = vpop.permute.xlu0 %12895  ;;  %v12898_v22 = vpop.permute.xlu1 %12897 }
 0x426   : > { %v12908_v8 = vsel %vm12899_vm13, %v19264_v33, %v12896_v6 }
 0x427   : > { %v12938_v59 = vsel %vm212_vm1, %v12908_v8, 0 }
 0x428   : > { %14623 = vmatmul.mubr.msk.bf16.vlgmr.msra.gmra.mrb[4].mxu0 %vm208_vm2, %v19253_v63 }
 0x429   : > { %12825 = vmatpush1.bf16.msra.mxu0 %v12655_v32  ;;  %v12601_v50 = vpop.permute.xlu0 %12600  ;;  %12856 = vmatprep.mubr.bf16.mxu0 %v19566_v1  ;;  %v13161_v2 = vpop.permute.xlu1 %13160 }
 0x42a   : > { %14629 = vmatprep.subr.msk.bf16.mxu0 %vm212_vm1, %v12901_v57  ;;  %v12620_v16 = vsel %vm12616_vm7, %v12601_v50, %v19172_v10  ;;  %v12619_v7 = vsel %vm12616_vm7, %v19159_v61, %v12601_v50 }
 0x42b   : > { %14599 = vmatmul.mubr.msk.bf16.vlgmr.msra.gmra.mrb[4].mxu1 %vm208_vm2, %v19094_v23  ;;  %v12637_v49 = vsel %vm212_vm1, %v12619_v7, 0 }
 0x42c   : > { %12218 = vmatpush1.bf16.msra.mxu1 %v12083_v43  ;;  %12249 = vmatprep.mubr.bf16.mxu1 %v19566_v1 }
 0x42d   : > { %14609 = vmatprep.subr.msk.bf16.mxu1 %vm212_vm1, %v12337_v45  ;;  %v13163_v26 = vpop.permute.xlu0 %13162  ;;  %v19293_v21 = vpop.permute.xlu1 %13164 }
 0x42e   : > { %v13184_v25 = vsel %vm13182_vm15, %v13163_v26, %v19293_v21  ;;  %v13183_v53 = vsel %vm13182_vm15, %v13161_v2, %v13163_v26 }
 0x42f   : > { %v13197_v19 = vsel %vm212_vm1, %v13183_v53, 0 }
 0x430   : > { %14627 = vmatmul.mubr.msk.bf16.vlgmr.msra.gmra.mrb[8].mxu0 %vm208_vm2, %v19253_v63 }
 0x431   : > { %12944 = vmatpush1.bf16.msra.mxu0 %v12914_v46  ;;  %v12609_v58 = vpop.permute.xlu0 %12608  ;;  %12975 = vmatprep.mubr.bf16.mxu0 %v19566_v1  ;;  %v19303_v30 = vpop.permute.xlu1 %13168 }
 0x432   : > { %14633 = vmatprep.subr.msk.bf16.mxu0 %vm212_vm1, %v12905_v54  ;;  %v12624_v61 = vsel %vm12616_vm7, %v12609_v58, %v19198_v9  ;;  %v12623_v44 = vsel %vm12616_vm7, %v19189_v18, %v12609_v58 }
 0x433   : > { %14603 = vmatmul.mubr.msk.bf16.vlgmr.msra.gmra.mrb[12].mxu1 %vm208_vm2, %v19094_v23  ;;  %v12909_v23 = vsel %vm12899_vm13, %v12896_v6, %v12898_v22  ;;  %v12649_v15 = vsel %vm212_vm1, %v12623_v44, 0 }
 0x434   : > { %12419 = vmatpush1.bf16.msra.mxu1 %v12354_v47  ;;  %12450 = vmatprep.mubr.bf16.mxu1 %v19566_v1 }
 0x435   : > { %14613 = vmatprep.subr.msk.bf16.mxu1 %vm212_vm1, %v12341_v27  ;;  %v13171_v17 = vpop.permute.xlu0 %13170  ;;  %v19320_v20 = vpop.permute.xlu1 %13172 }
 0x436   : > { %v13188_v60 = vsel %vm13182_vm15, %v13171_v17, %v19320_v20  ;;  %v13187_v35 = vsel %vm13182_vm15, %v19303_v30, %v13171_v17 }
 0x437   : > { %v13209_v13 = vsel %vm212_vm1, %v13187_v35, 0 }
 0x438   : > { %14630 = vmatmul.mubr.msk.bf16.vlgmr.msra.gmra.mrb[0].mxu0 %vm208_vm2, %v19318_v42 }
 0x439   : > { %13026 = vmatpush1.bf16.msra.mxu0 %v12926_v40  ;;  %v12884_v24 = vpop.permute.xlu0 %12883  ;;  %13057 = vmatprep.mubr.bf16.mxu0 %v19566_v1  ;;  %v19329_v55 = vpop.permute.xlu1 %13176  ;;  %v19444_v40 = vld [vmem:[%s19546_s1 + $0xbc] sm:$0xf] }
 0x43a   : > { %14637 = vmatprep.subr.msk.bf16.mxu0 %vm212_vm1, %v12909_v23  ;;  %v12903_v18 = vsel %vm12899_vm13, %v12884_v24, %v19238_v62  ;;  %v12902_v62 = vsel %vm12899_vm13, %v19228_v5, %v12884_v24 }
 0x43b   : > { %14610 = vmatmul.mubr.msk.bf16.vlgmr.msra.gmra.mrb[4].mxu1 %vm208_vm2, %v19187_v28  ;;  %v12920_v57 = vsel %vm212_vm1, %v12902_v62, 0 }
 0x43c   : > { %12501 = vmatpush1.bf16.msra.mxu1 %v12366_v41  ;;  %12532 = vmatprep.mubr.bf16.mxu1 %v19566_v1 }
 0x43d   : > { %14620 = vmatprep.subr.msk.bf16.mxu1 %vm212_vm1, %v12620_v16  ;;  %v13179_v34 = vpop.permute.xlu0 %13178  ;;  %v13181_v31 = vpop.permute.xlu1 %13180 }
 0x43e   : > { %v13192_v22 = vsel %vm13182_vm15, %v13179_v34, %v13181_v31  ;;  %v13191_v11 = vsel %vm13182_vm15, %v19329_v55, %v13179_v34 }
 0x43f   : > { %v13221_v2 = vsel %vm212_vm1, %v13191_v11, 0 }
 0x440   : > { %14634 = vmatmul.mubr.msk.bf16.vlgmr.msra.gmra.mrb[4].mxu0 %vm208_vm2, %v19318_v42 }
 0x441   : > { %13108 = vmatpush1.bf16.msra.mxu0 %v12938_v59  ;;  %v12892_v10 = vpop.permute.xlu0 %12891  ;;  %13139 = vmatprep.mubr.bf16.mxu0 %v19566_v1  ;;  %v13444_v14 = vpop.permute.xlu1 %13443 }
 0x442   : > { %14640 = vmatprep.subr.msk.bf16.mxu0 %vm212_vm1, %v13184_v25  ;;  %v12907_v5 = vsel %vm12899_vm13, %v12892_v10, %v19264_v33  ;;  %v12906_v12 = vsel %vm12899_vm13, %v19255_v36, %v12892_v10 }
 0x443   : > { %14614 = vmatmul.mubr.msk.bf16.vlgmr.msra.gmra.mrb[12].mxu1 %vm208_vm2, %v19187_v28  ;;  %v12932_v45 = vsel %vm212_vm1, %v12906_v12, 0 }
 0x444   : > { %12702 = vmatpush1.bf16.msra.mxu1 %v12637_v49  ;;  %12733 = vmatprep.mubr.bf16.mxu1 %v19566_v1 }
 0x445   : > { %14624 = vmatprep.subr.msk.bf16.mxu1 %vm212_vm1, %v12624_v61  ;;  %v13446_v29 = vpop.permute.xlu0 %13445  ;;  %v19358_v0 = vpop.permute.xlu1 %13447 }
 0x446   : > { %v13467_v43 = vsel %vm13465_vm10, %v13446_v29, %v19358_v0  ;;  %v13466_v26 = vsel %vm13465_vm10, %v13444_v14, %v13446_v29 }
 0x447   : > { %v13480_v46 = vsel %vm212_vm1, %v13466_v26, 0 }
 0x448   : > { %14638 = vmatmul.mubr.msk.bf16.vlgmr.msra.gmra.mrb[8].mxu0 %vm208_vm2, %v19318_v42 }
 0x449   : > { %13227 = vmatpush1.bf16.msra.mxu0 %v13197_v19  ;;  %v13167_v28 = vpop.permute.xlu0 %13166  ;;  %13258 = vmatprep.mubr.bf16.mxu0 %v19566_v1  ;;  %v19368_v9 = vpop.permute.xlu1 %13451 }
 0x44a   : > { %14644 = vmatprep.subr.msk.bf16.mxu0 %vm212_vm1, %v13188_v60  ;;  %v13186_v36 = vsel %vm13182_vm15, %v13167_v28, %v19303_v30  ;;  %v13185_v47 = vsel %vm13182_vm15, %v19293_v21, %v13167_v28 }
 0x44b   : > { %14621 = vmatmul.mubr.msk.bf16.vlgmr.msra.gmra.mrb[4].mxu1 %vm208_vm2, %v19253_v63  ;;  %v13203_v30 = vsel %vm212_vm1, %v13185_v47, 0 }
 0x44c   : > { %12784 = vmatpush1.bf16.msra.mxu1 %v12649_v15  ;;  %12815 = vmatprep.mubr.bf16.mxu1 %v19566_v1  ;;  %v14661_v15 = vld [vmem:[%s19546_s1 + $0xc0] sm:$0xf] }
 0x44d   : > { %14631 = vmatprep.subr.msk.bf16.mxu1 %vm212_vm1, %v12903_v18  ;;  %v19385_v48 = vpop.permute.xlu1 %13455  ;;  %v13454_v6 = vpop.permute.xlu0 %13453 }
 0x44e   : > { %v13471_v58 = vsel %vm13465_vm10, %v13454_v6, %v19385_v48  ;;  %v13470_v38 = vsel %vm13465_vm10, %v19368_v9, %v13454_v6 }
 0x44f   : > { %v13492_v23 = vsel %vm212_vm1, %v13470_v38, 0 }
 0x450   : > { %14641 = vmatmul.mubr.msk.bf16.vlgmr.msra.gmra.mrb[0].mxu0 %vm208_vm2, %v19383_v56 }
 0x451   : > { %13309 = vmatpush1.bf16.msra.mxu0 %v13209_v13  ;;  %13340 = vmatprep.mubr.bf16.mxu0 %v19566_v1  ;;  %v19395_v32 = vpop.permute.xlu1 %13459  ;;  %v13175_v50 = vpop.permute.xlu0 %13174 }
 0x452   : > { %14648 = vmatprep.subr.msk.bf16.mxu0 %vm212_vm1, %v13192_v22  ;;  %v13190_v27 = vsel %vm13182_vm15, %v13175_v50, %v19329_v55 }
 0x453   : > { %14625 = vmatmul.mubr.msk.bf16.vlgmr.msra.gmra.mrb[12].mxu1 %vm208_vm2, %v19253_v63 }
 0x454   : > { %12985 = vmatpush1.bf16.msra.mxu1 %v12920_v57  ;;  %13016 = vmatprep.mubr.bf16.mxu1 %v19566_v1 }
 0x455   : > { %14635 = vmatprep.subr.msk.bf16.mxu1 %vm212_vm1, %v12907_v5  ;;  %v13464_v63 = vpop.permute.xlu1 %13463  ;;  %v13462_v33 = vpop.permute.xlu0 %13461 }
 0x456   : > { %v13475_v4 = vsel %vm13465_vm10, %v13462_v33, %v13464_v63  ;;  %v13474_v41 = vsel %vm13465_vm10, %v19395_v32, %v13462_v33  ;;  %v19597_v33 = vld [vmem:[#allocation2_spill] sm:$0xff] }
 0x457   : > { %v13504_v16 = vsel %vm212_vm1, %v13474_v41, 0 }
 0x458   : > { %14645 = vmatmul.mubr.msk.bf16.vlgmr.msra.gmra.mrb[4].mxu0 %vm208_vm2, %v19383_v56 }
 0x459   : > { %13391 = vmatpush1.bf16.msra.mxu0 %v13221_v2  ;;  %13422 = vmatprep.mubr.bf16.mxu0 %v19566_v1  ;;  %v13727_v54 = vpop.permute.xlu1 %13726  ;;  %v13450_v3 = vpop.permute.xlu0 %13449 }
 0x45a   : > { %14651 = vmatprep.subr.msk.bf16.mxu0 %vm212_vm1, %v13467_v43  ;;  %v13468_v59 = vsel %vm13465_vm10, %v19358_v0, %v13450_v3 }
 0x45b   : > { %14632 = vmatmul.mubr.msk.bf16.vlgmr.msra.gmra.mrb[4].mxu1 %vm208_vm2, %v19318_v42  ;;  %v13486_v7 = vsel %vm212_vm1, %v13468_v59, 0  ;;  %v15824_v59 = vmov 0.0  }
 0x45c   : > { %13067 = vmatpush1.bf16.msra.mxu1 %v12932_v45  ;;  %13098 = vmatprep.mubr.bf16.mxu1 %v19566_v1 }
 0x45d   : > { %14642 = vmatprep.subr.msk.bf16.mxu1 %vm212_vm1, %v13186_v36  ;;  %v13731_v21 = vpop.permute.xlu1 %13730  ;;  %v13729_v17 = vpop.permute.xlu0 %13728 }
 0x45e   : > { %v13750_v34 = vsel %vm13748_vm0, %v13729_v17, %v13731_v21  ;;  %v13749_v10 = vsel %vm13748_vm0, %v13727_v54, %v13729_v17 }
 0x45f   : > { %v13763_v53 = vsel %vm212_vm1, %v13749_v10, 0 }
 0x460   : > { %14649 = vmatmul.mubr.msk.bf16.vlgmr.msra.gmra.mrb[8].mxu0 %vm208_vm2, %v19383_v56 }
 0x461   : > { %13510 = vmatpush1.bf16.msra.mxu0 %v13480_v46  ;;  %13541 = vmatprep.mubr.bf16.mxu0 %v19566_v1  ;;  %v13735_v24 = vpop.permute.xlu1 %13734  ;;  %v13458_v8 = vpop.permute.xlu0 %13457 }
 0x462   : > { %14655 = vmatprep.subr.msk.bf16.mxu0 %vm212_vm1, %v13471_v58  ;;  %v13473_v14 = vsel %vm13465_vm10, %v13458_v8, %v19395_v32  ;;  %v13472_v0 = vsel %vm13465_vm10, %v19385_v48, %v13458_v8 }
 0x463   : > { %14636 = vmatmul.mubr.msk.bf16.vlgmr.msra.gmra.mrb[12].mxu1 %vm208_vm2, %v19318_v42  ;;  %v13189_v42 = vsel %vm13182_vm15, %v19320_v20, %v13175_v50  ;;  %v13469_v20 = vsel %vm13465_vm10, %v13450_v3, %v19368_v9  ;;  %v13498_v60 = vsel %vm212_vm1, %v13472_v0, 0 }
 0x464   : > { %13268 = vmatpush1.bf16.msra.mxu1 %v13203_v30  ;;  %13299 = vmatprep.mubr.bf16.mxu1 %v19566_v1  ;;  %v13215_v55 = vsel %vm212_vm1, %v13189_v42, 0 }
 0x465   : > { %14646 = vmatprep.subr.msk.bf16.mxu1 %vm212_vm1, %v13190_v27  ;;  %v13737_v31 = vpop.permute.xlu0 %13736  ;;  %v13739_v25 = vpop.permute.xlu1 %13738 }
 0x466   : > { %v13754_v29 = vsel %vm13748_vm0, %v13737_v31, %v13739_v25  ;;  %v13753_v44 = vsel %vm13748_vm0, %v13735_v24, %v13737_v31 }
 0x467   : > { %v13775_v35 = vsel %vm212_vm1, %v13753_v44, 0 }
 0x468   : > { %14652 = vmatmul.mubr.msk.bf16.vlgmr.msra.gmra.mrb[0].mxu0 %vm208_vm2, %v19444_v40 }
 0x469   : > { %13592 = vmatpush1.bf16.msra.mxu0 %v13492_v23  ;;  %13623 = vmatprep.mubr.bf16.mxu0 %v19566_v1  ;;  %v13733_v49 = vpop.permute.xlu0 %13732  ;;  %v13743_v61 = vpop.permute.xlu1 %13742 }
 0x46a   : > { %14659 = vmatprep.subr.msk.bf16.mxu0 %vm212_vm1, %v13475_v4  ;;  %v13752_v19 = vsel %vm13748_vm0, %v13733_v49, %v13735_v24 }
 0x46b   : > { %14643 = vmatmul.mubr.msk.bf16.vlgmr.msra.gmra.mrb[4].mxu1 %vm208_vm2, %v19383_v56 }
 0x46c   : > { %13350 = vmatpush1.bf16.msra.mxu1 %v13215_v55  ;;  %13381 = vmatprep.mubr.bf16.mxu1 %v19566_v1 }
 0x46d   : > { %14653 = vmatprep.subr.msk.bf16.mxu1 %vm212_vm1, %v13469_v20  ;;  %v13745_v28 = vpop.permute.xlu0 %13744  ;;  %v13747_v9 = vpop.permute.xlu1 %13746 }
 0x46e   : > { %v13758_v18 = vsel %vm13748_vm0, %v13745_v28, %v13747_v9  ;;  %v13757_v22 = vsel %vm13748_vm0, %v13743_v61, %v13745_v28 }
 0x46f   : > { %v13787_v62 = vsel %vm212_vm1, %v13757_v22, 0 }
 0x470   : > { %14656 = vmatmul.mubr.msk.bf16.vlgmr.msra.gmra.mrb[4].mxu0 %vm208_vm2, %v19444_v40 }
 0x471   : > { %13674 = vmatpush1.bf16.msra.mxu0 %v13504_v16  ;;  %13705 = vmatprep.mubr.bf16.mxu0 %v19566_v1  ;;  %v13741_v48 = vpop.permute.xlu0 %13740 }
 0x472   : > { %14662 = vmatprep.subr.msk.bf16.mxu0 %vm212_vm1, %v13750_v34  ;;  %v13756_v13 = vsel %vm13748_vm0, %v13741_v48, %v13743_v61  ;;  %v13755_v32 = vsel %vm13748_vm0, %v13739_v25, %v13741_v48 }
 0x473   : > { %14647 = vmatmul.mubr.msk.bf16.vlgmr.msra.gmra.mrb[12].mxu1 %vm208_vm2, %v19383_v56  ;;  %v13751_v56 = vsel %vm13748_vm0, %v13731_v21, %v13733_v49  ;;  %v13781_v57 = vsel %vm212_vm1, %v13755_v32, 0 }
 0x474   : > { %13551 = vmatpush1.bf16.msra.mxu1 %v13486_v7  ;;  %13582 = vmatprep.mubr.bf16.mxu1 %v19566_v1  ;;  %v13769_v6 = vsel %vm212_vm1, %v13751_v56, 0 }
 0x475   : > { %14657 = vmatprep.subr.msk.bf16.mxu1 %vm212_vm1, %v13473_v14 }
 0x478   : > { %14660 = vmatmul.mubr.msk.bf16.vlgmr.msra.gmra.mrb[8].mxu0 %vm208_vm2, %v19444_v40 }
 0x479   : > { %13793 = vmatpush1.bf16.msra.mxu0 %v13763_v53  ;;  %13824 = vmatprep.mubr.bf16.mxu0 %v19566_v1 }
 0x47a   : > { %14666 = vmatprep.subr.msk.bf16.mxu0 %vm212_vm1, %v13754_v29 }
 0x47b   : > { %14654 = vmatmul.mubr.msk.bf16.vlgmr.msra.gmra.mrb[4].mxu1 %vm208_vm2, %v19444_v40 }
 0x47c   : > { %13633 = vmatpush1.bf16.msra.mxu1 %v13498_v60  ;;  %13664 = vmatprep.mubr.bf16.mxu1 %v19566_v1 }
 0x47d   : > { %14664 = vmatprep.subr.msk.bf16.mxu1 %vm212_vm1, %v13752_v19 }
 0x480   : > { %14663 = vmatmul.mubr.msk.bf16.vlgmr.msra.gmra.mrb[0].mxu0 %vm208_vm2, %v14661_v15 }
 0x481   : > { %13875 = vmatpush1.bf16.msra.mxu0 %v13775_v35  ;;  %13906 = vmatprep.mubr.bf16.mxu0 %v19566_v1 }
 0x482   : > { %14670 = vmatprep.subr.msk.bf16.mxu0 %vm212_vm1, %v13758_v18 }
 0x483   : > { %14658 = vmatmul.mubr.msk.bf16.vlgmr.msra.gmra.mrb[12].mxu1 %vm208_vm2, %v19444_v40 }
 0x484   : > { %13834 = vmatpush1.bf16.msra.mxu1 %v13769_v6  ;;  %13865 = vmatprep.mubr.bf16.mxu1 %v19566_v1 }
 0x485   : > { %14668 = vmatprep.subr.msk.bf16.mxu1 %vm212_vm1, %v13756_v13  ;;  %vm14026_vm1 = vcmask 474112  }
 0x488   : > { %14667 = vmatmul.mubr.msk.bf16.vlgmr.msra.gmra.mrb[4].mxu0 %vm208_vm2, %v14661_v15 }
 0x489   : > { %13957 = vmatpush1.bf16.msra.mxu0 %v13787_v62  ;;  %13988 = vmatprep.mubr.bf16.mxu0 %v19566_v1 }
 0x48b   : > { %14665 = vmatmul.mubr.msk.bf16.vlgmr.msra.gmra.mrb[4].mxu1 %vm208_vm2, %v14661_v15 }
 0x48c   : > { %13916 = vmatpush1.bf16.msra.mxu1 %v13781_v57  ;;  %13947 = vmatprep.mubr.bf16.mxu1 %v19566_v1  ;;  %v19598_v1 = vld [vmem:[#allocation3_spill] sm:$0xff] }
 0x490   : > { %14671 = vmatmul.mubr.msk.bf16.vlgmr.msra.gmra.mrb[8].mxu0 %vm208_vm2, %v14661_v15 }
 0x493   : > { %14669 = vmatmul.mubr.msk.bf16.vlgmr.msra.gmra.mrb[12].mxu1 %vm208_vm2, %v14661_v15  ;;  %vm14028_vm2 = vcmask 523728  }
 0x553   : > { %v13826_v11 = vpop.f32.mrb[0].mxu0 }
 0x554   : > { %v14674_v5 = vadd.f32 %v13826_v11, %v17787_v51  ;;  %v13828_v50 = vpop.f32.mrb[1].mxu0 }
 0x555   : > { %v14675_v2 = vadd.f32 %v13828_v50, %v17793_v52  ;;  %v13830_v43 = vpop.f32.mrb[2].mxu0 }
 0x556   : > { %15722 = vtanh.f32 %v14674_v5  ;;  %v13831_v12 = vpop.f32.mrb[3].mxu0 }
 0x557   : > { %15724 = vtanh.f32 %v14675_v2 }
 0x55b   : > { %v13908_v63 = vpop.f32.mrb[4].mxu0 }
 0x55c   : > { %v14676_v45 = vadd.f32 %v13908_v63, %v19597_v33  ;;  %v13910_v26 = vpop.f32.mrb[5].mxu0 }
 0x55d   : > { %v14677_v36 = vadd.f32 %v13910_v26, %v19598_v1  ;;  %v13912_v46 = vpop.f32.mrb[6].mxu0 }
 0x55e   : > { %15726 = vtanh.f32 %v14676_v45  ;;  %v13913_v51 = vpop.f32.mrb[7].mxu0  ;;  %v13867_v52 = vpop.f32.mrb[4].mxu1 }
 0x55f   : > { %15728 = vtanh.f32 %v14677_v36  ;;  %v13869_v54 = vpop.f32.mrb[5].mxu1 }
 0x560   : > { %v15723_v3 = vpop.eup %15722  ;;  %15730 = vtanh.f32 %v13867_v52  ;;  %v13871_v58 = vpop.f32.mrb[6].mxu1 }
 0x561   : > { %v15725_v47 = vpop.eup %15724  ;;  %14017 = vst [vmem:[%s19527_s19] sm:$0xff] %v15723_v3  ;;  %15732 = vtanh.f32 %v13869_v54  ;;  %v13872_v30 = vpop.f32.mrb[7].mxu1 }
 0x562   : > { %14018 = vst [vmem:[%s19527_s19 + $0x8] sm:$0xff] %v15725_v47 }
 0x563   : > { %v13990_v38 = vpop.f32.mrb[8].mxu0 }
 0x564   : > { %v14678_v27 = vadd.f32 %v13990_v38, %v17959_v37  ;;  %v13992_v21 = vpop.f32.mrb[9].mxu0 }
 0x565   : > { %v14679_v17 = vadd.f32 %v13992_v21, %v17965_v39  ;;  %v13994_v40 = vpop.f32.mrb[10].mxu0 }
 0x566   : > { %15734 = vtanh.f32 %v14678_v27  ;;  %v13995_v23 = vpop.f32.mrb[11].mxu0  ;;  %v13949_v4 = vpop.f32.mrb[12].mxu1 }
 0x567   : > { %15736 = vtanh.f32 %v14679_v17  ;;  %v13951_v42 = vpop.f32.mrb[13].mxu1 }
 0x568   : > { %v15727_v24 = vpop.eup %15726  ;;  %15738 = vtanh.f32 %v13949_v4  ;;  %v13953_v55 = vpop.f32.mrb[14].mxu1 }
 0x569   : > { %v15729_v41 = vpop.eup %15728  ;;  %14021 = vst [vmem:[%s19527_s19 + $0x20] sm:$0xff] %v15727_v24  ;;  %15740 = vtanh.f32 %v13951_v42  ;;  %v13954_v37 = vpop.f32.mrb[15].mxu1 }
 0x56a   : > { %v15731_v39 = vpop.eup %15730  ;;  %14022 = vst [vmem:[%s19527_s19 + $0x28] sm:$0xff] %v15729_v41 }
 0x56b   : > { %v15733_v8 = vpop.eup %15732  ;;  %14019 = vst [vmem:[%s19527_s19 + $0x10] sm:$0xff] %v15731_v39 }
 0x56c   : > { %14020 = vst [vmem:[%s19527_s19 + $0x18] sm:$0xff] %v15733_v8 }
 0x570   : > { %v15735_v20 = vpop.eup %15734 }
 0x571   : > { %v15737_v16 = vpop.eup %15736  ;;  %14025 = vst [vmem:[%s19527_s19 + $0x40] sm:$0xff] %v15735_v20 }
 0x572   : > { %v15739_v34 = vpop.eup %15738  ;;  %14027 = vst.msk [vmem:[%s19527_s19 + $0x48] sm:$0xff] %vm14026_vm1, %v15737_v16 }
 0x573   : > { %v15741_v31 = vpop.eup %15740  ;;  %14029 = vst.msk [vmem:[%s19527_s19 + $0x48] sm:$0xff] %vm14028_vm2, %v15824_v59  ;;  %14023 = vst [vmem:[%s19527_s19 + $0x30] sm:$0xff] %v15739_v34 }
 0x574   : > { %14024 = vst [vmem:[%s19527_s19 + $0x38] sm:$0xff] %v15741_v31 }
 0x575 PF: > { %s12_s9 = sadd.s32 1, %s15773_s9  }
 0x576   : > { %p9_p4 = scmp.ge.s32.totalorder %s12_s9, 4  }
 0x578   :  { %11 = sbr.rel (!%p9_p4) target bundleno = 1 (0x1), region = 106 }

</bundles_post_ra>
